<compile_context>
chip_gen: v7x
topology: tpu7x:2x2x1
jax: 0.10.0
libtpu: 0.0.40
codegen_flags: <defaults>
</compile_context>

<pallas_src>
import jax
import jax.numpy as jnp
from jax.experimental import pallas as pl
from jax.experimental.pallas import tpu as pltpu

H = 1024          # hidden size fixed by the module (Linear(1024, ...))
NEG_INF = -1e30


# ----------------------------------------------------------------------------
# Pallas kernel: encoder_linear + start/end heads + mask + softmax
# ----------------------------------------------------------------------------
def _argument_head_kernel(x_ref, mask_ref, w1_ref, b1_ref, wse_ref, bse_ref,
                          out_ref):
    nseq, seq, hid = x_ref.shape          # block = nseq sequences of length seq
    rows = nseq * seq

    # encoder_linear: Linear(1024, 1024) + Tanh for every row in the block.
    # bf16 operands on the MXU, f32 accumulate, f32 bias / tanh.
    x = x_ref[...].reshape(rows, hid).astype(jnp.bfloat16)        # [rows, H] bf16
    h = jnp.tanh(
        jnp.dot(x, w1_ref[...], preferred_element_type=jnp.float32)
        + b1_ref[...])                                            # [rows, H] f32

    # start_layer / end_layer fused into a single [H, 2] matmul (kept f32;
    # it is a negligible fraction of the work).
    logits = jnp.dot(h, wse_ref[...],
                     preferred_element_type=jnp.float32)          # [rows, 2]

    b_start = bse_ref[0]                                          # SMEM scalars
    b_end = bse_ref[1]

    # Per-sequence mask + softmax in the lane-dense [2, S] layout.
    for n in range(nseq):                 # static unroll (nseq <= 2 in practice)
        lt = jnp.transpose(logits[n * seq:(n + 1) * seq, :])      # [2, S]

        # start/end biases (constant along the softmax axis; kept for fidelity)
        is_start = jax.lax.broadcasted_iota(jnp.int32, lt.shape, 0) == 0
        lt = lt + jnp.where(is_start, b_start, b_end)

        # masked_fill_(input_mask == 0, -1e30); mask_ref[n] is [1, S]
        lt = jnp.where(mask_ref[n] == 0.0, jnp.float32(NEG_INF), lt)

        # softmax over the sequence axis (lanes)
        mx = jnp.max(lt, axis=-1, keepdims=True)                  # [2, 1]
        e = jnp.exp(lt - mx)
        denom = jnp.sum(e, axis=-1, keepdims=True)
        out_ref[n] = e / denom                                    # [2, S]


def _rows_per_block_target():
    """256-row tiles fill the 2x256^2 MXU on v6e/v7x; v5e (4x128^2) only needs 128."""
    try:
        kind = jax.devices()[0].device_kind.lower()
        if "v5" in kind:
            return 128
    except Exception:
        pass
    return 256


def _choose_nseq(batch, seq_len):
    """Number of sequences packed into one matmul block (must divide batch)."""
    target = _rows_per_block_target()
    nseq = 1
    while batch % (nseq * 2) == 0 and (nseq * 2) * seq_len <= max(target, seq_len):
        nseq *= 2
    return nseq


def argument_head(encoder_rep, cls_rep, input_mask, p):
    """encoder_rep [B,S,H], cls_rep [B,H], input_mask [B,S] -> (cls, start, end)."""
    B, S, Hh = encoder_rep.shape
    assert Hh == H

    # cls head: tiny [B,H] x [H,2] matmul -> plain JAX (hoisted out of the
    # Pallas grid loop per the perf review; zero extra HBM traffic).
    cls_logits = cls_rep @ p["cls_w"] + p["cls_b"]                 # [B, 2]

    # bf16 weight for the dominant 1024x1024 matmul; everything else stays f32.
    w1 = p["enc_w"].astype(jnp.bfloat16)                           # [H, H] bf16
    b1 = p["enc_b"][None, :]                                       # [1, H] f32
    wse = jnp.concatenate([p["start_w"], p["end_w"]], axis=1)      # [H, 2] f32
    bse = jnp.concatenate([p["start_b"], p["end_b"]], axis=0)      # [2]    f32 (SMEM)

    mask3 = input_mask.astype(jnp.float32)[:, None, :]             # [B, 1, S]

    nseq = _choose_nseq(B, S)
    grid = (B // nseq,)

    probs = pl.pallas_call(
        _argument_head_kernel,
        out_shape=jax.ShapeDtypeStruct((B, 2, S), jnp.float32),
        grid=grid,
        in_specs=[
            pl.BlockSpec((nseq, S, H), lambda i: (i, 0, 0)),       # encoder_rep
            pl.BlockSpec((nseq, 1, S), lambda i: (i, 0, 0)),       # input_mask
            pl.BlockSpec((H, H), lambda i: (0, 0)),                # enc_w (bf16)
            pl.BlockSpec((1, H), lambda i: (0, 0)),                # enc_b
            pl.BlockSpec((H, 2), lambda i: (0, 0)),                # start/end w
            pl.BlockSpec(memory_space=pltpu.MemorySpace.SMEM),     # start/end b
        ],
        out_specs=pl.BlockSpec((nseq, 2, S), lambda i: (i, 0, 0)), # lane-dense
        compiler_params=pltpu.CompilerParams(
            dimension_semantics=("parallel",),
            vmem_limit_bytes=32 * 1024 * 1024,
        ),
    )(encoder_rep, mask3, w1, b1, wse, bse)

    start_prob = probs[:, 0, :]
    end_prob = probs[:, 1, :]
    return cls_logits, start_prob, end_prob


# ----------------------------------------------------------------------------
# Synthetic BERT-style encoder (plain JAX glue; stands in for the pretrained
# roberta_encoder).  Produces (encoder_rep [B,S,H], cls_rep [B,H]).
# ----------------------------------------------------------------------------
def _layernorm(x, g, b, eps=1e-12):
    mu = jnp.mean(x, axis=-1, keepdims=True)
    var = jnp.var(x, axis=-1, keepdims=True)
    return (x - mu) * jax.lax.rsqrt(var + eps) * g + b


def synthetic_bert_encoder(ep, input_ids, input_mask, input_seg):
    B, S = input_ids.shape
    nh = ep["n_heads"]
    dh = H // nh

    x = (ep["word_emb"][input_ids]
         + ep["pos_emb"][None, :S, :]
         + ep["seg_emb"][input_seg])
    x = _layernorm(x, ep["ln0_g"], ep["ln0_b"])

    def split_heads(t):
        return t.reshape(B, S, nh, dh).transpose(0, 2, 1, 3)

    q = split_heads(x @ ep["wq"] + ep["bq"])
    k = split_heads(x @ ep["wk"] + ep["bk"])
    v = split_heads(x @ ep["wv"] + ep["bv"])

    scores = jnp.einsum("bhqd,bhkd->bhqk", q, k) / jnp.sqrt(jnp.float32(dh))
    scores = scores + (1.0 - input_mask)[:, None, None, :] * (-1e9)
    att = jax.nn.softmax(scores, axis=-1)
    ctx = jnp.einsum("bhqk,bhkd->bhqd", att, v).transpose(0, 2, 1, 3).reshape(B, S, H)

    x = _layernorm(x + ctx @ ep["wo"] + ep["bo"], ep["ln1_g"], ep["ln1_b"])
    ff = jax.nn.gelu(x @ ep["wff1"] + ep["bff1"]) @ ep["wff2"] + ep["bff2"]
    x = _layernorm(x + ff, ep["ln2_g"], ep["ln2_b"])

    encoder_rep = x
    cls_rep = jnp.tanh(x[:, 0, :] @ ep["wp"] + ep["bp"])   # BERT pooler
    return encoder_rep, cls_rep


# ----------------------------------------------------------------------------
# Deterministic parameter init
# ----------------------------------------------------------------------------
def init_params(key, vocab, seq_len, n_heads=8, ff=1024):
    keys = jax.random.split(key, 16)
    std = 0.02

    def rn(k, shape):
        return jax.random.normal(k, shape, jnp.float32) * std

    enc = {
        "n_heads": n_heads,
        "word_emb": rn(keys[0], (vocab, H)),
        "pos_emb": rn(keys[1], (seq_len, H)),
        "seg_emb": rn(keys[2], (2, H)),
        "ln0_g": jnp.ones((H,), jnp.float32), "ln0_b": jnp.zeros((H,), jnp.float32),
        "wq": rn(keys[3], (H, H)), "bq": jnp.zeros((H,), jnp.float32),
        "wk": rn(keys[4], (H, H)), "bk": jnp.zeros((H,), jnp.float32),
        "wv": rn(keys[5], (H, H)), "bv": jnp.zeros((H,), jnp.float32),
        "wo": rn(keys[6], (H, H)), "bo": jnp.zeros((H,), jnp.float32),
        "ln1_g": jnp.ones((H,), jnp.float32), "ln1_b": jnp.zeros((H,), jnp.float32),
        "wff1": rn(keys[7], (H, ff)), "bff1": jnp.zeros((ff,), jnp.float32),
        "wff2": rn(keys[8], (ff, H)), "bff2": jnp.zeros((H,), jnp.float32),
        "ln2_g": jnp.ones((H,), jnp.float32), "ln2_b": jnp.zeros((H,), jnp.float32),
        "wp": rn(keys[9], (H, H)), "bp": jnp.zeros((H,), jnp.float32),
    }
    head = {
        "enc_w": rn(keys[10], (H, H)), "enc_b": jnp.zeros((H,), jnp.float32),
        "cls_w": rn(keys[11], (H, 2)), "cls_b": jnp.zeros((2,), jnp.float32),
        "start_w": rn(keys[12], (H, 1)), "start_b": jnp.zeros((1,), jnp.float32),
        "end_w": rn(keys[13], (H, 1)), "end_b": jnp.zeros((1,), jnp.float32),
    }
    return enc, head


# Pure-JAX f32 reference of the head (for correctness check)
def head_reference(encoder_rep, cls_rep, input_mask, p):
    h = jnp.tanh(encoder_rep @ p["enc_w"] + p["enc_b"])
    cls_logits = cls_rep @ p["cls_w"] + p["cls_b"]
    start = (h @ p["start_w"] + p["start_b"]).squeeze(-1)
    end = (h @ p["end_w"] + p["end_b"]).squeeze(-1)
    start = jnp.where(input_mask == 0.0, NEG_INF, start)
    end = jnp.where(input_mask == 0.0, NEG_INF, end)
    return (cls_logits,
            jax.nn.softmax(start, axis=1),
            jax.nn.softmax(end, axis=1))


if __name__ == "__main__":
    B, S, V = 2, 128, 100

    key = jax.random.PRNGKey(0)
    k_ids, k_params = jax.random.split(key)

    input_ids = jax.random.randint(k_ids, (B, S), 0, V, dtype=jnp.int32)
    lengths = jnp.array([100, 77], dtype=jnp.int32)
    input_mask = (jnp.arange(S)[None, :] < lengths[:, None]).astype(jnp.float32)
    input_seg = jnp.zeros((B, S), jnp.int32)

    enc_params, head_params = init_params(k_params, V, S)

    # "roberta_encoder" stand-in (plain JAX glue)
    encoder_rep, cls_rep = synthetic_bert_encoder(
        enc_params, input_ids, input_mask, input_seg)

    # Pallas kernel: the module's own forward
    cls_logits, start_prob, end_prob = argument_head(
        encoder_rep, cls_rep, input_mask, head_params)
    jax.block_until_ready((cls_logits, start_prob, end_prob))

    # sanity-check against a plain-JAX f32 reference (kernel matmul runs in
    # bf16, so tolerances are slightly relaxed for the probabilities).
    ref_cls, ref_start, ref_end = head_reference(
        encoder_rep, cls_rep, input_mask, head_params)
    assert jnp.allclose(cls_logits, ref_cls, atol=1e-3, rtol=1e-3)
    assert jnp.allclose(start_prob, ref_start, atol=5e-3, rtol=5e-3)
    assert jnp.allclose(end_prob, ref_end, atol=5e-3, rtol=5e-3)
    assert jnp.allclose(jnp.sum(start_prob, axis=1), 1.0, atol=1e-4)
    assert jnp.allclose(jnp.sum(end_prob, axis=1), 1.0, atol=1e-4)

    print("KERNEL_OK")
</pallas_src>

<mosaic_0001>
module attributes {stable_mosaic.version = 11 : i64} {
  func.func @_argument_head_kernel(%arg0: i32, %arg1: memref<2x128x1024xf32, #tpu.memory_space<vmem>>, %arg2: memref<2x1x128xf32, #tpu.memory_space<vmem>>, %arg3: memref<1024x1024xbf16, #tpu.memory_space<vmem>>, %arg4: memref<1x1024xf32, #tpu.memory_space<vmem>>, %arg5: memref<1024x2xf32, #tpu.memory_space<vmem>>, %arg6: memref<2xf32, #tpu.memory_space<smem>>, %arg7: memref<2x2x128xf32, #tpu.memory_space<vmem>>) attributes {dimension_semantics = [#tpu.dimension_semantics<parallel>], iteration_bounds = array<i64: 1>, scalar_prefetch = 0 : i64, scratch_operands = 0 : i64, tpu.core_type = #tpu.core_type<tc>, window_params = [{transform_indices = @transform_0, window_bounds = array<i64: 2, 128, 1024>}, {transform_indices = @transform_1, window_bounds = array<i64: 2, 1, 128>}, {pipeline_mode = #tpu.pipeline_mode<synchronous>, transform_indices = @transform_2, window_bounds = array<i64: 1024, 1024>}, {pipeline_mode = #tpu.pipeline_mode<synchronous>, transform_indices = @transform_3, window_bounds = array<i64: 1, 1024>}, {pipeline_mode = #tpu.pipeline_mode<synchronous>, transform_indices = @transform_4, window_bounds = array<i64: 1024, 2>}, {transform_indices = @transform_5, window_bounds = array<i64: 2>}, {transform_indices = @transform_6, window_bounds = array<i64: 2, 2, 128>}]} {
    %c0 = arith.constant 0 : index
    %c0_0 = arith.constant 0 : index
    %c0_1 = arith.constant 0 : index
    %0 = vector.load %arg1[%c0, %c0_0, %c0_1] : memref<2x128x1024xf32, #tpu.memory_space<vmem>>, vector<2x128x1024xf32>
    %1 = vector.shape_cast %0 : vector<2x128x1024xf32> to vector<256x1024xf32>
    %2 = arith.truncf %1 : vector<256x1024xf32> to vector<256x1024xbf16>
    %c0_2 = arith.constant 0 : index
    %c0_3 = arith.constant 0 : index
    %3 = vector.load %arg3[%c0_2, %c0_3] : memref<1024x1024xbf16, #tpu.memory_space<vmem>>, vector<1024x1024xbf16>
    %cst = arith.constant dense<0.000000e+00> : vector<256x1024xf32>
    %4 = tpu.matmul %2, %3, %cst {dimension_numbers = #tpu.dot_dimension_numbers<[1], [0], [0], [1], [0, 0, 1, 1], [], []>} : vector<256x1024xbf16>, vector<1024x1024xbf16>, vector<256x1024xf32> -> vector<256x1024xf32>
    %c0_4 = arith.constant 0 : index
    %c0_5 = arith.constant 0 : index
    %5 = vector.load %arg4[%c0_4, %c0_5] : memref<1x1024xf32, #tpu.memory_space<vmem>>, vector<1x1024xf32>
    %6 = vector.broadcast %5 : vector<1x1024xf32> to vector<256x1024xf32>
    %7 = arith.addf %4, %6 : vector<256x1024xf32>
    %8 = math.tanh %7 : vector<256x1024xf32>
    %c0_6 = arith.constant 0 : index
    %c0_7 = arith.constant 0 : index
    %9 = vector.load %arg5[%c0_6, %c0_7] : memref<1024x2xf32, #tpu.memory_space<vmem>>, vector<1024x2xf32>
    %cst_8 = arith.constant dense<0.000000e+00> : vector<256x2xf32>
    %10 = tpu.matmul %8, %9, %cst_8 {dimension_numbers = #tpu.dot_dimension_numbers<[1], [0], [0], [1], [0, 0, 1, 1], [], []>} : vector<256x1024xf32>, vector<1024x2xf32>, vector<256x2xf32> -> vector<256x2xf32>
    %c0_9 = arith.constant 0 : index
    %11 = memref.load %arg6[%c0_9] : memref<2xf32, #tpu.memory_space<smem>>
    %c1 = arith.constant 1 : index
    %12 = memref.load %arg6[%c1] : memref<2xf32, #tpu.memory_space<smem>>
    %13 = vector.extract_strided_slice %10 {offsets = [0, 0], sizes = [128, 2], strides = [1, 1]} : vector<256x2xf32> to vector<128x2xf32>
    %14 = tpu.transpose %13, [1, 0] : vector<128x2xf32> -> vector<2x128xf32>
    %15 = tpu.iota {dimensions = array<i32: 0>} : vector<2x128xi32>
    %c0_i32 = arith.constant 0 : i32
    %16 = vector.broadcast %c0_i32 : i32 to vector<2x128xi32>
    %17 = arith.cmpi eq, %15, %16 : vector<2x128xi32>
    %18 = vector.broadcast %11 : f32 to vector<2x128xf32>
    %19 = vector.broadcast %12 : f32 to vector<2x128xf32>
    %20 = arith.select %17, %18, %19 : vector<2x128xi1>, vector<2x128xf32>
    %21 = arith.addf %14, %20 : vector<2x128xf32>
    %c0_10 = arith.constant 0 : index
    %c0_11 = arith.constant 0 : index
    %c0_12 = arith.constant 0 : index
    %22 = vector.load %arg2[%c0_10, %c0_11, %c0_12] : memref<2x1x128xf32, #tpu.memory_space<vmem>>, vector<1x1x128xf32>
    %23 = vector.shape_cast %22 : vector<1x1x128xf32> to vector<1x128xf32>
    %cst_13 = arith.constant 0.000000e+00 : f32
    %24 = vector.broadcast %cst_13 : f32 to vector<1x128xf32>
    %25 = arith.cmpf oeq, %23, %24 : vector<1x128xf32>
    %cst_14 = arith.constant -1.000000e+30 : f32
    %26 = vector.shape_cast %25 : vector<1x128xi1> to vector<1x128xi1>
    %27 = vector.broadcast %26 : vector<1x128xi1> to vector<2x128xi1>
    %28 = vector.broadcast %cst_14 : f32 to vector<2x128xf32>
    %29 = arith.select %27, %28, %21 : vector<2x128xi1>, vector<2x128xf32>
    %cst_15 = arith.constant dense<0xFF800000> : vector<2xf32>
    %30 = vector.multi_reduction <maximumf>, %29, %cst_15 [1] : vector<2x128xf32> to vector<2xf32>
    %31 = vector.shape_cast %30 : vector<2xf32> to vector<2x1xf32>
    %32 = vector.broadcast %31 : vector<2x1xf32> to vector<2x128xf32>
    %33 = arith.subf %29, %32 : vector<2x128xf32>
    %34 = math.exp %33 : vector<2x128xf32>
    %cst_16 = arith.constant dense<0.000000e+00> : vector<2xf32>
    %35 = vector.multi_reduction <add>, %34, %cst_16 [1] : vector<2x128xf32> to vector<2xf32>
    %36 = vector.shape_cast %35 : vector<2xf32> to vector<2x1xf32>
    %37 = vector.broadcast %36 : vector<2x1xf32> to vector<2x128xf32>
    %38 = arith.divf %34, %37 : vector<2x128xf32>
    %c0_17 = arith.constant 0 : index
    %c0_18 = arith.constant 0 : index
    %c0_19 = arith.constant 0 : index
    %39 = vector.load %arg7[%c0_17, %c0_18, %c0_19] : memref<2x2x128xf32, #tpu.memory_space<vmem>>, vector<1x2x128xf32>
    %40 = vector.shape_cast %39 : vector<1x2x128xf32> to vector<2x128xf32>
    %41 = vector.shape_cast %38 : vector<2x128xf32> to vector<1x2x128xf32>
    tpu.vector_store %arg7[%c0_17, %c0_18, %c0_19], %41 {strides = array<i32>} : memref<2x2x128xf32, #tpu.memory_space<vmem>>, vector<1x2x128xf32>,
    %42 = vector.extract_strided_slice %10 {offsets = [128, 0], sizes = [128, 2], strides = [1, 1]} : vector<256x2xf32> to vector<128x2xf32>
    %43 = tpu.transpose %42, [1, 0] : vector<128x2xf32> -> vector<2x128xf32>
    %44 = tpu.iota {dimensions = array<i32: 0>} : vector<2x128xi32>
    %c0_i32_20 = arith.constant 0 : i32
    %45 = vector.broadcast %c0_i32_20 : i32 to vector<2x128xi32>
    %46 = arith.cmpi eq, %44, %45 : vector<2x128xi32>
    %47 = vector.broadcast %11 : f32 to vector<2x128xf32>
    %48 = vector.broadcast %12 : f32 to vector<2x128xf32>
    %49 = arith.select %46, %47, %48 : vector<2x128xi1>, vector<2x128xf32>
    %50 = arith.addf %43, %49 : vector<2x128xf32>
    %c1_21 = arith.constant 1 : index
    %c0_22 = arith.constant 0 : index
    %c0_23 = arith.constant 0 : index
    %51 = vector.load %arg2[%c1_21, %c0_22, %c0_23] : memref<2x1x128xf32, #tpu.memory_space<vmem>>, vector<1x1x128xf32>
    %52 = vector.shape_cast %51 : vector<1x1x128xf32> to vector<1x128xf32>
    %cst_24 = arith.constant 0.000000e+00 : f32
    %53 = vector.broadcast %cst_24 : f32 to vector<1x128xf32>
    %54 = arith.cmpf oeq, %52, %53 : vector<1x128xf32>
    %cst_25 = arith.constant -1.000000e+30 : f32
    %55 = vector.shape_cast %54 : vector<1x128xi1> to vector<1x128xi1>
    %56 = vector.broadcast %55 : vector<1x128xi1> to vector<2x128xi1>
    %57 = vector.broadcast %cst_25 : f32 to vector<2x128xf32>
    %58 = arith.select %56, %57, %50 : vector<2x128xi1>, vector<2x128xf32>
    %cst_26 = arith.constant dense<0xFF800000> : vector<2xf32>
    %59 = vector.multi_reduction <maximumf>, %58, %cst_26 [1] : vector<2x128xf32> to vector<2xf32>
    %60 = vector.shape_cast %59 : vector<2xf32> to vector<2x1xf32>
    %61 = vector.broadcast %60 : vector<2x1xf32> to vector<2x128xf32>
    %62 = arith.subf %58, %61 : vector<2x128xf32>
    %63 = math.exp %62 : vector<2x128xf32>
    %cst_27 = arith.constant dense<0.000000e+00> : vector<2xf32>
    %64 = vector.multi_reduction <add>, %63, %cst_27 [1] : vector<2x128xf32> to vector<2xf32>
    %65 = vector.shape_cast %64 : vector<2xf32> to vector<2x1xf32>
    %66 = vector.broadcast %65 : vector<2x1xf32> to vector<2x128xf32>
    %67 = arith.divf %63, %66 : vector<2x128xf32>
    %c1_28 = arith.constant 1 : index
    %c0_29 = arith.constant 0 : index
    %c0_30 = arith.constant 0 : index
    %68 = vector.load %arg7[%c1_28, %c0_29, %c0_30] : memref<2x2x128xf32, #tpu.memory_space<vmem>>, vector<1x2x128xf32>
    %69 = vector.shape_cast %68 : vector<1x2x128xf32> to vector<2x128xf32>
    %70 = vector.shape_cast %67 : vector<2x128xf32> to vector<1x2x128xf32>
    tpu.vector_store %arg7[%c1_28, %c0_29, %c0_30], %70 {strides = array<i32>} : memref<2x2x128xf32, #tpu.memory_space<vmem>>, vector<1x2x128xf32>,
    return
  }
  func.func @transform_0(%arg0: i32) -> (i32, i32, i32) {
    %c0_i32 = arith.constant 0 : i32
    %c0_i32_0 = arith.constant 0 : i32
    %c0_i32_1 = arith.constant 0 : i32
    return %arg0, %c0_i32, %c0_i32_0 : i32, i32, i32
  }
  func.func @transform_1(%arg0: i32) -> (i32, i32, i32) {
    %c0_i32 = arith.constant 0 : i32
    %c0_i32_0 = arith.constant 0 : i32
    %c0_i32_1 = arith.constant 0 : i32
    return %arg0, %c0_i32, %c0_i32_0 : i32, i32, i32
  }
  func.func @transform_2(%arg0: i32) -> (i32, i32) {
    %c0_i32 = arith.constant 0 : i32
    %c0_i32_0 = arith.constant 0 : i32
    %c0_i32_1 = arith.constant 0 : i32
    return %c0_i32, %c0_i32_0 : i32, i32
  }
  func.func @transform_3(%arg0: i32) -> (i32, i32) {
    %c0_i32 = arith.constant 0 : i32
    %c0_i32_0 = arith.constant 0 : i32
    %c0_i32_1 = arith.constant 0 : i32
    return %c0_i32, %c0_i32_0 : i32, i32
  }
  func.func @transform_4(%arg0: i32) -> (i32, i32) {
    %c0_i32 = arith.constant 0 : i32
    %c0_i32_0 = arith.constant 0 : i32
    %c0_i32_1 = arith.constant 0 : i32
    return %c0_i32, %c0_i32_0 : i32, i32
  }
  func.func @transform_5(%arg0: i32) -> i32 {
    %c0_i32 = arith.constant 0 : i32
    %c0_i32_0 = arith.constant 0 : i32
    return %c0_i32 : i32
  }
  func.func @transform_6(%arg0: i32) -> (i32, i32, i32) {
    %c0_i32 = arith.constant 0 : i32
    %c0_i32_0 = arith.constant 0 : i32
    %c0_i32_1 = arith.constant 0 : i32
    return %arg0, %c0_i32, %c0_i32_0 : i32, i32, i32
  }
}

</mosaic_0001>

<bundles_post_ra>
// kernel: tpu_custom_call.1
= control target key start
LH: loop header
LB: loop body
LE: loop exit
PB: predicated region body
PF: predicated region fallthrough
CT: control target
= control target key end

     0   :  { %11 = vsyncpa [#allocation3], 0  ;;  %s13079_s0 = inlined_call_operand.hbm [shape: f32[2,128,1024], index: 0, kind: input, shape index: {}]   ;;  %s13080_s1 = inlined_call_operand.hbm [shape: f32[2,1,128], index: 1, kind: input, shape index: {}]   ;;  %s13081_s2 = inlined_call_operand.hbm [shape: bf16[1024,1024], index: 2, kind: input, shape index: {}]   ;;  %s13082_s3 = inlined_call_operand.hbm [shape: f32[1,1024], index: 3, kind: input, shape index: {}]   ;;  %s13083_s4 = inlined_call_operand.vmem [shape: f32[1024,2], index: 4, kind: input, shape index: {}]   ;;  %s13084_s5 = inlined_call_operand.hbm [shape: f32[2], index: 5, kind: input, shape index: {}]   ;;  %s13085_s6 = inlined_call_operand.hbm [shape: f32[2,2,128], index: 6, kind: output, shape index: {}]  }
   0x1   :  { %12 = vsyncpa [#allocation7], 0 }
   0x2   :  { %13 = vsyncpa [#allocation10], 0 }
   0x3   :  { %14 = vsyncpa [#allocation5], 0 }
   0x4   :  { %15 = vsyncpa [#allocation4], 0  ;;  %s10686_s21 = smov [#allocation6]   ;;  %s10556_s25 = scalar_lea.hbm %s13080_s1, 32 }
   0x5   :  { %s33_s22 = sshll.u32 %s10686_s21, 4  ;;  %p10557_p0 = scmp.ne.s32.totalorder %s13080_s1, %s10556_s25  ;;  %s34_s22 = int_to_ptr.vmem [resolvable:$true] %s33_s22 }
   0x6   :  { %p10560_p1 = scmp.lt.u32.totalorder %s10556_s25, %s13080_s1 }
   0x8   :  { %p10562_p2 = pnand %p10560_p1, %p10557_p0 }
   0xa   :  { %10565 = shalt.err (!%p10562_p2)
}
   0xb   :  { %s10566_s30 = scalar_lea.vmem %s34_s22, 32  ;;  %p10571_p4 = scmp.lt.s32.totalorder %s34_s22, %s34_s22 }
   0xc   :  { %p10567_p3 = scmp.ne.s32.totalorder %s34_s22, %s10566_s30  ;;  %p10572_p5 = scmp.lt.s32.totalorder %s10566_s30, %s10566_s30 }
   0xe   :  { %p10573_p6 = por %p10572_p5, %p10571_p4 }
  0x10   :  { %p10574_p7 = pnand %p10573_p6, %p10567_p3 }
  0x12   :  { %10577 = shalt.err (!%p10574_p7)
}
  0x13   :  { %s10687_s7 = smov 16   ;;  %s10688_s8 = smov 1  }
  0x14   :  { %39 = dma.hbm_to_vmem [thread:$0]  %s13080_s1, 32, %s34_s22, [#allocation7], %s10687_s7, %s10687_s7, %s10688_s8  }
  0x15   :  { %s10689_s11 = smov [#allocation2]   ;;  %s10578_s15 = scalar_lea.hbm %s13079_s0, 32768 }
  0x16   :  { %s21_s12 = sshll.u32 %s10689_s11, 4  ;;  %p10579_p8 = scmp.ne.s32.totalorder %s13079_s0, %s10578_s15  ;;  %s22_s12 = int_to_ptr.vmem [resolvable:$true] %s21_s12 }
  0x17   :  { %p10582_p9 = scmp.lt.u32.totalorder %s10578_s15, %s13079_s0 }
  0x19   :  { %p10584_p10 = pnand %p10582_p9, %p10579_p8 }
  0x1b   :  { %10587 = shalt.err (!%p10584_p10)
}
  0x1c   :  { %s10588_s20 = scalar_lea.vmem %s22_s12, 32768  ;;  %p10593_p12 = scmp.lt.s32.totalorder %s22_s12, %s22_s12 }
  0x1d   :  { %p10589_p11 = scmp.ne.s32.totalorder %s22_s12, %s10588_s20  ;;  %p10594_p13 = scmp.lt.s32.totalorder %s10588_s20, %s10588_s20 }
  0x1f   :  { %p10595_p0 = por %p10594_p13, %p10593_p12 }
  0x21   :  { %p10596_p1 = pnand %p10595_p0, %p10589_p11 }
  0x23   :  { %10599 = shalt.err (!%p10596_p1)
}
  0x24   :  { %s10690_s1 = smov 1024   ;;  %s10691_s21 = smov 64  }
  0x25   :  { %27 = dma.hbm_to_vmem [thread:$0]  %s13079_s0, 32768, %s22_s12, [#allocation3], %s10690_s1, %s10690_s1, %s10691_s21  }
  0x26   :  { %s10692_s24 = smov [#allocation8]   ;;  %s10600_s28 = scalar_lea.hbm %s13081_s2, 65536 }
  0x27   :  { %s45_s25 = sshll.u32 %s10692_s24, 4  ;;  %p10601_p2 = scmp.ne.s32.totalorder %s13081_s2, %s10600_s28  ;;  %s46_s25 = int_to_ptr.vmem [resolvable:$true] %s45_s25 }
  0x28   :  { %p10604_p3 = scmp.lt.u32.totalorder %s10600_s28, %s13081_s2 }
  0x2a   :  { %p10606_p4 = pnand %p10604_p3, %p10601_p2 }
  0x2c   :  { %10609 = shalt.err (!%p10606_p4)
}
  0x2d   :  { %s10610_s9 = scalar_lea.vmem %s46_s25, 65536  ;;  %p10615_p6 = scmp.lt.s32.totalorder %s46_s25, %s46_s25 }
  0x2e   :  { %p10611_p5 = scmp.ne.s32.totalorder %s46_s25, %s10610_s9  ;;  %p10616_p7 = scmp.lt.s32.totalorder %s10610_s9, %s10610_s9 }
  0x30   :  { %p10617_p8 = por %p10616_p7, %p10615_p6 }
  0x32   :  { %p10618_p9 = pnand %p10617_p8, %p10611_p5 }
  0x34   :  { %10621 = shalt.err (!%p10618_p9)
}
  0x35   :  { %s10693_s0 = smov 512   ;;  %s10694_s10 = smov 32  }
  0x36   :  { %51 = dma.hbm_to_vmem [thread:$0]  %s13081_s2, 65536, %s46_s25, [#allocation7], %s10693_s0, %s10693_s0, %s10694_s10  }
  0x37   :  { %s10695_s13 = smov [#allocation9]   ;;  %s10622_s17 = scalar_lea.hbm %s13082_s3, 128 }
  0x38   :  { %s58_s14 = sshll.u32 %s10695_s13, 4  ;;  %p10623_p10 = scmp.ne.s32.totalorder %s13082_s3, %s10622_s17  ;;  %s59_s14 = int_to_ptr.vmem [resolvable:$true] %s58_s14 }
  0x39   :  { %p10626_p11 = scmp.lt.u32.totalorder %s10622_s17, %s13082_s3 }
  0x3b   :  { %p10628_p12 = pnand %p10626_p11, %p10623_p10 }
  0x3d   :  { %10631 = shalt.err (!%p10628_p12)
}
  0x3e   :  { %s10632_s21 = scalar_lea.vmem %s59_s14, 128  ;;  %p10637_p0 = scmp.lt.s32.totalorder %s59_s14, %s59_s14 }
  0x3f   :  { %p10633_p13 = scmp.ne.s32.totalorder %s59_s14, %s10632_s21  ;;  %p10638_p1 = scmp.lt.s32.totalorder %s10632_s21, %s10632_s21 }
  0x41   :  { %p10639_p2 = por %p10638_p1, %p10637_p0 }
  0x43   :  { %p10640_p3 = pnand %p10639_p2, %p10633_p13 }
  0x45   :  { %10643 = shalt.err (!%p10640_p3)
}
  0x46   :  { %61 = dma.hbm_to_vmem [thread:$0]  %s13082_s3, 128, %s59_s14, [#allocation10]  }
  0x47   :  { %s10644_s25 = scalar_lea.hbm %s13084_s5, 16 }
  0x48   :  { %p10645_p4 = scmp.ne.s32.totalorder %s13084_s5, %s10644_s25  ;;  %p10648_p5 = scmp.lt.u32.totalorder %s10644_s25, %s13084_s5 }
  0x4a   :  { %p10650_p6 = pnand %p10648_p5, %p10645_p4 }
  0x4c   :  { %10653 = shalt.err (!%p10650_p6)
}
  0x4d   :  { %s10696_s30 = smov [#allocation11]  }
  0x4e   :  { %71 = dma.hbm_to_smem %s13084_s5, 16, %s10696_s30, [#allocation5]  }
  0x4f   :  { %10676 = dma.done.wait [#allocation3], 32768  }
  0x50   :  { %10677 = vsyncadd [#allocation3], 4294934528 }
  0x51   :  { %10678 = dma.done.wait [#allocation7], 65568  }
  0x52   :  { %10679 = vsyncadd [#allocation7], 4294901728 }
  0x53   :  { %10680 = dma.done.wait [#allocation10], 128  }
  0x54   :  { %10681 = vsyncadd [#allocation10], 4294967168 }
  0x55   :  { %10682 = dma.done.wait [#allocation5], 16  }
  0x56   :  { %10683 = vsyncadd [#allocation5], 4294967280 }
  0x57   :  { %87 = sfence }
  0x58   :  { %v472_v0 = vld [vmem:[#allocation8] sm:$0xff]  ;;  %s8609_s11 = sld [smem:[#allocation11 + $0x1]]  ;;  %vm8008_vm3 = vcmask 1041408   ;;  %s10699_s12 = smov [#allocation12]  }
  0x59   :  { %v476_v1 = vld [vmem:[#allocation8 + $0x20] sm:$0xff]  ;;  %s8082_s13 = sshll.u32 %s10699_s12, 4  ;;  %s8083_s13 = int_to_ptr.vmem [resolvable:$true] %s8082_s13 }
  0x5a   :  { %v728_v2 = vld [vmem:[#allocation8 + $0x800] sm:$0xff]  ;;  %v8098_v3 = vcombine.high %v472_v0, %v476_v1  ;;  %v8097_v5 = vcombine.low %v472_v0, %v476_v1  ;;  %s10654_s14 = scalar_lea.vmem %s8083_s13, 64  ;;  %p10659_p8 = scmp.lt.s32.totalorder %s8083_s13, %s8083_s13 }
  0x5b   :  { %v732_v4 = vld [vmem:[#allocation8 + $0x820] sm:$0xff]  ;;  %p10655_p7 = scmp.ne.s32.totalorder %s8083_s13, %s10654_s14  ;;  %p10660_p9 = scmp.lt.s32.totalorder %s10654_s14, %s10654_s14 }
  0x5c   :  { %v480_v6 = vld [vmem:[#allocation8 + $0x40] sm:$0xff]  ;;  %v8354_v8 = vcombine.high %v728_v2, %v732_v4  ;;  %v8353_v9 = vcombine.low %v728_v2, %v732_v4  ;;  %3586 = vmatprep.subr.bf16.mxu1 %v8098_v3 }
  0x5d   :  { %v484_v7 = vld [vmem:[#allocation8 + $0x60] sm:$0xff]  ;;  %3587 = vmatpush1.bf16.msra.mxu1 %v8097_v5  ;;  %p10661_p10 = por %p10660_p9, %p10659_p8 }
  0x5e   :  { %v8106_v10 = vcombine.high %v480_v6, %v484_v7  ;;  %v736_v11 = vld [vmem:[#allocation8 + $0x840] sm:$0xff]  ;;  %3972 = vmatprep.subr.bf16.mxu0 %v8354_v8  ;;  %v8105_v18 = vcombine.low %v480_v6, %v484_v7 }
  0x5f   :  { %v740_v12 = vld [vmem:[#allocation8 + $0x860] sm:$0xff]  ;;  %3973 = vmatpush1.bf16.msra.mxu0 %v8353_v9  ;;  %p10662_p11 = pnand %p10661_p10, %p10655_p7 }
  0x60   :  { %v488_v13 = vld [vmem:[#allocation8 + $0x80] sm:$0xff]  ;;  %v8362_v14 = vcombine.high %v736_v11, %v740_v12  ;;  %3588 = vmatprep.subr.bf16.mxu1 %v8106_v10  ;;  %v8361_v19 = vcombine.low %v736_v11, %v740_v12 }
  0x61   :  { %v492_v15 = vld [vmem:[#allocation8 + $0xa0] sm:$0xff]  ;;  %3589 = vmatpush1.bf16.msra.mxu1 %v8105_v18 }
  0x62   :  { %v744_v16 = vld [vmem:[#allocation8 + $0x880] sm:$0xff]  ;;  %v8114_v20 = vcombine.high %v488_v13, %v492_v15  ;;  %3974 = vmatprep.subr.bf16.mxu0 %v8362_v14  ;;  %v8113_v26 = vcombine.low %v488_v13, %v492_v15 }
  0x63   :  { %v748_v17 = vld [vmem:[#allocation8 + $0x8a0] sm:$0xff]  ;;  %3975 = vmatpush1.bf16.msra.mxu0 %v8361_v19 }
  0x64   :  { %v8370_v21 = vcombine.high %v744_v16, %v748_v17  ;;  %v496_v22 = vld [vmem:[#allocation8 + $0xc0] sm:$0xff]  ;;  %3590 = vmatprep.subr.bf16.mxu1 %v8114_v20  ;;  %v8369_v27 = vcombine.low %v744_v16, %v748_v17 }
  0x65   :  { %v500_v23 = vld [vmem:[#allocation8 + $0xe0] sm:$0xff]  ;;  %3591 = vmatpush1.bf16.msra.mxu1 %v8113_v26 }
  0x66   :  { %v752_v24 = vld [vmem:[#allocation8 + $0x8c0] sm:$0xff]  ;;  %v8122_v28 = vcombine.high %v496_v22, %v500_v23  ;;  %3976 = vmatprep.subr.bf16.mxu0 %v8370_v21  ;;  %v8121_v34 = vcombine.low %v496_v22, %v500_v23 }
  0x67   :  { %v756_v25 = vld [vmem:[#allocation8 + $0x8e0] sm:$0xff]  ;;  %3977 = vmatpush1.bf16.msra.mxu0 %v8369_v27 }
  0x68   :  { %v8378_v29 = vcombine.high %v752_v24, %v756_v25  ;;  %v504_v30 = vld [vmem:[#allocation8 + $0x100] sm:$0xff]  ;;  %3592 = vmatprep.subr.bf16.mxu1 %v8122_v28  ;;  %v8377_v35 = vcombine.low %v752_v24, %v756_v25 }
  0x69   :  { %v508_v31 = vld [vmem:[#allocation8 + $0x120] sm:$0xff]  ;;  %3593 = vmatpush1.bf16.msra.mxu1 %v8121_v34 }
  0x6a   :  { %v760_v32 = vld [vmem:[#allocation8 + $0x900] sm:$0xff]  ;;  %v8130_v36 = vcombine.high %v504_v30, %v508_v31  ;;  %3978 = vmatprep.subr.bf16.mxu0 %v8378_v29  ;;  %v8129_v42 = vcombine.low %v504_v30, %v508_v31 }
  0x6b   :  { %v764_v33 = vld [vmem:[#allocation8 + $0x920] sm:$0xff]  ;;  %3979 = vmatpush1.bf16.msra.mxu0 %v8377_v35 }
  0x6c   :  { %v8386_v37 = vcombine.high %v760_v32, %v764_v33  ;;  %v512_v38 = vld [vmem:[#allocation8 + $0x140] sm:$0xff]  ;;  %3594 = vmatprep.subr.bf16.mxu1 %v8130_v36  ;;  %v8385_v43 = vcombine.low %v760_v32, %v764_v33 }
  0x6d   :  { %v516_v39 = vld [vmem:[#allocation8 + $0x160] sm:$0xff]  ;;  %3595 = vmatpush1.bf16.msra.mxu1 %v8129_v42 }
  0x6e   :  { %v768_v40 = vld [vmem:[#allocation8 + $0x940] sm:$0xff]  ;;  %v8138_v44 = vcombine.high %v512_v38, %v516_v39  ;;  %3980 = vmatprep.subr.bf16.mxu0 %v8386_v37  ;;  %v8137_v50 = vcombine.low %v512_v38, %v516_v39 }
  0x6f   :  { %v772_v41 = vld [vmem:[#allocation8 + $0x960] sm:$0xff]  ;;  %3981 = vmatpush1.bf16.msra.mxu0 %v8385_v43 }
  0x70   :  { %v8394_v45 = vcombine.high %v768_v40, %v772_v41  ;;  %v520_v46 = vld [vmem:[#allocation8 + $0x180] sm:$0xff]  ;;  %3596 = vmatprep.subr.bf16.mxu1 %v8138_v44  ;;  %v8393_v51 = vcombine.low %v768_v40, %v772_v41 }
  0x71   :  { %v524_v47 = vld [vmem:[#allocation8 + $0x1a0] sm:$0xff]  ;;  %3597 = vmatpush1.bf16.msra.mxu1 %v8137_v50 }
  0x72   :  { %v776_v48 = vld [vmem:[#allocation8 + $0x980] sm:$0xff]  ;;  %v8146_v52 = vcombine.high %v520_v46, %v524_v47  ;;  %3982 = vmatprep.subr.bf16.mxu0 %v8394_v45  ;;  %v8145_v0 = vcombine.low %v520_v46, %v524_v47 }
  0x73   :  { %v780_v49 = vld [vmem:[#allocation8 + $0x9a0] sm:$0xff]  ;;  %3983 = vmatpush1.bf16.msra.mxu0 %v8393_v51 }
  0x74   :  { %v528_v53 = vld [vmem:[#allocation8 + $0x1c0] sm:$0xff]  ;;  %v8402_v56 = vcombine.high %v776_v48, %v780_v49  ;;  %3598 = vmatprep.subr.bf16.mxu1 %v8146_v52  ;;  %v8401_v1 = vcombine.low %v776_v48, %v780_v49 }
  0x75   :  { %v89_v54 = vld [vmem:[#allocation2 + $0x8] sm:$0xff]  ;;  %3599 = vmatpush1.bf16.msra.mxu1 %v8145_v0 }
  0x76   :  { %v97_v55 = vld [vmem:[#allocation2 + $0x48] sm:$0xff]  ;;  %3984 = vmatprep.subr.bf16.mxu0 %v8402_v56 }
  0x77   :  { %v532_v57 = vld [vmem:[#allocation8 + $0x1e0] sm:$0xff]  ;;  %v10797_v58 = vpack.c.bf16 %v97_v55, %v89_v54  ;;  %3985 = vmatpush1.bf16.msra.mxu0 %v8401_v1 }
  0x78   :  { %v93_v59 = vld [vmem:[#allocation2 + $0x28] sm:$0xff]  ;;  %v8154_v2 = vcombine.high %v528_v53, %v532_v57  ;;  %v8153_v8 = vcombine.low %v528_v53, %v532_v57 }
  0x79   :  { %13386 = vst [vmem:[#allocation18_spill] sm:$0xff] %v10797_v58  ;;  %v101_v60 = vld [vmem:[#allocation2 + $0x68] sm:$0xff]  ;;  %3618 = vmatprep.mubr.bf16.mxu1 %v10797_v58 }
  0x7a   :  { %v784_v61 = vld [vmem:[#allocation8 + $0x9c0] sm:$0xff]  ;;  %v10799_v63 = vpack.c.bf16 %v101_v60, %v93_v59  ;;  %3600 = vmatprep.subr.bf16.mxu1 %v8154_v2 }
  0x7b   :  { %v788_v62 = vld [vmem:[#allocation8 + $0x9e0] sm:$0xff]  ;;  %3601 = vmatpush1.bf16.msra.mxu1 %v8153_v8 }
  0x7c   :  { %13387 = vst [vmem:[#allocation19_spill] sm:$0xff] %v10799_v63  ;;  %v8410_v3 = vcombine.high %v784_v61, %v788_v62  ;;  %v536_v4 = vld [vmem:[#allocation8 + $0x200] sm:$0xff]  ;;  %4004 = vmatprep.mubr.bf16.mxu0 %v10799_v63  ;;  %v8409_v9 = vcombine.low %v784_v61, %v788_v62  ;;  %v135_v63 = vld [vmem:[#allocation2 + $0x178] sm:$0xff] }
  0x7d   :  { %v540_v5 = vld [vmem:[#allocation8 + $0x220] sm:$0xff] }
  0x7e   :  { %v792_v6 = vld [vmem:[#allocation8 + $0xa00] sm:$0xff]  ;;  %v8162_v10 = vcombine.high %v536_v4, %v540_v5  ;;  %3986 = vmatprep.subr.bf16.mxu0 %v8410_v3  ;;  %v8161_v16 = vcombine.low %v536_v4, %v540_v5 }
  0x7f   :  { %v796_v7 = vld [vmem:[#allocation8 + $0xa20] sm:$0xff]  ;;  %3987 = vmatpush1.bf16.msra.mxu0 %v8409_v9 }
  0x80   :  { %v8418_v11 = vcombine.high %v792_v6, %v796_v7  ;;  %v544_v12 = vld [vmem:[#allocation8 + $0x240] sm:$0xff]  ;;  %3602 = vmatprep.subr.bf16.mxu1 %v8162_v10  ;;  %v8417_v17 = vcombine.low %v792_v6, %v796_v7 }
  0x81   :  { %v548_v13 = vld [vmem:[#allocation8 + $0x260] sm:$0xff]  ;;  %3603 = vmatpush1.bf16.msra.mxu1 %v8161_v16 }
  0x82   :  { %v800_v14 = vld [vmem:[#allocation8 + $0xa40] sm:$0xff]  ;;  %v8170_v18 = vcombine.high %v544_v12, %v548_v13  ;;  %3988 = vmatprep.subr.bf16.mxu0 %v8418_v11  ;;  %v8169_v24 = vcombine.low %v544_v12, %v548_v13 }
  0x83   :  { %v804_v15 = vld [vmem:[#allocation8 + $0xa60] sm:$0xff]  ;;  %3989 = vmatpush1.bf16.msra.mxu0 %v8417_v17 }
  0x84   :  { %v8426_v19 = vcombine.high %v800_v14, %v804_v15  ;;  %v552_v20 = vld [vmem:[#allocation8 + $0x280] sm:$0xff]  ;;  %3604 = vmatprep.subr.bf16.mxu1 %v8170_v18  ;;  %v8425_v25 = vcombine.low %v800_v14, %v804_v15 }
  0x85   :  { %v556_v21 = vld [vmem:[#allocation8 + $0x2a0] sm:$0xff]  ;;  %3605 = vmatpush1.bf16.msra.mxu1 %v8169_v24 }
  0x86   :  { %v808_v22 = vld [vmem:[#allocation8 + $0xa80] sm:$0xff]  ;;  %v8178_v26 = vcombine.high %v552_v20, %v556_v21  ;;  %3990 = vmatprep.subr.bf16.mxu0 %v8426_v19  ;;  %v8177_v32 = vcombine.low %v552_v20, %v556_v21 }
  0x87   :  { %v812_v23 = vld [vmem:[#allocation8 + $0xaa0] sm:$0xff]  ;;  %3991 = vmatpush1.bf16.msra.mxu0 %v8425_v25 }
  0x88   :  { %v8434_v27 = vcombine.high %v808_v22, %v812_v23  ;;  %v560_v28 = vld [vmem:[#allocation8 + $0x2c0] sm:$0xff]  ;;  %3606 = vmatprep.subr.bf16.mxu1 %v8178_v26  ;;  %v8433_v33 = vcombine.low %v808_v22, %v812_v23 }
  0x89   :  { %v564_v29 = vld [vmem:[#allocation8 + $0x2e0] sm:$0xff]  ;;  %3607 = vmatpush1.bf16.msra.mxu1 %v8177_v32 }
  0x8a   :  { %v816_v30 = vld [vmem:[#allocation8 + $0xac0] sm:$0xff]  ;;  %v8186_v34 = vcombine.high %v560_v28, %v564_v29  ;;  %3992 = vmatprep.subr.bf16.mxu0 %v8434_v27  ;;  %v8185_v40 = vcombine.low %v560_v28, %v564_v29 }
  0x8b   :  { %v820_v31 = vld [vmem:[#allocation8 + $0xae0] sm:$0xff]  ;;  %3993 = vmatpush1.bf16.msra.mxu0 %v8433_v33 }
  0x8c   :  { %v8442_v35 = vcombine.high %v816_v30, %v820_v31  ;;  %v568_v36 = vld [vmem:[#allocation8 + $0x300] sm:$0xff]  ;;  %3608 = vmatprep.subr.bf16.mxu1 %v8186_v34  ;;  %v8441_v41 = vcombine.low %v816_v30, %v820_v31 }
  0x8d   :  { %v572_v37 = vld [vmem:[#allocation8 + $0x320] sm:$0xff]  ;;  %3609 = vmatpush1.bf16.msra.mxu1 %v8185_v40 }
  0x8e   :  { %v824_v38 = vld [vmem:[#allocation8 + $0xb00] sm:$0xff]  ;;  %v8194_v42 = vcombine.high %v568_v36, %v572_v37  ;;  %3994 = vmatprep.subr.bf16.mxu0 %v8442_v35  ;;  %v8193_v48 = vcombine.low %v568_v36, %v572_v37 }
  0x8f   :  { %v828_v39 = vld [vmem:[#allocation8 + $0xb20] sm:$0xff]  ;;  %3995 = vmatpush1.bf16.msra.mxu0 %v8441_v41 }
  0x90   :  { %v8450_v43 = vcombine.high %v824_v38, %v828_v39  ;;  %v576_v44 = vld [vmem:[#allocation8 + $0x340] sm:$0xff]  ;;  %3610 = vmatprep.subr.bf16.mxu1 %v8194_v42  ;;  %v8449_v49 = vcombine.low %v824_v38, %v828_v39 }
  0x91   :  { %v580_v45 = vld [vmem:[#allocation8 + $0x360] sm:$0xff]  ;;  %3611 = vmatpush1.bf16.msra.mxu1 %v8193_v48 }
  0x92   :  { %v832_v46 = vld [vmem:[#allocation8 + $0xb40] sm:$0xff]  ;;  %v8202_v50 = vcombine.high %v576_v44, %v580_v45  ;;  %3996 = vmatprep.subr.bf16.mxu0 %v8450_v43  ;;  %v8201_v56 = vcombine.low %v576_v44, %v580_v45 }
  0x93   :  { %v836_v47 = vld [vmem:[#allocation8 + $0xb60] sm:$0xff]  ;;  %3997 = vmatpush1.bf16.msra.mxu0 %v8449_v49 }
  0x94   :  { %v8458_v51 = vcombine.high %v832_v46, %v836_v47  ;;  %v584_v52 = vld [vmem:[#allocation8 + $0x380] sm:$0xff]  ;;  %3612 = vmatprep.subr.bf16.mxu1 %v8202_v50  ;;  %v8457_v57 = vcombine.low %v832_v46, %v836_v47 }
  0x95   :  { %v588_v53 = vld [vmem:[#allocation8 + $0x3a0] sm:$0xff]  ;;  %3613 = vmatpush1.bf16.msra.mxu1 %v8201_v56 }
  0x96   :  { %v840_v54 = vld [vmem:[#allocation8 + $0xb80] sm:$0xff]  ;;  %v8210_v59 = vcombine.high %v584_v52, %v588_v53  ;;  %3998 = vmatprep.subr.bf16.mxu0 %v8458_v51  ;;  %v8209_v2 = vcombine.low %v584_v52, %v588_v53 }
  0x97   :  { %v844_v55 = vld [vmem:[#allocation8 + $0xba0] sm:$0xff]  ;;  %3999 = vmatpush1.bf16.msra.mxu0 %v8457_v57 }
  0x98   :  { %v8466_v60 = vcombine.high %v840_v54, %v844_v55  ;;  %v592_v61 = vld [vmem:[#allocation8 + $0x3c0] sm:$0xff]  ;;  %3614 = vmatprep.subr.bf16.mxu1 %v8210_v59  ;;  %v8465_v3 = vcombine.low %v840_v54, %v844_v55 }
  0x99   :  { %v596_v62 = vld [vmem:[#allocation8 + $0x3e0] sm:$0xff]  ;;  %3615 = vmatpush1.bf16.msra.mxu1 %v8209_v2 }
  0x9a   :  { %v848_v0 = vld [vmem:[#allocation8 + $0xbc0] sm:$0xff]  ;;  %v8218_v4 = vcombine.high %v592_v61, %v596_v62  ;;  %4000 = vmatprep.subr.bf16.mxu0 %v8466_v60  ;;  %v8217_v10 = vcombine.low %v592_v61, %v596_v62 }
  0x9b   :  { %v852_v1 = vld [vmem:[#allocation8 + $0xbe0] sm:$0xff]  ;;  %4001 = vmatpush1.bf16.msra.mxu0 %v8465_v3 }
  0x9c   :  { %v8474_v5 = vcombine.high %v848_v0, %v852_v1  ;;  %v600_v6 = vld [vmem:[#allocation8 + $0x400] sm:$0xff]  ;;  %3616 = vmatprep.subr.bf16.mxu1 %v8218_v4  ;;  %v8473_v13 = vcombine.low %v848_v0, %v852_v1 }
  0x9d   :  { %v604_v7 = vld [vmem:[#allocation8 + $0x420] sm:$0xff]  ;;  %3617 = vmatpush1.bf16.msra.mxu1 %v8217_v10 }
  0x9e   :  { %v856_v8 = vld [vmem:[#allocation8 + $0xc00] sm:$0xff]  ;;  %v8226_v14 = vcombine.high %v600_v6, %v604_v7  ;;  %4002 = vmatprep.subr.bf16.mxu0 %v8474_v5  ;;  %v8225_v25 = vcombine.low %v600_v6, %v604_v7 }
  0x9f   :  { %v860_v9 = vld [vmem:[#allocation8 + $0xc20] sm:$0xff]  ;;  %4003 = vmatpush1.bf16.msra.mxu0 %v8473_v13 }
  0xa0   :  { %v88_v11 = vld [vmem:[#allocation2] sm:$0xff]  ;;  %v105_v17 = vld [vmem:[#allocation2 + $0x88] sm:$0xff]  ;;  %v8482_v21 = vcombine.high %v856_v8, %v860_v9  ;;  %3779 = vmatprep.subr.bf16.mxu1 %v8226_v14  ;;  %v8481_v34 = vcombine.low %v856_v8, %v860_v9 }
  0xa1   :  { %v96_v12 = vld [vmem:[#allocation2 + $0x40] sm:$0xff]  ;;  %v113_v18 = vld [vmem:[#allocation2 + $0xc8] sm:$0xff] }
  0xa2   :  { %v92_v15 = vld [vmem:[#allocation2 + $0x20] sm:$0xff]  ;;  %v109_v19 = vld [vmem:[#allocation2 + $0xa8] sm:$0xff]  ;;  %v10803_v22 = vpack.c.bf16 %v96_v12, %v88_v11  ;;  %v10807_v29 = vpack.c.bf16 %v113_v18, %v105_v17  ;;  %4165 = vmatprep.subr.bf16.mxu0 %v8482_v21 }
  0xa3   :  { %v100_v16 = vld [vmem:[#allocation2 + $0x60] sm:$0xff]  ;;  %v117_v20 = vld [vmem:[#allocation2 + $0xe8] sm:$0xff] }
  0xa4   :  { %13388 = vst [vmem:[#allocation20_spill] sm:$0xff] %v10803_v22  ;;  %v608_v23 = vld [vmem:[#allocation8 + $0x440] sm:$0xff]  ;;  %v10805_v26 = vpack.c.bf16 %v100_v16, %v92_v15  ;;  %13390 = vst [vmem:[#allocation22_spill] sm:$0xff] %v10807_v29  ;;  %v10809_v30 = vpack.c.bf16 %v117_v20, %v109_v19  ;;  %3619 = vmatmul.mubr.bf16.vlgmr.msra.gmra.mrb[0].mxu1 %v10803_v22 }
  0xa5   :  { %v612_v24 = vld [vmem:[#allocation8 + $0x460] sm:$0xff]  ;;  %3780 = vmatpush1.bf16.msra.mxu1 %v8225_v25  ;;  %3628 = vmatprep.mubr.bf16.mxu1 %v10807_v29 }
  0xa6   :  { %13389 = vst [vmem:[#allocation21_spill] sm:$0xff] %v10805_v26  ;;  %v864_v27 = vld [vmem:[#allocation8 + $0xc40] sm:$0xff]  ;;  %13391 = vst [vmem:[#allocation23_spill] sm:$0xff] %v10809_v30  ;;  %v8234_v31 = vcombine.high %v608_v23, %v612_v24  ;;  %4005 = vmatmul.mubr.bf16.vlgmr.msra.gmra.mrb[0].mxu0 %v10805_v26  ;;  %v8233_v38 = vcombine.low %v608_v23, %v612_v24 }
  0xa7   :  { %v868_v28 = vld [vmem:[#allocation8 + $0xc60] sm:$0xff]  ;;  %4014 = vmatprep.mubr.bf16.mxu0 %v10809_v30  ;;  %4166 = vmatpush1.bf16.msra.mxu0 %v8481_v34  ;;  %v131_v30 = vld [vmem:[#allocation2 + $0x158] sm:$0xff] }
  0xa8   :  { %v616_v32 = vld [vmem:[#allocation8 + $0x480] sm:$0xff]  ;;  %v8490_v37 = vcombine.high %v864_v27, %v868_v28  ;;  %3781 = vmatprep.subr.bf16.mxu1 %v8234_v31  ;;  %v8489_v48 = vcombine.low %v864_v27, %v868_v28 }
  0xa9   :  { %v620_v33 = vld [vmem:[#allocation8 + $0x4a0] sm:$0xff]  ;;  %3782 = vmatpush1.bf16.msra.mxu1 %v8233_v38 }
  0xaa   :  { %v104_v35 = vld [vmem:[#allocation2 + $0x80] sm:$0xff]  ;;  %v121_v43 = vld [vmem:[#allocation2 + $0x108] sm:$0xff]  ;;  %v8242_v45 = vcombine.high %v616_v32, %v620_v33  ;;  %4167 = vmatprep.subr.bf16.mxu0 %v8490_v37  ;;  %v8241_v59 = vcombine.low %v616_v32, %v620_v33 }
  0xab   :  { %v112_v36 = vld [vmem:[#allocation2 + $0xc0] sm:$0xff]  ;;  %v129_v44 = vld [vmem:[#allocation2 + $0x148] sm:$0xff]  ;;  %4168 = vmatpush1.bf16.msra.mxu0 %v8489_v48 }
  0xac   :  { %v108_v39 = vld [vmem:[#allocation2 + $0xa0] sm:$0xff]  ;;  %v125_v46 = vld [vmem:[#allocation2 + $0x128] sm:$0xff]  ;;  %v10815_v49 = vpack.c.bf16 %v112_v36, %v104_v35  ;;  %v10819_v54 = vpack.c.bf16 %v129_v44, %v121_v43  ;;  %3783 = vmatprep.subr.bf16.mxu1 %v8242_v45 }
  0xad   :  { %v872_v40 = vld [vmem:[#allocation8 + $0xc80] sm:$0xff]  ;;  %3784 = vmatpush1.bf16.msra.mxu1 %v8241_v59 }
  0xae   :  { %v876_v41 = vld [vmem:[#allocation8 + $0xca0] sm:$0xff]  ;;  %13392 = vst [vmem:[#allocation24_spill] sm:$0xff] %v10815_v49  ;;  %3629 = vmatmul.mubr.bf16.gmra.mrb[4].mxu1 %v10815_v49 }
  0xaf   :  { %v116_v42 = vld [vmem:[#allocation2 + $0xe0] sm:$0xff]  ;;  %v133_v47 = vld [vmem:[#allocation2 + $0x168] sm:$0xff]  ;;  %v8498_v52 = vcombine.high %v872_v40, %v876_v41  ;;  %v8497_v62 = vcombine.low %v872_v40, %v876_v41  ;;  %3638 = vmatprep.mubr.bf16.mxu1 %v10819_v54 }
  0xb0   :  { %v624_v50 = vld [vmem:[#allocation8 + $0x4c0] sm:$0xff]  ;;  %v10817_v53 = vpack.c.bf16 %v116_v42, %v108_v39  ;;  %v10821_v57 = vpack.c.bf16 %v133_v47, %v125_v46 }
  0xb1   :  { %v628_v51 = vld [vmem:[#allocation8 + $0x4e0] sm:$0xff]  ;;  %4169 = vmatprep.subr.bf16.mxu0 %v8498_v52 }
  0xb2   :  { %13393 = vst [vmem:[#allocation25_spill] sm:$0xff] %v10817_v53  ;;  %v880_v55 = vld [vmem:[#allocation8 + $0xcc0] sm:$0xff]  ;;  %13394 = vst [vmem:[#allocation26_spill] sm:$0xff] %v10821_v57  ;;  %v8250_v61 = vcombine.high %v624_v50, %v628_v51  ;;  %4015 = vmatmul.mubr.bf16.gmra.mrb[4].mxu0 %v10817_v53  ;;  %v8249_v10 = vcombine.low %v624_v50, %v628_v51  ;;  %v123_v53 = vld [vmem:[#allocation2 + $0x118] sm:$0xff] }
  0xb3   :  { %v884_v56 = vld [vmem:[#allocation8 + $0xce0] sm:$0xff]  ;;  %4024 = vmatprep.mubr.bf16.mxu0 %v10821_v57  ;;  %4170 = vmatpush1.bf16.msra.mxu0 %v8497_v62  ;;  %v118_v57 = vld [vmem:[#allocation2 + $0xf0] sm:$0xff] }
  0xb4   :  { %v120_v60 = vld [vmem:[#allocation2 + $0x100] sm:$0xff]  ;;  %v8506_v3 = vcombine.high %v880_v55, %v884_v56  ;;  %v137_v8 = vld [vmem:[#allocation2 + $0x188] sm:$0xff]  ;;  %3785 = vmatprep.subr.bf16.mxu1 %v8250_v61  ;;  %v8505_v14 = vcombine.low %v880_v55, %v884_v56 }
  0xb5   :  { %v128_v0 = vld [vmem:[#allocation2 + $0x140] sm:$0xff]  ;;  %v145_v9 = vld [vmem:[#allocation2 + $0x1c8] sm:$0xff]  ;;  %3786 = vmatpush1.bf16.msra.mxu1 %v8249_v10 }
  0xb6   :  { %v632_v1 = vld [vmem:[#allocation8 + $0x500] sm:$0xff]  ;;  %v10827_v15 = vpack.c.bf16 %v128_v0, %v120_v60  ;;  %4171 = vmatprep.subr.bf16.mxu0 %v8506_v3  ;;  %v10831_v20 = vpack.c.bf16 %v145_v9, %v137_v8  ;;  %v10845_v60 = vld [vmem:[#allocation8 + $0x8] sm:$0xff] }
  0xb7   :  { %v636_v2 = vld [vmem:[#allocation8 + $0x520] sm:$0xff]  ;;  %4172 = vmatpush1.bf16.msra.mxu0 %v8505_v14  ;;  %v10847_v61 = vld [vmem:[#allocation8 + $0x28] sm:$0xff] }
  0xb8   :  { %v124_v4 = vld [vmem:[#allocation2 + $0x120] sm:$0xff]  ;;  %v141_v11 = vld [vmem:[#allocation2 + $0x1a8] sm:$0xff]  ;;  %v8258_v13 = vcombine.high %v632_v1, %v636_v2  ;;  %v8257_v25 = vcombine.low %v632_v1, %v636_v2  ;;  %3639 = vmatmul.mubr.bf16.gmra.mrb[8].mxu1 %v10827_v15 }
  0xb9   :  { %v888_v5 = vld [vmem:[#allocation8 + $0xd00] sm:$0xff]  ;;  %3648 = vmatprep.mubr.bf16.mxu1 %v10831_v20 }
  0xba   :  { %v892_v6 = vld [vmem:[#allocation8 + $0xd20] sm:$0xff]  ;;  %3787 = vmatprep.subr.bf16.mxu1 %v8258_v13 }
  0xbb   :  { %v132_v7 = vld [vmem:[#allocation2 + $0x160] sm:$0xff]  ;;  %v149_v12 = vld [vmem:[#allocation2 + $0x1e8] sm:$0xff]  ;;  %v8514_v18 = vcombine.high %v888_v5, %v892_v6  ;;  %v8513_v31 = vcombine.low %v888_v5, %v892_v6  ;;  %3788 = vmatpush1.bf16.msra.mxu1 %v8257_v25 }
  0xbc   :  { %v640_v16 = vld [vmem:[#allocation8 + $0x540] sm:$0xff]  ;;  %v10829_v19 = vpack.c.bf16 %v132_v7, %v124_v4  ;;  %v10833_v24 = vpack.c.bf16 %v149_v12, %v141_v11 }
  0xbd   :  { %v644_v17 = vld [vmem:[#allocation8 + $0x560] sm:$0xff]  ;;  %4173 = vmatprep.subr.bf16.mxu0 %v8514_v18 }
  0xbe   :  { %13395 = vst [vmem:[#allocation27_spill] sm:$0xff] %v10829_v19  ;;  %v896_v21 = vld [vmem:[#allocation8 + $0xd40] sm:$0xff]  ;;  %13396 = vst [vmem:[#allocation28_spill] sm:$0xff] %v10833_v24  ;;  %v8266_v28 = vcombine.high %v640_v16, %v644_v17  ;;  %4025 = vmatmul.mubr.bf16.gmra.mrb[8].mxu0 %v10829_v19  ;;  %v8265_v42 = vcombine.low %v640_v16, %v644_v17 }
  0xbf   :  { %v900_v23 = vld [vmem:[#allocation8 + $0xd60] sm:$0xff]  ;;  %4034 = vmatprep.mubr.bf16.mxu0 %v10833_v24  ;;  %4174 = vmatpush1.bf16.msra.mxu0 %v8513_v31  ;;  %v114_v24 = vld [vmem:[#allocation2 + $0xd0] sm:$0xff] }
  0xc0   :  { %v136_v27 = vld [vmem:[#allocation2 + $0x180] sm:$0xff]  ;;  %v8522_v35 = vcombine.high %v896_v21, %v900_v23  ;;  %v153_v40 = vld [vmem:[#allocation2 + $0x208] sm:$0xff]  ;;  %3789 = vmatprep.subr.bf16.mxu1 %v8266_v28  ;;  %v8521_v46 = vcombine.low %v896_v21, %v900_v23 }
  0xc1   :  { %v144_v32 = vld [vmem:[#allocation2 + $0x1c0] sm:$0xff]  ;;  %v161_v41 = vld [vmem:[#allocation2 + $0x248] sm:$0xff]  ;;  %3790 = vmatpush1.bf16.msra.mxu1 %v8265_v42 }
  0xc2   :  { %v648_v33 = vld [vmem:[#allocation8 + $0x580] sm:$0xff]  ;;  %v10839_v47 = vpack.c.bf16 %v144_v32, %v136_v27  ;;  %4175 = vmatprep.subr.bf16.mxu0 %v8522_v35  ;;  %v10843_v56 = vpack.c.bf16 %v161_v41, %v153_v40 }
  0xc3   :  { %v652_v34 = vld [vmem:[#allocation8 + $0x5a0] sm:$0xff]  ;;  %4176 = vmatpush1.bf16.msra.mxu0 %v8521_v46 }
  0xc4   :  { %v140_v36 = vld [vmem:[#allocation2 + $0x1a0] sm:$0xff]  ;;  %v157_v43 = vld [vmem:[#allocation2 + $0x228] sm:$0xff]  ;;  %v8274_v45 = vcombine.high %v648_v33, %v652_v34  ;;  %13397 = vst [vmem:[#allocation29_spill] sm:$0xff] %v10839_v47  ;;  %13399 = vst [vmem:[#allocation31_spill] sm:$0xff] %v10843_v56  ;;  %v8273_v0 = vcombine.low %v648_v33, %v652_v34  ;;  %3649 = vmatmul.mubr.bf16.gmra.mrb[12].mxu1 %v10839_v47 }
  0xc5   :  { %v904_v37 = vld [vmem:[#allocation8 + $0xd80] sm:$0xff]  ;;  %3658 = vmatprep.mubr.bf16.mxu1 %v10843_v56 }
  0xc6   :  { %v908_v38 = vld [vmem:[#allocation8 + $0xda0] sm:$0xff]  ;;  %3791 = vmatprep.subr.bf16.mxu1 %v8274_v45 }
  0xc7   :  { %v148_v39 = vld [vmem:[#allocation2 + $0x1e0] sm:$0xff]  ;;  %v165_v44 = vld [vmem:[#allocation2 + $0x268] sm:$0xff]  ;;  %v8530_v51 = vcombine.high %v904_v37, %v908_v38  ;;  %v8529_v4 = vcombine.low %v904_v37, %v908_v38  ;;  %3792 = vmatpush1.bf16.msra.mxu1 %v8273_v0 }
  0xc8   :  { %v656_v48 = vld [vmem:[#allocation8 + $0x5c0] sm:$0xff]  ;;  %v10841_v55 = vpack.c.bf16 %v148_v39, %v140_v36  ;;  %v10849_v62 = vpack.c.bf16 %v165_v44, %v157_v43 }
  0xc9   :  { %v660_v50 = vld [vmem:[#allocation8 + $0x5e0] sm:$0xff]  ;;  %4177 = vmatprep.subr.bf16.mxu0 %v8530_v51 }
  0xca   :  { %v912_v52 = vld [vmem:[#allocation8 + $0xdc0] sm:$0xff]  ;;  %13398 = vst [vmem:[#allocation30_spill] sm:$0xff] %v10841_v55  ;;  %13400 = vst [vmem:[#allocation32_spill] sm:$0xff] %v10849_v62  ;;  %v8282_v3 = vcombine.high %v656_v48, %v660_v50  ;;  %4035 = vmatmul.mubr.bf16.gmra.mrb[12].mxu0 %v10841_v55  ;;  %v8281_v16 = vcombine.low %v656_v48, %v660_v50  ;;  %v493_v55 = vld [vmem:[#allocation8 + $0xa8] sm:$0xff] }
  0xcb   :  { %v916_v59 = vld [vmem:[#allocation8 + $0xde0] sm:$0xff]  ;;  %4044 = vmatprep.mubr.bf16.mxu0 %v10849_v62  ;;  %4178 = vmatpush1.bf16.msra.mxu0 %v8529_v4  ;;  %v489_v62 = vld [vmem:[#allocation8 + $0x88] sm:$0xff] }
  0xcc   :  { %v152_v2 = vld [vmem:[#allocation2 + $0x200] sm:$0xff]  ;;  %v8538_v8 = vcombine.high %v912_v52, %v916_v59  ;;  %v169_v13 = vld [vmem:[#allocation2 + $0x288] sm:$0xff]  ;;  %3793 = vmatprep.subr.bf16.mxu1 %v8282_v3  ;;  %v8537_v23 = vcombine.low %v912_v52, %v916_v59  ;;  %v8116_v26 = vcombine.high %v489_v62, %v493_v55 }
  0xcd   :  { %v160_v5 = vld [vmem:[#allocation2 + $0x240] sm:$0xff]  ;;  %v177_v14 = vld [vmem:[#allocation2 + $0x2c8] sm:$0xff]  ;;  %3794 = vmatpush1.bf16.msra.mxu1 %v8281_v16 }
  0xce   :  { %v664_v6 = vld [vmem:[#allocation8 + $0x600] sm:$0xff]  ;;  %v10857_v25 = vpack.c.bf16 %v160_v5, %v152_v2  ;;  %4179 = vmatprep.subr.bf16.mxu0 %v8538_v8  ;;  %v10861_v33 = vpack.c.bf16 %v177_v14, %v169_v13 }
  0xcf   :  { %v668_v7 = vld [vmem:[#allocation8 + $0x620] sm:$0xff]  ;;  %4180 = vmatpush1.bf16.msra.mxu0 %v8537_v23 }
  0xd0   :  { %v156_v9 = vld [vmem:[#allocation2 + $0x220] sm:$0xff]  ;;  %v173_v17 = vld [vmem:[#allocation2 + $0x2a8] sm:$0xff]  ;;  %v8290_v21 = vcombine.high %v664_v6, %v668_v7  ;;  %13401 = vst [vmem:[#allocation33_spill] sm:$0xff] %v10857_v25  ;;  %13403 = vst [vmem:[#allocation35_spill] sm:$0xff] %v10861_v33  ;;  %v8289_v37 = vcombine.low %v664_v6, %v668_v7  ;;  %3659 = vmatmul.mubr.bf16.gmra.mrb[16].mxu1 %v10857_v25 }
  0xd1   :  { %v920_v10 = vld [vmem:[#allocation8 + $0xe00] sm:$0xff]  ;;  %3668 = vmatprep.mubr.bf16.mxu1 %v10861_v33 }
  0xd2   :  { %v924_v11 = vld [vmem:[#allocation8 + $0xe20] sm:$0xff]  ;;  %3795 = vmatprep.subr.bf16.mxu1 %v8290_v21 }
  0xd3   :  { %v164_v12 = vld [vmem:[#allocation2 + $0x260] sm:$0xff]  ;;  %v181_v18 = vld [vmem:[#allocation2 + $0x2e8] sm:$0xff]  ;;  %v8546_v31 = vcombine.high %v920_v10, %v924_v11  ;;  %v8545_v40 = vcombine.low %v920_v10, %v924_v11  ;;  %3796 = vmatpush1.bf16.msra.mxu1 %v8289_v37 }
  0xd4   :  { %v672_v27 = vld [vmem:[#allocation8 + $0x640] sm:$0xff]  ;;  %v10859_v32 = vpack.c.bf16 %v164_v12, %v156_v9  ;;  %v10863_v36 = vpack.c.bf16 %v181_v18, %v173_v17 }
  0xd5   :  { %v676_v28 = vld [vmem:[#allocation8 + $0x660] sm:$0xff]  ;;  %4181 = vmatprep.subr.bf16.mxu0 %v8546_v31 }
  0xd6   :  { %13402 = vst [vmem:[#allocation34_spill] sm:$0xff] %v10859_v32  ;;  %v928_v34 = vld [vmem:[#allocation8 + $0xe40] sm:$0xff]  ;;  %13404 = vst [vmem:[#allocation36_spill] sm:$0xff] %v10863_v36  ;;  %v8298_v39 = vcombine.high %v672_v27, %v676_v28  ;;  %4045 = vmatmul.mubr.bf16.gmra.mrb[16].mxu0 %v10859_v32  ;;  %v8297_v59 = vcombine.low %v672_v27, %v676_v28  ;;  %v106_v32 = vld [vmem:[#allocation2 + $0x90] sm:$0xff] }
  0xd7   :  { %v932_v35 = vld [vmem:[#allocation8 + $0xe60] sm:$0xff]  ;;  %4054 = vmatprep.mubr.bf16.mxu0 %v10863_v36  ;;  %4182 = vmatpush1.bf16.msra.mxu0 %v8545_v40 }
  0xd8   :  { %v168_v38 = vld [vmem:[#allocation2 + $0x280] sm:$0xff]  ;;  %v8554_v44 = vcombine.high %v928_v34, %v932_v35  ;;  %v185_v51 = vld [vmem:[#allocation2 + $0x308] sm:$0xff]  ;;  %3797 = vmatprep.subr.bf16.mxu1 %v8298_v39  ;;  %v8553_v4 = vcombine.low %v928_v34, %v932_v35 }
  0xd9   :  { %v176_v41 = vld [vmem:[#allocation2 + $0x2c0] sm:$0xff]  ;;  %v193_v52 = vld [vmem:[#allocation2 + $0x348] sm:$0xff]  ;;  %3798 = vmatpush1.bf16.msra.mxu1 %v8297_v59 }
  0xda   :  { %v680_v42 = vld [vmem:[#allocation8 + $0x680] sm:$0xff]  ;;  %v10869_v5 = vpack.c.bf16 %v176_v41, %v168_v38  ;;  %4183 = vmatprep.subr.bf16.mxu0 %v8554_v44  ;;  %v10873_v10 = vpack.c.bf16 %v193_v52, %v185_v51 }
  0xdb   :  { %v684_v43 = vld [vmem:[#allocation8 + $0x6a0] sm:$0xff]  ;;  %4184 = vmatpush1.bf16.msra.mxu0 %v8553_v4 }
  0xdc   :  { %v172_v45 = vld [vmem:[#allocation2 + $0x2a0] sm:$0xff]  ;;  %v189_v0 = vld [vmem:[#allocation2 + $0x328] sm:$0xff]  ;;  %v8306_v3 = vcombine.high %v680_v42, %v684_v43  ;;  %13405 = vst [vmem:[#allocation37_spill] sm:$0xff] %v10869_v5  ;;  %13407 = vst [vmem:[#allocation39_spill] sm:$0xff] %v10873_v10  ;;  %v8305_v14 = vcombine.low %v680_v42, %v684_v43  ;;  %3669 = vmatmul.mubr.bf16.gmra.mrb[20].mxu1 %v10869_v5 }
  0xdd   :  { %v936_v46 = vld [vmem:[#allocation8 + $0xe80] sm:$0xff]  ;;  %3678 = vmatprep.mubr.bf16.mxu1 %v10873_v10 }
  0xde   :  { %v940_v48 = vld [vmem:[#allocation8 + $0xea0] sm:$0xff]  ;;  %3799 = vmatprep.subr.bf16.mxu1 %v8306_v3 }
  0xdf   :  { %v180_v50 = vld [vmem:[#allocation2 + $0x2e0] sm:$0xff]  ;;  %v197_v2 = vld [vmem:[#allocation2 + $0x368] sm:$0xff]  ;;  %v8562_v8 = vcombine.high %v936_v46, %v940_v48  ;;  %v8561_v18 = vcombine.low %v936_v46, %v940_v48  ;;  %3800 = vmatpush1.bf16.msra.mxu1 %v8305_v14 }
  0xe0   :  { %v688_v6 = vld [vmem:[#allocation8 + $0x6c0] sm:$0xff]  ;;  %v10871_v9 = vpack.c.bf16 %v180_v50, %v172_v45  ;;  %v10875_v13 = vpack.c.bf16 %v197_v2, %v189_v0 }
  0xe1   :  { %v692_v7 = vld [vmem:[#allocation8 + $0x6e0] sm:$0xff]  ;;  %4185 = vmatprep.subr.bf16.mxu0 %v8562_v8 }
  0xe2   :  { %13406 = vst [vmem:[#allocation38_spill] sm:$0xff] %v10871_v9  ;;  %v944_v11 = vld [vmem:[#allocation8 + $0xec0] sm:$0xff]  ;;  %13408 = vst [vmem:[#allocation40_spill] sm:$0xff] %v10875_v13  ;;  %v8314_v17 = vcombine.high %v688_v6, %v692_v7  ;;  %4055 = vmatmul.mubr.bf16.gmra.mrb[20].mxu0 %v10871_v9  ;;  %v8313_v40 = vcombine.low %v688_v6, %v692_v7 }
  0xe3   :  { %v948_v12 = vld [vmem:[#allocation8 + $0xee0] sm:$0xff]  ;;  %4064 = vmatprep.mubr.bf16.mxu0 %v10875_v13  ;;  %4186 = vmatpush1.bf16.msra.mxu0 %v8561_v18  ;;  %v482_v13 = vld [vmem:[#allocation8 + $0x50] sm:$0xff] }
  0xe4   :  { %v184_v16 = vld [vmem:[#allocation2 + $0x300] sm:$0xff]  ;;  %v8570_v28 = vcombine.high %v944_v11, %v948_v12  ;;  %v201_v38 = vld [vmem:[#allocation2 + $0x388] sm:$0xff]  ;;  %3801 = vmatprep.subr.bf16.mxu1 %v8314_v17  ;;  %v8569_v44 = vcombine.low %v944_v11, %v948_v12 }
  0xe5   :  { %v192_v21 = vld [vmem:[#allocation2 + $0x340] sm:$0xff]  ;;  %v209_v39 = vld [vmem:[#allocation2 + $0x3c8] sm:$0xff]  ;;  %3802 = vmatpush1.bf16.msra.mxu1 %v8313_v40 }
  0xe6   :  { %v696_v23 = vld [vmem:[#allocation8 + $0x700] sm:$0xff]  ;;  %v10881_v45 = vpack.c.bf16 %v192_v21, %v184_v16  ;;  %4187 = vmatprep.subr.bf16.mxu0 %v8570_v28  ;;  %v10885_v52 = vpack.c.bf16 %v209_v39, %v201_v38 }
  0xe7   :  { %v700_v27 = vld [vmem:[#allocation8 + $0x720] sm:$0xff]  ;;  %4188 = vmatpush1.bf16.msra.mxu0 %v8569_v44 }
  0xe8   :  { %v188_v31 = vld [vmem:[#allocation2 + $0x320] sm:$0xff]  ;;  %v205_v41 = vld [vmem:[#allocation2 + $0x3a8] sm:$0xff]  ;;  %v8322_v43 = vcombine.high %v696_v23, %v700_v27  ;;  %13409 = vst [vmem:[#allocation41_spill] sm:$0xff] %v10881_v45  ;;  %13411 = vst [vmem:[#allocation43_spill] sm:$0xff] %v10885_v52  ;;  %v8321_v3 = vcombine.low %v696_v23, %v700_v27  ;;  %3679 = vmatmul.mubr.bf16.gmra.mrb[24].mxu1 %v10881_v45 }
  0xe9   :  { %v952_v34 = vld [vmem:[#allocation8 + $0xf00] sm:$0xff]  ;;  %3688 = vmatprep.mubr.bf16.mxu1 %v10885_v52 }
  0xea   :  { %v956_v35 = vld [vmem:[#allocation8 + $0xf20] sm:$0xff]  ;;  %3803 = vmatprep.subr.bf16.mxu1 %v8322_v43 }
  0xeb   :  { %v196_v37 = vld [vmem:[#allocation2 + $0x360] sm:$0xff]  ;;  %v213_v42 = vld [vmem:[#allocation2 + $0x3e8] sm:$0xff]  ;;  %v8578_v50 = vcombine.high %v952_v34, %v956_v35  ;;  %v8577_v7 = vcombine.low %v952_v34, %v956_v35  ;;  %3804 = vmatpush1.bf16.msra.mxu1 %v8321_v3 }
  0xec   :  { %v704_v46 = vld [vmem:[#allocation8 + $0x740] sm:$0xff]  ;;  %v10883_v51 = vpack.c.bf16 %v196_v37, %v188_v31  ;;  %v10887_v2 = vpack.c.bf16 %v213_v42, %v205_v41 }
  0xed   :  { %v708_v48 = vld [vmem:[#allocation8 + $0x760] sm:$0xff]  ;;  %4189 = vmatprep.subr.bf16.mxu0 %v8578_v50 }
  0xee   :  { %13410 = vst [vmem:[#allocation42_spill] sm:$0xff] %v10883_v51  ;;  %v960_v59 = vld [vmem:[#allocation8 + $0xf40] sm:$0xff]  ;;  %13412 = vst [vmem:[#allocation44_spill] sm:$0xff] %v10887_v2  ;;  %v8330_v6 = vcombine.high %v704_v46, %v708_v48  ;;  %4065 = vmatmul.mubr.bf16.gmra.mrb[24].mxu0 %v10883_v51  ;;  %v8329_v28 = vcombine.low %v704_v46, %v708_v48  ;;  %v102_v51 = vld [vmem:[#allocation2 + $0x70] sm:$0xff] }
  0xef   :  { %v964_v0 = vld [vmem:[#allocation8 + $0xf60] sm:$0xff]  ;;  %4074 = vmatprep.mubr.bf16.mxu0 %v10887_v2  ;;  %4190 = vmatpush1.bf16.msra.mxu0 %v8577_v7  ;;  %v94_v2 = vld [vmem:[#allocation2 + $0x30] sm:$0xff] }
  0xf0   :  { %v200_v4 = vld [vmem:[#allocation2 + $0x380] sm:$0xff]  ;;  %v8586_v14 = vcombine.high %v960_v59, %v964_v0  ;;  %v217_v23 = vld [vmem:[#allocation2 + $0x408] sm:$0xff]  ;;  %3805 = vmatprep.subr.bf16.mxu1 %v8330_v6  ;;  %v8585_v37 = vcombine.low %v960_v59, %v964_v0 }
  0xf1   :  { %v208_v8 = vld [vmem:[#allocation2 + $0x3c0] sm:$0xff]  ;;  %v225_v27 = vld [vmem:[#allocation2 + $0x448] sm:$0xff]  ;;  %3806 = vmatpush1.bf16.msra.mxu1 %v8329_v28 }
  0xf2   :  { %v712_v11 = vld [vmem:[#allocation8 + $0x780] sm:$0xff]  ;;  %v10893_v38 = vpack.c.bf16 %v208_v8, %v200_v4  ;;  %4191 = vmatprep.subr.bf16.mxu0 %v8586_v14  ;;  %v10897_v43 = vpack.c.bf16 %v225_v27, %v217_v23 }
  0xf3   :  { %v716_v12 = vld [vmem:[#allocation8 + $0x7a0] sm:$0xff]  ;;  %4192 = vmatpush1.bf16.msra.mxu0 %v8585_v37 }
  0xf4   :  { %v204_v16 = vld [vmem:[#allocation2 + $0x3a0] sm:$0xff]  ;;  %v221_v31 = vld [vmem:[#allocation2 + $0x428] sm:$0xff]  ;;  %v8338_v35 = vcombine.high %v712_v11, %v716_v12  ;;  %13413 = vst [vmem:[#allocation45_spill] sm:$0xff] %v10893_v38  ;;  %13415 = vst [vmem:[#allocation47_spill] sm:$0xff] %v10897_v43  ;;  %v8337_v46 = vcombine.low %v712_v11, %v716_v12  ;;  %3689 = vmatmul.mubr.bf16.gmra.mrb[28].mxu1 %v10893_v38 }
  0xf5   :  { %v968_v17 = vld [vmem:[#allocation8 + $0xf80] sm:$0xff]  ;;  %3698 = vmatprep.mubr.bf16.mxu1 %v10897_v43 }
  0xf6   :  { %v972_v18 = vld [vmem:[#allocation8 + $0xfa0] sm:$0xff]  ;;  %3807 = vmatprep.subr.bf16.mxu1 %v8338_v35  ;;  %v10917_v35 = vld [vmem:[#allocation8 + $0x30] sm:$0xff] }
  0xf7   :  { %v212_v21 = vld [vmem:[#allocation2 + $0x3e0] sm:$0xff]  ;;  %v229_v34 = vld [vmem:[#allocation2 + $0x468] sm:$0xff]  ;;  %v8594_v41 = vcombine.high %v968_v17, %v972_v18  ;;  %v8593_v59 = vcombine.low %v968_v17, %v972_v18  ;;  %3808 = vmatpush1.bf16.msra.mxu1 %v8337_v46 }
  0xf8   :  { %v720_v39 = vld [vmem:[#allocation8 + $0x7c0] sm:$0xff]  ;;  %v10895_v42 = vpack.c.bf16 %v212_v21, %v204_v16  ;;  %v10899_v3 = vpack.c.bf16 %v229_v34, %v221_v31  ;;  %v8100_v21 = vcombine.high %v10845_v60, %v10847_v61  ;;  %v10915_v34 = vld [vmem:[#allocation8 + $0x10] sm:$0xff] }
  0xf9   :  { %v724_v40 = vld [vmem:[#allocation8 + $0x7e0] sm:$0xff]  ;;  %4193 = vmatprep.subr.bf16.mxu0 %v8594_v41 }
  0xfa   :  { %13414 = vst [vmem:[#allocation46_spill] sm:$0xff] %v10895_v42  ;;  %v976_v44 = vld [vmem:[#allocation8 + $0xfc0] sm:$0xff]  ;;  %13416 = vst [vmem:[#allocation48_spill] sm:$0xff] %v10899_v3  ;;  %v8346_v48 = vcombine.high %v720_v39, %v724_v40  ;;  %4075 = vmatmul.mubr.bf16.gmra.mrb[28].mxu0 %v10895_v42  ;;  %v8345_v12 = vcombine.low %v720_v39, %v724_v40  ;;  %v8102_v39 = vcombine.high %v10915_v34, %v10917_v35 }
  0xfb   :  { %v980_v50 = vld [vmem:[#allocation8 + $0xfe0] sm:$0xff]  ;;  %4084 = vmatprep.mubr.bf16.mxu0 %v10899_v3  ;;  %4194 = vmatpush1.bf16.msra.mxu0 %v8593_v59 }
  0xfc   :  { %v8602_v0 = vcombine.high %v976_v44, %v980_v50  ;;  %v216_v4 = vld [vmem:[#allocation2 + $0x400] sm:$0xff]  ;;  %v233_v14 = vld [vmem:[#allocation2 + $0x488] sm:$0xff]  ;;  %3809 = vmatprep.subr.bf16.mxu1 %v8346_v48  ;;  %v8601_v18 = vcombine.low %v976_v44, %v980_v50 }
  0xfd   :  { %v224_v6 = vld [vmem:[#allocation2 + $0x440] sm:$0xff]  ;;  %v241_v11 = vld [vmem:[#allocation2 + $0x4c8] sm:$0xff]  ;;  %3810 = vmatpush1.bf16.msra.mxu1 %v8345_v12 }
  0xfe   :  { %v220_v7 = vld [vmem:[#allocation2 + $0x420] sm:$0xff]  ;;  %v237_v16 = vld [vmem:[#allocation2 + $0x4a8] sm:$0xff]  ;;  %v10907_v23 = vpack.c.bf16 %v224_v6, %v216_v4  ;;  %4195 = vmatprep.subr.bf16.mxu0 %v8602_v0  ;;  %v10911_v28 = vpack.c.bf16 %v241_v11, %v233_v14  ;;  %4358 = vmatprep.subr.bf16.mxu1 %v8100_v21 }
  0xff   :  { %v228_v8 = vld [vmem:[#allocation2 + $0x460] sm:$0xff]  ;;  %v245_v17 = vld [vmem:[#allocation2 + $0x4e8] sm:$0xff]  ;;  %4196 = vmatpush1.bf16.msra.mxu0 %v8601_v18 }
 0x100   :  { %13417 = vst [vmem:[#allocation49_spill] sm:$0xff] %v10907_v23  ;;  %v10909_v27 = vpack.c.bf16 %v228_v8, %v220_v7  ;;  %13419 = vst [vmem:[#allocation51_spill] sm:$0xff] %v10911_v28  ;;  %v10913_v31 = vpack.c.bf16 %v245_v17, %v237_v16  ;;  %3699 = vmatmul.mubr.bf16.gmra.mrb[32].mxu1 %v10907_v23  ;;  %v232_v40 = vld [vmem:[#allocation2 + $0x480] sm:$0xff]  ;;  %v249_v46 = vld [vmem:[#allocation2 + $0x508] sm:$0xff]  ;;  %5130 = vmatprep.subr.bf16.mxu0 %v8102_v39 }
 0x101   :  { %3708 = vmatprep.mubr.bf16.mxu1 %v10911_v28  ;;  %v240_v41 = vld [vmem:[#allocation2 + $0x4c0] sm:$0xff]  ;;  %v257_v48 = vld [vmem:[#allocation2 + $0x548] sm:$0xff] }
 0x102   :  { %13418 = vst [vmem:[#allocation50_spill] sm:$0xff] %v10909_v27  ;;  %13420 = vst [vmem:[#allocation52_spill] sm:$0xff] %v10913_v31  ;;  %4085 = vmatmul.mubr.bf16.gmra.mrb[32].mxu0 %v10909_v27  ;;  %v236_v44 = vld [vmem:[#allocation2 + $0x4a0] sm:$0xff]  ;;  %v253_v59 = vld [vmem:[#allocation2 + $0x528] sm:$0xff]  ;;  %v10927_v4 = vpack.c.bf16 %v240_v41, %v232_v40  ;;  %v10931_v7 = vpack.c.bf16 %v257_v48, %v249_v46 }
 0x103   :  { %4094 = vmatprep.mubr.bf16.mxu0 %v10913_v31  ;;  %v244_v50 = vld [vmem:[#allocation2 + $0x4e0] sm:$0xff]  ;;  %v261_v0 = vld [vmem:[#allocation2 + $0x568] sm:$0xff] }
 0x104   :  { %13421 = vst [vmem:[#allocation53_spill] sm:$0xff] %v10927_v4  ;;  %v10929_v6 = vpack.c.bf16 %v244_v50, %v236_v44  ;;  %13423 = vst [vmem:[#allocation55_spill] sm:$0xff] %v10931_v7  ;;  %v10933_v8 = vpack.c.bf16 %v261_v0, %v253_v59  ;;  %v248_v14 = vld [vmem:[#allocation2 + $0x500] sm:$0xff]  ;;  %v265_v17 = vld [vmem:[#allocation2 + $0x588] sm:$0xff] }
 0x105   :  { %v256_v11 = vld [vmem:[#allocation2 + $0x540] sm:$0xff]  ;;  %v273_v18 = vld [vmem:[#allocation2 + $0x5c8] sm:$0xff] }
 0x106   :  { %13422 = vst [vmem:[#allocation54_spill] sm:$0xff] %v10929_v6  ;;  %13424 = vst [vmem:[#allocation56_spill] sm:$0xff] %v10933_v8  ;;  %v252_v12 = vld [vmem:[#allocation2 + $0x520] sm:$0xff]  ;;  %v269_v21 = vld [vmem:[#allocation2 + $0x5a8] sm:$0xff]  ;;  %v10939_v40 = vpack.c.bf16 %v256_v11, %v248_v14  ;;  %v10943_v44 = vpack.c.bf16 %v273_v18, %v265_v17 }
 0x107   :  { %v260_v16 = vld [vmem:[#allocation2 + $0x560] sm:$0xff]  ;;  %v277_v39 = vld [vmem:[#allocation2 + $0x5e8] sm:$0xff] }
 0x108   :  { %3709 = vmatmul.mubr.bf16.gmra.mrb[36].mxu1 %v10927_v4  ;;  %13425 = vst [vmem:[#allocation57_spill] sm:$0xff] %v10939_v40  ;;  %v10941_v41 = vpack.c.bf16 %v260_v16, %v252_v12  ;;  %13427 = vst [vmem:[#allocation59_spill] sm:$0xff] %v10943_v44  ;;  %v10945_v50 = vpack.c.bf16 %v277_v39, %v269_v21  ;;  %v264_v46 = vld [vmem:[#allocation2 + $0x580] sm:$0xff]  ;;  %v281_v14 = vld [vmem:[#allocation2 + $0x608] sm:$0xff] }
 0x109   :  { %3718 = vmatprep.mubr.bf16.mxu1 %v10931_v7  ;;  %v272_v48 = vld [vmem:[#allocation2 + $0x5c0] sm:$0xff]  ;;  %v289_v11 = vld [vmem:[#allocation2 + $0x648] sm:$0xff] }
 0x10a   :  { %4095 = vmatmul.mubr.bf16.gmra.mrb[36].mxu0 %v10929_v6  ;;  %13426 = vst [vmem:[#allocation58_spill] sm:$0xff] %v10941_v41  ;;  %13428 = vst [vmem:[#allocation60_spill] sm:$0xff] %v10945_v50  ;;  %v268_v59 = vld [vmem:[#allocation2 + $0x5a0] sm:$0xff]  ;;  %v285_v12 = vld [vmem:[#allocation2 + $0x628] sm:$0xff]  ;;  %v10951_v17 = vpack.c.bf16 %v272_v48, %v264_v46  ;;  %v10955_v21 = vpack.c.bf16 %v289_v11, %v281_v14 }
 0x10b   :  { %4104 = vmatprep.mubr.bf16.mxu0 %v10933_v8  ;;  %v276_v0 = vld [vmem:[#allocation2 + $0x5e0] sm:$0xff]  ;;  %v293_v16 = vld [vmem:[#allocation2 + $0x668] sm:$0xff] }
 0x10c   :  { %13429 = vst [vmem:[#allocation61_spill] sm:$0xff] %v10951_v17  ;;  %v10953_v18 = vpack.c.bf16 %v276_v0, %v268_v59  ;;  %13431 = vst [vmem:[#allocation63_spill] sm:$0xff] %v10955_v21  ;;  %v10957_v39 = vpack.c.bf16 %v293_v16, %v285_v12  ;;  %v280_v37 = vld [vmem:[#allocation2 + $0x600] sm:$0xff]  ;;  %v297_v46 = vld [vmem:[#allocation2 + $0x688] sm:$0xff] }
 0x10d   :  { %v288_v1 = vld [vmem:[#allocation2 + $0x640] sm:$0xff]  ;;  %v305_v48 = vld [vmem:[#allocation2 + $0x6c8] sm:$0xff] }
 0x10e   :  { %13430 = vst [vmem:[#allocation62_spill] sm:$0xff] %v10953_v18  ;;  %13432 = vst [vmem:[#allocation64_spill] sm:$0xff] %v10957_v39  ;;  %v301_v59 = vld [vmem:[#allocation2 + $0x6a8] sm:$0xff]  ;;  %v10963_v14 = vpack.c.bf16 %v288_v1, %v280_v37  ;;  %v10967_v12 = vpack.c.bf16 %v305_v48, %v297_v46  ;;  %v300_v8 = vld [vmem:[#allocation2 + $0x6a0] sm:$0xff] }
 0x10f   :  { %v309_v0 = vld [vmem:[#allocation2 + $0x6e8] sm:$0xff]  ;;  %v308_v6 = vld [vmem:[#allocation2 + $0x6e0] sm:$0xff] }
 0x110   :  { %3719 = vmatmul.mubr.bf16.gmra.mrb[40].mxu1 %v10939_v40  ;;  %13433 = vst [vmem:[#allocation65_spill] sm:$0xff] %v10963_v14  ;;  %13435 = vst [vmem:[#allocation67_spill] sm:$0xff] %v10967_v12  ;;  %v10969_v16 = vpack.c.bf16 %v309_v0, %v301_v59  ;;  %v313_v1 = vld [vmem:[#allocation2 + $0x708] sm:$0xff]  ;;  %v10977_v48 = vpack.c.bf16 %v308_v6, %v300_v8  ;;  %v316_v31 = vld [vmem:[#allocation2 + $0x720] sm:$0xff] }
 0x111   :  { %3728 = vmatprep.mubr.bf16.mxu1 %v10943_v44  ;;  %v321_v37 = vld [vmem:[#allocation2 + $0x748] sm:$0xff]  ;;  %v324_v27 = vld [vmem:[#allocation2 + $0x760] sm:$0xff] }
 0x112   :  { %4105 = vmatmul.mubr.bf16.gmra.mrb[40].mxu0 %v10941_v41  ;;  %v292_v41 = vld [vmem:[#allocation2 + $0x660] sm:$0xff]  ;;  %13436 = vst [vmem:[#allocation68_spill] sm:$0xff] %v10969_v16  ;;  %13438 = vst [vmem:[#allocation70_spill] sm:$0xff] %v10977_v48  ;;  %v10979_v59 = vpack.c.bf16 %v321_v37, %v313_v1  ;;  %v333_v6 = vld [vmem:[#allocation2 + $0x7a8] sm:$0xff]  ;;  %v10989_v37 = vpack.c.bf16 %v324_v27, %v316_v31 }
 0x113   :  { %4114 = vmatprep.mubr.bf16.mxu0 %v10945_v50  ;;  %v284_v50 = vld [vmem:[#allocation2 + $0x620] sm:$0xff]  ;;  %v341_v8 = vld [vmem:[#allocation2 + $0x7e8] sm:$0xff]  ;;  %v95_v27 = vld [vmem:[#allocation2 + $0x38] sm:$0xff] }
 0x114   :  { %v10965_v11 = vpack.c.bf16 %v292_v41, %v284_v50  ;;  %v317_v41 = vld [vmem:[#allocation2 + $0x728] sm:$0xff]  ;;  %13439 = vst [vmem:[#allocation71_spill] sm:$0xff] %v10979_v59  ;;  %13442 = vst [vmem:[#allocation74_spill] sm:$0xff] %v10989_v37  ;;  %v332_v3 = vld [vmem:[#allocation2 + $0x7a0] sm:$0xff] }
 0x115   :  { %v325_v50 = vld [vmem:[#allocation2 + $0x768] sm:$0xff]  ;;  %v340_v42 = vld [vmem:[#allocation2 + $0x7e0] sm:$0xff]  ;;  %v103_v31 = vld [vmem:[#allocation2 + $0x78] sm:$0xff] }
 0x116   :  { %13434 = vst [vmem:[#allocation66_spill] sm:$0xff] %v10965_v11  ;;  %v10981_v0 = vpack.c.bf16 %v325_v50, %v317_v41  ;;  %v10993_v50 = vpack.c.bf16 %v341_v8, %v333_v6  ;;  %v11005_v8 = vpack.c.bf16 %v103_v31, %v95_v27  ;;  %v485_v27 = vld [vmem:[#allocation8 + $0x68] sm:$0xff]  ;;  %v11013_v31 = vpack.c.bf16 %v102_v51, %v94_v2 }
 0x117   :  { %v13453_v51 = vcombine.low %v10845_v60, %v10847_v61  ;;  %v110_v2 = vld [vmem:[#allocation2 + $0xb0] sm:$0xff]  ;;  %v13454_v60 = vcombine.low %v10915_v34, %v10917_v35 }
 0x118   :  { %3729 = vmatmul.mubr.bf16.gmra.mrb[44].mxu1 %v10951_v17  ;;  %13440 = vst [vmem:[#allocation72_spill] sm:$0xff] %v10981_v0  ;;  %13444 = vst [vmem:[#allocation76_spill] sm:$0xff] %v10993_v50  ;;  %v122_v34 = vld [vmem:[#allocation2 + $0x110] sm:$0xff] }
 0x119   :  { %3738 = vmatprep.mubr.bf16.mxu1 %v10955_v21  ;;  %13448 = vst [vmem:[#allocation80_spill] sm:$0xff] %v11005_v8  ;;  %13450 = vst [vmem:[#allocation82_spill] sm:$0xff] %v11013_v31 }
 0x11a   :  { %4115 = vmatmul.mubr.bf16.gmra.mrb[44].mxu0 %v10953_v18  ;;  %v304_v18 = vld [vmem:[#allocation2 + $0x6c0] sm:$0xff] }
 0x11b   :  { %4124 = vmatprep.mubr.bf16.mxu0 %v10957_v39  ;;  %v296_v39 = vld [vmem:[#allocation2 + $0x680] sm:$0xff] }
 0x11c   :  { %v10975_v46 = vpack.c.bf16 %v304_v18, %v296_v39  ;;  %v329_v18 = vld [vmem:[#allocation2 + $0x788] sm:$0xff] }
 0x11d   :  { %v337_v39 = vld [vmem:[#allocation2 + $0x7c8] sm:$0xff] }
 0x11e   :  { %13437 = vst [vmem:[#allocation69_spill] sm:$0xff] %v10975_v46  ;;  %v10991_v41 = vpack.c.bf16 %v337_v39, %v329_v18  ;;  %v11001_v39 = vpack.c.bf16 %v340_v42, %v332_v3  ;;  %v111_v42 = vld [vmem:[#allocation2 + $0xb8] sm:$0xff] }
 0x11f   :  { %v119_v3 = vld [vmem:[#allocation2 + $0xf8] sm:$0xff] }
 0x120   :  { %3739 = vmatmul.mubr.bf16.gmra.mrb[48].mxu1 %v10963_v14  ;;  %13443 = vst [vmem:[#allocation75_spill] sm:$0xff] %v10991_v41  ;;  %13446 = vst [vmem:[#allocation78_spill] sm:$0xff] %v11001_v39  ;;  %v11017_v36 = vpack.c.bf16 %v119_v3, %v111_v42  ;;  %v494_v42 = vld [vmem:[#allocation8 + $0xb0] sm:$0xff] }
 0x121   :  { %3748 = vmatprep.mubr.bf16.mxu1 %v10967_v12 }
 0x122   :  { %4125 = vmatmul.mubr.bf16.gmra.mrb[48].mxu0 %v10965_v11  ;;  %v320_v11 = vld [vmem:[#allocation2 + $0x740] sm:$0xff]  ;;  %13452 = vst [vmem:[#allocation84_spill] sm:$0xff] %v11017_v36 }
 0x123   :  { %4134 = vmatprep.mubr.bf16.mxu0 %v10969_v16  ;;  %v312_v16 = vld [vmem:[#allocation2 + $0x700] sm:$0xff] }
 0x124   :  { %v10987_v1 = vpack.c.bf16 %v320_v11, %v312_v16  ;;  %v91_v11 = vld [vmem:[#allocation2 + $0x18] sm:$0xff] }
 0x125   :  { %v99_v16 = vld [vmem:[#allocation2 + $0x58] sm:$0xff] }
 0x126   :  { %13441 = vst [vmem:[#allocation73_spill] sm:$0xff] %v10987_v1  ;;  %v11003_v6 = vpack.c.bf16 %v99_v16, %v91_v11  ;;  %v481_v16 = vld [vmem:[#allocation8 + $0x48] sm:$0xff] }
 0x128   :  { %3749 = vmatmul.mubr.bf16.gmra.mrb[52].mxu1 %v10975_v46  ;;  %13447 = vst [vmem:[#allocation79_spill] sm:$0xff] %v11003_v6 }
 0x129   :  { %3758 = vmatprep.mubr.bf16.mxu1 %v10979_v59 }
 0x12a   :  { %4135 = vmatmul.mubr.bf16.gmra.mrb[52].mxu0 %v10977_v48  ;;  %v336_v48 = vld [vmem:[#allocation2 + $0x7c0] sm:$0xff] }
 0x12b   :  { %4144 = vmatprep.mubr.bf16.mxu0 %v10981_v0  ;;  %v328_v0 = vld [vmem:[#allocation2 + $0x780] sm:$0xff] }
 0x12c   :  { %v10999_v18 = vpack.c.bf16 %v336_v48, %v328_v0  ;;  %v107_v48 = vld [vmem:[#allocation2 + $0x98] sm:$0xff] }
 0x12d   :  { %v115_v0 = vld [vmem:[#allocation2 + $0xd8] sm:$0xff] }
 0x12e   :  { %13445 = vst [vmem:[#allocation77_spill] sm:$0xff] %v10999_v18  ;;  %v11015_v9 = vpack.c.bf16 %v115_v0, %v107_v48  ;;  %v8107_v48 = vcombine.low %v481_v16, %v485_v27  ;;  %v490_v0 = vld [vmem:[#allocation8 + $0x90] sm:$0xff] }
 0x12f   :  { %v8118_v3 = vcombine.high %v490_v0, %v494_v42 }
 0x130   :  { %3759 = vmatmul.mubr.bf16.gmra.mrb[56].mxu1 %v10987_v1  ;;  %13451 = vst [vmem:[#allocation83_spill] sm:$0xff] %v11015_v9 }
 0x131   :  { %3768 = vmatprep.mubr.bf16.mxu1 %v10991_v41 }
 0x132   :  { %4145 = vmatmul.mubr.bf16.gmra.mrb[56].mxu0 %v10989_v37  ;;  %v98_v37 = vld [vmem:[#allocation2 + $0x50] sm:$0xff] }
 0x133   :  { %4154 = vmatprep.mubr.bf16.mxu0 %v10993_v50  ;;  %v90_v50 = vld [vmem:[#allocation2 + $0x10] sm:$0xff] }
 0x134   :  { %v11011_v11 = vpack.c.bf16 %v98_v37, %v90_v50  ;;  %v11020_v37 = vld [vmem:[#allocation8 + $0x408] sm:$0xff] }
 0x135   :  { %v11022_v50 = vld [vmem:[#allocation8 + $0x428] sm:$0xff] }
 0x136   :  { %13449 = vst [vmem:[#allocation81_spill] sm:$0xff] %v11011_v11 }
 0x138   :  { %3769 = vmatmul.mubr.bf16.gmra.mrb[60].mxu1 %v10999_v18  ;;  %v8115_v18 = vcombine.low %v489_v62, %v493_v55  ;;  %v139_v55 = vld [vmem:[#allocation2 + $0x198] sm:$0xff] }
 0x139   :  { %3811 = vmatprep.mubr.bf16.mxu1 %v11003_v6  ;;  %v147_v62 = vld [vmem:[#allocation2 + $0x1d8] sm:$0xff] }
 0x13a   :  { %4155 = vmatmul.mubr.bf16.gmra.mrb[60].mxu0 %v11001_v39  ;;  %v486_v39 = vld [vmem:[#allocation8 + $0x70] sm:$0xff] }
 0x13b   :  { %4197 = vmatprep.mubr.bf16.mxu0 %v11005_v8  ;;  %v8108_v8 = vcombine.high %v481_v16, %v485_v27  ;;  %v8110_v19 = vcombine.high %v482_v13, %v486_v39  ;;  %v8109_v61 = vcombine.low %v482_v13, %v486_v39  ;;  %v11035_v16 = vpack.c.bf16 %v114_v24, %v106_v32  ;;  %v497_v27 = vld [vmem:[#allocation8 + $0xc8] sm:$0xff] }
 0x13c   :  { %v8117_v24 = vcombine.low %v490_v0, %v494_v42  ;;  %v130_v32 = vld [vmem:[#allocation2 + $0x150] sm:$0xff] }
 0x13d   :  { %13455 = vst [vmem:[#allocation85_spill] sm:$0xff] %v11035_v16  ;;  %v509_v13 = vld [vmem:[#allocation8 + $0x128] sm:$0xff]  ;;  %v11047_v42 = vpack.c.bf16 %v130_v32, %v122_v34 }
 0x13e   :  { %v521_v34 = vld [vmem:[#allocation8 + $0x188] sm:$0xff] }
 0x13f   :  { %13459 = vst [vmem:[#allocation89_spill] sm:$0xff] %v11047_v42 }
 0x140   :  { %3812 = vmatmul.mubr.bf16.vlgmr.msra.gmra.mrb[0].mxu1 %v11011_v11  ;;  %v498_v11 = vld [vmem:[#allocation8 + $0xd0] sm:$0xff] }
 0x141   :  { %4359 = vmatpush1.bf16.msra.mxu1 %v13453_v51  ;;  %3821 = vmatprep.mubr.bf16.mxu1 %v11015_v9  ;;  %v501_v51 = vld [vmem:[#allocation8 + $0xe8] sm:$0xff]  ;;  %v11037_v9 = vpack.c.bf16 %v118_v57, %v110_v2  ;;  %v151_v2 = vld [vmem:[#allocation2 + $0x1f8] sm:$0xff] }
 0x142   :  { %4198 = vmatmul.mubr.bf16.vlgmr.msra.gmra.mrb[0].mxu0 %v11013_v31  ;;  %4360 = vmatprep.subr.bf16.mxu1 %v8108_v8  ;;  %v127_v31 = vld [vmem:[#allocation2 + $0x138] sm:$0xff]  ;;  %v8124_v35 = vcombine.high %v497_v27, %v501_v51  ;;  %v8123_v39 = vcombine.low %v497_v27, %v501_v51  ;;  %v138_v51 = vld [vmem:[#allocation2 + $0x190] sm:$0xff] }
 0x143   :  { %4207 = vmatprep.mubr.bf16.mxu0 %v11017_v36  ;;  %5131 = vmatpush1.bf16.msra.mxu0 %v13454_v60  ;;  %13456 = vst [vmem:[#allocation86_spill] sm:$0xff] %v11037_v9  ;;  %v11039_v36 = vpack.c.bf16 %v131_v30, %v123_v53  ;;  %v502_v8 = vld [vmem:[#allocation8 + $0xf0] sm:$0xff]  ;;  %v11041_v6 = vpack.c.bf16 %v135_v63, %v127_v31  ;;  %v517_v60 = vld [vmem:[#allocation8 + $0x168] sm:$0xff] }
 0x144   :  { %5132 = vmatprep.subr.bf16.mxu0 %v8110_v19  ;;  %v505_v19 = vld [vmem:[#allocation8 + $0x108] sm:$0xff]  ;;  %v8126_v57 = vcombine.high %v498_v11, %v502_v8  ;;  %v506_v63 = vld [vmem:[#allocation8 + $0x110] sm:$0xff]  ;;  %v8125_v0 = vcombine.low %v498_v11, %v502_v8 }
 0x145   :  { %4361 = vmatpush1.bf16.msra.mxu1 %v8107_v48  ;;  %13457 = vst [vmem:[#allocation87_spill] sm:$0xff] %v11039_v36  ;;  %13458 = vst [vmem:[#allocation88_spill] sm:$0xff] %v11041_v6  ;;  %v126_v30 = vld [vmem:[#allocation2 + $0x130] sm:$0xff]  ;;  %v143_v31 = vld [vmem:[#allocation2 + $0x1b8] sm:$0xff]  ;;  %v8132_v48 = vcombine.high %v505_v19, %v509_v13  ;;  %v8131_v27 = vcombine.low %v505_v19, %v509_v13 }
 0x146   :  { %4362 = vmatprep.subr.bf16.mxu1 %v8116_v26  ;;  %v510_v53 = vld [vmem:[#allocation8 + $0x130] sm:$0xff] }
 0x147   :  { %5133 = vmatpush1.bf16.msra.mxu0 %v8109_v61  ;;  %v134_v26 = vld [vmem:[#allocation2 + $0x170] sm:$0xff]  ;;  %v8134_v61 = vcombine.high %v506_v63, %v510_v53  ;;  %v8133_v11 = vcombine.low %v506_v63, %v510_v53  ;;  %v155_v13 = vld [vmem:[#allocation2 + $0x218] sm:$0xff] }
 0x148   :  { %3822 = vmatmul.mubr.bf16.gmra.mrb[4].mxu1 %v11035_v16  ;;  %5134 = vmatprep.subr.bf16.mxu0 %v8118_v3  ;;  %v513_v3 = vld [vmem:[#allocation8 + $0x148] sm:$0xff]  ;;  %v11053_v16 = vpack.c.bf16 %v151_v2, %v143_v31  ;;  %v159_v53 = vld [vmem:[#allocation2 + $0x238] sm:$0xff] }
 0x149   :  { %3831 = vmatprep.mubr.bf16.mxu1 %v11039_v36  ;;  %4363 = vmatpush1.bf16.msra.mxu1 %v8115_v18  ;;  %v514_v18 = vld [vmem:[#allocation8 + $0x150] sm:$0xff]  ;;  %v8139_v63 = vcombine.low %v513_v3, %v517_v60 }
 0x14a   :  { %4208 = vmatmul.mubr.bf16.gmra.mrb[4].mxu0 %v11037_v9  ;;  %4364 = vmatprep.subr.bf16.mxu1 %v8124_v35  ;;  %v11049_v9 = vpack.c.bf16 %v134_v26, %v126_v30  ;;  %v518_v36 = vld [vmem:[#allocation8 + $0x170] sm:$0xff]  ;;  %13462 = vst [vmem:[#allocation92_spill] sm:$0xff] %v11053_v16  ;;  %v8140_v35 = vcombine.high %v513_v3, %v517_v60 }
 0x14b   :  { %4217 = vmatprep.mubr.bf16.mxu0 %v11041_v6  ;;  %5135 = vmatpush1.bf16.msra.mxu0 %v8117_v24  ;;  %v11051_v6 = vpack.c.bf16 %v147_v62, %v139_v55  ;;  %v146_v8 = vld [vmem:[#allocation2 + $0x1d0] sm:$0xff]  ;;  %v8142_v32 = vcombine.high %v514_v18, %v518_v36  ;;  %v163_v55 = vld [vmem:[#allocation2 + $0x258] sm:$0xff]  ;;  %v8141_v31 = vcombine.low %v514_v18, %v518_v36 }
 0x14c   :  { %5136 = vmatprep.subr.bf16.mxu0 %v8126_v57  ;;  %13460 = vst [vmem:[#allocation90_spill] sm:$0xff] %v11049_v9  ;;  %v525_v24 = vld [vmem:[#allocation8 + $0x1a8] sm:$0xff]  ;;  %v522_v30 = vld [vmem:[#allocation8 + $0x190] sm:$0xff]  ;;  %v11059_v2 = vpack.c.bf16 %v146_v8, %v138_v51 }
 0x14d   :  { %13461 = vst [vmem:[#allocation91_spill] sm:$0xff] %v11051_v6  ;;  %4365 = vmatpush1.bf16.msra.mxu1 %v8123_v39  ;;  %v142_v57 = vld [vmem:[#allocation2 + $0x1b0] sm:$0xff]  ;;  %v167_v62 = vld [vmem:[#allocation2 + $0x278] sm:$0xff]  ;;  %v8148_v39 = vcombine.high %v521_v34, %v525_v24  ;;  %v8147_v3 = vcombine.low %v521_v34, %v525_v24 }
 0x14e   :  { %4366 = vmatprep.subr.bf16.mxu1 %v8132_v48  ;;  %v526_v26 = vld [vmem:[#allocation8 + $0x1b0] sm:$0xff]  ;;  %13463 = vst [vmem:[#allocation93_spill] sm:$0xff] %v11059_v2  ;;  %v529_v48 = vld [vmem:[#allocation8 + $0x1c8] sm:$0xff] }
 0x14f   :  { %5137 = vmatpush1.bf16.msra.mxu0 %v8125_v0  ;;  %v150_v19 = vld [vmem:[#allocation2 + $0x1f0] sm:$0xff]  ;;  %v8149_v36 = vcombine.low %v522_v30, %v526_v26  ;;  %v171_v24 = vld [vmem:[#allocation2 + $0x298] sm:$0xff] }
 0x150   :  { %3832 = vmatmul.mubr.bf16.gmra.mrb[8].mxu1 %v11047_v42  ;;  %5138 = vmatprep.subr.bf16.mxu0 %v8134_v61  ;;  %v533_v0 = vld [vmem:[#allocation8 + $0x1e8] sm:$0xff]  ;;  %v8150_v61 = vcombine.high %v522_v30, %v526_v26  ;;  %v534_v42 = vld [vmem:[#allocation8 + $0x1f0] sm:$0xff] }
 0x151   :  { %3841 = vmatprep.mubr.bf16.mxu1 %v11051_v6  ;;  %4367 = vmatpush1.bf16.msra.mxu1 %v8131_v27  ;;  %v530_v6 = vld [vmem:[#allocation8 + $0x1d0] sm:$0xff]  ;;  %v11065_v27 = vpack.c.bf16 %v167_v62, %v159_v53  ;;  %v537_v51 = vld [vmem:[#allocation8 + $0x208] sm:$0xff]  ;;  %v8155_v30 = vcombine.low %v529_v48, %v533_v0 }
 0x152   :  { %4218 = vmatmul.mubr.bf16.gmra.mrb[8].mxu0 %v11049_v9  ;;  %4368 = vmatprep.subr.bf16.mxu1 %v8140_v35  ;;  %v11061_v9 = vpack.c.bf16 %v150_v19, %v142_v57  ;;  %v154_v60 = vld [vmem:[#allocation2 + $0x210] sm:$0xff]  ;;  %v8156_v35 = vcombine.high %v529_v48, %v533_v0  ;;  %v8158_v8 = vcombine.high %v530_v6, %v534_v42  ;;  %v175_v26 = vld [vmem:[#allocation2 + $0x2b8] sm:$0xff] }
 0x153   :  { %4227 = vmatprep.mubr.bf16.mxu0 %v11053_v16  ;;  %5139 = vmatpush1.bf16.msra.mxu0 %v8133_v11  ;;  %v11063_v16 = vpack.c.bf16 %v163_v55, %v155_v13  ;;  %13466 = vst [vmem:[#allocation96_spill] sm:$0xff] %v11065_v27  ;;  %v162_v18 = vld [vmem:[#allocation2 + $0x250] sm:$0xff]  ;;  %v179_v13 = vld [vmem:[#allocation2 + $0x2d8] sm:$0xff]  ;;  %v8157_v53 = vcombine.low %v530_v6, %v534_v42 }
 0x154   :  { %5140 = vmatprep.subr.bf16.mxu0 %v8142_v32  ;;  %13464 = vst [vmem:[#allocation94_spill] sm:$0xff] %v11061_v9  ;;  %v541_v11 = vld [vmem:[#allocation8 + $0x228] sm:$0xff]  ;;  %v538_v57 = vld [vmem:[#allocation8 + $0x210] sm:$0xff]  ;;  %v11071_v62 = vpack.c.bf16 %v162_v18, %v154_v60 }
 0x155   :  { %13465 = vst [vmem:[#allocation95_spill] sm:$0xff] %v11063_v16  ;;  %4369 = vmatpush1.bf16.msra.mxu1 %v8139_v63  ;;  %v158_v32 = vld [vmem:[#allocation2 + $0x230] sm:$0xff]  ;;  %v183_v55 = vld [vmem:[#allocation2 + $0x2f8] sm:$0xff]  ;;  %v8164_v63 = vcombine.high %v537_v51, %v541_v11  ;;  %v8163_v48 = vcombine.low %v537_v51, %v541_v11 }
 0x156   :  { %4370 = vmatprep.subr.bf16.mxu1 %v8148_v39  ;;  %v542_v19 = vld [vmem:[#allocation8 + $0x230] sm:$0xff]  ;;  %13467 = vst [vmem:[#allocation97_spill] sm:$0xff] %v11071_v62  ;;  %v545_v39 = vld [vmem:[#allocation8 + $0x248] sm:$0xff] }
 0x157   :  { %5141 = vmatpush1.bf16.msra.mxu0 %v8141_v31  ;;  %v166_v34 = vld [vmem:[#allocation2 + $0x270] sm:$0xff]  ;;  %v8165_v6 = vcombine.low %v538_v57, %v542_v19  ;;  %v187_v11 = vld [vmem:[#allocation2 + $0x318] sm:$0xff] }
 0x158   :  { %3842 = vmatmul.mubr.bf16.gmra.mrb[12].mxu1 %v11059_v2  ;;  %5142 = vmatprep.subr.bf16.mxu0 %v8150_v61  ;;  %v549_v31 = vld [vmem:[#allocation8 + $0x268] sm:$0xff]  ;;  %v8166_v61 = vcombine.high %v538_v57, %v542_v19  ;;  %v550_v2 = vld [vmem:[#allocation8 + $0x270] sm:$0xff] }
 0x159   :  { %3851 = vmatprep.mubr.bf16.mxu1 %v11063_v16  ;;  %4371 = vmatpush1.bf16.msra.mxu1 %v8147_v3  ;;  %v546_v16 = vld [vmem:[#allocation8 + $0x250] sm:$0xff]  ;;  %v11077_v3 = vpack.c.bf16 %v183_v55, %v175_v26  ;;  %v553_v60 = vld [vmem:[#allocation8 + $0x288] sm:$0xff]  ;;  %v8171_v57 = vcombine.low %v545_v39, %v549_v31 }
 0x15a   :  { %4228 = vmatmul.mubr.bf16.gmra.mrb[12].mxu0 %v11061_v9  ;;  %4372 = vmatprep.subr.bf16.mxu1 %v8156_v35  ;;  %v11073_v9 = vpack.c.bf16 %v166_v34, %v158_v32  ;;  %v170_v0 = vld [vmem:[#allocation2 + $0x290] sm:$0xff]  ;;  %v8172_v35 = vcombine.high %v545_v39, %v549_v31  ;;  %v8174_v18 = vcombine.high %v546_v16, %v550_v2  ;;  %v191_v19 = vld [vmem:[#allocation2 + $0x338] sm:$0xff] }
 0x15b   :  { %4237 = vmatprep.mubr.bf16.mxu0 %v11065_v27  ;;  %5143 = vmatpush1.bf16.msra.mxu0 %v8149_v36  ;;  %v11075_v27 = vpack.c.bf16 %v179_v13, %v171_v24  ;;  %13470 = vst [vmem:[#allocation100_spill] sm:$0xff] %v11077_v3  ;;  %v178_v42 = vld [vmem:[#allocation2 + $0x2d0] sm:$0xff]  ;;  %v195_v24 = vld [vmem:[#allocation2 + $0x358] sm:$0xff]  ;;  %v8173_v26 = vcombine.low %v546_v16, %v550_v2 }
 0x15c   :  { %5144 = vmatprep.subr.bf16.mxu0 %v8158_v8  ;;  %13468 = vst [vmem:[#allocation98_spill] sm:$0xff] %v11073_v9  ;;  %v557_v36 = vld [vmem:[#allocation8 + $0x2a8] sm:$0xff]  ;;  %v554_v32 = vld [vmem:[#allocation8 + $0x290] sm:$0xff]  ;;  %v11083_v55 = vpack.c.bf16 %v178_v42, %v170_v0 }
 0x15d   :  { %13469 = vst [vmem:[#allocation99_spill] sm:$0xff] %v11075_v27  ;;  %4373 = vmatpush1.bf16.msra.mxu1 %v8155_v30  ;;  %v174_v8 = vld [vmem:[#allocation2 + $0x2b0] sm:$0xff]  ;;  %v199_v13 = vld [vmem:[#allocation2 + $0x378] sm:$0xff]  ;;  %v8180_v30 = vcombine.high %v553_v60, %v557_v36  ;;  %v8179_v39 = vcombine.low %v553_v60, %v557_v36 }
 0x15e   :  { %4374 = vmatprep.subr.bf16.mxu1 %v8164_v63  ;;  %v558_v34 = vld [vmem:[#allocation8 + $0x2b0] sm:$0xff]  ;;  %13471 = vst [vmem:[#allocation101_spill] sm:$0xff] %v11083_v55  ;;  %v561_v63 = vld [vmem:[#allocation8 + $0x2c8] sm:$0xff] }
 0x15f   :  { %5145 = vmatpush1.bf16.msra.mxu0 %v8157_v53  ;;  %v182_v51 = vld [vmem:[#allocation2 + $0x2f0] sm:$0xff]  ;;  %v8181_v16 = vcombine.low %v554_v32, %v558_v34  ;;  %v203_v36 = vld [vmem:[#allocation2 + $0x398] sm:$0xff] }
 0x160   :  { %3852 = vmatmul.mubr.bf16.gmra.mrb[16].mxu1 %v11071_v62  ;;  %5146 = vmatprep.subr.bf16.mxu0 %v8166_v61  ;;  %v565_v53 = vld [vmem:[#allocation8 + $0x2e8] sm:$0xff]  ;;  %v8182_v61 = vcombine.high %v554_v32, %v558_v34  ;;  %v566_v62 = vld [vmem:[#allocation8 + $0x2f0] sm:$0xff] }
 0x161   :  { %3861 = vmatprep.mubr.bf16.mxu1 %v11075_v27  ;;  %4375 = vmatpush1.bf16.msra.mxu1 %v8163_v48  ;;  %v562_v27 = vld [vmem:[#allocation8 + $0x2d0] sm:$0xff]  ;;  %v11089_v48 = vpack.c.bf16 %v199_v13, %v191_v19  ;;  %v569_v0 = vld [vmem:[#allocation8 + $0x308] sm:$0xff]  ;;  %v8187_v32 = vcombine.low %v561_v63, %v565_v53 }
 0x162   :  { %4238 = vmatmul.mubr.bf16.gmra.mrb[16].mxu0 %v11073_v9  ;;  %4376 = vmatprep.subr.bf16.mxu1 %v8172_v35  ;;  %v11085_v9 = vpack.c.bf16 %v182_v51, %v174_v8  ;;  %v186_v31 = vld [vmem:[#allocation2 + $0x310] sm:$0xff]  ;;  %v8188_v35 = vcombine.high %v561_v63, %v565_v53  ;;  %v8190_v42 = vcombine.high %v562_v27, %v566_v62  ;;  %v207_v34 = vld [vmem:[#allocation2 + $0x3b8] sm:$0xff] }
 0x163   :  { %4247 = vmatprep.mubr.bf16.mxu0 %v11077_v3  ;;  %5147 = vmatpush1.bf16.msra.mxu0 %v8165_v6  ;;  %v11087_v3 = vpack.c.bf16 %v195_v24, %v187_v11  ;;  %13474 = vst [vmem:[#allocation104_spill] sm:$0xff] %v11089_v48  ;;  %v194_v2 = vld [vmem:[#allocation2 + $0x350] sm:$0xff]  ;;  %v211_v11 = vld [vmem:[#allocation2 + $0x3d8] sm:$0xff]  ;;  %v8189_v19 = vcombine.low %v562_v27, %v566_v62 }
 0x164   :  { %5148 = vmatprep.subr.bf16.mxu0 %v8174_v18  ;;  %13472 = vst [vmem:[#allocation102_spill] sm:$0xff] %v11085_v9  ;;  %v573_v6 = vld [vmem:[#allocation8 + $0x328] sm:$0xff]  ;;  %v570_v8 = vld [vmem:[#allocation8 + $0x310] sm:$0xff]  ;;  %v11095_v13 = vpack.c.bf16 %v194_v2, %v186_v31 }
 0x165   :  { %13473 = vst [vmem:[#allocation103_spill] sm:$0xff] %v11087_v3  ;;  %4377 = vmatpush1.bf16.msra.mxu1 %v8171_v57  ;;  %v190_v18 = vld [vmem:[#allocation2 + $0x330] sm:$0xff]  ;;  %v215_v24 = vld [vmem:[#allocation2 + $0x3f8] sm:$0xff]  ;;  %v8196_v57 = vcombine.high %v569_v0, %v573_v6  ;;  %v8195_v63 = vcombine.low %v569_v0, %v573_v6 }
 0x166   :  { %4378 = vmatprep.subr.bf16.mxu1 %v8180_v30  ;;  %v574_v51 = vld [vmem:[#allocation8 + $0x330] sm:$0xff]  ;;  %13475 = vst [vmem:[#allocation105_spill] sm:$0xff] %v11095_v13  ;;  %v577_v30 = vld [vmem:[#allocation8 + $0x348] sm:$0xff] }
 0x167   :  { %5149 = vmatpush1.bf16.msra.mxu0 %v8173_v26  ;;  %v198_v60 = vld [vmem:[#allocation2 + $0x370] sm:$0xff]  ;;  %v8197_v27 = vcombine.low %v570_v8, %v574_v51  ;;  %v219_v6 = vld [vmem:[#allocation2 + $0x418] sm:$0xff] }
 0x168   :  { %3862 = vmatmul.mubr.bf16.gmra.mrb[20].mxu1 %v11083_v55  ;;  %5150 = vmatprep.subr.bf16.mxu0 %v8182_v61  ;;  %v581_v26 = vld [vmem:[#allocation8 + $0x368] sm:$0xff]  ;;  %v8198_v61 = vcombine.high %v570_v8, %v574_v51  ;;  %v582_v55 = vld [vmem:[#allocation8 + $0x370] sm:$0xff] }
 0x169   :  { %3871 = vmatprep.mubr.bf16.mxu1 %v11087_v3  ;;  %4379 = vmatpush1.bf16.msra.mxu1 %v8179_v39  ;;  %v578_v3 = vld [vmem:[#allocation8 + $0x350] sm:$0xff]  ;;  %v11101_v39 = vpack.c.bf16 %v215_v24, %v207_v34  ;;  %v585_v31 = vld [vmem:[#allocation8 + $0x388] sm:$0xff]  ;;  %v8203_v8 = vcombine.low %v577_v30, %v581_v26 }
 0x16a   :  { %4248 = vmatmul.mubr.bf16.gmra.mrb[20].mxu0 %v11085_v9  ;;  %4380 = vmatprep.subr.bf16.mxu1 %v8188_v35  ;;  %v11097_v9 = vpack.c.bf16 %v198_v60, %v190_v18  ;;  %v202_v53 = vld [vmem:[#allocation2 + $0x390] sm:$0xff]  ;;  %v8204_v35 = vcombine.high %v577_v30, %v581_v26  ;;  %v8206_v2 = vcombine.high %v578_v3, %v582_v55  ;;  %v223_v51 = vld [vmem:[#allocation2 + $0x438] sm:$0xff] }
 0x16b   :  { %4257 = vmatprep.mubr.bf16.mxu0 %v11089_v48  ;;  %5151 = vmatpush1.bf16.msra.mxu0 %v8181_v16  ;;  %v11099_v48 = vpack.c.bf16 %v211_v11, %v203_v36  ;;  %13478 = vst [vmem:[#allocation108_spill] sm:$0xff] %v11101_v39  ;;  %v210_v62 = vld [vmem:[#allocation2 + $0x3d0] sm:$0xff]  ;;  %v227_v36 = vld [vmem:[#allocation2 + $0x458] sm:$0xff]  ;;  %v8205_v34 = vcombine.low %v578_v3, %v582_v55 }
 0x16c   :  { %5152 = vmatprep.subr.bf16.mxu0 %v8190_v42  ;;  %13476 = vst [vmem:[#allocation106_spill] sm:$0xff] %v11097_v9  ;;  %v589_v16 = vld [vmem:[#allocation8 + $0x3a8] sm:$0xff]  ;;  %v586_v18 = vld [vmem:[#allocation8 + $0x390] sm:$0xff]  ;;  %v11107_v24 = vpack.c.bf16 %v210_v62, %v202_v53 }
 0x16d   :  { %13477 = vst [vmem:[#allocation107_spill] sm:$0xff] %v11099_v48  ;;  %4381 = vmatpush1.bf16.msra.mxu1 %v8187_v32  ;;  %v206_v42 = vld [vmem:[#allocation2 + $0x3b0] sm:$0xff]  ;;  %v231_v11 = vld [vmem:[#allocation2 + $0x478] sm:$0xff]  ;;  %v8212_v32 = vcombine.high %v585_v31, %v589_v16  ;;  %v8211_v30 = vcombine.low %v585_v31, %v589_v16 }
 0x16e   :  { %4382 = vmatprep.subr.bf16.mxu1 %v8196_v57  ;;  %v590_v60 = vld [vmem:[#allocation8 + $0x3b0] sm:$0xff]  ;;  %v593_v57 = vld [vmem:[#allocation8 + $0x3c8] sm:$0xff] }
 0x16f   :  { %5153 = vmatpush1.bf16.msra.mxu0 %v8189_v19  ;;  %v214_v0 = vld [vmem:[#allocation2 + $0x3f0] sm:$0xff]  ;;  %v8213_v3 = vcombine.low %v586_v18, %v590_v60  ;;  %v243_v31 = vld [vmem:[#allocation2 + $0x4d8] sm:$0xff] }
 0x170   :  { %3872 = vmatmul.mubr.bf16.gmra.mrb[24].mxu1 %v11095_v13  ;;  %5154 = vmatprep.subr.bf16.mxu0 %v8198_v61  ;;  %v597_v19 = vld [vmem:[#allocation8 + $0x3e8] sm:$0xff]  ;;  %v8214_v61 = vcombine.high %v586_v18, %v590_v60  ;;  %v598_v13 = vld [vmem:[#allocation8 + $0x3f0] sm:$0xff] }
 0x171   :  { %3881 = vmatprep.mubr.bf16.mxu1 %v11099_v48  ;;  %4383 = vmatpush1.bf16.msra.mxu1 %v8195_v63  ;;  %v594_v48 = vld [vmem:[#allocation8 + $0x3d0] sm:$0xff]  ;;  %v11113_v63 = vpack.c.bf16 %v231_v11, %v223_v51  ;;  %v8220_v26 = vcombine.high %v593_v57, %v597_v19  ;;  %v8219_v16 = vcombine.low %v593_v57, %v597_v19 }
 0x172   :  { %4258 = vmatmul.mubr.bf16.gmra.mrb[24].mxu0 %v11097_v9  ;;  %4384 = vmatprep.subr.bf16.mxu1 %v8204_v35  ;;  %v11109_v9 = vpack.c.bf16 %v214_v0, %v206_v42  ;;  %v8222_v55 = vcombine.high %v594_v48, %v598_v13  ;;  %v218_v53 = vld [vmem:[#allocation2 + $0x410] sm:$0xff]  ;;  %v239_v42 = vld [vmem:[#allocation2 + $0x4b8] sm:$0xff]  ;;  %v8221_v60 = vcombine.low %v594_v48, %v598_v13 }
 0x173   :  { %4267 = vmatprep.mubr.bf16.mxu0 %v11101_v39  ;;  %5155 = vmatpush1.bf16.msra.mxu0 %v8197_v27  ;;  %v11111_v39 = vpack.c.bf16 %v227_v36, %v219_v6  ;;  %13481 = vst [vmem:[#allocation111_spill] sm:$0xff] %v11113_v63  ;;  %v226_v35 = vld [vmem:[#allocation2 + $0x450] sm:$0xff]  ;;  %v247_v18 = vld [vmem:[#allocation2 + $0x4f8] sm:$0xff]  ;;  %v8228_v0 = vcombine.high %v11020_v37, %v11022_v50 }
 0x174   :  { %5156 = vmatprep.subr.bf16.mxu0 %v8206_v2  ;;  %13479 = vst [vmem:[#allocation109_spill] sm:$0xff] %v11109_v9  ;;  %v222_v27 = vld [vmem:[#allocation2 + $0x430] sm:$0xff]  ;;  %v235_v2 = vld [vmem:[#allocation2 + $0x498] sm:$0xff]  ;;  %v11121_v6 = vpack.c.bf16 %v226_v35, %v218_v53  ;;  %v11127_v51 = vpack.c.bf16 %v247_v18, %v239_v42 }
 0x175   :  { %13480 = vst [vmem:[#allocation110_spill] sm:$0xff] %v11111_v39  ;;  %4385 = vmatpush1.bf16.msra.mxu1 %v8203_v8  ;;  %v230_v62 = vld [vmem:[#allocation2 + $0x470] sm:$0xff]  ;;  %v11125_v8 = vpack.c.bf16 %v243_v31, %v235_v2  ;;  %v267_v18 = vld [vmem:[#allocation2 + $0x598] sm:$0xff] }
 0x176   :  { %4386 = vmatprep.subr.bf16.mxu1 %v8212_v32  ;;  %13482 = vst [vmem:[#allocation112_spill] sm:$0xff] %v11121_v6  ;;  %v11123_v36 = vpack.c.bf16 %v230_v62, %v222_v27  ;;  %13485 = vst [vmem:[#allocation115_spill] sm:$0xff] %v11127_v51  ;;  %v11129_v11 = vld [vmem:[#allocation8 + $0x410] sm:$0xff] }
 0x177   :  { %5157 = vmatpush1.bf16.msra.mxu0 %v8205_v34  ;;  %13484 = vst [vmem:[#allocation114_spill] sm:$0xff] %v11125_v8  ;;  %v11131_v32 = vld [vmem:[#allocation8 + $0x430] sm:$0xff] }
 0x178   :  { %3882 = vmatmul.mubr.bf16.gmra.mrb[28].mxu1 %v11107_v24  ;;  %5158 = vmatprep.subr.bf16.mxu0 %v8214_v61  ;;  %13483 = vst [vmem:[#allocation113_spill] sm:$0xff] %v11123_v36  ;;  %v8230_v48 = vcombine.high %v11129_v11, %v11131_v32  ;;  %v234_v34 = vld [vmem:[#allocation2 + $0x490] sm:$0xff] }
 0x179   :  { %3891 = vmatprep.mubr.bf16.mxu1 %v11111_v39  ;;  %4387 = vmatpush1.bf16.msra.mxu1 %v8211_v30  ;;  %v242_v57 = vld [vmem:[#allocation2 + $0x4d0] sm:$0xff]  ;;  %v251_v30 = vld [vmem:[#allocation2 + $0x518] sm:$0xff] }
 0x17a   :  { %4268 = vmatmul.mubr.bf16.gmra.mrb[28].mxu0 %v11109_v9  ;;  %4388 = vmatprep.subr.bf16.mxu1 %v8220_v26  ;;  %v238_v19 = vld [vmem:[#allocation2 + $0x4b0] sm:$0xff]  ;;  %v259_v26 = vld [vmem:[#allocation2 + $0x558] sm:$0xff]  ;;  %v11141_v53 = vpack.c.bf16 %v242_v57, %v234_v34 }
 0x17b   :  { %4277 = vmatprep.mubr.bf16.mxu0 %v11113_v63  ;;  %5159 = vmatpush1.bf16.msra.mxu0 %v8213_v3  ;;  %v246_v61 = vld [vmem:[#allocation2 + $0x4f0] sm:$0xff]  ;;  %v255_v3 = vld [vmem:[#allocation2 + $0x538] sm:$0xff]  ;;  %v11145_v27 = vpack.c.bf16 %v259_v26, %v251_v30 }
 0x17c   :  { %5160 = vmatprep.subr.bf16.mxu0 %v8222_v55  ;;  %v263_v55 = vld [vmem:[#allocation2 + $0x578] sm:$0xff]  ;;  %13486 = vst [vmem:[#allocation116_spill] sm:$0xff] %v11141_v53  ;;  %v11143_v35 = vpack.c.bf16 %v246_v61, %v238_v19  ;;  %v250_v2 = vld [vmem:[#allocation2 + $0x510] sm:$0xff] }
 0x17d   :  { %4389 = vmatpush1.bf16.msra.mxu1 %v8219_v16  ;;  %13488 = vst [vmem:[#allocation118_spill] sm:$0xff] %v11145_v27  ;;  %v11147_v62 = vpack.c.bf16 %v263_v55, %v255_v3  ;;  %v258_v31 = vld [vmem:[#allocation2 + $0x550] sm:$0xff] }
 0x17e   :  { %4551 = vmatprep.subr.bf16.mxu1 %v8228_v0  ;;  %13487 = vst [vmem:[#allocation117_spill] sm:$0xff] %v11143_v35  ;;  %v254_v16 = vld [vmem:[#allocation2 + $0x530] sm:$0xff]  ;;  %v271_v0 = vld [vmem:[#allocation2 + $0x5b8] sm:$0xff]  ;;  %v11153_v34 = vpack.c.bf16 %v258_v31, %v250_v2 }
 0x17f   :  { %5161 = vmatpush1.bf16.msra.mxu0 %v8221_v60  ;;  %13489 = vst [vmem:[#allocation119_spill] sm:$0xff] %v11147_v62  ;;  %v262_v42 = vld [vmem:[#allocation2 + $0x570] sm:$0xff]  ;;  %v275_v60 = vld [vmem:[#allocation2 + $0x5d8] sm:$0xff] }
 0x180   :  { %3892 = vmatmul.mubr.bf16.gmra.mrb[32].mxu1 %v11121_v6  ;;  %5323 = vmatprep.subr.bf16.mxu0 %v8230_v48  ;;  %v279_v48 = vld [vmem:[#allocation2 + $0x5f8] sm:$0xff]  ;;  %13490 = vst [vmem:[#allocation120_spill] sm:$0xff] %v11153_v34  ;;  %v11155_v57 = vpack.c.bf16 %v262_v42, %v254_v16  ;;  %v11157_v19 = vpack.c.bf16 %v275_v60, %v267_v18  ;;  %v266_v30 = vld [vmem:[#allocation2 + $0x590] sm:$0xff] }
 0x181   :  { %3901 = vmatprep.mubr.bf16.mxu1 %v11125_v8  ;;  %v11159_v61 = vpack.c.bf16 %v279_v48, %v271_v0  ;;  %v274_v26 = vld [vmem:[#allocation2 + $0x5d0] sm:$0xff]  ;;  %v283_v2 = vld [vmem:[#allocation2 + $0x618] sm:$0xff] }
 0x182   :  { %4278 = vmatmul.mubr.bf16.gmra.mrb[32].mxu0 %v11123_v36  ;;  %13491 = vst [vmem:[#allocation121_spill] sm:$0xff] %v11155_v57  ;;  %13492 = vst [vmem:[#allocation122_spill] sm:$0xff] %v11157_v19  ;;  %v270_v3 = vld [vmem:[#allocation2 + $0x5b0] sm:$0xff]  ;;  %v291_v31 = vld [vmem:[#allocation2 + $0x658] sm:$0xff]  ;;  %v11165_v18 = vpack.c.bf16 %v274_v26, %v266_v30 }
 0x183   :  { %4287 = vmatprep.mubr.bf16.mxu0 %v11127_v51  ;;  %13493 = vst [vmem:[#allocation123_spill] sm:$0xff] %v11159_v61  ;;  %v278_v55 = vld [vmem:[#allocation2 + $0x5f0] sm:$0xff]  ;;  %v287_v16 = vld [vmem:[#allocation2 + $0x638] sm:$0xff]  ;;  %v11169_v0 = vpack.c.bf16 %v291_v31, %v283_v2 }
 0x184   :  { %v295_v42 = vld [vmem:[#allocation2 + $0x678] sm:$0xff]  ;;  %13494 = vst [vmem:[#allocation124_spill] sm:$0xff] %v11165_v18  ;;  %v11167_v60 = vpack.c.bf16 %v278_v55, %v270_v3  ;;  %v282_v13 = vld [vmem:[#allocation2 + $0x610] sm:$0xff] }
 0x185   :  { %13496 = vst [vmem:[#allocation126_spill] sm:$0xff] %v11169_v0  ;;  %v11171_v48 = vpack.c.bf16 %v295_v42, %v287_v16  ;;  %v299_v30 = vld [vmem:[#allocation2 + $0x698] sm:$0xff]  ;;  %v310_v51 = vld [vmem:[#allocation2 + $0x6f0] sm:$0xff] }
 0x186   :  { %13495 = vst [vmem:[#allocation125_spill] sm:$0xff] %v11167_v60  ;;  %v307_v26 = vld [vmem:[#allocation2 + $0x6d8] sm:$0xff]  ;;  %v318_v36 = vld [vmem:[#allocation2 + $0x730] sm:$0xff] }
 0x187   :  { %13497 = vst [vmem:[#allocation127_spill] sm:$0xff] %v11171_v48  ;;  %v303_v3 = vld [vmem:[#allocation2 + $0x6b8] sm:$0xff]  ;;  %v11181_v16 = vpack.c.bf16 %v307_v26, %v299_v30  ;;  %v326_v63 = vld [vmem:[#allocation2 + $0x770] sm:$0xff] }
 0x188   :  { %3902 = vmatmul.mubr.bf16.gmra.mrb[36].mxu1 %v11141_v53  ;;  %v311_v55 = vld [vmem:[#allocation2 + $0x6f8] sm:$0xff]  ;;  %v334_v9 = vld [vmem:[#allocation2 + $0x7b0] sm:$0xff] }
 0x189   :  { %3911 = vmatprep.mubr.bf16.mxu1 %v11145_v27  ;;  %13500 = vst [vmem:[#allocation130_spill] sm:$0xff] %v11181_v16  ;;  %v11183_v42 = vpack.c.bf16 %v311_v55, %v303_v3 }
 0x18a   :  { %4288 = vmatmul.mubr.bf16.gmra.mrb[36].mxu0 %v11143_v35  ;;  %v302_v35 = vld [vmem:[#allocation2 + $0x6b0] sm:$0xff] }
 0x18b   :  { %4297 = vmatprep.mubr.bf16.mxu0 %v11147_v62  ;;  %v294_v62 = vld [vmem:[#allocation2 + $0x670] sm:$0xff]  ;;  %13501 = vst [vmem:[#allocation131_spill] sm:$0xff] %v11183_v42  ;;  %v11191_v26 = vpack.c.bf16 %v310_v51, %v302_v35  ;;  %v335_v51 = vld [vmem:[#allocation2 + $0x7b8] sm:$0xff] }
 0x18c   :  { %v343_v35 = vld [vmem:[#allocation2 + $0x7f8] sm:$0xff] }
 0x18d   :  { %13503 = vst [vmem:[#allocation133_spill] sm:$0xff] %v11191_v26 }
 0x190   :  { %3912 = vmatmul.mubr.bf16.gmra.mrb[40].mxu1 %v11153_v34 }
 0x191   :  { %3921 = vmatprep.mubr.bf16.mxu1 %v11157_v19 }
 0x192   :  { %4298 = vmatmul.mubr.bf16.gmra.mrb[40].mxu0 %v11155_v57  ;;  %v286_v57 = vld [vmem:[#allocation2 + $0x630] sm:$0xff] }
 0x193   :  { %4307 = vmatprep.mubr.bf16.mxu0 %v11159_v61  ;;  %v290_v61 = vld [vmem:[#allocation2 + $0x650] sm:$0xff]  ;;  %v11179_v31 = vpack.c.bf16 %v294_v62, %v286_v57  ;;  %v319_v62 = vld [vmem:[#allocation2 + $0x738] sm:$0xff] }
 0x194   :  { %v11177_v2 = vpack.c.bf16 %v290_v61, %v282_v13  ;;  %v315_v13 = vld [vmem:[#allocation2 + $0x718] sm:$0xff] }
 0x195   :  { %13499 = vst [vmem:[#allocation129_spill] sm:$0xff] %v11179_v31  ;;  %v323_v61 = vld [vmem:[#allocation2 + $0x758] sm:$0xff] }
 0x196   :  { %13498 = vst [vmem:[#allocation128_spill] sm:$0xff] %v11177_v2  ;;  %v327_v57 = vld [vmem:[#allocation2 + $0x778] sm:$0xff]  ;;  %v11193_v3 = vpack.c.bf16 %v323_v61, %v315_v13  ;;  %v11203_v61 = vpack.c.bf16 %v326_v63, %v318_v36  ;;  %v609_v36 = vld [vmem:[#allocation8 + $0x448] sm:$0xff] }
 0x197   :  { %v11195_v55 = vpack.c.bf16 %v327_v57, %v319_v62  ;;  %v11207_v57 = vpack.c.bf16 %v343_v35, %v335_v51  ;;  %v617_v35 = vld [vmem:[#allocation8 + $0x488] sm:$0xff] }
 0x198   :  { %3922 = vmatmul.mubr.bf16.gmra.mrb[44].mxu1 %v11165_v18  ;;  %13504 = vst [vmem:[#allocation134_spill] sm:$0xff] %v11193_v3  ;;  %13507 = vst [vmem:[#allocation137_spill] sm:$0xff] %v11203_v61 }
 0x199   :  { %3931 = vmatprep.mubr.bf16.mxu1 %v11169_v0  ;;  %13505 = vst [vmem:[#allocation135_spill] sm:$0xff] %v11195_v55  ;;  %13509 = vst [vmem:[#allocation139_spill] sm:$0xff] %v11207_v57 }
 0x19a   :  { %4308 = vmatmul.mubr.bf16.gmra.mrb[44].mxu0 %v11167_v60  ;;  %v306_v60 = vld [vmem:[#allocation2 + $0x6d0] sm:$0xff] }
 0x19b   :  { %4317 = vmatprep.mubr.bf16.mxu0 %v11171_v48  ;;  %v298_v48 = vld [vmem:[#allocation2 + $0x690] sm:$0xff] }
 0x19c   :  { %v11189_v30 = vpack.c.bf16 %v306_v60, %v298_v48  ;;  %v331_v60 = vld [vmem:[#allocation2 + $0x798] sm:$0xff] }
 0x19d   :  { %v339_v48 = vld [vmem:[#allocation2 + $0x7d8] sm:$0xff] }
 0x19e   :  { %13502 = vst [vmem:[#allocation132_spill] sm:$0xff] %v11189_v30  ;;  %v11205_v62 = vpack.c.bf16 %v339_v48, %v331_v60  ;;  %v610_v60 = vld [vmem:[#allocation8 + $0x450] sm:$0xff] }
 0x19f   :  { %v614_v48 = vld [vmem:[#allocation8 + $0x470] sm:$0xff] }
 0x1a0   :  { %3932 = vmatmul.mubr.bf16.gmra.mrb[48].mxu1 %v11177_v2  ;;  %13508 = vst [vmem:[#allocation138_spill] sm:$0xff] %v11205_v62 }
 0x1a1   :  { %3941 = vmatprep.mubr.bf16.mxu1 %v11181_v16 }
 0x1a2   :  { %4318 = vmatmul.mubr.bf16.gmra.mrb[48].mxu0 %v11179_v31  ;;  %v322_v31 = vld [vmem:[#allocation2 + $0x750] sm:$0xff] }
 0x1a3   :  { %4327 = vmatprep.mubr.bf16.mxu0 %v11183_v42  ;;  %v314_v42 = vld [vmem:[#allocation2 + $0x710] sm:$0xff] }
 0x1a4   :  { %v11201_v13 = vpack.c.bf16 %v322_v31, %v314_v42  ;;  %v613_v42 = vld [vmem:[#allocation8 + $0x468] sm:$0xff] }
 0x1a5   :  { %v8236_v51 = vcombine.high %v609_v36, %v613_v42 }
 0x1a6   :  { %13506 = vst [vmem:[#allocation136_spill] sm:$0xff] %v11201_v13 }
 0x1a8   :  { %3942 = vmatmul.mubr.bf16.gmra.mrb[52].mxu1 %v11189_v30 }
 0x1a9   :  { %3951 = vmatprep.mubr.bf16.mxu1 %v11193_v3  ;;  %v342_v3 = vld [vmem:[#allocation2 + $0x7f0] sm:$0xff] }
 0x1aa   :  { %4328 = vmatmul.mubr.bf16.gmra.mrb[52].mxu0 %v11191_v26  ;;  %v338_v26 = vld [vmem:[#allocation2 + $0x7d0] sm:$0xff]  ;;  %v11215_v63 = vpack.c.bf16 %v342_v3, %v334_v9  ;;  %v13512_v9 = vcombine.low %v11020_v37, %v11022_v50  ;;  %v8235_v3 = vcombine.low %v609_v36, %v613_v42 }
 0x1ab   :  { %4337 = vmatprep.mubr.bf16.mxu0 %v11195_v55  ;;  %v330_v55 = vld [vmem:[#allocation2 + $0x790] sm:$0xff] }
 0x1ac   :  { %v11213_v31 = vpack.c.bf16 %v338_v26, %v330_v55  ;;  %13511 = vst [vmem:[#allocation141_spill] sm:$0xff] %v11215_v63  ;;  %v8238_v26 = vcombine.high %v610_v60, %v614_v48  ;;  %v618_v55 = vld [vmem:[#allocation8 + $0x490] sm:$0xff]  ;;  %v625_v37 = vld [vmem:[#allocation8 + $0x4c8] sm:$0xff] }
 0x1ad   :  { %v629_v50 = vld [vmem:[#allocation8 + $0x4e8] sm:$0xff] }
 0x1ae   :  { %13510 = vst [vmem:[#allocation140_spill] sm:$0xff] %v11213_v31 }
 0x1b0   :  { %3952 = vmatmul.mubr.bf16.gmra.mrb[56].mxu1 %v11201_v13  ;;  %v8252_v13 = vcombine.high %v625_v37, %v629_v50 }
 0x1b1   :  { %3961 = vmatprep.mubr.bf16.mxu1 %v11205_v62  ;;  %v11231_v62 = vld [vmem:[#allocation8 + $0x808] sm:$0xff] }
 0x1b2   :  { %4338 = vmatmul.mubr.bf16.gmra.mrb[56].mxu0 %v11203_v61  ;;  %v13513_v61 = vcombine.low %v11129_v11, %v11131_v32  ;;  %v633_v32 = vld [vmem:[#allocation8 + $0x508] sm:$0xff] }
 0x1b3   :  { %4347 = vmatprep.mubr.bf16.mxu0 %v11207_v57  ;;  %v621_v57 = vld [vmem:[#allocation8 + $0x4a8] sm:$0xff] }
 0x1b8   :  { %3962 = vmatmul.mubr.bf16.gmra.mrb[60].mxu1 %v11213_v31  ;;  %v8237_v31 = vcombine.low %v610_v60, %v614_v48  ;;  %v634_v48 = vld [vmem:[#allocation8 + $0x510] sm:$0xff] }
 0x1b9   :  { %4390 = vmatprep.mubr.bf16.mxu1 %v10797_v58 }
 0x1ba   :  { %4348 = vmatmul.mubr.bf16.gmra.mrb[60].mxu0 %v11215_v63  ;;  %v622_v63 = vld [vmem:[#allocation8 + $0x4b0] sm:$0xff] }
 0x1bb   :  { %5162 = vmatprep.mubr.bf16.mxu0 %v10797_v58  ;;  %v8244_v58 = vcombine.high %v617_v35, %v621_v57  ;;  %v8246_v36 = vcombine.high %v618_v55, %v622_v63  ;;  %v8245_v11 = vcombine.low %v618_v55, %v622_v63  ;;  %v641_v63 = vld [vmem:[#allocation8 + $0x548] sm:$0xff]  ;;  %v642_v55 = vld [vmem:[#allocation8 + $0x550] sm:$0xff] }
 0x1c0   :  { %4391 = vmatmul.mubr.bf16.vlgmr.msra.gmra.mrb[64].mxu1 %v10803_v22 }
 0x1c1   :  { %4552 = vmatpush1.bf16.msra.mxu1 %v13512_v9  ;;  %4400 = vmatprep.mubr.bf16.mxu1 %v10807_v29  ;;  %v626_v9 = vld [vmem:[#allocation8 + $0x4d0] sm:$0xff] }
 0x1c2   :  { %5163 = vmatmul.mubr.bf16.vlgmr.msra.gmra.mrb[64].mxu0 %v10803_v22  ;;  %4553 = vmatprep.subr.bf16.mxu1 %v8236_v51  ;;  %v11233_v22 = vld [vmem:[#allocation8 + $0x828] sm:$0xff]  ;;  %v8243_v51 = vcombine.low %v617_v35, %v621_v57  ;;  %v8251_v57 = vcombine.low %v625_v37, %v629_v50  ;;  %v654_v50 = vld [vmem:[#allocation8 + $0x5b0] sm:$0xff] }
 0x1c3   :  { %5172 = vmatprep.mubr.bf16.mxu0 %v10807_v29  ;;  %5324 = vmatpush1.bf16.msra.mxu0 %v13513_v61  ;;  %v630_v29 = vld [vmem:[#allocation8 + $0x4f0] sm:$0xff]  ;;  %v637_v61 = vld [vmem:[#allocation8 + $0x528] sm:$0xff] }
 0x1c4   :  { %5325 = vmatprep.subr.bf16.mxu0 %v8238_v26  ;;  %v8254_v60 = vcombine.high %v626_v9, %v630_v29  ;;  %v638_v26 = vld [vmem:[#allocation8 + $0x530] sm:$0xff]  ;;  %v645_v35 = vld [vmem:[#allocation8 + $0x568] sm:$0xff]  ;;  %v8259_v42 = vcombine.low %v633_v32, %v637_v61 }
 0x1c5   :  { %4554 = vmatpush1.bf16.msra.mxu1 %v8235_v3  ;;  %v8262_v3 = vcombine.high %v634_v48, %v638_v26  ;;  %v8261_v30 = vcombine.low %v634_v48, %v638_v26  ;;  %v653_v37 = vld [vmem:[#allocation8 + $0x5a8] sm:$0xff]  ;;  %v658_v26 = vld [vmem:[#allocation8 + $0x5d0] sm:$0xff] }
 0x1c6   :  { %4555 = vmatprep.subr.bf16.mxu1 %v8244_v58  ;;  %v8260_v58 = vcombine.high %v633_v32, %v637_v61  ;;  %v657_v61 = vld [vmem:[#allocation8 + $0x5c8] sm:$0xff] }
 0x1c7   :  { %5326 = vmatpush1.bf16.msra.mxu0 %v8237_v31  ;;  %v8253_v31 = vcombine.low %v626_v9, %v630_v29  ;;  %v650_v29 = vld [vmem:[#allocation8 + $0x590] sm:$0xff]  ;;  %v8267_v9 = vcombine.low %v641_v63, %v645_v35 }
 0x1c8   :  { %4401 = vmatmul.mubr.bf16.gmra.mrb[68].mxu1 %v10815_v49  ;;  %5327 = vmatprep.subr.bf16.mxu0 %v8246_v36  ;;  %v646_v36 = vld [vmem:[#allocation8 + $0x570] sm:$0xff]  ;;  %v8278_v48 = vcombine.high %v650_v29, %v654_v50 }
 0x1c9   :  { %4410 = vmatprep.mubr.bf16.mxu1 %v10819_v54  ;;  %4556 = vmatpush1.bf16.msra.mxu1 %v8243_v51  ;;  %v649_v51 = vld [vmem:[#allocation8 + $0x588] sm:$0xff]  ;;  %v8269_v32 = vcombine.low %v642_v55, %v646_v36 }
 0x1ca   :  { %5173 = vmatmul.mubr.bf16.gmra.mrb[68].mxu0 %v10815_v49  ;;  %4557 = vmatprep.subr.bf16.mxu1 %v8252_v13  ;;  %v8268_v49 = vcombine.high %v641_v63, %v645_v35  ;;  %v8270_v13 = vcombine.high %v642_v55, %v646_v36  ;;  %v669_v63 = vld [vmem:[#allocation8 + $0x628] sm:$0xff]  ;;  %v670_v35 = vld [vmem:[#allocation8 + $0x630] sm:$0xff] }
 0x1cb   :  { %5182 = vmatprep.mubr.bf16.mxu0 %v10819_v54  ;;  %5328 = vmatpush1.bf16.msra.mxu0 %v8245_v11  ;;  %v8276_v11 = vcombine.high %v649_v51, %v653_v37 }
 0x1cc   :  { %5329 = vmatprep.subr.bf16.mxu0 %v8254_v60  ;;  %v661_v60 = vld [vmem:[#allocation8 + $0x5e8] sm:$0xff] }
 0x1cd   :  { %4558 = vmatpush1.bf16.msra.mxu1 %v8251_v57  ;;  %v662_v57 = vld [vmem:[#allocation8 + $0x5f0] sm:$0xff]  ;;  %v8283_v55 = vcombine.low %v657_v61, %v661_v60 }
 0x1ce   :  { %4559 = vmatprep.subr.bf16.mxu1 %v8260_v58  ;;  %v8275_v58 = vcombine.low %v649_v51, %v653_v37  ;;  %v8285_v51 = vcombine.low %v658_v26, %v662_v57  ;;  %v673_v37 = vld [vmem:[#allocation8 + $0x648] sm:$0xff] }
 0x1cf   :  { %5330 = vmatpush1.bf16.msra.mxu0 %v8253_v31  ;;  %v8284_v31 = vcombine.high %v657_v61, %v661_v60  ;;  %v685_v61 = vld [vmem:[#allocation8 + $0x6a8] sm:$0xff] }
 0x1d0   :  { %4411 = vmatmul.mubr.bf16.gmra.mrb[72].mxu1 %v10827_v15  ;;  %5331 = vmatprep.subr.bf16.mxu0 %v8262_v3  ;;  %v8277_v3 = vcombine.low %v650_v29, %v654_v50  ;;  %v674_v50 = vld [vmem:[#allocation8 + $0x650] sm:$0xff] }
 0x1d1   :  { %4420 = vmatprep.mubr.bf16.mxu1 %v10831_v20  ;;  %4560 = vmatpush1.bf16.msra.mxu1 %v8259_v42  ;;  %v665_v42 = vld [vmem:[#allocation8 + $0x608] sm:$0xff] }
 0x1d2   :  { %5183 = vmatmul.mubr.bf16.gmra.mrb[72].mxu0 %v10827_v15  ;;  %4561 = vmatprep.subr.bf16.mxu1 %v8268_v49  ;;  %v8286_v49 = vcombine.high %v658_v26, %v662_v57  ;;  %v8292_v36 = vcombine.high %v665_v42, %v669_v63  ;;  %v682_v26 = vld [vmem:[#allocation8 + $0x690] sm:$0xff] }
 0x1d3   :  { %5192 = vmatprep.mubr.bf16.mxu0 %v10831_v20  ;;  %5332 = vmatpush1.bf16.msra.mxu0 %v8261_v30  ;;  %v666_v30 = vld [vmem:[#allocation8 + $0x610] sm:$0xff] }
 0x1d4   :  { %5333 = vmatprep.subr.bf16.mxu0 %v8270_v13  ;;  %v677_v13 = vld [vmem:[#allocation8 + $0x668] sm:$0xff]  ;;  %v8294_v29 = vcombine.high %v666_v30, %v670_v35  ;;  %v686_v57 = vld [vmem:[#allocation8 + $0x6b0] sm:$0xff] }
 0x1d5   :  { %4562 = vmatpush1.bf16.msra.mxu1 %v8267_v9  ;;  %v678_v9 = vld [vmem:[#allocation8 + $0x670] sm:$0xff] }
 0x1d6   :  { %4563 = vmatprep.subr.bf16.mxu1 %v8276_v11  ;;  %v8291_v11 = vcombine.low %v665_v42, %v669_v63  ;;  %v8302_v60 = vcombine.high %v674_v50, %v678_v9  ;;  %v8301_v42 = vcombine.low %v674_v50, %v678_v9  ;;  %v689_v63 = vld [vmem:[#allocation8 + $0x6c8] sm:$0xff]  ;;  %v698_v50 = vld [vmem:[#allocation8 + $0x710] sm:$0xff] }
 0x1d7   :  { %5334 = vmatpush1.bf16.msra.mxu0 %v8269_v32  ;;  %v8300_v32 = vcombine.high %v673_v37, %v677_v13  ;;  %v702_v9 = vld [vmem:[#allocation8 + $0x730] sm:$0xff] }
 0x1d8   :  { %4421 = vmatmul.mubr.bf16.gmra.mrb[76].mxu1 %v10839_v47  ;;  %5335 = vmatprep.subr.bf16.mxu0 %v8278_v48  ;;  %v8293_v48 = vcombine.low %v666_v30, %v670_v35  ;;  %v8310_v30 = vcombine.high %v682_v26, %v686_v57  ;;  %v690_v35 = vld [vmem:[#allocation8 + $0x6d0] sm:$0xff] }
 0x1d9   :  { %4430 = vmatprep.mubr.bf16.mxu1 %v10843_v56  ;;  %4564 = vmatpush1.bf16.msra.mxu1 %v8275_v58  ;;  %v681_v58 = vld [vmem:[#allocation8 + $0x688] sm:$0xff] }
 0x1da   :  { %5193 = vmatmul.mubr.bf16.gmra.mrb[76].mxu0 %v10839_v47  ;;  %4565 = vmatprep.subr.bf16.mxu1 %v8284_v31  ;;  %v8299_v31 = vcombine.low %v673_v37, %v677_v13  ;;  %v701_v37 = vld [vmem:[#allocation8 + $0x728] sm:$0xff] }
 0x1db   :  { %5202 = vmatprep.mubr.bf16.mxu0 %v10843_v56  ;;  %5336 = vmatpush1.bf16.msra.mxu0 %v8277_v3  ;;  %v8308_v3 = vcombine.high %v681_v58, %v685_v61  ;;  %v11389_v56 = vld [vmem:[#allocation8 + $0xc08] sm:$0xff] }
 0x1dc   :  { %5337 = vmatprep.subr.bf16.mxu0 %v8286_v49  ;;  %v693_v49 = vld [vmem:[#allocation8 + $0x6e8] sm:$0xff] }
 0x1dd   :  { %4566 = vmatpush1.bf16.msra.mxu1 %v8283_v55  ;;  %v694_v55 = vld [vmem:[#allocation8 + $0x6f0] sm:$0xff] }
 0x1de   :  { %4567 = vmatprep.subr.bf16.mxu1 %v8292_v36  ;;  %v8307_v36 = vcombine.low %v681_v58, %v685_v61  ;;  %v8318_v13 = vcombine.high %v690_v35, %v694_v55  ;;  %v8317_v58 = vcombine.low %v690_v35, %v694_v55  ;;  %v705_v61 = vld [vmem:[#allocation8 + $0x748] sm:$0xff]  ;;  %v714_v35 = vld [vmem:[#allocation8 + $0x790] sm:$0xff] }
 0x1df   :  { %5338 = vmatpush1.bf16.msra.mxu0 %v8285_v51  ;;  %v8316_v51 = vcombine.high %v689_v63, %v693_v49  ;;  %v718_v55 = vld [vmem:[#allocation8 + $0x7b0] sm:$0xff] }
 0x1e0   :  { %4431 = vmatmul.mubr.bf16.gmra.mrb[80].mxu1 %v10857_v25  ;;  %5339 = vmatprep.subr.bf16.mxu0 %v8294_v29  ;;  %v8309_v29 = vcombine.low %v682_v26, %v686_v57  ;;  %v8326_v26 = vcombine.high %v698_v50, %v702_v9  ;;  %v706_v57 = vld [vmem:[#allocation8 + $0x750] sm:$0xff] }
 0x1e1   :  { %4440 = vmatprep.mubr.bf16.mxu1 %v10861_v33  ;;  %4568 = vmatpush1.bf16.msra.mxu1 %v8291_v11  ;;  %v697_v11 = vld [vmem:[#allocation8 + $0x708] sm:$0xff] }
 0x1e2   :  { %5203 = vmatmul.mubr.bf16.gmra.mrb[80].mxu0 %v10857_v25  ;;  %4569 = vmatprep.subr.bf16.mxu1 %v8300_v32  ;;  %v8315_v32 = vcombine.low %v689_v63, %v693_v49  ;;  %v717_v63 = vld [vmem:[#allocation8 + $0x7a8] sm:$0xff] }
 0x1e3   :  { %5212 = vmatprep.mubr.bf16.mxu0 %v10861_v33  ;;  %5340 = vmatpush1.bf16.msra.mxu0 %v8293_v48  ;;  %v8324_v48 = vcombine.high %v697_v11, %v701_v37  ;;  %v749_v33 = vld [vmem:[#allocation8 + $0x8a8] sm:$0xff] }
 0x1e4   :  { %5341 = vmatprep.subr.bf16.mxu0 %v8302_v60  ;;  %v709_v60 = vld [vmem:[#allocation8 + $0x768] sm:$0xff] }
 0x1e5   :  { %4570 = vmatpush1.bf16.msra.mxu1 %v8299_v31  ;;  %v710_v31 = vld [vmem:[#allocation8 + $0x770] sm:$0xff] }
 0x1e6   :  { %4571 = vmatprep.subr.bf16.mxu1 %v8308_v3  ;;  %v8323_v3 = vcombine.low %v697_v11, %v701_v37  ;;  %v8334_v49 = vcombine.high %v706_v57, %v710_v31  ;;  %v8333_v11 = vcombine.low %v706_v57, %v710_v31  ;;  %v721_v37 = vld [vmem:[#allocation8 + $0x7c8] sm:$0xff]  ;;  %v8356_v31 = vcombine.high %v11231_v62, %v11233_v22 }
 0x1e7   :  { %5342 = vmatpush1.bf16.msra.mxu0 %v8301_v42  ;;  %v8332_v42 = vcombine.high %v705_v61, %v709_v60 }
 0x1e8   :  { %4441 = vmatmul.mubr.bf16.gmra.mrb[84].mxu1 %v10869_v5  ;;  %5343 = vmatprep.subr.bf16.mxu0 %v8310_v30  ;;  %v8325_v30 = vcombine.low %v698_v50, %v702_v9  ;;  %v8342_v50 = vcombine.high %v714_v35, %v718_v55  ;;  %v722_v9 = vld [vmem:[#allocation8 + $0x7d0] sm:$0xff] }
 0x1e9   :  { %4450 = vmatprep.mubr.bf16.mxu1 %v10873_v10  ;;  %4572 = vmatpush1.bf16.msra.mxu1 %v8307_v36  ;;  %v713_v36 = vld [vmem:[#allocation8 + $0x788] sm:$0xff] }
 0x1ea   :  { %5213 = vmatmul.mubr.bf16.gmra.mrb[84].mxu0 %v10869_v5  ;;  %4573 = vmatprep.subr.bf16.mxu1 %v8316_v51  ;;  %v8331_v51 = vcombine.low %v705_v61, %v709_v60  ;;  %v745_v5 = vld [vmem:[#allocation8 + $0x888] sm:$0xff] }
 0x1eb   :  { %5222 = vmatprep.mubr.bf16.mxu0 %v10873_v10  ;;  %5344 = vmatpush1.bf16.msra.mxu0 %v8309_v29  ;;  %v8340_v29 = vcombine.high %v713_v36, %v717_v63 }
 0x1ec   :  { %5345 = vmatprep.subr.bf16.mxu0 %v8318_v13  ;;  %v725_v13 = vld [vmem:[#allocation8 + $0x7e8] sm:$0xff] }
 0x1ed   :  { %4574 = vmatpush1.bf16.msra.mxu1 %v8315_v32  ;;  %v726_v32 = vld [vmem:[#allocation8 + $0x7f0] sm:$0xff]  ;;  %v8347_v60 = vcombine.low %v721_v37, %v725_v13 }
 0x1ee   :  { %4575 = vmatprep.subr.bf16.mxu1 %v8324_v48  ;;  %v8339_v48 = vcombine.low %v713_v36, %v717_v63  ;;  %v8350_v61 = vcombine.high %v722_v9, %v726_v32  ;;  %v8349_v57 = vcombine.low %v722_v9, %v726_v32  ;;  %v986_v63 = vlaneseq }
 0x1ef   :  { %5346 = vmatpush1.bf16.msra.mxu0 %v8317_v58  ;;  %v8348_v58 = vcombine.high %v721_v37, %v725_v13 }
 0x1f0   :  { %4451 = vmatmul.mubr.bf16.gmra.mrb[88].mxu1 %v10881_v45  ;;  %5347 = vmatprep.subr.bf16.mxu0 %v8326_v26  ;;  %v8341_v26 = vcombine.low %v714_v35, %v718_v55  ;;  %v984_v55 = vld [vmem:[#allocation9] sm:$0xff] }
 0x1f1   :  { %4460 = vmatprep.mubr.bf16.mxu1 %v10885_v52  ;;  %4576 = vmatpush1.bf16.msra.mxu1 %v8323_v3  ;;  %v11267_v3 = vld [vmem:[#allocation8 + $0x810] sm:$0xff] }
 0x1f2   :  { %5223 = vmatmul.mubr.bf16.gmra.mrb[88].mxu0 %v10881_v45  ;;  %4577 = vmatprep.subr.bf16.mxu1 %v8332_v42  ;;  %v11269_v42 = vld [vmem:[#allocation8 + $0x830] sm:$0xff] }
 0x1f3   :  { %5232 = vmatprep.mubr.bf16.mxu0 %v10885_v52  ;;  %5348 = vmatpush1.bf16.msra.mxu0 %v8325_v30  ;;  %v8358_v30 = vcombine.high %v11267_v3, %v11269_v42 }
 0x1f4   :  { %5349 = vmatprep.subr.bf16.mxu0 %v8334_v49  ;;  %v11280_v49 = vshrl.u32 %v986_v63, 7 }
 0x1f5   :  { %4578 = vmatpush1.bf16.msra.mxu1 %v8331_v51 }
 0x1f6   :  { %4579 = vmatprep.subr.bf16.mxu1 %v8340_v29  ;;  %13514 = vst [vmem:[#allocation142_spill] sm:$0xff] %v11280_v49  ;;  %v11286_v35 = vsub.s32 0, %v11280_v49  ;;  %v992_v51 = vsub.s32 1, %v11280_v49 }
 0x1f7   :  { %5350 = vmatpush1.bf16.msra.mxu0 %v8333_v11 }
 0x1f8   :  { %4461 = vmatmul.mubr.bf16.gmra.mrb[92].mxu1 %v10893_v38  ;;  %5351 = vmatprep.subr.bf16.mxu0 %v8342_v50  ;;  %13515 = vst [vmem:[#allocation143_spill] sm:$0xff] %v11286_v35  ;;  %v11291_v29 = vrot.slane %v984_v55, %v11286_v35  ;;  %v11294_v11 = vrot.slane %v984_v55, %v992_v51 }
 0x1f9   :  { %4470 = vmatprep.mubr.bf16.mxu1 %v10897_v43  ;;  %4580 = vmatpush1.bf16.msra.mxu1 %v8339_v48 }
 0x1fa   :  { %5233 = vmatmul.mubr.bf16.gmra.mrb[92].mxu0 %v10893_v38  ;;  %4581 = vmatprep.subr.bf16.mxu1 %v8348_v58 }
 0x1fb   :  { %5242 = vmatprep.mubr.bf16.mxu0 %v10897_v43  ;;  %5352 = vmatpush1.bf16.msra.mxu0 %v8341_v26  ;;  %v738_v43 = vld [vmem:[#allocation8 + $0x850] sm:$0xff] }
 0x1fc   :  { %5353 = vmatprep.subr.bf16.mxu0 %v8350_v61 }
 0x1fd   :  { %4582 = vmatpush1.bf16.msra.mxu1 %v8347_v60 }
 0x1fe   :  { %4744 = vmatprep.subr.bf16.mxu1 %v8356_v31 }
 0x1ff   :  { %5354 = vmatpush1.bf16.msra.mxu0 %v8349_v57 }
 0x200   :  { %4471 = vmatmul.mubr.bf16.gmra.mrb[96].mxu1 %v10907_v23  ;;  %5516 = vmatprep.subr.bf16.mxu0 %v8358_v30 }
 0x201   :  { %4480 = vmatprep.mubr.bf16.mxu1 %v10911_v28 }
 0x202   :  { %5243 = vmatmul.mubr.bf16.gmra.mrb[96].mxu0 %v10907_v23 }
 0x203   :  { %5252 = vmatprep.mubr.bf16.mxu0 %v10911_v28 }
 0x208   :  { %4481 = vmatmul.mubr.bf16.gmra.mrb[100].mxu1 %v10927_v4 }
 0x209   :  { %4490 = vmatprep.mubr.bf16.mxu1 %v10931_v7 }
 0x20a   :  { %5253 = vmatmul.mubr.bf16.gmra.mrb[100].mxu0 %v10927_v4 }
 0x20b   :  { %5262 = vmatprep.mubr.bf16.mxu0 %v10931_v7 }
 0x210   :  { %4491 = vmatmul.mubr.bf16.gmra.mrb[104].mxu1 %v10939_v40 }
 0x211   :  { %4500 = vmatprep.mubr.bf16.mxu1 %v10943_v44 }
 0x212   :  { %5263 = vmatmul.mubr.bf16.gmra.mrb[104].mxu0 %v10939_v40 }
 0x213   :  { %5272 = vmatprep.mubr.bf16.mxu0 %v10943_v44  ;;  %v3813_v37 = vpop.f32.mrb[0].mxu1 }
 0x214   :  { %v8802_v13 = vadd.f32 %v3813_v37, %v11291_v29  ;;  %v3815_v50 = vpop.f32.mrb[1].mxu1 }
 0x215   :  { %v4199_v9 = vpop.f32.mrb[0].mxu0  ;;  %v8804_v32 = vadd.f32 %v3815_v50, %v11294_v11  ;;  %v3817_v48 = vpop.f32.mrb[2].mxu1 }
 0x216   :  { %v4201_v58 = vpop.f32.mrb[1].mxu0  ;;  %v8806_v26 = vadd.f32 %v3817_v48, %v11291_v29  ;;  %v11301_v61 = vadd.f32 %v8802_v13, %v4199_v9  ;;  %v3819_v60 = vpop.f32.mrb[3].mxu1 }
 0x217   :  { %v4203_v57 = vpop.f32.mrb[2].mxu0  ;;  %v8808_v31 = vadd.f32 %v3819_v60, %v11294_v11  ;;  %v11304_v30 = vadd.f32 %v8804_v32, %v4201_v58 }
 0x218   :  { %v4205_v63 = vpop.f32.mrb[3].mxu0  ;;  %v11306_v55 = vadd.f32 %v8806_v26, %v4203_v57  ;;  %4501 = vmatmul.mubr.bf16.gmra.mrb[108].mxu1 %v10951_v17 }
 0x219   :  { %v11309_v51 = vadd.f32 %v8808_v31, %v4205_v63  ;;  %4510 = vmatprep.mubr.bf16.mxu1 %v10955_v21  ;;  %10033 = vtanh.f32 %v11304_v30  ;;  %v611_v30 = vld [vmem:[#allocation8 + $0x458] sm:$0xff] }
 0x21a   :  { %5273 = vmatmul.mubr.bf16.gmra.mrb[108].mxu0 %v10951_v17  ;;  %10035 = vtanh.f32 %v11301_v61  ;;  %v6962_v61 = vld [vmem:[%s13083_s4 + $0x100] sm:$0xff] }
 0x21b   :  { %5282 = vmatprep.mubr.bf16.mxu0 %v10955_v21  ;;  %v3823_v37 = vpop.f32.mrb[4].mxu1  ;;  %10037 = vtanh.f32 %v11309_v51  ;;  %v6963_v51 = vld [vmem:[%s13083_s4 + $0x108] sm:$0xff] }
 0x21c   :  { %v8810_v13 = vadd.f32 %v3823_v37, %v11291_v29  ;;  %v3825_v50 = vpop.f32.mrb[5].mxu1  ;;  %10039 = vtanh.f32 %v11306_v55  ;;  %v623_v55 = vld [vmem:[#allocation8 + $0x4b8] sm:$0xff] }
 0x21d   :  { %v4209_v9 = vpop.f32.mrb[4].mxu0  ;;  %v8812_v32 = vadd.f32 %v3825_v50, %v11294_v11  ;;  %v3827_v48 = vpop.f32.mrb[6].mxu1 }
 0x21e   :  { %v4211_v58 = vpop.f32.mrb[5].mxu0  ;;  %v8814_v26 = vadd.f32 %v3827_v48, %v11291_v29  ;;  %v11317_v60 = vadd.f32 %v8810_v13, %v4209_v9  ;;  %v3829_v57 = vpop.f32.mrb[7].mxu1 }
 0x21f   :  { %v4213_v31 = vpop.f32.mrb[6].mxu0  ;;  %v8816_v63 = vadd.f32 %v3829_v57, %v11294_v11  ;;  %v11320_v36 = vadd.f32 %v8812_v32, %v4211_v58 }
 0x220   :  { %v4215_v35 = vpop.f32.mrb[7].mxu0  ;;  %v11322_v49 = vadd.f32 %v8814_v26, %v4213_v31  ;;  %4511 = vmatmul.mubr.bf16.gmra.mrb[112].mxu1 %v10963_v14 }
 0x221   :  { %v11325_v37 = vadd.f32 %v8816_v63, %v4215_v35  ;;  %4520 = vmatprep.mubr.bf16.mxu1 %v10967_v12  ;;  %10041 = vtanh.f32 %v11320_v36  ;;  %v13639_v36 = vld [vmem:[#allocation20_spill] sm:$0xff] }
 0x222   :  { %5283 = vmatmul.mubr.bf16.gmra.mrb[112].mxu0 %v10963_v14  ;;  %10043 = vtanh.f32 %v11317_v60 }
 0x223   :  { %5292 = vmatprep.mubr.bf16.mxu0 %v10967_v12  ;;  %v3833_v13 = vpop.f32.mrb[8].mxu1  ;;  %10045 = vtanh.f32 %v11325_v37 }
 0x224   :  { %v8818_v50 = vadd.f32 %v3833_v13, %v11291_v29  ;;  %v3835_v9 = vpop.f32.mrb[9].mxu1  ;;  %10047 = vtanh.f32 %v11322_v49  ;;  %v6967_v49 = vld [vmem:[%s13083_s4 + $0x128] sm:$0xff] }
 0x225   :  { %v4219_v48 = vpop.f32.mrb[8].mxu0  ;;  %v8820_v32 = vadd.f32 %v3835_v9, %v11294_v11  ;;  %v3837_v58 = vpop.f32.mrb[10].mxu1 }
 0x226   :  { %v4221_v26 = vpop.f32.mrb[9].mxu0  ;;  %v8822_v57 = vadd.f32 %v3837_v58, %v11291_v29  ;;  %v11333_v31 = vadd.f32 %v8818_v50, %v4219_v48  ;;  %v3839_v35 = vpop.f32.mrb[11].mxu1 }
 0x227   :  { %v4223_v63 = vpop.f32.mrb[10].mxu0  ;;  %v8824_v14 = vadd.f32 %v3839_v35, %v11294_v11  ;;  %v11336_v21 = vadd.f32 %v8820_v32, %v4221_v26 }
 0x228   :  { %v4225_v12 = vpop.f32.mrb[11].mxu0  ;;  %v11338_v17 = vadd.f32 %v8822_v57, %v4223_v63  ;;  %4521 = vmatmul.mubr.bf16.gmra.mrb[116].mxu1 %v10975_v46 }
 0x229   :  { %v11341_v13 = vadd.f32 %v8824_v14, %v4225_v12  ;;  %4530 = vmatprep.mubr.bf16.mxu1 %v10979_v59  ;;  %10049 = vtanh.f32 %v11336_v21  ;;  %v11894_v21 = vld [vmem:[#allocation8 + $0x818] sm:$0xff] }
 0x22a   :  { %5293 = vmatmul.mubr.bf16.gmra.mrb[116].mxu0 %v10975_v46  ;;  %10051 = vtanh.f32 %v11333_v31  ;;  %v6968_v31 = vld [vmem:[%s13083_s4 + $0x130] sm:$0xff] }
 0x22b   :  { %5302 = vmatprep.mubr.bf16.mxu0 %v10979_v59  ;;  %v3843_v50 = vpop.f32.mrb[12].mxu1  ;;  %10053 = vtanh.f32 %v11341_v13 }
 0x22c   :  { %v8826_v9 = vadd.f32 %v3843_v50, %v11291_v29  ;;  %v3845_v48 = vpop.f32.mrb[13].mxu1  ;;  %10055 = vtanh.f32 %v11338_v17  ;;  %v6971_v17 = vld [vmem:[%s13083_s4 + $0x148] sm:$0xff] }
 0x22d   :  { %v4229_v58 = vpop.f32.mrb[12].mxu0  ;;  %v8828_v32 = vadd.f32 %v3845_v48, %v11294_v11  ;;  %v3847_v26 = vpop.f32.mrb[14].mxu1 }
 0x22e   :  { %v4231_v57 = vpop.f32.mrb[13].mxu0  ;;  %v8830_v35 = vadd.f32 %v3847_v26, %v11291_v29  ;;  %v11349_v63 = vadd.f32 %v8826_v9, %v4229_v58  ;;  %v3849_v14 = vpop.f32.mrb[15].mxu1 }
 0x22f   :  { %v4233_v12 = vpop.f32.mrb[14].mxu0  ;;  %v8832_v46 = vadd.f32 %v3849_v14, %v11294_v11  ;;  %v11352_v44 = vadd.f32 %v8828_v32, %v4231_v57 }
 0x230   :  { %v4235_v59 = vpop.f32.mrb[15].mxu0  ;;  %v11354_v40 = vadd.f32 %v8830_v35, %v4233_v12  ;;  %4531 = vmatmul.mubr.bf16.gmra.mrb[120].mxu1 %v10987_v1 }
 0x231   :  { %v11357_v50 = vadd.f32 %v8832_v46, %v4235_v59  ;;  %4540 = vmatprep.mubr.bf16.mxu1 %v10991_v41  ;;  %10057 = vtanh.f32 %v11352_v44 }
 0x232   :  { %5303 = vmatmul.mubr.bf16.gmra.mrb[120].mxu0 %v10987_v1  ;;  %10059 = vtanh.f32 %v11349_v63  ;;  %v6972_v63 = vld [vmem:[%s13083_s4 + $0x150] sm:$0xff] }
 0x233   :  { %5312 = vmatprep.mubr.bf16.mxu0 %v10991_v41  ;;  %v3853_v9 = vpop.f32.mrb[16].mxu1  ;;  %10061 = vtanh.f32 %v11357_v50 }
 0x234   :  { %v8834_v48 = vadd.f32 %v3853_v9, %v11291_v29  ;;  %v3855_v58 = vpop.f32.mrb[17].mxu1  ;;  %v13519_v9 = vld [vmem:[#allocation77_spill] sm:$0xff]  ;;  %10063 = vtanh.f32 %v11354_v40 }
 0x235   :  { %v4239_v26 = vpop.f32.mrb[16].mxu0  ;;  %v8836_v32 = vadd.f32 %v3855_v58, %v11294_v11  ;;  %v3857_v57 = vpop.f32.mrb[18].mxu1  ;;  %v13521_v58 = vld [vmem:[#allocation79_spill] sm:$0xff]  ;;  %v6975_v40 = vld [vmem:[%s13083_s4 + $0x168] sm:$0xff] }
 0x236   :  { %v4241_v35 = vpop.f32.mrb[17].mxu0  ;;  %v8838_v14 = vadd.f32 %v3857_v57, %v11291_v29  ;;  %v11365_v12 = vadd.f32 %v8834_v48, %v4239_v26  ;;  %v3859_v46 = vpop.f32.mrb[19].mxu1 }
 0x237   :  { %v4243_v59 = vpop.f32.mrb[18].mxu0  ;;  %v8840_v1 = vadd.f32 %v3859_v46, %v11294_v11  ;;  %v11368_v7 = vadd.f32 %v8836_v32, %v4241_v35  ;;  %v737_v32 = vld [vmem:[#allocation8 + $0x848] sm:$0xff] }
 0x238   :  { %13516 = vst [vmem:[#allocation144_spill] sm:$0xff] %v11365_v12  ;;  %v4245_v41 = vpop.f32.mrb[19].mxu0  ;;  %v11370_v4 = vadd.f32 %v8838_v14, %v4243_v59  ;;  %4541 = vmatmul.mubr.bf16.gmra.mrb[124].mxu1 %v13519_v9  ;;  %v741_v35 = vld [vmem:[#allocation8 + $0x868] sm:$0xff] }
 0x239   :  { %13517 = vst [vmem:[#allocation145_spill] sm:$0xff] %v11368_v7  ;;  %v11373_v28 = vadd.f32 %v8840_v1, %v4245_v41  ;;  %4583 = vmatprep.mubr.bf16.mxu1 %v13521_v58  ;;  %v742_v1 = vld [vmem:[#allocation8 + $0x870] sm:$0xff]  ;;  %v8364_v10 = vcombine.high %v737_v32, %v741_v35  ;;  %v761_v7 = vld [vmem:[#allocation8 + $0x908] sm:$0xff] }
 0x23a   :  { %13518 = vst [vmem:[#allocation146_spill] sm:$0xff] %v11370_v4  ;;  %5313 = vmatmul.mubr.bf16.gmra.mrb[124].mxu0 %v13519_v9  ;;  %v8366_v4 = vcombine.high %v738_v43, %v742_v1 }
 0x23b   :  { %13520 = vst [vmem:[#allocation147_spill] sm:$0xff] %v11373_v28  ;;  %5355 = vmatprep.mubr.bf16.mxu0 %v13521_v58  ;;  %v3863_v48 = vpop.f32.mrb[20].mxu1 }
 0x23c   :  { %v8842_v26 = vadd.f32 %v3863_v48, %v11291_v29  ;;  %v3865_v57 = vpop.f32.mrb[21].mxu1 }
 0x23d   :  { %v4249_v46 = vpop.f32.mrb[20].mxu0  ;;  %v8844_v14 = vadd.f32 %v3865_v57, %v11294_v11  ;;  %v3867_v59 = vpop.f32.mrb[22].mxu1  ;;  %v13525_v57 = vld [vmem:[#allocation81_spill] sm:$0xff] }
 0x23e   :  { %v4251_v23 = vpop.f32.mrb[21].mxu0  ;;  %v8846_v41 = vadd.f32 %v3867_v59, %v11291_v29  ;;  %v11381_v9 = vadd.f32 %v8842_v26, %v4249_v46  ;;  %v3869_v38 = vpop.f32.mrb[23].mxu1  ;;  %v11391_v59 = vld [vmem:[#allocation8 + $0xc28] sm:$0xff]  ;;  %v746_v46 = vld [vmem:[#allocation8 + $0x890] sm:$0xff] }
 0x23f   :  { %v4253_v52 = vpop.f32.mrb[22].mxu0  ;;  %v8848_v58 = vadd.f32 %v3869_v38, %v11294_v11  ;;  %v11384_v45 = vadd.f32 %v8844_v14, %v4251_v23  ;;  %v13527_v38 = vcombine.low %v11231_v62, %v11233_v22  ;;  %v8363_v23 = vcombine.low %v737_v32, %v741_v35  ;;  %v750_v14 = vld [vmem:[#allocation8 + $0x8b0] sm:$0xff]  ;;  %v753_v35 = vld [vmem:[#allocation8 + $0x8c8] sm:$0xff] }
 0x240   :  { %13522 = vst [vmem:[#allocation148_spill] sm:$0xff] %v11381_v9  ;;  %v4255_v48 = vpop.f32.mrb[23].mxu0  ;;  %v11386_v25 = vadd.f32 %v8846_v41, %v4253_v52  ;;  %4584 = vmatmul.mubr.bf16.vlgmr.msra.gmra.mrb[64].mxu1 %v13525_v57  ;;  %v13528_v41 = vld [vmem:[#allocation83_spill] sm:$0xff]  ;;  %v8374_v52 = vcombine.high %v746_v46, %v750_v14 }
 0x241   :  { %13523 = vst [vmem:[#allocation149_spill] sm:$0xff] %v11384_v45  ;;  %v11393_v26 = vadd.f32 %v8848_v58, %v4255_v48  ;;  %4745 = vmatpush1.bf16.msra.mxu1 %v13527_v38  ;;  %4593 = vmatprep.mubr.bf16.mxu1 %v13528_v41  ;;  %v13529_v58 = vcombine.low %v11267_v3, %v11269_v42  ;;  %v757_v38 = vld [vmem:[#allocation8 + $0x8e8] sm:$0xff]  ;;  %v754_v45 = vld [vmem:[#allocation8 + $0x8d0] sm:$0xff] }
 0x242   :  { %13524 = vst [vmem:[#allocation150_spill] sm:$0xff] %v11386_v25  ;;  %5356 = vmatmul.mubr.bf16.vlgmr.msra.gmra.mrb[64].mxu0 %v13525_v57  ;;  %v8372_v25 = vcombine.high %v745_v5, %v749_v33  ;;  %4746 = vmatprep.subr.bf16.mxu1 %v8364_v10  ;;  %v8365_v48 = vcombine.low %v738_v43, %v742_v1  ;;  %v758_v10 = vld [vmem:[#allocation8 + $0x8f0] sm:$0xff] }
 0x243   :  { %13526 = vst [vmem:[#allocation151_spill] sm:$0xff] %v11393_v26  ;;  %5365 = vmatprep.mubr.bf16.mxu0 %v13528_v41  ;;  %v3873_v9 = vpop.f32.mrb[24].mxu1  ;;  %5517 = vmatpush1.bf16.msra.mxu0 %v13529_v58  ;;  %v8380_v28 = vcombine.high %v753_v35, %v757_v38 }
 0x244   :  { %v8850_v22 = vadd.f32 %v3873_v9, %v11291_v29  ;;  %v3875_v62 = vpop.f32.mrb[25].mxu1  ;;  %5518 = vmatprep.subr.bf16.mxu0 %v8366_v4  ;;  %v8371_v9 = vcombine.low %v745_v5, %v749_v33  ;;  %v762_v33 = vld [vmem:[#allocation8 + $0x910] sm:$0xff] }
 0x245   :  { %v4259_v32 = vpop.f32.mrb[24].mxu0  ;;  %v8852_v57 = vadd.f32 %v3875_v62, %v11294_v11  ;;  %v3877_v26 = vpop.f32.mrb[26].mxu1  ;;  %4747 = vmatpush1.bf16.msra.mxu1 %v8363_v23  ;;  %v8373_v62 = vcombine.low %v746_v46, %v750_v14  ;;  %v13533_v23 = vld [vmem:[#allocation85_spill] sm:$0xff]  ;;  %v766_v5 = vld [vmem:[#allocation8 + $0x930] sm:$0xff] }
 0x246   :  { %v4261_v41 = vpop.f32.mrb[25].mxu0  ;;  %v8854_v47 = vadd.f32 %v3877_v26, %v11291_v29  ;;  %v11409_v3 = vadd.f32 %v8850_v22, %v4259_v32  ;;  %v3879_v43 = vpop.f32.mrb[27].mxu1  ;;  %4748 = vmatprep.subr.bf16.mxu1 %v8372_v25  ;;  %v765_v26 = vld [vmem:[#allocation8 + $0x928] sm:$0xff]  ;;  %v8382_v22 = vcombine.high %v754_v45, %v758_v10  ;;  %v13535_v25 = vld [vmem:[#allocation87_spill] sm:$0xff] }
 0x247   :  { %v4263_v42 = vpop.f32.mrb[26].mxu0  ;;  %v8856_v1 = vadd.f32 %v3879_v43, %v11294_v11  ;;  %v11412_v58 = vadd.f32 %v8852_v57, %v4261_v41  ;;  %5519 = vmatpush1.bf16.msra.mxu0 %v8365_v48  ;;  %v8379_v57 = vcombine.low %v753_v35, %v757_v38  ;;  %v8388_v46 = vcombine.high %v761_v7, %v765_v26  ;;  %v769_v14 = vld [vmem:[#allocation8 + $0x948] sm:$0xff] }
 0x248   :  { %13530 = vst [vmem:[#allocation152_spill] sm:$0xff] %v11409_v3  ;;  %v4265_v4 = vpop.f32.mrb[27].mxu0  ;;  %v11414_v12 = vadd.f32 %v8854_v47, %v4263_v42  ;;  %4594 = vmatmul.mubr.bf16.gmra.mrb[68].mxu1 %v13533_v23  ;;  %5520 = vmatprep.subr.bf16.mxu0 %v8374_v52  ;;  %v773_v41 = vld [vmem:[#allocation8 + $0x968] sm:$0xff]  ;;  %v8381_v52 = vcombine.low %v754_v45, %v758_v10 }
 0x249   :  { %13531 = vst [vmem:[#allocation153_spill] sm:$0xff] %v11412_v58  ;;  %v11417_v32 = vadd.f32 %v8856_v1, %v4265_v4  ;;  %4603 = vmatprep.mubr.bf16.mxu1 %v13535_v25  ;;  %4749 = vmatpush1.bf16.msra.mxu1 %v8371_v9  ;;  %v8390_v1 = vcombine.high %v762_v33, %v766_v5  ;;  %v774_v9 = vld [vmem:[#allocation8 + $0x970] sm:$0xff]  ;;  %v13539_v58 = vld [vmem:[#allocation89_spill] sm:$0xff] }
 0x24a   :  { %13532 = vst [vmem:[#allocation154_spill] sm:$0xff] %v11414_v12  ;;  %5366 = vmatmul.mubr.bf16.gmra.mrb[68].mxu0 %v13533_v23  ;;  %4750 = vmatprep.subr.bf16.mxu1 %v8380_v28  ;;  %v8387_v45 = vcombine.low %v761_v7, %v765_v26  ;;  %v8396_v10 = vcombine.high %v769_v14, %v773_v41  ;;  %v13541_v7 = vld [vmem:[#allocation91_spill] sm:$0xff] }
 0x24b   :  { %13534 = vst [vmem:[#allocation155_spill] sm:$0xff] %v11417_v32  ;;  %5375 = vmatprep.mubr.bf16.mxu0 %v13535_v25  ;;  %v3883_v47 = vpop.f32.mrb[28].mxu1  ;;  %5521 = vmatpush1.bf16.msra.mxu0 %v8373_v62  ;;  %v770_v25 = vld [vmem:[#allocation8 + $0x950] sm:$0xff] }
 0x24c   :  { %v8858_v48 = vadd.f32 %v3883_v47, %v11291_v29  ;;  %v3885_v43 = vpop.f32.mrb[29].mxu1  ;;  %5522 = vmatprep.subr.bf16.mxu0 %v8382_v22  ;;  %v782_v26 = vld [vmem:[#allocation8 + $0x9b0] sm:$0xff] }
 0x24d   :  { %v4269_v42 = vpop.f32.mrb[28].mxu0  ;;  %v8860_v4 = vadd.f32 %v3885_v43, %v11294_v11  ;;  %v3887_v23 = vpop.f32.mrb[30].mxu1  ;;  %4751 = vmatpush1.bf16.msra.mxu1 %v8379_v57  ;;  %v8389_v43 = vcombine.low %v762_v33, %v766_v5  ;;  %v8395_v33 = vcombine.low %v769_v14, %v773_v41  ;;  %v785_v57 = vld [vmem:[#allocation8 + $0x9c8] sm:$0xff] }
 0x24e   :  { %v4271_v12 = vpop.f32.mrb[29].mxu0  ;;  %v8862_v35 = vadd.f32 %v3887_v23, %v11291_v29  ;;  %v11425_v28 = vadd.f32 %v8858_v48, %v4269_v42  ;;  %v3889_v38 = vpop.f32.mrb[31].mxu1  ;;  %4752 = vmatprep.subr.bf16.mxu1 %v8388_v46  ;;  %v777_v23 = vld [vmem:[#allocation8 + $0x988] sm:$0xff]  ;;  %v8398_v42 = vcombine.high %v770_v25, %v774_v9 }
 0x24f   :  { %v4273_v32 = vpop.f32.mrb[30].mxu0  ;;  %v8864_v62 = vadd.f32 %v3889_v38, %v11294_v11  ;;  %v11428_v47 = vadd.f32 %v8860_v4, %v4271_v12  ;;  %5523 = vmatpush1.bf16.msra.mxu0 %v8381_v52  ;;  %v781_v48 = vld [vmem:[#allocation8 + $0x9a8] sm:$0xff]  ;;  %v778_v12 = vld [vmem:[#allocation8 + $0x990] sm:$0xff]  ;;  %v8397_v52 = vcombine.low %v770_v25, %v774_v9 }
 0x250   :  { %13536 = vst [vmem:[#allocation156_spill] sm:$0xff] %v11425_v28  ;;  %v4275_v22 = vpop.f32.mrb[31].mxu0  ;;  %v11430_v3 = vadd.f32 %v8862_v35, %v4273_v32  ;;  %4604 = vmatmul.mubr.bf16.gmra.mrb[72].mxu1 %v13539_v58  ;;  %5524 = vmatprep.subr.bf16.mxu0 %v8390_v1  ;;  %v8404_v5 = vcombine.high %v777_v23, %v781_v48  ;;  %v789_v46 = vld [vmem:[#allocation8 + $0x9e8] sm:$0xff] }
 0x251   :  { %13537 = vst [vmem:[#allocation157_spill] sm:$0xff] %v11428_v47  ;;  %v11433_v28 = vadd.f32 %v8864_v62, %v4275_v22  ;;  %4613 = vmatprep.mubr.bf16.mxu1 %v13541_v7  ;;  %4753 = vmatpush1.bf16.msra.mxu1 %v8387_v45  ;;  %v8406_v38 = vcombine.high %v778_v12, %v782_v26  ;;  %v790_v45 = vld [vmem:[#allocation8 + $0x9f0] sm:$0xff]  ;;  %v13545_v47 = vld [vmem:[#allocation93_spill] sm:$0xff] }
 0x252   :  { %13538 = vst [vmem:[#allocation158_spill] sm:$0xff] %v11430_v3  ;;  %5376 = vmatmul.mubr.bf16.gmra.mrb[72].mxu0 %v13539_v58  ;;  %4754 = vmatprep.subr.bf16.mxu1 %v8396_v10  ;;  %v8403_v25 = vcombine.low %v777_v23, %v781_v48  ;;  %v8412_v9 = vcombine.high %v785_v57, %v789_v46  ;;  %v13547_v23 = vld [vmem:[#allocation95_spill] sm:$0xff] }
 0x253   :  { %13540 = vst [vmem:[#allocation159_spill] sm:$0xff] %v11433_v28  ;;  %5385 = vmatprep.mubr.bf16.mxu0 %v13541_v7  ;;  %v3893_v32 = vpop.f32.mrb[32].mxu1  ;;  %5525 = vmatpush1.bf16.msra.mxu0 %v8389_v43  ;;  %v786_v7 = vld [vmem:[#allocation8 + $0x9d0] sm:$0xff] }
 0x254   :  { %v8866_v1 = vadd.f32 %v3893_v32, %v11291_v29  ;;  %v3895_v4 = vpop.f32.mrb[33].mxu1  ;;  %5526 = vmatprep.subr.bf16.mxu0 %v8398_v42  ;;  %v798_v48 = vld [vmem:[#allocation8 + $0xa30] sm:$0xff] }
 0x255   :  { %v4279_v35 = vpop.f32.mrb[32].mxu0  ;;  %v8868_v62 = vadd.f32 %v3895_v4, %v11294_v11  ;;  %v3897_v22 = vpop.f32.mrb[34].mxu1  ;;  %4755 = vmatpush1.bf16.msra.mxu1 %v8395_v33  ;;  %v8405_v4 = vcombine.low %v778_v12, %v782_v26  ;;  %v8411_v12 = vcombine.low %v785_v57, %v789_v46  ;;  %v801_v33 = vld [vmem:[#allocation8 + $0xa48] sm:$0xff] }
 0x256   :  { %v4281_v58 = vpop.f32.mrb[33].mxu0  ;;  %v8870_v14 = vadd.f32 %v3897_v22, %v11291_v29  ;;  %v11441_v41 = vadd.f32 %v8866_v1, %v4279_v35  ;;  %v3899_v10 = vpop.f32.mrb[35].mxu1  ;;  %4756 = vmatprep.subr.bf16.mxu1 %v8404_v5  ;;  %v793_v22 = vld [vmem:[#allocation8 + $0xa08] sm:$0xff]  ;;  %v8414_v35 = vcombine.high %v786_v7, %v790_v45 }
 0x257   :  { %v4283_v3 = vpop.f32.mrb[34].mxu0  ;;  %v8872_v43 = vadd.f32 %v3899_v10, %v11294_v11  ;;  %v11444_v32 = vadd.f32 %v8868_v62, %v4281_v58  ;;  %5527 = vmatpush1.bf16.msra.mxu0 %v8397_v52  ;;  %v797_v1 = vld [vmem:[#allocation8 + $0xa28] sm:$0xff]  ;;  %v794_v58 = vld [vmem:[#allocation8 + $0xa10] sm:$0xff]  ;;  %v8413_v52 = vcombine.low %v786_v7, %v790_v45 }
 0x258   :  { %13542 = vst [vmem:[#allocation160_spill] sm:$0xff] %v11441_v41  ;;  %v4285_v42 = vpop.f32.mrb[35].mxu0  ;;  %v11446_v28 = vadd.f32 %v8870_v14, %v4283_v3  ;;  %4614 = vmatmul.mubr.bf16.gmra.mrb[76].mxu1 %v13545_v47  ;;  %5528 = vmatprep.subr.bf16.mxu0 %v8406_v38  ;;  %v8420_v26 = vcombine.high %v793_v22, %v797_v1  ;;  %v805_v5 = vld [vmem:[#allocation8 + $0xa68] sm:$0xff] }
 0x259   :  { %13543 = vst [vmem:[#allocation161_spill] sm:$0xff] %v11444_v32  ;;  %v11449_v41 = vadd.f32 %v8872_v43, %v4285_v42  ;;  %4623 = vmatprep.mubr.bf16.mxu1 %v13547_v23  ;;  %4757 = vmatpush1.bf16.msra.mxu1 %v8403_v25  ;;  %v8422_v10 = vcombine.high %v794_v58, %v798_v48  ;;  %v806_v25 = vld [vmem:[#allocation8 + $0xa70] sm:$0xff]  ;;  %v13551_v32 = vld [vmem:[#allocation97_spill] sm:$0xff] }
 0x25a   :  { %13544 = vst [vmem:[#allocation162_spill] sm:$0xff] %v11446_v28  ;;  %5386 = vmatmul.mubr.bf16.gmra.mrb[76].mxu0 %v13545_v47  ;;  %4758 = vmatprep.subr.bf16.mxu1 %v8412_v9  ;;  %v8419_v7 = vcombine.low %v793_v22, %v797_v1  ;;  %v8428_v45 = vcombine.high %v801_v33, %v805_v5  ;;  %v13553_v22 = vld [vmem:[#allocation99_spill] sm:$0xff] }
 0x25b   :  { %13546 = vst [vmem:[#allocation163_spill] sm:$0xff] %v11449_v41  ;;  %5395 = vmatprep.mubr.bf16.mxu0 %v13547_v23  ;;  %v3903_v3 = vpop.f32.mrb[36].mxu1  ;;  %5529 = vmatpush1.bf16.msra.mxu0 %v8405_v4  ;;  %v802_v23 = vld [vmem:[#allocation8 + $0xa50] sm:$0xff] }
 0x25c   :  { %v8874_v38 = vadd.f32 %v3903_v3, %v11291_v29  ;;  %v3905_v62 = vpop.f32.mrb[37].mxu1  ;;  %5530 = vmatprep.subr.bf16.mxu0 %v8414_v35  ;;  %v814_v1 = vld [vmem:[#allocation8 + $0xab0] sm:$0xff] }
 0x25d   :  { %v4289_v14 = vpop.f32.mrb[36].mxu0  ;;  %v8876_v43 = vadd.f32 %v3905_v62, %v11294_v11  ;;  %v3907_v42 = vpop.f32.mrb[38].mxu1  ;;  %4759 = vmatpush1.bf16.msra.mxu1 %v8411_v12  ;;  %v8421_v62 = vcombine.low %v794_v58, %v798_v48  ;;  %v8427_v58 = vcombine.low %v801_v33, %v805_v5  ;;  %v817_v12 = vld [vmem:[#allocation8 + $0xac8] sm:$0xff] }
 0x25e   :  { %v4291_v47 = vpop.f32.mrb[37].mxu0  ;;  %v8878_v57 = vadd.f32 %v3907_v42, %v11291_v29  ;;  %v11457_v46 = vadd.f32 %v8874_v38, %v4289_v14  ;;  %v3909_v9 = vpop.f32.mrb[39].mxu1  ;;  %4760 = vmatprep.subr.bf16.mxu1 %v8420_v26  ;;  %v809_v42 = vld [vmem:[#allocation8 + $0xa88] sm:$0xff]  ;;  %v8430_v14 = vcombine.high %v802_v23, %v806_v25 }
 0x25f   :  { %v4293_v28 = vpop.f32.mrb[38].mxu0  ;;  %v8880_v4 = vadd.f32 %v3909_v9, %v11294_v11  ;;  %v11460_v3 = vadd.f32 %v8876_v43, %v4291_v47  ;;  %5531 = vmatpush1.bf16.msra.mxu0 %v8413_v52  ;;  %v813_v38 = vld [vmem:[#allocation8 + $0xaa8] sm:$0xff]  ;;  %v810_v47 = vld [vmem:[#allocation8 + $0xa90] sm:$0xff]  ;;  %v8429_v52 = vcombine.low %v802_v23, %v806_v25 }
 0x260   :  { %13548 = vst [vmem:[#allocation164_spill] sm:$0xff] %v11457_v46  ;;  %v4295_v35 = vpop.f32.mrb[39].mxu0  ;;  %v11462_v41 = vadd.f32 %v8878_v57, %v4293_v28  ;;  %4624 = vmatmul.mubr.bf16.gmra.mrb[80].mxu1 %v13551_v32  ;;  %5532 = vmatprep.subr.bf16.mxu0 %v8422_v10  ;;  %v8436_v48 = vcombine.high %v809_v42, %v813_v38  ;;  %v821_v26 = vld [vmem:[#allocation8 + $0xae8] sm:$0xff] }
 0x261   :  { %13549 = vst [vmem:[#allocation165_spill] sm:$0xff] %v11460_v3  ;;  %v11465_v46 = vadd.f32 %v8880_v4, %v4295_v35  ;;  %4633 = vmatprep.mubr.bf16.mxu1 %v13553_v22  ;;  %4761 = vmatpush1.bf16.msra.mxu1 %v8419_v7  ;;  %v8438_v9 = vcombine.high %v810_v47, %v814_v1  ;;  %v822_v7 = vld [vmem:[#allocation8 + $0xaf0] sm:$0xff]  ;;  %v13557_v3 = vld [vmem:[#allocation101_spill] sm:$0xff] }
 0x262   :  { %13550 = vst [vmem:[#allocation166_spill] sm:$0xff] %v11462_v41  ;;  %5396 = vmatmul.mubr.bf16.gmra.mrb[80].mxu0 %v13551_v32  ;;  %4762 = vmatprep.subr.bf16.mxu1 %v8428_v45  ;;  %v8435_v23 = vcombine.low %v809_v42, %v813_v38  ;;  %v8444_v25 = vcombine.high %v817_v12, %v821_v26  ;;  %v13559_v42 = vld [vmem:[#allocation103_spill] sm:$0xff] }
 0x263   :  { %13552 = vst [vmem:[#allocation167_spill] sm:$0xff] %v11465_v46  ;;  %5405 = vmatprep.mubr.bf16.mxu0 %v13553_v22  ;;  %v3913_v28 = vpop.f32.mrb[40].mxu1  ;;  %5533 = vmatpush1.bf16.msra.mxu0 %v8421_v62  ;;  %v818_v22 = vld [vmem:[#allocation8 + $0xad0] sm:$0xff] }
 0x264   :  { %v8882_v10 = vadd.f32 %v3913_v28, %v11291_v29  ;;  %v3915_v43 = vpop.f32.mrb[41].mxu1  ;;  %5534 = vmatprep.subr.bf16.mxu0 %v8430_v14  ;;  %v830_v38 = vld [vmem:[#allocation8 + $0xb30] sm:$0xff] }
 0x265   :  { %v4299_v57 = vpop.f32.mrb[40].mxu0  ;;  %v8884_v4 = vadd.f32 %v3915_v43, %v11294_v11  ;;  %v3917_v35 = vpop.f32.mrb[42].mxu1  ;;  %4763 = vmatpush1.bf16.msra.mxu1 %v8427_v58  ;;  %v8437_v43 = vcombine.low %v810_v47, %v814_v1  ;;  %v8443_v47 = vcombine.low %v817_v12, %v821_v26  ;;  %v833_v58 = vld [vmem:[#allocation8 + $0xb48] sm:$0xff] }
 0x266   :  { %v4301_v32 = vpop.f32.mrb[41].mxu0  ;;  %v8886_v33 = vadd.f32 %v3917_v35, %v11291_v29  ;;  %v11473_v5 = vadd.f32 %v8882_v10, %v4299_v57  ;;  %v3919_v45 = vpop.f32.mrb[43].mxu1  ;;  %4764 = vmatprep.subr.bf16.mxu1 %v8436_v48  ;;  %v825_v35 = vld [vmem:[#allocation8 + $0xb08] sm:$0xff]  ;;  %v8446_v57 = vcombine.high %v818_v22, %v822_v7 }
 0x267   :  { %v4303_v41 = vpop.f32.mrb[42].mxu0  ;;  %v8888_v62 = vadd.f32 %v3919_v45, %v11294_v11  ;;  %v11476_v28 = vadd.f32 %v8884_v4, %v4301_v32  ;;  %5535 = vmatpush1.bf16.msra.mxu0 %v8429_v52  ;;  %v829_v10 = vld [vmem:[#allocation8 + $0xb28] sm:$0xff]  ;;  %v826_v32 = vld [vmem:[#allocation8 + $0xb10] sm:$0xff]  ;;  %v8445_v52 = vcombine.low %v818_v22, %v822_v7 }
 0x268   :  { %13554 = vst [vmem:[#allocation168_spill] sm:$0xff] %v11473_v5  ;;  %v4305_v14 = vpop.f32.mrb[43].mxu0  ;;  %v11478_v46 = vadd.f32 %v8886_v33, %v4303_v41  ;;  %4634 = vmatmul.mubr.bf16.gmra.mrb[84].mxu1 %v13557_v3  ;;  %5536 = vmatprep.subr.bf16.mxu0 %v8438_v9  ;;  %v8452_v1 = vcombine.high %v825_v35, %v829_v10  ;;  %v837_v48 = vld [vmem:[#allocation8 + $0xb68] sm:$0xff] }
 0x269   :  { %13555 = vst [vmem:[#allocation169_spill] sm:$0xff] %v11476_v28  ;;  %v11481_v5 = vadd.f32 %v8888_v62, %v4305_v14  ;;  %4643 = vmatprep.mubr.bf16.mxu1 %v13559_v42  ;;  %4765 = vmatpush1.bf16.msra.mxu1 %v8435_v23  ;;  %v8454_v45 = vcombine.high %v826_v32, %v830_v38  ;;  %v838_v23 = vld [vmem:[#allocation8 + $0xb70] sm:$0xff]  ;;  %v13562_v28 = vld [vmem:[#allocation105_spill] sm:$0xff] }
 0x26a   :  { %13556 = vst [vmem:[#allocation170_spill] sm:$0xff] %v11478_v46  ;;  %5406 = vmatmul.mubr.bf16.gmra.mrb[84].mxu0 %v13557_v3  ;;  %4766 = vmatprep.subr.bf16.mxu1 %v8444_v25  ;;  %v8451_v22 = vcombine.low %v825_v35, %v829_v10  ;;  %v8460_v7 = vcombine.high %v833_v58, %v837_v48  ;;  %v13564_v35 = vld [vmem:[#allocation107_spill] sm:$0xff] }
 0x26b   :  { %13558 = vst [vmem:[#allocation171_spill] sm:$0xff] %v11481_v5  ;;  %5415 = vmatprep.mubr.bf16.mxu0 %v13559_v42  ;;  %v3923_v41 = vpop.f32.mrb[44].mxu1  ;;  %5537 = vmatpush1.bf16.msra.mxu0 %v8437_v43  ;;  %v834_v42 = vld [vmem:[#allocation8 + $0xb50] sm:$0xff] }
 0x26c   :  { %v8890_v9 = vadd.f32 %v3923_v41, %v11291_v29  ;;  %v3925_v4 = vpop.f32.mrb[45].mxu1  ;;  %5538 = vmatprep.subr.bf16.mxu0 %v8446_v57  ;;  %v846_v10 = vld [vmem:[#allocation8 + $0xbb0] sm:$0xff] }
 0x26d   :  { %v4309_v33 = vpop.f32.mrb[44].mxu0  ;;  %v8892_v62 = vadd.f32 %v3925_v4, %v11294_v11  ;;  %v3927_v14 = vpop.f32.mrb[46].mxu1  ;;  %4767 = vmatpush1.bf16.msra.mxu1 %v8443_v47  ;;  %v8453_v4 = vcombine.low %v826_v32, %v830_v38  ;;  %v8459_v32 = vcombine.low %v833_v58, %v837_v48  ;;  %v8461_v47 = vcombine.low %v834_v42, %v838_v23 }
 0x26e   :  { %v4311_v3 = vpop.f32.mrb[45].mxu0  ;;  %v8894_v12 = vadd.f32 %v3927_v14, %v11291_v29  ;;  %v11489_v26 = vadd.f32 %v8890_v9, %v4309_v33  ;;  %v3929_v25 = vpop.f32.mrb[47].mxu1  ;;  %4768 = vmatprep.subr.bf16.mxu1 %v8452_v1  ;;  %v841_v14 = vld [vmem:[#allocation8 + $0xb88] sm:$0xff]  ;;  %v8462_v33 = vcombine.high %v834_v42, %v838_v23 }
 0x26f   :  { %v4313_v46 = vpop.f32.mrb[46].mxu0  ;;  %v8896_v43 = vadd.f32 %v3929_v25, %v11294_v11  ;;  %v11492_v41 = vadd.f32 %v8892_v62, %v4311_v3  ;;  %5539 = vmatpush1.bf16.msra.mxu0 %v8445_v52  ;;  %v845_v9 = vld [vmem:[#allocation8 + $0xba8] sm:$0xff]  ;;  %v842_v3 = vld [vmem:[#allocation8 + $0xb90] sm:$0xff] }
 0x270   :  { %13560 = vst [vmem:[#allocation172_spill] sm:$0xff] %v11489_v26  ;;  %v4315_v57 = vpop.f32.mrb[47].mxu0  ;;  %v11494_v5 = vadd.f32 %v8894_v12, %v4313_v46  ;;  %4644 = vmatmul.mubr.bf16.gmra.mrb[88].mxu1 %v13562_v28  ;;  %5540 = vmatprep.subr.bf16.mxu0 %v8454_v45  ;;  %v8468_v38 = vcombine.high %v841_v14, %v845_v9  ;;  %v849_v62 = vld [vmem:[#allocation8 + $0xbc8] sm:$0xff] }
 0x271   :  { %v11497_v26 = vadd.f32 %v8896_v43, %v4315_v57  ;;  %4653 = vmatprep.mubr.bf16.mxu1 %v13564_v35  ;;  %4769 = vmatpush1.bf16.msra.mxu1 %v8451_v22  ;;  %v853_v12 = vld [vmem:[#allocation8 + $0xbe8] sm:$0xff]  ;;  %v8470_v25 = vcombine.high %v842_v3, %v846_v10  ;;  %v854_v22 = vld [vmem:[#allocation8 + $0xbf0] sm:$0xff]  ;;  %v8467_v23 = vcombine.low %v841_v14, %v845_v9 }
 0x272   :  { %13561 = vst [vmem:[#allocation173_spill] sm:$0xff] %v11494_v5  ;;  %5416 = vmatmul.mubr.bf16.gmra.mrb[88].mxu0 %v13562_v28  ;;  %4770 = vmatprep.subr.bf16.mxu1 %v8460_v7 }
 0x273   :  { %13563 = vst [vmem:[#allocation174_spill] sm:$0xff] %v11497_v26  ;;  %5425 = vmatprep.mubr.bf16.mxu0 %v13564_v35  ;;  %v3933_v46 = vpop.f32.mrb[48].mxu1  ;;  %5541 = vmatpush1.bf16.msra.mxu0 %v8453_v4  ;;  %v850_v35 = vld [vmem:[#allocation8 + $0xbd0] sm:$0xff]  ;;  %v8469_v4 = vcombine.low %v842_v3, %v846_v10  ;;  %v8484_v3 = vcombine.high %v11389_v56, %v11391_v59 }
 0x274   :  { %v8898_v1 = vadd.f32 %v3933_v46, %v11291_v29  ;;  %v3935_v52 = vpop.f32.mrb[49].mxu1  ;;  %5542 = vmatprep.subr.bf16.mxu0 %v8462_v33  ;;  %v8477_v9 = vcombine.low %v850_v35, %v854_v22 }
 0x275   :  { %v4319_v45 = vpop.f32.mrb[48].mxu0  ;;  %v8900_v43 = vadd.f32 %v3935_v52, %v11294_v11  ;;  %v3937_v57 = vpop.f32.mrb[50].mxu1  ;;  %4771 = vmatpush1.bf16.msra.mxu1 %v8459_v32  ;;  %v8476_v52 = vcombine.high %v849_v62, %v853_v12 }
 0x276   :  { %v4321_v28 = vpop.f32.mrb[49].mxu0  ;;  %v8902_v58 = vadd.f32 %v3937_v57, %v11291_v29  ;;  %v11505_v48 = vadd.f32 %v8898_v1, %v4319_v45  ;;  %v3939_v7 = vpop.f32.mrb[51].mxu1  ;;  %4772 = vmatprep.subr.bf16.mxu1 %v8468_v38  ;;  %v8478_v1 = vcombine.high %v850_v35, %v854_v22  ;;  %v11525_v35 = vld [vmem:[#allocation8 + $0xc10] sm:$0xff] }
 0x277   :  { %v4323_v42 = vpop.f32.mrb[50].mxu0  ;;  %v8904_v33 = vadd.f32 %v3939_v7, %v11294_v11  ;;  %v11508_v46 = vadd.f32 %v8900_v43, %v4321_v28  ;;  %5543 = vmatpush1.bf16.msra.mxu0 %v8461_v47  ;;  %v8475_v28 = vcombine.low %v849_v62, %v853_v12  ;;  %v11527_v22 = vld [vmem:[#allocation8 + $0xc30] sm:$0xff] }
 0x278   :  { %v4325_v5 = vpop.f32.mrb[51].mxu0  ;;  %v11510_v26 = vadd.f32 %v8902_v58, %v4323_v42  ;;  %4654 = vmatmul.mubr.bf16.gmra.mrb[92].mxu1 %v11107_v24  ;;  %5544 = vmatprep.subr.bf16.mxu0 %v8470_v25 }
 0x279   :  { %v11513_v45 = vadd.f32 %v8904_v33, %v4325_v5  ;;  %4663 = vmatprep.mubr.bf16.mxu1 %v11111_v39  ;;  %4773 = vmatpush1.bf16.msra.mxu1 %v8467_v23  ;;  %v8486_v23 = vcombine.high %v11525_v35, %v11527_v22 }
 0x27a   :  { %5426 = vmatmul.mubr.bf16.gmra.mrb[92].mxu0 %v11107_v24  ;;  %4774 = vmatprep.subr.bf16.mxu1 %v8476_v52 }
 0x27b   :  { %5435 = vmatprep.mubr.bf16.mxu0 %v11111_v39  ;;  %v3943_v14 = vpop.f32.mrb[52].mxu1  ;;  %5545 = vmatpush1.bf16.msra.mxu0 %v8469_v4  ;;  %v13577_v39 = vld [vmem:[#allocation27_spill] sm:$0xff] }
 0x27c   :  { %v8906_v10 = vadd.f32 %v3943_v14, %v11291_v29  ;;  %v3945_v32 = vpop.f32.mrb[53].mxu1  ;;  %5546 = vmatprep.subr.bf16.mxu0 %v8478_v1 }
 0x27d   :  { %v4329_v5 = vpop.f32.mrb[52].mxu0  ;;  %v8908_v38 = vadd.f32 %v3945_v32, %v11294_v11  ;;  %v3947_v47 = vpop.f32.mrb[54].mxu1  ;;  %4775 = vmatpush1.bf16.msra.mxu1 %v8475_v28 }
 0x27e   :  { %v4331_v25 = vpop.f32.mrb[53].mxu0  ;;  %v8910_v43 = vadd.f32 %v3947_v47, %v11291_v29  ;;  %v11523_v57 = vadd.f32 %v8906_v10, %v4329_v5  ;;  %v3949_v62 = vpop.f32.mrb[55].mxu1  ;;  %4937 = vmatprep.subr.bf16.mxu1 %v8484_v3 }
 0x27f   :  { %v4333_v12 = vpop.f32.mrb[54].mxu0  ;;  %v8912_v58 = vadd.f32 %v3949_v62, %v11294_v11  ;;  %v11530_v7 = vadd.f32 %v8908_v38, %v4331_v25  ;;  %5547 = vmatpush1.bf16.msra.mxu0 %v8477_v9 }
 0x280   :  { %v4335_v42 = vpop.f32.mrb[55].mxu0  ;;  %v11534_v4 = vadd.f32 %v8910_v43, %v4333_v12  ;;  %4664 = vmatmul.mubr.bf16.gmra.mrb[96].mxu1 %v11121_v6  ;;  %5709 = vmatprep.subr.bf16.mxu0 %v8486_v23 }
 0x281   :  { %v11539_v52 = vadd.f32 %v8912_v58, %v4335_v42  ;;  %4673 = vmatprep.mubr.bf16.mxu1 %v11125_v8 }
 0x282   :  { %5436 = vmatmul.mubr.bf16.gmra.mrb[96].mxu0 %v11121_v6  ;;  %v13575_v6 = vld [vmem:[#allocation25_spill] sm:$0xff] }
 0x283   :  { %5445 = vmatprep.mubr.bf16.mxu0 %v11125_v8  ;;  %v3953_v1 = vpop.f32.mrb[56].mxu1 }
 0x284   :  { %v8914_v28 = vadd.f32 %v3953_v1, %v11291_v29  ;;  %v3955_v14 = vpop.f32.mrb[57].mxu1 }
 0x285   :  { %v4339_v9 = vpop.f32.mrb[56].mxu0  ;;  %v8916_v3 = vadd.f32 %v3955_v14, %v11294_v11  ;;  %v3957_v10 = vpop.f32.mrb[58].mxu1 }
 0x286   :  { %v4341_v32 = vpop.f32.mrb[57].mxu0  ;;  %v8918_v5 = vadd.f32 %v3957_v10, %v11291_v29  ;;  %v11547_v38 = vadd.f32 %v8914_v28, %v4339_v9  ;;  %v3959_v47 = vpop.f32.mrb[59].mxu1 }
 0x287   :  { %v4343_v25 = vpop.f32.mrb[58].mxu0  ;;  %v8920_v43 = vadd.f32 %v3959_v47, %v11294_v11  ;;  %v11550_v62 = vadd.f32 %v8916_v3, %v4341_v32 }
 0x288   :  { %v4345_v12 = vpop.f32.mrb[59].mxu0  ;;  %v11552_v58 = vadd.f32 %v8918_v5, %v4343_v25  ;;  %4674 = vmatmul.mubr.bf16.gmra.mrb[100].mxu1 %v11141_v53 }
 0x289   :  { %v11555_v42 = vadd.f32 %v8920_v43, %v4345_v12  ;;  %4683 = vmatprep.mubr.bf16.mxu1 %v11145_v27 }
 0x28a   :  { %5446 = vmatmul.mubr.bf16.gmra.mrb[100].mxu0 %v11141_v53 }
 0x28b   :  { %5455 = vmatprep.mubr.bf16.mxu0 %v11145_v27  ;;  %v3963_v23 = vpop.f32.mrb[60].mxu1 }
 0x28c   :  { %v8922_v1 = vadd.f32 %v3963_v23, %v11291_v29  ;;  %v3965_v28 = vpop.f32.mrb[61].mxu1 }
 0x28d   :  { %v4349_v14 = vpop.f32.mrb[60].mxu0  ;;  %v8924_v9 = vadd.f32 %v3965_v28, %v11294_v11  ;;  %v3967_v3 = vpop.f32.mrb[62].mxu1  ;;  %v13569_v28 = vld [vmem:[#allocation140_spill] sm:$0xff] }
 0x28e   :  { %v4351_v10 = vpop.f32.mrb[61].mxu0  ;;  %v8926_v32 = vadd.f32 %v3967_v3, %v11291_v29  ;;  %v11563_v5 = vadd.f32 %v8922_v1, %v4349_v14  ;;  %v3969_v47 = vpop.f32.mrb[63].mxu1  ;;  %v13565_v29 = vld [vmem:[#allocation132_spill] sm:$0xff]  ;;  %v13568_v1 = vld [vmem:[#allocation138_spill] sm:$0xff]  ;;  %v13570_v14 = vld [vmem:[#allocation19_spill] sm:$0xff] }
 0x28f   :  { %v4353_v25 = vpop.f32.mrb[62].mxu0  ;;  %v8928_v43 = vadd.f32 %v3969_v47, %v11294_v11  ;;  %v11566_v12 = vadd.f32 %v8924_v9, %v4351_v10  ;;  %v13566_v11 = vld [vmem:[#allocation134_spill] sm:$0xff] }
 0x290   :  { %v4355_v33 = vpop.f32.mrb[63].mxu0  ;;  %v11568_v27 = vadd.f32 %v8926_v32, %v4353_v25  ;;  %4684 = vmatmul.mubr.bf16.gmra.mrb[104].mxu1 %v11153_v34  ;;  %v865_v9 = vld [vmem:[#allocation8 + $0xc48] sm:$0xff]  ;;  %v866_v10 = vld [vmem:[#allocation8 + $0xc50] sm:$0xff] }
 0x291   :  { %v11571_v23 = vadd.f32 %v8928_v43, %v4355_v33  ;;  %4693 = vmatprep.mubr.bf16.mxu1 %v11157_v19  ;;  %v13567_v33 = vld [vmem:[#allocation136_spill] sm:$0xff]  ;;  %v869_v3 = vld [vmem:[#allocation8 + $0xc68] sm:$0xff]  ;;  %v870_v32 = vld [vmem:[#allocation8 + $0xc70] sm:$0xff] }
 0x292   :  { %5456 = vmatmul.mubr.bf16.gmra.mrb[104].mxu0 %v11153_v34  ;;  %v8492_v47 = vcombine.high %v865_v9, %v869_v3  ;;  %v873_v25 = vld [vmem:[#allocation8 + $0xc88] sm:$0xff]  ;;  %v886_v34 = vld [vmem:[#allocation8 + $0xcf0] sm:$0xff] }
 0x293   :  { %5465 = vmatprep.mubr.bf16.mxu0 %v11157_v19  ;;  %v877_v43 = vld [vmem:[#allocation8 + $0xca8] sm:$0xff] }
 0x294   :  { %v8499_v53 = vcombine.low %v873_v25, %v877_v43  ;;  %v893_v19 = vld [vmem:[#allocation8 + $0xd28] sm:$0xff] }
 0x298   :  { %4694 = vmatmul.mubr.bf16.gmra.mrb[108].mxu1 %v11165_v18 }
 0x299   :  { %4703 = vmatprep.mubr.bf16.mxu1 %v11169_v0 }
 0x29a   :  { %5466 = vmatmul.mubr.bf16.gmra.mrb[108].mxu0 %v11165_v18  ;;  %v8500_v18 = vcombine.high %v873_v25, %v877_v43  ;;  %v898_v25 = vld [vmem:[#allocation8 + $0xd50] sm:$0xff] }
 0x29b   :  { %5475 = vmatprep.mubr.bf16.mxu0 %v11169_v0  ;;  %v13573_v0 = vld [vmem:[#allocation23_spill] sm:$0xff] }
 0x29c   :  { %v902_v43 = vld [vmem:[#allocation8 + $0xd70] sm:$0xff] }
 0x2a0   :  { %4704 = vmatmul.mubr.bf16.gmra.mrb[112].mxu1 %v11177_v2 }
 0x2a1   :  { %4713 = vmatprep.mubr.bf16.mxu1 %v11181_v16 }
 0x2a2   :  { %5476 = vmatmul.mubr.bf16.gmra.mrb[112].mxu0 %v11177_v2  ;;  %v11603_v2 = vld [vmem:[#allocation8 + $0x38] sm:$0xff] }
 0x2a3   :  { %5485 = vmatprep.mubr.bf16.mxu0 %v11181_v16  ;;  %v878_v16 = vld [vmem:[#allocation8 + $0xcb0] sm:$0xff] }
 0x2a8   :  { %4714 = vmatmul.mubr.bf16.gmra.mrb[116].mxu1 %v13565_v29 }
 0x2a9   :  { %4723 = vmatprep.mubr.bf16.mxu1 %v13566_v11 }
 0x2aa   :  { %5486 = vmatmul.mubr.bf16.gmra.mrb[116].mxu0 %v13565_v29  ;;  %v874_v29 = vld [vmem:[#allocation8 + $0xc90] sm:$0xff] }
 0x2ab   :  { %5495 = vmatprep.mubr.bf16.mxu0 %v13566_v11  ;;  %v8494_v11 = vcombine.high %v866_v10, %v870_v32  ;;  %v8501_v8 = vcombine.low %v874_v29, %v878_v16 }
 0x2b0   :  { %4724 = vmatmul.mubr.bf16.gmra.mrb[120].mxu1 %v13567_v33 }
 0x2b1   :  { %4733 = vmatprep.mubr.bf16.mxu1 %v13568_v1 }
 0x2b2   :  { %5496 = vmatmul.mubr.bf16.gmra.mrb[120].mxu0 %v13567_v33  ;;  %v13571_v33 = vld [vmem:[#allocation21_spill] sm:$0xff] }
 0x2b3   :  { %5505 = vmatprep.mubr.bf16.mxu0 %v13568_v1  ;;  %v8491_v1 = vcombine.low %v865_v9, %v869_v3  ;;  %v8502_v9 = vcombine.high %v874_v29, %v878_v16  ;;  %v882_v3 = vld [vmem:[#allocation8 + $0xcd0] sm:$0xff]  ;;  %v897_v29 = vld [vmem:[#allocation8 + $0xd48] sm:$0xff] }
 0x2b4   :  { %v8509_v16 = vcombine.low %v882_v3, %v886_v34 }
 0x2b8   :  { %4734 = vmatmul.mubr.bf16.gmra.mrb[124].mxu1 %v13569_v28 }
 0x2b9   :  { %4776 = vmatprep.mubr.bf16.mxu1 %v13570_v14 }
 0x2ba   :  { %5506 = vmatmul.mubr.bf16.gmra.mrb[124].mxu0 %v13569_v28  ;;  %v13572_v28 = vcombine.low %v11389_v56, %v11391_v59  ;;  %v8493_v56 = vcombine.low %v866_v10, %v870_v32  ;;  %v881_v59 = vld [vmem:[#allocation8 + $0xcc8] sm:$0xff] }
 0x2bb   :  { %5548 = vmatprep.mubr.bf16.mxu0 %v13570_v14  ;;  %v11601_v14 = vld [vmem:[#allocation8 + $0x18] sm:$0xff]  ;;  %v901_v10 = vld [vmem:[#allocation8 + $0xd68] sm:$0xff] }
 0x2c0   :  { %4777 = vmatmul.mubr.bf16.vlgmr.msra.gmra.mrb[64].mxu1 %v13571_v33 }
 0x2c1   :  { %4938 = vmatpush1.bf16.msra.mxu1 %v13572_v28  ;;  %4786 = vmatprep.mubr.bf16.mxu1 %v13573_v0  ;;  %v885_v28 = vld [vmem:[#allocation8 + $0xce8] sm:$0xff] }
 0x2c2   :  { %5549 = vmatmul.mubr.bf16.vlgmr.msra.gmra.mrb[64].mxu0 %v13571_v33  ;;  %4939 = vmatprep.subr.bf16.mxu1 %v8492_v47  ;;  %v13574_v33 = vcombine.low %v11525_v35, %v11527_v22  ;;  %v889_v47 = vld [vmem:[#allocation8 + $0xd08] sm:$0xff]  ;;  %v8510_v35 = vcombine.high %v882_v3, %v886_v34  ;;  %v906_v34 = vld [vmem:[#allocation8 + $0xd90] sm:$0xff] }
 0x2c3   :  { %5558 = vmatprep.mubr.bf16.mxu0 %v13573_v0  ;;  %v8508_v0 = vcombine.high %v881_v59, %v885_v28  ;;  %v13576_v22 = vld [vmem:[#allocation26_spill] sm:$0xff] }
 0x2c4   :  { %5710 = vmatpush1.bf16.msra.mxu0 %v13574_v33  ;;  %v894_v33 = vld [vmem:[#allocation8 + $0xd30] sm:$0xff] }
 0x2c5   :  { %5711 = vmatprep.subr.bf16.mxu0 %v8494_v11  ;;  %4940 = vmatpush1.bf16.msra.mxu1 %v8491_v1  ;;  %v890_v11 = vld [vmem:[#allocation8 + $0xd10] sm:$0xff]  ;;  %v8507_v1 = vcombine.low %v881_v59, %v885_v28  ;;  %v909_v59 = vld [vmem:[#allocation8 + $0xda8] sm:$0xff] }
 0x2c6   :  { %4941 = vmatprep.subr.bf16.mxu1 %v8500_v18  ;;  %v8516_v18 = vcombine.high %v889_v47, %v893_v19  ;;  %v8518_v32 = vcombine.high %v890_v11, %v894_v33  ;;  %v910_v28 = vld [vmem:[#allocation8 + $0xdb0] sm:$0xff] }
 0x2c8   :  { %5712 = vmatpush1.bf16.msra.mxu0 %v8493_v56  ;;  %4787 = vmatmul.mubr.bf16.gmra.mrb[68].mxu1 %v13575_v6  ;;  %v8515_v56 = vcombine.low %v889_v47, %v893_v19  ;;  %v8523_v19 = vcombine.low %v897_v29, %v901_v10  ;;  %v8525_v47 = vcombine.low %v898_v25, %v902_v43 }
 0x2c9   :  { %5713 = vmatprep.subr.bf16.mxu0 %v8502_v9  ;;  %4796 = vmatprep.mubr.bf16.mxu1 %v13576_v22  ;;  %v8524_v9 = vcombine.high %v897_v29, %v901_v10  ;;  %v925_v29 = vld [vmem:[#allocation8 + $0xe28] sm:$0xff] }
 0x2ca   :  { %5559 = vmatmul.mubr.bf16.gmra.mrb[68].mxu0 %v13575_v6  ;;  %4942 = vmatpush1.bf16.msra.mxu1 %v8499_v53  ;;  %v8517_v6 = vcombine.low %v890_v11, %v894_v33  ;;  %v905_v53 = vld [vmem:[#allocation8 + $0xd88] sm:$0xff]  ;;  %v8534_v33 = vcombine.high %v906_v34, %v910_v28 }
 0x2cb   :  { %5568 = vmatprep.mubr.bf16.mxu0 %v13576_v22  ;;  %4943 = vmatprep.subr.bf16.mxu1 %v8508_v0  ;;  %v8526_v0 = vcombine.high %v898_v25, %v902_v43  ;;  %v8532_v3 = vcombine.high %v905_v53, %v909_v59  ;;  %v917_v11 = vld [vmem:[#allocation8 + $0xde8] sm:$0xff]  ;;  %v922_v25 = vld [vmem:[#allocation8 + $0xe10] sm:$0xff] }
 0x2cc   :  { %5714 = vmatpush1.bf16.msra.mxu0 %v8501_v8  ;;  %v13578_v8 = vld [vmem:[#allocation28_spill] sm:$0xff]  ;;  %v13579_v22 = vld [vmem:[#allocation30_spill] sm:$0xff] }
 0x2cd   :  { %5715 = vmatprep.subr.bf16.mxu0 %v8510_v35  ;;  %v913_v35 = vld [vmem:[#allocation8 + $0xdc8] sm:$0xff]  ;;  %v926_v43 = vld [vmem:[#allocation8 + $0xe30] sm:$0xff] }
 0x2ce   :  { %4944 = vmatpush1.bf16.msra.mxu1 %v8507_v1  ;;  %v914_v1 = vld [vmem:[#allocation8 + $0xdd0] sm:$0xff] }
 0x2cf   :  { %4945 = vmatprep.subr.bf16.mxu1 %v8516_v18  ;;  %v918_v18 = vld [vmem:[#allocation8 + $0xdf0] sm:$0xff] }
 0x2d0   :  { %5716 = vmatpush1.bf16.msra.mxu0 %v8509_v16  ;;  %4797 = vmatmul.mubr.bf16.gmra.mrb[72].mxu1 %v13577_v39  ;;  %v8531_v16 = vcombine.low %v905_v53, %v909_v59  ;;  %v8542_v10 = vcombine.high %v914_v1, %v918_v18  ;;  %v8541_v59 = vcombine.low %v914_v1, %v918_v18  ;;  %v938_v1 = vld [vmem:[#allocation8 + $0xe90] sm:$0xff] }
 0x2d1   :  { %5717 = vmatprep.subr.bf16.mxu0 %v8518_v32  ;;  %4806 = vmatprep.mubr.bf16.mxu1 %v13578_v8  ;;  %v8540_v32 = vcombine.high %v913_v35, %v917_v11  ;;  %v942_v18 = vld [vmem:[#allocation8 + $0xeb0] sm:$0xff] }
 0x2d2   :  { %5569 = vmatmul.mubr.bf16.gmra.mrb[72].mxu0 %v13577_v39  ;;  %4946 = vmatpush1.bf16.msra.mxu1 %v8515_v56  ;;  %v8533_v39 = vcombine.low %v906_v34, %v910_v28  ;;  %v921_v56 = vld [vmem:[#allocation8 + $0xe08] sm:$0xff]  ;;  %v8550_v28 = vcombine.high %v922_v25, %v926_v43 }
 0x2d3   :  { %5578 = vmatprep.mubr.bf16.mxu0 %v13578_v8  ;;  %4947 = vmatprep.subr.bf16.mxu1 %v8524_v9  ;;  %v8539_v9 = vcombine.low %v913_v35, %v917_v11  ;;  %v8548_v53 = vcombine.high %v921_v56, %v925_v29  ;;  %v933_v34 = vld [vmem:[#allocation8 + $0xe68] sm:$0xff] }
 0x2d4   :  { %5718 = vmatpush1.bf16.msra.mxu0 %v8517_v6  ;;  %v13580_v6 = vld [vmem:[#allocation32_spill] sm:$0xff]  ;;  %v13581_v8 = vld [vmem:[#allocation34_spill] sm:$0xff] }
 0x2d5   :  { %5719 = vmatprep.subr.bf16.mxu0 %v8526_v0  ;;  %v929_v0 = vld [vmem:[#allocation8 + $0xe48] sm:$0xff] }
 0x2d6   :  { %4948 = vmatpush1.bf16.msra.mxu1 %v8523_v19  ;;  %v930_v19 = vld [vmem:[#allocation8 + $0xe50] sm:$0xff]  ;;  %v941_v35 = vld [vmem:[#allocation8 + $0xea8] sm:$0xff] }
 0x2d7   :  { %4949 = vmatprep.subr.bf16.mxu1 %v8532_v3  ;;  %v934_v3 = vld [vmem:[#allocation8 + $0xe70] sm:$0xff] }
 0x2d8   :  { %5720 = vmatpush1.bf16.msra.mxu0 %v8525_v47  ;;  %4807 = vmatmul.mubr.bf16.gmra.mrb[76].mxu1 %v13579_v22  ;;  %v8547_v47 = vcombine.low %v921_v56, %v925_v29  ;;  %v8558_v11 = vcombine.high %v930_v19, %v934_v3  ;;  %v8557_v29 = vcombine.low %v930_v19, %v934_v3  ;;  %v954_v19 = vld [vmem:[#allocation8 + $0xf10] sm:$0xff] }
 0x2d9   :  { %5721 = vmatprep.subr.bf16.mxu0 %v8534_v33  ;;  %4816 = vmatprep.mubr.bf16.mxu1 %v13580_v6  ;;  %v8556_v33 = vcombine.high %v929_v0, %v933_v34  ;;  %v958_v3 = vld [vmem:[#allocation8 + $0xf30] sm:$0xff] }
 0x2da   :  { %5579 = vmatmul.mubr.bf16.gmra.mrb[76].mxu0 %v13579_v22  ;;  %4950 = vmatpush1.bf16.msra.mxu1 %v8531_v16  ;;  %v8549_v22 = vcombine.low %v922_v25, %v926_v43  ;;  %v937_v16 = vld [vmem:[#allocation8 + $0xe88] sm:$0xff]  ;;  %v8566_v43 = vcombine.high %v938_v1, %v942_v18 }
 0x2db   :  { %5588 = vmatprep.mubr.bf16.mxu0 %v13580_v6  ;;  %4951 = vmatprep.subr.bf16.mxu1 %v8540_v32  ;;  %v8555_v32 = vcombine.low %v929_v0, %v933_v34  ;;  %v8564_v56 = vcombine.high %v937_v16, %v941_v35  ;;  %v949_v25 = vld [vmem:[#allocation8 + $0xee8] sm:$0xff] }
 0x2dc   :  { %5722 = vmatpush1.bf16.msra.mxu0 %v8533_v39  ;;  %v13582_v39 = vld [vmem:[#allocation36_spill] sm:$0xff]  ;;  %v13583_v6 = vld [vmem:[#allocation38_spill] sm:$0xff] }
 0x2dd   :  { %5723 = vmatprep.subr.bf16.mxu0 %v8542_v10  ;;  %v945_v10 = vld [vmem:[#allocation8 + $0xec8] sm:$0xff] }
 0x2de   :  { %4952 = vmatpush1.bf16.msra.mxu1 %v8539_v9  ;;  %v946_v9 = vld [vmem:[#allocation8 + $0xed0] sm:$0xff]  ;;  %v957_v0 = vld [vmem:[#allocation8 + $0xf28] sm:$0xff] }
 0x2df   :  { %4953 = vmatprep.subr.bf16.mxu1 %v8548_v53  ;;  %v950_v53 = vld [vmem:[#allocation8 + $0xef0] sm:$0xff] }
 0x2e0   :  { %5724 = vmatpush1.bf16.msra.mxu0 %v8541_v59  ;;  %4817 = vmatmul.mubr.bf16.gmra.mrb[80].mxu1 %v13581_v8  ;;  %v8563_v59 = vcombine.low %v937_v16, %v941_v35  ;;  %v8574_v34 = vcombine.high %v946_v9, %v950_v53  ;;  %v8573_v35 = vcombine.low %v946_v9, %v950_v53  ;;  %v970_v9 = vld [vmem:[#allocation8 + $0xf90] sm:$0xff] }
 0x2e1   :  { %5725 = vmatprep.subr.bf16.mxu0 %v8550_v28  ;;  %4826 = vmatprep.mubr.bf16.mxu1 %v13582_v39  ;;  %v8572_v28 = vcombine.high %v945_v10, %v949_v25  ;;  %v974_v53 = vld [vmem:[#allocation8 + $0xfb0] sm:$0xff] }
 0x2e2   :  { %5589 = vmatmul.mubr.bf16.gmra.mrb[80].mxu0 %v13581_v8  ;;  %4954 = vmatpush1.bf16.msra.mxu1 %v8547_v47  ;;  %v8565_v8 = vcombine.low %v938_v1, %v942_v18  ;;  %v953_v47 = vld [vmem:[#allocation8 + $0xf08] sm:$0xff]  ;;  %v8582_v18 = vcombine.high %v954_v19, %v958_v3 }
 0x2e3   :  { %5598 = vmatprep.mubr.bf16.mxu0 %v13582_v39  ;;  %4955 = vmatprep.subr.bf16.mxu1 %v8556_v33  ;;  %v8571_v33 = vcombine.low %v945_v10, %v949_v25  ;;  %v8580_v16 = vcombine.high %v953_v47, %v957_v0  ;;  %v965_v1 = vld [vmem:[#allocation8 + $0xf68] sm:$0xff] }
 0x2e4   :  { %5726 = vmatpush1.bf16.msra.mxu0 %v8549_v22  ;;  %v13584_v22 = vld [vmem:[#allocation40_spill] sm:$0xff]  ;;  %v13585_v39 = vld [vmem:[#allocation42_spill] sm:$0xff] }
 0x2e5   :  { %5727 = vmatprep.subr.bf16.mxu0 %v8558_v11  ;;  %v961_v11 = vld [vmem:[#allocation8 + $0xf48] sm:$0xff] }
 0x2e6   :  { %4956 = vmatpush1.bf16.msra.mxu1 %v8555_v32  ;;  %v962_v32 = vld [vmem:[#allocation8 + $0xf50] sm:$0xff]  ;;  %v973_v10 = vld [vmem:[#allocation8 + $0xfa8] sm:$0xff] }
 0x2e7   :  { %4957 = vmatprep.subr.bf16.mxu1 %v8564_v56  ;;  %v966_v56 = vld [vmem:[#allocation8 + $0xf70] sm:$0xff] }
 0x2e8   :  { %5728 = vmatpush1.bf16.msra.mxu0 %v8557_v29  ;;  %4827 = vmatmul.mubr.bf16.gmra.mrb[84].mxu1 %v13583_v6  ;;  %v8579_v29 = vcombine.low %v953_v47, %v957_v0  ;;  %v8590_v25 = vcombine.high %v962_v32, %v966_v56  ;;  %v8589_v0 = vcombine.low %v962_v32, %v966_v56 }
 0x2e9   :  { %5729 = vmatprep.subr.bf16.mxu0 %v8566_v43  ;;  %4836 = vmatprep.mubr.bf16.mxu1 %v13584_v22  ;;  %v8588_v43 = vcombine.high %v961_v11, %v965_v1  ;;  %v8104_v56 = vcombine.high %v11601_v14, %v11603_v2 }
 0x2ea   :  { %5599 = vmatmul.mubr.bf16.gmra.mrb[84].mxu0 %v13583_v6  ;;  %4958 = vmatpush1.bf16.msra.mxu1 %v8563_v59  ;;  %v8581_v6 = vcombine.low %v954_v19, %v958_v3  ;;  %v969_v59 = vld [vmem:[#allocation8 + $0xf88] sm:$0xff]  ;;  %v8598_v3 = vcombine.high %v970_v9, %v974_v53 }
 0x2eb   :  { %5608 = vmatprep.mubr.bf16.mxu0 %v13584_v22  ;;  %4959 = vmatprep.subr.bf16.mxu1 %v8572_v28  ;;  %v8587_v28 = vcombine.low %v961_v11, %v965_v1  ;;  %v8596_v47 = vcombine.high %v969_v59, %v973_v10  ;;  %v981_v19 = vld [vmem:[#allocation8 + $0xfe8] sm:$0xff] }
 0x2ec   :  { %5730 = vmatpush1.bf16.msra.mxu0 %v8565_v8  ;;  %v13586_v8 = vld [vmem:[#allocation44_spill] sm:$0xff]  ;;  %v13587_v22 = vld [vmem:[#allocation46_spill] sm:$0xff] }
 0x2ed   :  { %5731 = vmatprep.subr.bf16.mxu0 %v8574_v34  ;;  %v977_v34 = vld [vmem:[#allocation8 + $0xfc8] sm:$0xff] }
 0x2ee   :  { %4960 = vmatpush1.bf16.msra.mxu1 %v8571_v33  ;;  %v978_v33 = vld [vmem:[#allocation8 + $0xfd0] sm:$0xff]  ;;  %v8603_v1 = vcombine.low %v977_v34, %v981_v19 }
 0x2ef   :  { %4961 = vmatprep.subr.bf16.mxu1 %v8580_v16  ;;  %v982_v16 = vld [vmem:[#allocation8 + $0xff0] sm:$0xff] }
 0x2f0   :  { %5732 = vmatpush1.bf16.msra.mxu0 %v8573_v35  ;;  %4837 = vmatmul.mubr.bf16.gmra.mrb[88].mxu1 %v13585_v39  ;;  %v8595_v35 = vcombine.low %v969_v59, %v973_v10  ;;  %v8606_v11 = vcombine.high %v978_v33, %v982_v16  ;;  %v8605_v32 = vcombine.low %v978_v33, %v982_v16  ;;  %v13334_v59 = vmov 0.0|0.0   ;;  %v13592_v10 = vld [vmem:[#allocation56_spill] sm:$0xff]  ;;  %v13603_v16 = vld [vmem:[#allocation78_spill] sm:$0xff] }
 0x2f1   :  { %5733 = vmatprep.subr.bf16.mxu0 %v8582_v18  ;;  %4846 = vmatprep.mubr.bf16.mxu1 %v13586_v8  ;;  %v8604_v18 = vcombine.high %v977_v34, %v981_v19  ;;  %v13599_v34 = vld [vmem:[#allocation70_spill] sm:$0xff]  ;;  %v13600_v19 = vld [vmem:[#allocation72_spill] sm:$0xff] }
 0x2f2   :  { %5609 = vmatmul.mubr.bf16.gmra.mrb[88].mxu0 %v13585_v39  ;;  %4962 = vmatpush1.bf16.msra.mxu1 %v8579_v29  ;;  %v8597_v39 = vcombine.low %v970_v9, %v974_v53  ;;  %v13589_v29 = vld [vmem:[#allocation50_spill] sm:$0xff]  ;;  %v13594_v9 = vld [vmem:[#allocation60_spill] sm:$0xff] }
 0x2f3   :  { %5618 = vmatprep.mubr.bf16.mxu0 %v13586_v8  ;;  %4963 = vmatprep.subr.bf16.mxu1 %v8588_v43  ;;  %v13590_v43 = vld [vmem:[#allocation52_spill] sm:$0xff]  ;;  %v13595_v53 = vld [vmem:[#allocation62_spill] sm:$0xff] }
 0x2f4   :  { %5734 = vmatpush1.bf16.msra.mxu0 %v8581_v6  ;;  %v13588_v6 = vld [vmem:[#allocation48_spill] sm:$0xff] }
 0x2f5   :  { %5735 = vmatprep.subr.bf16.mxu0 %v8590_v25  ;;  %v13593_v25 = vld [vmem:[#allocation58_spill] sm:$0xff]  ;;  %v13602_v33 = vld [vmem:[#allocation76_spill] sm:$0xff] }
 0x2f6   :  { %4964 = vmatpush1.bf16.msra.mxu1 %v8587_v28  ;;  %v13596_v28 = vld [vmem:[#allocation64_spill] sm:$0xff] }
 0x2f7   :  { %4965 = vmatprep.subr.bf16.mxu1 %v8596_v47  ;;  %v13597_v47 = vld [vmem:[#allocation66_spill] sm:$0xff] }
 0x2f8   :  { %5736 = vmatpush1.bf16.msra.mxu0 %v8589_v0  ;;  %4847 = vmatmul.mubr.bf16.gmra.mrb[92].mxu1 %v13587_v22  ;;  %v13598_v0 = vld [vmem:[#allocation68_spill] sm:$0xff] }
 0x2f9   :  { %5737 = vmatprep.subr.bf16.mxu0 %v8598_v3  ;;  %4856 = vmatprep.mubr.bf16.mxu1 %v13588_v6  ;;  %v13601_v3 = vld [vmem:[#allocation74_spill] sm:$0xff] }
 0x2fa   :  { %5619 = vmatmul.mubr.bf16.gmra.mrb[92].mxu0 %v13587_v22  ;;  %4966 = vmatpush1.bf16.msra.mxu1 %v8595_v35  ;;  %v13604_v35 = vld [vmem:[#allocation80_spill] sm:$0xff] }
 0x2fb   :  { %5628 = vmatprep.mubr.bf16.mxu0 %v13588_v6  ;;  %4967 = vmatprep.subr.bf16.mxu1 %v8604_v18  ;;  %v483_v18 = vld [vmem:[#allocation8 + $0x58] sm:$0xff] }
 0x2fc   :  { %5738 = vmatpush1.bf16.msra.mxu0 %v8597_v39  ;;  %v13591_v39 = vld [vmem:[#allocation54_spill] sm:$0xff]  ;;  %v12219_v6 = vld [vmem:[#allocation8 + $0xc38] sm:$0xff] }
 0x2fd   :  { %5739 = vmatprep.subr.bf16.mxu0 %v8606_v11  ;;  %v487_v11 = vld [vmem:[#allocation8 + $0x78] sm:$0xff] }
 0x2fe   :  { %4968 = vmatpush1.bf16.msra.mxu1 %v8603_v1  ;;  %v6930_v1 = vld [vmem:[%s13083_s4] sm:$0xff] }
 0x2ff   :  { %5902 = vmatprep.subr.bf16.mxu1 %v8104_v56  ;;  %v8112_v56 = vcombine.high %v483_v18, %v487_v11 }
 0x300   :  { %5740 = vmatpush1.bf16.msra.mxu0 %v8605_v32  ;;  %4857 = vmatmul.mubr.bf16.gmra.mrb[96].mxu1 %v13589_v29  ;;  %v6931_v32 = vld [vmem:[%s13083_s4 + $0x8] sm:$0xff] }
 0x301   :  { %4866 = vmatprep.mubr.bf16.mxu1 %v13590_v43  ;;  %8610 = vmatprep.subr.bf16.mxu0 %v13334_v59  ;;  %v491_v59 = vld [vmem:[#allocation8 + $0x98] sm:$0xff] }
 0x302   :  { %5629 = vmatmul.mubr.bf16.gmra.mrb[96].mxu0 %v13589_v29 }
 0x303   :  { %5638 = vmatprep.mubr.bf16.mxu0 %v13590_v43  ;;  %v12206_v43 = vld [vmem:[#allocation8 + $0x898] sm:$0xff] }
 0x308   :  { %4867 = vmatmul.mubr.bf16.gmra.mrb[100].mxu1 %v13591_v39 }
 0x309   :  { %4876 = vmatprep.mubr.bf16.mxu1 %v13592_v10 }
 0x30a   :  { %5639 = vmatmul.mubr.bf16.gmra.mrb[100].mxu0 %v13591_v39  ;;  %v13608_v39 = vmov 0.0|0.0  }
 0x30b   :  { %5648 = vmatprep.mubr.bf16.mxu0 %v13592_v10  ;;  %v503_v10 = vld [vmem:[#allocation8 + $0xf8] sm:$0xff] }
 0x310   :  { %4877 = vmatmul.mubr.bf16.gmra.mrb[104].mxu1 %v13593_v25 }
 0x311   :  { %4886 = vmatprep.mubr.bf16.mxu1 %v13594_v9 }
 0x312   :  { %5649 = vmatmul.mubr.bf16.gmra.mrb[104].mxu0 %v13593_v25 }
 0x313   :  { %5658 = vmatprep.mubr.bf16.mxu0 %v13594_v9  ;;  %v499_v9 = vld [vmem:[#allocation8 + $0xd8] sm:$0xff] }
 0x318   :  { %4887 = vmatmul.mubr.bf16.gmra.mrb[108].mxu1 %v13595_v53 }
 0x319   :  { %4896 = vmatprep.mubr.bf16.mxu1 %v13596_v28 }
 0x31a   :  { %5659 = vmatmul.mubr.bf16.gmra.mrb[108].mxu0 %v13595_v53 }
 0x31b   :  { %5668 = vmatprep.mubr.bf16.mxu0 %v13596_v28  ;;  %v13607_v28 = vld [vmem:[#allocation84_spill] sm:$0xff] }
 0x320   :  { %4897 = vmatmul.mubr.bf16.gmra.mrb[112].mxu1 %v13597_v47 }
 0x321   :  { %4906 = vmatprep.mubr.bf16.mxu1 %v13598_v0 }
 0x322   :  { %5669 = vmatmul.mubr.bf16.gmra.mrb[112].mxu0 %v13597_v47  ;;  %v13606_v47 = vcombine.low %v11601_v14, %v11603_v2  ;;  %v6934_v2 = vld [vmem:[%s13083_s4 + $0x20] sm:$0xff]  ;;  %v6935_v14 = vld [vmem:[%s13083_s4 + $0x28] sm:$0xff] }
 0x323   :  { %5678 = vmatprep.mubr.bf16.mxu0 %v13598_v0  ;;  %v11690_v0 = vld [vmem:[#allocation8 + $0x438] sm:$0xff] }
 0x328   :  { %4907 = vmatmul.mubr.bf16.gmra.mrb[116].mxu1 %v13599_v34 }
 0x329   :  { %4916 = vmatprep.mubr.bf16.mxu1 %v13600_v19 }
 0x32a   :  { %5679 = vmatmul.mubr.bf16.gmra.mrb[116].mxu0 %v13599_v34  ;;  %v11688_v34 = vld [vmem:[#allocation8 + $0x418] sm:$0xff] }
 0x32b   :  { %5688 = vmatprep.mubr.bf16.mxu0 %v13600_v19  ;;  %v13605_v19 = vld [vmem:[#allocation82_spill] sm:$0xff]  ;;  %v13640_v60 = vcombine.low %v11688_v34, %v11690_v0 }
 0x330   :  { %4917 = vmatmul.mubr.bf16.gmra.mrb[120].mxu1 %v13601_v3 }
 0x331   :  { %4926 = vmatprep.mubr.bf16.mxu1 %v13602_v33 }
 0x332   :  { %5689 = vmatmul.mubr.bf16.gmra.mrb[120].mxu0 %v13601_v3  ;;  %v8611_v3 = vpack.c.bf16 %v6931_v32, %v6930_v1  ;;  %v8111_v1 = vcombine.low %v483_v18, %v487_v11  ;;  %v8128_v18 = vcombine.high %v499_v9, %v503_v10  ;;  %v507_v11 = vld [vmem:[#allocation8 + $0x118] sm:$0xff] }
 0x333   :  { %5698 = vmatprep.mubr.bf16.mxu0 %v13602_v33  ;;  %v495_v33 = vld [vmem:[#allocation8 + $0xb8] sm:$0xff] }
 0x334   :  { %v8120_v53 = vcombine.high %v491_v59, %v495_v33  ;;  %v6937_v32 = vld [vmem:[%s13083_s4 + $0x38] sm:$0xff] }
 0x338   :  { %4927 = vmatmul.mubr.bf16.gmra.mrb[124].mxu1 %v13603_v16 }
 0x339   :  { %4969 = vmatprep.mubr.bf16.mxu1 %v13604_v35 }
 0x33a   :  { %5699 = vmatmul.mubr.bf16.gmra.mrb[124].mxu0 %v13603_v16  ;;  %v6932_v16 = vld [vmem:[%s13083_s4 + $0x10] sm:$0xff] }
 0x33b   :  { %5741 = vmatprep.mubr.bf16.mxu0 %v13604_v35  ;;  %v6933_v35 = vld [vmem:[%s13083_s4 + $0x18] sm:$0xff] }
 0x33c   :  { %v8614_v25 = vpack.c.bf16 %v6933_v35, %v6932_v16  ;;  %v511_v16 = vld [vmem:[#allocation8 + $0x138] sm:$0xff]  ;;  %v6936_v35 = vld [vmem:[%s13083_s4 + $0x30] sm:$0xff] }
 0x340   :  { %4970 = vmatmul.mubr.bf16.vlgmr.msra.gmra.mrb[64].mxu1 %v13605_v19 }
 0x341   :  { %5903 = vmatpush1.bf16.msra.mxu1 %v13606_v47  ;;  %4979 = vmatprep.mubr.bf16.mxu1 %v13607_v28  ;;  %v8119_v47 = vcombine.low %v491_v59, %v495_v33  ;;  %v13610_v59 = vld [vmem:[#allocation88_spill] sm:$0xff] }
 0x342   :  { %5742 = vmatmul.mubr.bf16.vlgmr.msra.gmra.mrb[64].mxu0 %v13605_v19  ;;  %5904 = vmatprep.subr.bf16.mxu1 %v8112_v56  ;;  %v8617_v56 = vpack.c.bf16 %v6935_v14, %v6934_v2  ;;  %v515_v33 = vld [vmem:[#allocation8 + $0x158] sm:$0xff] }
 0x343   :  { %5751 = vmatprep.mubr.bf16.mxu0 %v13607_v28  ;;  %8612 = vmatpush1.bf16.msra.mxu0 %v8611_v3  ;;  %v13609_v3 = vld [vmem:[#allocation86_spill] sm:$0xff]  ;;  %v519_v2 = vld [vmem:[#allocation8 + $0x178] sm:$0xff] }
 0x344   :  { %8613 = vmatprep.subr.bf16.mxu0 %v13608_v39  ;;  %v6938_v14 = vld [vmem:[%s13083_s4 + $0x40] sm:$0xff] }
 0x345   :  { %5905 = vmatpush1.bf16.msra.mxu1 %v8111_v1  ;;  %v8620_v1 = vpack.c.bf16 %v6937_v32, %v6936_v35  ;;  %v527_v32 = vld [vmem:[#allocation8 + $0x1b8] sm:$0xff] }
 0x346   :  { %5906 = vmatprep.subr.bf16.mxu1 %v8120_v53  ;;  %v8136_v53 = vcombine.high %v507_v11, %v511_v16  ;;  %v6941_v35 = vld [vmem:[%s13083_s4 + $0x58] sm:$0xff] }
 0x347   :  { %8615 = vmatpush1.bf16.msra.mxu0 %v8614_v25  ;;  %v8127_v25 = vcombine.low %v499_v9, %v503_v10  ;;  %v8144_v10 = vcombine.high %v515_v33, %v519_v2  ;;  %v523_v9 = vld [vmem:[#allocation8 + $0x198] sm:$0xff] }
 0x348   :  { %4980 = vmatmul.mubr.bf16.gmra.mrb[68].mxu1 %v13609_v3  ;;  %8616 = vmatprep.subr.bf16.mxu0 %v13608_v39 }
 0x349   :  { %4989 = vmatprep.mubr.bf16.mxu1 %v13610_v59  ;;  %5907 = vmatpush1.bf16.msra.mxu1 %v8119_v47 }
 0x34a   :  { %5752 = vmatmul.mubr.bf16.gmra.mrb[68].mxu0 %v13609_v3  ;;  %5908 = vmatprep.subr.bf16.mxu1 %v8128_v18  ;;  %v6939_v3 = vld [vmem:[%s13083_s4 + $0x48] sm:$0xff] }
 0x34b   :  { %5761 = vmatprep.mubr.bf16.mxu0 %v13610_v59  ;;  %8618 = vmatpush1.bf16.msra.mxu0 %v8617_v56  ;;  %v8135_v59 = vcombine.low %v507_v11, %v511_v16  ;;  %v8623_v47 = vpack.c.bf16 %v6939_v3, %v6938_v14  ;;  %v13611_v18 = vld [vmem:[#allocation90_spill] sm:$0xff]  ;;  %v13612_v11 = vld [vmem:[#allocation92_spill] sm:$0xff]  ;;  %v8143_v3 = vcombine.low %v515_v33, %v519_v2 }
 0x34c   :  { %8619 = vmatprep.subr.bf16.mxu0 %v13608_v39  ;;  %v6940_v56 = vld [vmem:[%s13083_s4 + $0x50] sm:$0xff]  ;;  %v8152_v16 = vcombine.high %v523_v9, %v527_v32  ;;  %v6942_v14 = vld [vmem:[%s13083_s4 + $0x60] sm:$0xff] }
 0x34d   :  { %5909 = vmatpush1.bf16.msra.mxu1 %v8127_v25  ;;  %v531_v25 = vld [vmem:[#allocation8 + $0x1d8] sm:$0xff] }
 0x34e   :  { %5910 = vmatprep.subr.bf16.mxu1 %v8136_v53  ;;  %v8626_v53 = vpack.c.bf16 %v6941_v35, %v6940_v56  ;;  %v539_v33 = vld [vmem:[#allocation8 + $0x218] sm:$0xff]  ;;  %v6944_v56 = vld [vmem:[%s13083_s4 + $0x70] sm:$0xff] }
 0x34f   :  { %8621 = vmatpush1.bf16.msra.mxu0 %v8620_v1  ;;  %v535_v1 = vld [vmem:[#allocation8 + $0x1f8] sm:$0xff] }
 0x350   :  { %4990 = vmatmul.mubr.bf16.gmra.mrb[72].mxu1 %v13611_v18  ;;  %8622 = vmatprep.subr.bf16.mxu0 %v13608_v39  ;;  %v6945_v35 = vld [vmem:[%s13083_s4 + $0x78] sm:$0xff] }
 0x351   :  { %4999 = vmatprep.mubr.bf16.mxu1 %v13612_v11  ;;  %5911 = vmatpush1.bf16.msra.mxu1 %v8135_v59  ;;  %v8160_v59 = vcombine.high %v531_v25, %v535_v1 }
 0x352   :  { %5762 = vmatmul.mubr.bf16.gmra.mrb[72].mxu0 %v13611_v18  ;;  %5912 = vmatprep.subr.bf16.mxu1 %v8144_v10  ;;  %v6943_v18 = vld [vmem:[%s13083_s4 + $0x68] sm:$0xff] }
 0x353   :  { %5771 = vmatprep.mubr.bf16.mxu0 %v13612_v11  ;;  %8624 = vmatpush1.bf16.msra.mxu0 %v8623_v47  ;;  %v8151_v11 = vcombine.low %v523_v9, %v527_v32  ;;  %v8629_v2 = vpack.c.bf16 %v6943_v18, %v6942_v14  ;;  %v13613_v10 = vld [vmem:[#allocation94_spill] sm:$0xff]  ;;  %v543_v47 = vld [vmem:[#allocation8 + $0x238] sm:$0xff]  ;;  %v8159_v18 = vcombine.low %v531_v25, %v535_v1 }
 0x354   :  { %8625 = vmatprep.subr.bf16.mxu0 %v13608_v39  ;;  %v13614_v9 = vld [vmem:[#allocation96_spill] sm:$0xff]  ;;  %v8168_v32 = vcombine.high %v539_v33, %v543_v47 }
 0x355   :  { %5913 = vmatpush1.bf16.msra.mxu1 %v8143_v3  ;;  %v547_v3 = vld [vmem:[#allocation8 + $0x258] sm:$0xff] }
 0x356   :  { %5914 = vmatprep.subr.bf16.mxu1 %v8152_v16  ;;  %v8632_v16 = vpack.c.bf16 %v6945_v35, %v6944_v56  ;;  %v6946_v14 = vld [vmem:[%s13083_s4 + $0x80] sm:$0xff]  ;;  %v6948_v56 = vld [vmem:[%s13083_s4 + $0x90] sm:$0xff]  ;;  %v6949_v35 = vld [vmem:[%s13083_s4 + $0x98] sm:$0xff] }
 0x357   :  { %8627 = vmatpush1.bf16.msra.mxu0 %v8626_v53  ;;  %v551_v53 = vld [vmem:[#allocation8 + $0x278] sm:$0xff] }
 0x358   :  { %5000 = vmatmul.mubr.bf16.gmra.mrb[76].mxu1 %v13613_v10  ;;  %8628 = vmatprep.subr.bf16.mxu0 %v13608_v39  ;;  %v555_v25 = vld [vmem:[#allocation8 + $0x298] sm:$0xff] }
 0x359   :  { %5009 = vmatprep.mubr.bf16.mxu1 %v13614_v9  ;;  %5915 = vmatpush1.bf16.msra.mxu1 %v8151_v11  ;;  %v8176_v11 = vcombine.high %v547_v3, %v551_v53 }
 0x35a   :  { %5772 = vmatmul.mubr.bf16.gmra.mrb[76].mxu0 %v13613_v10  ;;  %5916 = vmatprep.subr.bf16.mxu1 %v8160_v59  ;;  %v6947_v10 = vld [vmem:[%s13083_s4 + $0x88] sm:$0xff] }
 0x35b   :  { %5781 = vmatprep.mubr.bf16.mxu0 %v13614_v9  ;;  %8630 = vmatpush1.bf16.msra.mxu0 %v8629_v2  ;;  %v8167_v9 = vcombine.low %v539_v33, %v543_v47  ;;  %v8635_v1 = vpack.c.bf16 %v6947_v10, %v6946_v14  ;;  %v13615_v59 = vld [vmem:[#allocation98_spill] sm:$0xff]  ;;  %v559_v2 = vld [vmem:[#allocation8 + $0x2b8] sm:$0xff]  ;;  %v8175_v10 = vcombine.low %v547_v3, %v551_v53 }
 0x35c   :  { %8631 = vmatprep.subr.bf16.mxu0 %v13608_v39  ;;  %v13616_v33 = vld [vmem:[#allocation100_spill] sm:$0xff]  ;;  %v8184_v47 = vcombine.high %v555_v25, %v559_v2 }
 0x35d   :  { %5917 = vmatpush1.bf16.msra.mxu1 %v8159_v18  ;;  %v563_v18 = vld [vmem:[#allocation8 + $0x2d8] sm:$0xff] }
 0x35e   :  { %5918 = vmatprep.subr.bf16.mxu1 %v8168_v32  ;;  %v8638_v32 = vpack.c.bf16 %v6949_v35, %v6948_v56  ;;  %v6950_v14 = vld [vmem:[%s13083_s4 + $0xa0] sm:$0xff]  ;;  %v6952_v56 = vld [vmem:[%s13083_s4 + $0xb0] sm:$0xff]  ;;  %v6953_v35 = vld [vmem:[%s13083_s4 + $0xb8] sm:$0xff] }
 0x35f   :  { %8633 = vmatpush1.bf16.msra.mxu0 %v8632_v16  ;;  %v567_v16 = vld [vmem:[#allocation8 + $0x2f8] sm:$0xff] }
 0x360   :  { %5010 = vmatmul.mubr.bf16.gmra.mrb[80].mxu1 %v13615_v59  ;;  %8634 = vmatprep.subr.bf16.mxu0 %v13608_v39  ;;  %v571_v3 = vld [vmem:[#allocation8 + $0x318] sm:$0xff] }
 0x361   :  { %5019 = vmatprep.mubr.bf16.mxu1 %v13616_v33  ;;  %5919 = vmatpush1.bf16.msra.mxu1 %v8167_v9  ;;  %v8192_v9 = vcombine.high %v563_v18, %v567_v16 }
 0x362   :  { %5782 = vmatmul.mubr.bf16.gmra.mrb[80].mxu0 %v13615_v59  ;;  %5920 = vmatprep.subr.bf16.mxu1 %v8176_v11  ;;  %v6951_v59 = vld [vmem:[%s13083_s4 + $0xa8] sm:$0xff] }
 0x363   :  { %5791 = vmatprep.mubr.bf16.mxu0 %v13616_v33  ;;  %8636 = vmatpush1.bf16.msra.mxu0 %v8635_v1  ;;  %v8183_v33 = vcombine.low %v555_v25, %v559_v2  ;;  %v8641_v53 = vpack.c.bf16 %v6951_v59, %v6950_v14  ;;  %v13617_v11 = vld [vmem:[#allocation102_spill] sm:$0xff]  ;;  %v575_v1 = vld [vmem:[#allocation8 + $0x338] sm:$0xff]  ;;  %v8191_v59 = vcombine.low %v563_v18, %v567_v16 }
 0x364   :  { %8637 = vmatprep.subr.bf16.mxu0 %v13608_v39  ;;  %v13618_v25 = vld [vmem:[#allocation104_spill] sm:$0xff]  ;;  %v8200_v2 = vcombine.high %v571_v3, %v575_v1 }
 0x365   :  { %5921 = vmatpush1.bf16.msra.mxu1 %v8175_v10  ;;  %v579_v10 = vld [vmem:[#allocation8 + $0x358] sm:$0xff] }
 0x366   :  { %5922 = vmatprep.subr.bf16.mxu1 %v8184_v47  ;;  %v8644_v47 = vpack.c.bf16 %v6953_v35, %v6952_v56  ;;  %v6954_v14 = vld [vmem:[%s13083_s4 + $0xc0] sm:$0xff]  ;;  %v6956_v56 = vld [vmem:[%s13083_s4 + $0xd0] sm:$0xff]  ;;  %v6957_v35 = vld [vmem:[%s13083_s4 + $0xd8] sm:$0xff] }
 0x367   :  { %8639 = vmatpush1.bf16.msra.mxu0 %v8638_v32  ;;  %v583_v32 = vld [vmem:[#allocation8 + $0x378] sm:$0xff] }
 0x368   :  { %5020 = vmatmul.mubr.bf16.gmra.mrb[84].mxu1 %v13617_v11  ;;  %8640 = vmatprep.subr.bf16.mxu0 %v13608_v39  ;;  %v587_v18 = vld [vmem:[#allocation8 + $0x398] sm:$0xff] }
 0x369   :  { %5029 = vmatprep.mubr.bf16.mxu1 %v13618_v25  ;;  %5923 = vmatpush1.bf16.msra.mxu1 %v8183_v33  ;;  %v8208_v33 = vcombine.high %v579_v10, %v583_v32 }
 0x36a   :  { %5792 = vmatmul.mubr.bf16.gmra.mrb[84].mxu0 %v13617_v11  ;;  %5924 = vmatprep.subr.bf16.mxu1 %v8192_v9  ;;  %v6955_v11 = vld [vmem:[%s13083_s4 + $0xc8] sm:$0xff] }
 0x36b   :  { %5801 = vmatprep.mubr.bf16.mxu0 %v13618_v25  ;;  %8642 = vmatpush1.bf16.msra.mxu0 %v8641_v53  ;;  %v8199_v25 = vcombine.low %v571_v3, %v575_v1  ;;  %v8647_v16 = vpack.c.bf16 %v6955_v11, %v6954_v14  ;;  %v13619_v9 = vld [vmem:[#allocation106_spill] sm:$0xff]  ;;  %v591_v53 = vld [vmem:[#allocation8 + $0x3b8] sm:$0xff]  ;;  %v8207_v11 = vcombine.low %v579_v10, %v583_v32  ;;  %v13621_v32 = vld [vmem:[#allocation109_spill] sm:$0xff] }
 0x36c   :  { %8643 = vmatprep.subr.bf16.mxu0 %v13608_v39  ;;  %v13620_v3 = vld [vmem:[#allocation108_spill] sm:$0xff]  ;;  %v8216_v1 = vcombine.high %v587_v18, %v591_v53 }
 0x36d   :  { %5925 = vmatpush1.bf16.msra.mxu1 %v8191_v59  ;;  %v8650_v59 = vpack.c.bf16 %v6957_v35, %v6956_v56  ;;  %v599_v14 = vld [vmem:[#allocation8 + $0x3f8] sm:$0xff]  ;;  %v13623_v35 = vld [vmem:[#allocation113_spill] sm:$0xff] }
 0x36e   :  { %5926 = vmatprep.subr.bf16.mxu1 %v8200_v2  ;;  %v6958_v2 = vld [vmem:[%s13083_s4 + $0xe0] sm:$0xff]  ;;  %v13622_v56 = vld [vmem:[#allocation111_spill] sm:$0xff] }
 0x36f   :  { %8645 = vmatpush1.bf16.msra.mxu0 %v8644_v47  ;;  %v595_v47 = vld [vmem:[#allocation8 + $0x3d8] sm:$0xff] }
 0x370   :  { %5030 = vmatmul.mubr.bf16.gmra.mrb[88].mxu1 %v13619_v9  ;;  %8646 = vmatprep.subr.bf16.mxu0 %v13608_v39 }
 0x371   :  { %5039 = vmatprep.mubr.bf16.mxu1 %v13620_v3  ;;  %5927 = vmatpush1.bf16.msra.mxu1 %v8199_v25  ;;  %v8224_v25 = vcombine.high %v595_v47, %v599_v14 }
 0x372   :  { %5802 = vmatmul.mubr.bf16.gmra.mrb[88].mxu0 %v13619_v9  ;;  %5928 = vmatprep.subr.bf16.mxu1 %v8208_v33  ;;  %v6959_v9 = vld [vmem:[%s13083_s4 + $0xe8] sm:$0xff]  ;;  %v6960_v33 = vld [vmem:[%s13083_s4 + $0xf0] sm:$0xff] }
 0x373   :  { %5811 = vmatprep.mubr.bf16.mxu0 %v13620_v3  ;;  %8648 = vmatpush1.bf16.msra.mxu0 %v8647_v16  ;;  %v8215_v3 = vcombine.low %v587_v18, %v591_v53  ;;  %v8653_v10 = vpack.c.bf16 %v6959_v9, %v6958_v2  ;;  %v6961_v16 = vld [vmem:[%s13083_s4 + $0xf8] sm:$0xff]  ;;  %v8223_v18 = vcombine.low %v595_v47, %v599_v14  ;;  %v13629_v47 = vld [vmem:[#allocation125_spill] sm:$0xff] }
 0x374   :  { %8649 = vmatprep.subr.bf16.mxu0 %v13608_v39  ;;  %v8656_v9 = vpack.c.bf16 %v6961_v16, %v6960_v33  ;;  %v8232_v53 = vcombine.high %v11688_v34, %v11690_v0  ;;  %v13628_v2 = vld [vmem:[#allocation123_spill] sm:$0xff]  ;;  %v13633_v33 = vld [vmem:[#allocation133_spill] sm:$0xff] }
 0x375   :  { %5929 = vmatpush1.bf16.msra.mxu1 %v8207_v11  ;;  %v13624_v11 = vld [vmem:[#allocation115_spill] sm:$0xff]  ;;  %v6966_v0 = vld [vmem:[%s13083_s4 + $0x120] sm:$0xff] }
 0x376   :  { %5930 = vmatprep.subr.bf16.mxu1 %v8216_v1  ;;  %v13626_v1 = vld [vmem:[#allocation119_spill] sm:$0xff] }
 0x377   :  { %8651 = vmatpush1.bf16.msra.mxu0 %v8650_v59  ;;  %v13627_v59 = vld [vmem:[#allocation121_spill] sm:$0xff]  ;;  %v13630_v14 = vld [vmem:[#allocation127_spill] sm:$0xff] }
 0x378   :  { %5040 = vmatmul.mubr.bf16.gmra.mrb[92].mxu1 %v13621_v32  ;;  %8652 = vmatprep.subr.bf16.mxu0 %v13608_v39  ;;  %v13634_v16 = vld [vmem:[#allocation135_spill] sm:$0xff] }
 0x379   :  { %5049 = vmatprep.mubr.bf16.mxu1 %v13622_v56  ;;  %5931 = vmatpush1.bf16.msra.mxu1 %v8215_v3  ;;  %v13625_v3 = vld [vmem:[#allocation117_spill] sm:$0xff] }
 0x37a   :  { %5812 = vmatmul.mubr.bf16.gmra.mrb[92].mxu0 %v13621_v32  ;;  %5932 = vmatprep.subr.bf16.mxu1 %v8224_v25  ;;  %v13631_v25 = vld [vmem:[#allocation129_spill] sm:$0xff] }
 0x37b   :  { %5821 = vmatprep.mubr.bf16.mxu0 %v13622_v56  ;;  %8654 = vmatpush1.bf16.msra.mxu0 %v8653_v10  ;;  %v13632_v10 = vld [vmem:[#allocation131_spill] sm:$0xff] }
 0x37c   :  { %8655 = vmatprep.subr.bf16.mxu0 %v13608_v39 }
 0x37d   :  { %5933 = vmatpush1.bf16.msra.mxu1 %v8223_v18  ;;  %v13635_v18 = vld [vmem:[#allocation137_spill] sm:$0xff] }
 0x37e   :  { %6095 = vmatprep.subr.bf16.mxu1 %v8232_v53  ;;  %v13637_v53 = vld [vmem:[#allocation141_spill] sm:$0xff] }
 0x37f   :  { %8657 = vmatpush1.bf16.msra.mxu0 %v8656_v9  ;;  %v13636_v9 = vld [vmem:[#allocation139_spill] sm:$0xff] }
 0x380   :  { %5050 = vmatmul.mubr.bf16.gmra.mrb[96].mxu1 %v13623_v35  ;;  %8658 = vmatprep.subr.bf16.mxu0 %v13608_v39 }
 0x381   :  { %5059 = vmatprep.mubr.bf16.mxu1 %v13624_v11 }
 0x382   :  { %5822 = vmatmul.mubr.bf16.gmra.mrb[96].mxu0 %v13623_v35 }
 0x383   :  { %5831 = vmatprep.mubr.bf16.mxu0 %v13624_v11 }
 0x388   :  { %5060 = vmatmul.mubr.bf16.gmra.mrb[100].mxu1 %v13625_v3 }
 0x389   :  { %5069 = vmatprep.mubr.bf16.mxu1 %v13626_v1 }
 0x38a   :  { %5832 = vmatmul.mubr.bf16.gmra.mrb[100].mxu0 %v13625_v3 }
 0x38b   :  { %5841 = vmatprep.mubr.bf16.mxu0 %v13626_v1  ;;  %v13699_v1 = vld [vmem:[#allocation77_spill] sm:$0xff] }
 0x390   :  { %5070 = vmatmul.mubr.bf16.gmra.mrb[104].mxu1 %v13627_v59 }
 0x391   :  { %5079 = vmatprep.mubr.bf16.mxu1 %v13628_v2 }
 0x392   :  { %5842 = vmatmul.mubr.bf16.gmra.mrb[104].mxu0 %v13627_v59  ;;  %v631_v59 = vld [vmem:[#allocation8 + $0x4f8] sm:$0xff] }
 0x393   :  { %5851 = vmatprep.mubr.bf16.mxu0 %v13628_v2 }
 0x398   :  { %5080 = vmatmul.mubr.bf16.gmra.mrb[108].mxu1 %v13629_v47 }
 0x399   :  { %5089 = vmatprep.mubr.bf16.mxu1 %v13630_v14 }
 0x39a   :  { %5852 = vmatmul.mubr.bf16.gmra.mrb[108].mxu0 %v13629_v47 }
 0x39b   :  { %5861 = vmatprep.mubr.bf16.mxu0 %v13630_v14 }
 0x3a0   :  { %5090 = vmatmul.mubr.bf16.gmra.mrb[112].mxu1 %v13631_v25 }
 0x3a1   :  { %5099 = vmatprep.mubr.bf16.mxu1 %v13632_v10 }
 0x3a2   :  { %5862 = vmatmul.mubr.bf16.gmra.mrb[112].mxu0 %v13631_v25  ;;  %v6965_v25 = vld [vmem:[%s13083_s4 + $0x118] sm:$0xff] }
 0x3a3   :  { %5871 = vmatprep.mubr.bf16.mxu0 %v13632_v10  ;;  %v6964_v10 = vld [vmem:[%s13083_s4 + $0x110] sm:$0xff] }
 0x3a4   :  { %v8662_v47 = vpack.c.bf16 %v6965_v25, %v6964_v10 }
 0x3a8   :  { %5100 = vmatmul.mubr.bf16.gmra.mrb[116].mxu1 %v13633_v33 }
 0x3a9   :  { %5109 = vmatprep.mubr.bf16.mxu1 %v13634_v16 }
 0x3aa   :  { %5872 = vmatmul.mubr.bf16.gmra.mrb[116].mxu0 %v13633_v33  ;;  %v10034_v33 = vpop.eup %10033 }
 0x3ab   :  { %5881 = vmatprep.mubr.bf16.mxu0 %v13634_v16  ;;  %v13638_v16 = vld [vmem:[#allocation18_spill] sm:$0xff] }
 0x3b0   :  { %5110 = vmatmul.mubr.bf16.gmra.mrb[120].mxu1 %v13635_v18 }
 0x3b1   :  { %5119 = vmatprep.mubr.bf16.mxu1 %v13636_v9 }
 0x3b2   :  { %5882 = vmatmul.mubr.bf16.gmra.mrb[120].mxu0 %v13635_v18  ;;  %v615_v18 = vld [vmem:[#allocation8 + $0x478] sm:$0xff] }
 0x3b3   :  { %5891 = vmatprep.mubr.bf16.mxu0 %v13636_v9  ;;  %v10036_v9 = vpop.eup %10035  ;;  %v8239_v37 = vcombine.low %v611_v30, %v615_v18 }
 0x3b4   :  { %v10038_v14 = vpop.eup %10037 }
 0x3b5   :  { %v10040_v2 = vpop.eup %10039 }
 0x3b6   :  { %v10042_v34 = vpop.eup %10041 }
 0x3b8   :  { %5120 = vmatmul.mubr.bf16.gmra.mrb[124].mxu1 %v13637_v53 }
 0x3b9   :  { %5934 = vmatprep.mubr.bf16.mxu1 %v13638_v16  ;;  %v8240_v16 = vcombine.high %v611_v30, %v615_v18  ;;  %v8665_v30 = vpack.c.bf16 %v6967_v49, %v6966_v0  ;;  %v651_v0 = vld [vmem:[#allocation8 + $0x598] sm:$0xff] }
 0x3ba   :  { %5892 = vmatmul.mubr.bf16.gmra.mrb[124].mxu0 %v13637_v53  ;;  %v619_v53 = vld [vmem:[#allocation8 + $0x498] sm:$0xff] }
 0x3bb   :  { %7122 = vmatprep.mubr.f32.mxu0 %v10034_v33  ;;  %v8659_v33 = vpack.c.bf16 %v6963_v51, %v6962_v61  ;;  %v13641_v61 = vld [vmem:[#allocation22_spill] sm:$0xff]  ;;  %v8248_v51 = vcombine.high %v619_v53, %v623_v55  ;;  %v8247_v25 = vcombine.low %v619_v53, %v623_v55  ;;  %v6969_v53 = vld [vmem:[%s13083_s4 + $0x138] sm:$0xff] }
 0x3c0   :  { %5935 = vmatmul.mubr.bf16.vlgmr.msra.gmra.mrb[128].mxu1 %v13639_v36  ;;  %v627_v36 = vld [vmem:[#allocation8 + $0x4d8] sm:$0xff] }
 0x3c1   :  { %6096 = vmatpush1.bf16.msra.mxu1 %v13640_v60  ;;  %5944 = vmatprep.mubr.bf16.mxu1 %v13641_v61  ;;  %v8256_v18 = vcombine.high %v627_v36, %v631_v59  ;;  %v8255_v13 = vcombine.low %v627_v36, %v631_v59  ;;  %v643_v60 = vld [vmem:[#allocation8 + $0x558] sm:$0xff] }
 0x3c2   :  { %7123 = vmatmul.mubr.f32.vlgmr.msra.gmra.mrb[128].mxu0 %v10036_v9  ;;  %6097 = vmatprep.subr.bf16.mxu1 %v8240_v16  ;;  %v635_v9 = vld [vmem:[#allocation8 + $0x518] sm:$0xff] }
 0x3c3   :  { %7127 = vmatprep.mubr.f32.mxu0 %v10038_v14  ;;  %8660 = vmatpush1.bf16.msra.mxu0 %v8659_v33  ;;  %v11896_v14 = vld [vmem:[#allocation8 + $0x838] sm:$0xff] }
 0x3c4   :  { %8661 = vmatprep.subr.bf16.mxu0 %v13608_v39  ;;  %v13642_v16 = vld [vmem:[#allocation24_spill] sm:$0xff] }
 0x3c5   :  { %6098 = vmatpush1.bf16.msra.mxu1 %v8239_v37  ;;  %v639_v33 = vld [vmem:[#allocation8 + $0x538] sm:$0xff]  ;;  %v8668_v37 = vpack.c.bf16 %v6969_v53, %v6968_v31 }
 0x3c6   :  { %7128 = vmatmul.mubr.f32.gmra.mrb[130].mxu0 %v10040_v2  ;;  %6099 = vmatprep.subr.bf16.mxu1 %v8248_v51  ;;  %v10044_v2 = vpop.eup %10043  ;;  %v647_v51 = vld [vmem:[#allocation8 + $0x578] sm:$0xff]  ;;  %v8263_v44 = vcombine.low %v635_v9, %v639_v33 }
 0x3c7   :  { %7132 = vmatprep.mubr.f32.mxu0 %v10042_v34  ;;  %8663 = vmatpush1.bf16.msra.mxu0 %v8662_v47  ;;  %v10046_v55 = vpop.eup %10045  ;;  %v8264_v47 = vcombine.high %v635_v9, %v639_v33  ;;  %v8272_v36 = vcombine.high %v643_v60, %v647_v51  ;;  %v13643_v9 = vld [vmem:[#allocation145_spill] sm:$0xff]  ;;  %v663_v31 = vld [vmem:[#allocation8 + $0x5f8] sm:$0xff] }
 0x3c8   :  { %5945 = vmatmul.mubr.bf16.gmra.mrb[132].mxu1 %v13642_v16  ;;  %8664 = vmatprep.subr.bf16.mxu0 %v13608_v39  ;;  %v10048_v61 = vpop.eup %10047  ;;  %10065 = vtanh.f32 %v13643_v9  ;;  %v679_v9 = vld [vmem:[#allocation8 + $0x678] sm:$0xff] }
 0x3c9   :  { %5954 = vmatprep.mubr.bf16.mxu1 %v10819_v54  ;;  %6100 = vmatpush1.bf16.msra.mxu1 %v8247_v25  ;;  %v6970_v54 = vld [vmem:[%s13083_s4 + $0x140] sm:$0xff]  ;;  %v10050_v59 = vpop.eup %10049 }
 0x3ca   :  { %7133 = vmatmul.mubr.f32.gmra.mrb[132].mxu0 %v10044_v2  ;;  %6101 = vmatprep.subr.bf16.mxu1 %v8256_v18  ;;  %v8671_v49 = vpack.c.bf16 %v6971_v17, %v6970_v54  ;;  %v10052_v34 = vpop.eup %10051  ;;  %v655_v25 = vld [vmem:[#allocation8 + $0x5b8] sm:$0xff]  ;;  %v13646_v54 = vld [vmem:[#allocation29_spill] sm:$0xff] }
 0x3cb   :  { %7137 = vmatprep.mubr.f32.mxu0 %v10046_v55  ;;  %8666 = vmatpush1.bf16.msra.mxu0 %v8665_v30  ;;  %v6973_v18 = vld [vmem:[%s13083_s4 + $0x158] sm:$0xff]  ;;  %v10054_v50 = vpop.eup %10053  ;;  %v8280_v30 = vcombine.high %v651_v0, %v655_v25 }
 0x3cc   :  { %8667 = vmatprep.subr.bf16.mxu0 %v13608_v39  ;;  %v659_v2 = vld [vmem:[#allocation8 + $0x5d8] sm:$0xff]  ;;  %v8674_v16 = vpack.c.bf16 %v6973_v18, %v6972_v63  ;;  %v10056_v33 = vpop.eup %10055 }
 0x3cd   :  { %6102 = vmatpush1.bf16.msra.mxu1 %v8255_v13  ;;  %v10058_v53 = vpop.eup %10057  ;;  %v13644_v55 = vld [vmem:[#allocation144_spill] sm:$0xff]  ;;  %v8279_v13 = vcombine.low %v651_v0, %v655_v25  ;;  %v13647_v0 = vld [vmem:[#allocation31_spill] sm:$0xff]  ;;  %v13649_v25 = vld [vmem:[#allocation149_spill] sm:$0xff] }
 0x3ce   :  { %7138 = vmatmul.mubr.f32.gmra.mrb[134].mxu0 %v10048_v61  ;;  %6103 = vmatprep.subr.bf16.mxu1 %v8264_v47  ;;  %10067 = vtanh.f32 %v13644_v55  ;;  %v13645_v47 = vld [vmem:[#allocation147_spill] sm:$0xff] }
 0x3cf   :  { %7142 = vmatprep.mubr.f32.mxu0 %v10050_v59  ;;  %8669 = vmatpush1.bf16.msra.mxu0 %v8668_v37  ;;  %10069 = vtanh.f32 %v13645_v47  ;;  %v667_v37 = vld [vmem:[#allocation8 + $0x618] sm:$0xff]  ;;  %v6976_v59 = vld [vmem:[%s13083_s4 + $0x170] sm:$0xff]  ;;  %v13652_v47 = vld [vmem:[#allocation33_spill] sm:$0xff] }
 0x3d0   :  { %5955 = vmatmul.mubr.bf16.gmra.mrb[136].mxu1 %v10827_v15  ;;  %8670 = vmatprep.subr.bf16.mxu0 %v13608_v39  ;;  %v8271_v15 = vcombine.low %v643_v60, %v647_v51  ;;  %v8288_v60 = vcombine.high %v659_v2, %v663_v31  ;;  %v10060_v51 = vpop.eup %10059  ;;  %v671_v17 = vld [vmem:[#allocation8 + $0x638] sm:$0xff] }
 0x3d1   :  { %5964 = vmatprep.mubr.bf16.mxu1 %v10831_v20  ;;  %6104 = vmatpush1.bf16.msra.mxu1 %v8263_v44  ;;  %v6974_v20 = vld [vmem:[%s13083_s4 + $0x160] sm:$0xff]  ;;  %v6977_v44 = vld [vmem:[%s13083_s4 + $0x178] sm:$0xff]  ;;  %v8296_v63 = vcombine.high %v667_v37, %v671_v17 }
 0x3d2   :  { %7143 = vmatmul.mubr.f32.gmra.mrb[136].mxu0 %v10052_v34  ;;  %6105 = vmatprep.subr.bf16.mxu1 %v8272_v36  ;;  %v8677_v61 = vpack.c.bf16 %v6975_v40, %v6974_v20  ;;  %v10062_v36 = vpop.eup %10061  ;;  %v8287_v34 = vcombine.low %v659_v2, %v663_v31  ;;  %v675_v18 = vld [vmem:[#allocation8 + $0x658] sm:$0xff]  ;;  %v8295_v31 = vcombine.low %v667_v37, %v671_v17  ;;  %v13654_v17 = vld [vmem:[#allocation150_spill] sm:$0xff] }
 0x3d3   :  { %7147 = vmatprep.mubr.f32.mxu0 %v10054_v50  ;;  %8672 = vmatpush1.bf16.msra.mxu0 %v8671_v49  ;;  %v13648_v49 = vld [vmem:[#allocation146_spill] sm:$0xff]  ;;  %v8680_v50 = vpack.c.bf16 %v6977_v44, %v6976_v59  ;;  %v13651_v20 = vld [vmem:[#allocation151_spill] sm:$0xff]  ;;  %v8304_v40 = vcombine.high %v675_v18, %v679_v9  ;;  %v8303_v59 = vcombine.low %v675_v18, %v679_v9  ;;  %v13655_v44 = vld [vmem:[#allocation153_spill] sm:$0xff] }
 0x3d4   :  { %8673 = vmatprep.subr.bf16.mxu0 %v13608_v39  ;;  %10071 = vtanh.f32 %v13648_v49  ;;  %v6981_v37 = vld [vmem:[%s13083_s4 + $0x198] sm:$0xff] }
 0x3d5   :  { %6106 = vmatpush1.bf16.msra.mxu1 %v8271_v15  ;;  %10073 = vtanh.f32 %v13649_v25  ;;  %v10064_v15 = vpop.eup %10063  ;;  %v695_v25 = vld [vmem:[#allocation8 + $0x6f8] sm:$0xff] }
 0x3d6   :  { %7148 = vmatmul.mubr.f32.gmra.mrb[138].mxu0 %v10056_v33  ;;  %6107 = vmatprep.subr.bf16.mxu1 %v8280_v30  ;;  %v6978_v30 = vld [vmem:[%s13083_s4 + $0x180] sm:$0xff]  ;;  %v10066_v2 = vpop.eup %10065 }
 0x3d7   :  { %7152 = vmatprep.mubr.f32.mxu0 %v10058_v53  ;;  %8675 = vmatpush1.bf16.msra.mxu0 %v8674_v16  ;;  %v6979_v16 = vld [vmem:[%s13083_s4 + $0x188] sm:$0xff]  ;;  %v13650_v33 = vld [vmem:[#allocation148_spill] sm:$0xff] }
 0x3d8   :  { %5965 = vmatmul.mubr.bf16.gmra.mrb[140].mxu1 %v13646_v54  ;;  %8676 = vmatprep.subr.bf16.mxu0 %v13608_v39  ;;  %10075 = vtanh.f32 %v13650_v33  ;;  %v683_v53 = vld [vmem:[#allocation8 + $0x698] sm:$0xff]  ;;  %v8683_v55 = vpack.c.bf16 %v6979_v16, %v6978_v30 }
 0x3d9   :  { %5974 = vmatprep.mubr.bf16.mxu1 %v13647_v0  ;;  %6108 = vmatpush1.bf16.msra.mxu1 %v8279_v13  ;;  %10077 = vtanh.f32 %v13651_v20  ;;  %v10068_v13 = vpop.eup %10067  ;;  %v13653_v54 = vld [vmem:[#allocation35_spill] sm:$0xff]  ;;  %v13658_v20 = vld [vmem:[#allocation37_spill] sm:$0xff] }
 0x3da   :  { %7153 = vmatmul.mubr.f32.gmra.mrb[140].mxu0 %v10060_v51  ;;  %6109 = vmatprep.subr.bf16.mxu1 %v8288_v60  ;;  %v687_v60 = vld [vmem:[#allocation8 + $0x6b8] sm:$0xff]  ;;  %v10070_v51 = vpop.eup %10069  ;;  %10079 = vtanh.f32 %v13654_v17 }
 0x3db   :  { %7157 = vmatprep.mubr.f32.mxu0 %v10062_v36  ;;  %8678 = vmatpush1.bf16.msra.mxu0 %v8677_v61  ;;  %v6980_v61 = vld [vmem:[%s13083_s4 + $0x190] sm:$0xff]  ;;  %10081 = vtanh.f32 %v13655_v44  ;;  %v8312_v36 = vcombine.high %v683_v53, %v687_v60  ;;  %v691_v0 = vld [vmem:[#allocation8 + $0x6d8] sm:$0xff]  ;;  %v8311_v9 = vcombine.low %v683_v53, %v687_v60 }
 0x3dc   :  { %8679 = vmatprep.subr.bf16.mxu0 %v13608_v39  ;;  %v8686_v49 = vpack.c.bf16 %v6981_v37, %v6980_v61  ;;  %v13657_v30 = vld [vmem:[#allocation155_spill] sm:$0xff]  ;;  %v8320_v16 = vcombine.high %v691_v0, %v695_v25  ;;  %v13660_v60 = vld [vmem:[#allocation154_spill] sm:$0xff]  ;;  %v8319_v61 = vcombine.low %v691_v0, %v695_v25  ;;  %v13661_v37 = vld [vmem:[#allocation157_spill] sm:$0xff] }
 0x3dd   :  { %6110 = vmatpush1.bf16.msra.mxu1 %v8287_v34  ;;  %v6985_v53 = vld [vmem:[%s13083_s4 + $0x1b8] sm:$0xff] }
 0x3de   :  { %7158 = vmatmul.mubr.f32.gmra.mrb[142].mxu0 %v10064_v15  ;;  %6111 = vmatprep.subr.bf16.mxu1 %v8296_v63  ;;  %v10072_v34 = vpop.eup %10071  ;;  %v6982_v63 = vld [vmem:[%s13083_s4 + $0x1a0] sm:$0xff] }
 0x3df   :  { %7162 = vmatprep.mubr.f32.mxu0 %v10066_v2  ;;  %8681 = vmatpush1.bf16.msra.mxu0 %v8680_v50  ;;  %v6983_v50 = vld [vmem:[%s13083_s4 + $0x1a8] sm:$0xff]  ;;  %v10074_v18 = vpop.eup %10073  ;;  %v13656_v15 = vld [vmem:[#allocation152_spill] sm:$0xff] }
 0x3e0   :  { %5975 = vmatmul.mubr.bf16.gmra.mrb[144].mxu1 %v13652_v47  ;;  %8682 = vmatprep.subr.bf16.mxu0 %v13608_v39  ;;  %10083 = vtanh.f32 %v13656_v15  ;;  %v699_v2 = vld [vmem:[#allocation8 + $0x718] sm:$0xff]  ;;  %v8689_v33 = vpack.c.bf16 %v6983_v50, %v6982_v63 }
 0x3e1   :  { %5984 = vmatprep.mubr.bf16.mxu1 %v13653_v54  ;;  %6112 = vmatpush1.bf16.msra.mxu1 %v8295_v31  ;;  %10085 = vtanh.f32 %v13657_v30  ;;  %v13659_v47 = vld [vmem:[#allocation39_spill] sm:$0xff]  ;;  %v13664_v30 = vld [vmem:[#allocation41_spill] sm:$0xff] }
 0x3e2   :  { %7163 = vmatmul.mubr.f32.gmra.mrb[144].mxu0 %v10068_v13  ;;  %6113 = vmatprep.subr.bf16.mxu1 %v8304_v40  ;;  %v10076_v31 = vpop.eup %10075  ;;  %v703_v40 = vld [vmem:[#allocation8 + $0x738] sm:$0xff]  ;;  %10087 = vtanh.f32 %v13660_v60 }
 0x3e3   :  { %7167 = vmatprep.mubr.f32.mxu0 %v10070_v51  ;;  %8684 = vmatpush1.bf16.msra.mxu0 %v8683_v55  ;;  %v6984_v55 = vld [vmem:[%s13083_s4 + $0x1b0] sm:$0xff]  ;;  %v10078_v13 = vpop.eup %10077  ;;  %10089 = vtanh.f32 %v13661_v37  ;;  %v8328_v51 = vcombine.high %v699_v2, %v703_v40  ;;  %v707_v54 = vld [vmem:[#allocation8 + $0x758] sm:$0xff]  ;;  %v8327_v25 = vcombine.low %v699_v2, %v703_v40 }
 0x3e4   :  { %8685 = vmatprep.subr.bf16.mxu0 %v13608_v39  ;;  %v8692_v17 = vpack.c.bf16 %v6985_v53, %v6984_v55  ;;  %v711_v44 = vld [vmem:[#allocation8 + $0x778] sm:$0xff]  ;;  %v13666_v40 = vld [vmem:[#allocation158_spill] sm:$0xff]  ;;  %v13667_v53 = vld [vmem:[#allocation161_spill] sm:$0xff] }
 0x3e5   :  { %6114 = vmatpush1.bf16.msra.mxu1 %v8303_v59  ;;  %v10080_v59 = vpop.eup %10079  ;;  %v13663_v63 = vld [vmem:[#allocation159_spill] sm:$0xff]  ;;  %v8336_v50 = vcombine.high %v707_v54, %v711_v44  ;;  %v8335_v55 = vcombine.low %v707_v54, %v711_v44  ;;  %v6990_v60 = vld [vmem:[%s13083_s4 + $0x1e0] sm:$0xff] }
 0x3e6   :  { %7168 = vmatmul.mubr.f32.gmra.mrb[146].mxu0 %v10072_v34  ;;  %6115 = vmatprep.subr.bf16.mxu1 %v8312_v36  ;;  %v6986_v36 = vld [vmem:[%s13083_s4 + $0x1c0] sm:$0xff]  ;;  %v10082_v0 = vpop.eup %10081  ;;  %v6989_v2 = vld [vmem:[%s13083_s4 + $0x1d8] sm:$0xff] }
 0x3e7   :  { %7172 = vmatprep.mubr.f32.mxu0 %v10074_v18  ;;  %8687 = vmatpush1.bf16.msra.mxu0 %v8686_v49  ;;  %v6987_v49 = vld [vmem:[%s13083_s4 + $0x1c8] sm:$0xff]  ;;  %v13662_v34 = vld [vmem:[#allocation156_spill] sm:$0xff] }
 0x3e8   :  { %5985 = vmatmul.mubr.bf16.gmra.mrb[148].mxu1 %v13658_v20  ;;  %8688 = vmatprep.subr.bf16.mxu0 %v13608_v39  ;;  %10091 = vtanh.f32 %v13662_v34  ;;  %v715_v18 = vld [vmem:[#allocation8 + $0x798] sm:$0xff]  ;;  %v8695_v15 = vpack.c.bf16 %v6987_v49, %v6986_v36 }
 0x3e9   :  { %5994 = vmatprep.mubr.bf16.mxu1 %v13659_v47  ;;  %6116 = vmatpush1.bf16.msra.mxu1 %v8311_v9  ;;  %10093 = vtanh.f32 %v13663_v63  ;;  %v13665_v20 = vld [vmem:[#allocation43_spill] sm:$0xff] }
 0x3ea   :  { %7173 = vmatmul.mubr.f32.gmra.mrb[148].mxu0 %v10076_v31  ;;  %6117 = vmatprep.subr.bf16.mxu1 %v8320_v16  ;;  %v10084_v9 = vpop.eup %10083  ;;  %v719_v16 = vld [vmem:[#allocation8 + $0x7b8] sm:$0xff]  ;;  %10095 = vtanh.f32 %v13666_v40  ;;  %v6992_v63 = vld [vmem:[%s13083_s4 + $0x1f0] sm:$0xff] }
 0x3eb   :  { %7177 = vmatprep.mubr.f32.mxu0 %v10078_v13  ;;  %8690 = vmatpush1.bf16.msra.mxu0 %v8689_v33  ;;  %v6988_v33 = vld [vmem:[%s13083_s4 + $0x1d0] sm:$0xff]  ;;  %v10086_v31 = vpop.eup %10085  ;;  %10097 = vtanh.f32 %v13667_v53  ;;  %v8344_v13 = vcombine.high %v715_v18, %v719_v16  ;;  %v723_v37 = vld [vmem:[#allocation8 + $0x7d8] sm:$0xff]  ;;  %v8343_v44 = vcombine.low %v715_v18, %v719_v16  ;;  %v13673_v16 = vld [vmem:[#allocation165_spill] sm:$0xff] }
 0x3ec   :  { %8691 = vmatprep.subr.bf16.mxu0 %v13608_v39  ;;  %v8698_v47 = vpack.c.bf16 %v6989_v2, %v6988_v33  ;;  %v13669_v36 = vld [vmem:[#allocation163_spill] sm:$0xff]  ;;  %v8360_v2 = vcombine.high %v11894_v21, %v11896_v14  ;;  %v13674_v40 = vld [vmem:[#allocation164_spill] sm:$0xff] }
 0x3ed   :  { %6118 = vmatpush1.bf16.msra.mxu1 %v8319_v61  ;;  %v10088_v61 = vpop.eup %10087 }
 0x3ee   :  { %7178 = vmatmul.mubr.f32.gmra.mrb[150].mxu0 %v10080_v59  ;;  %6119 = vmatprep.subr.bf16.mxu1 %v8328_v51  ;;  %v727_v51 = vld [vmem:[#allocation8 + $0x7f8] sm:$0xff]  ;;  %v10090_v54 = vpop.eup %10089 }
 0x3ef   :  { %7182 = vmatprep.mubr.f32.mxu0 %v10082_v0  ;;  %8693 = vmatpush1.bf16.msra.mxu0 %v8692_v17  ;;  %v6991_v17 = vld [vmem:[%s13083_s4 + $0x1e8] sm:$0xff]  ;;  %v13668_v59 = vld [vmem:[#allocation160_spill] sm:$0xff]  ;;  %v8352_v49 = vcombine.high %v723_v37, %v727_v51 }
 0x3f0   :  { %5995 = vmatmul.mubr.bf16.gmra.mrb[152].mxu1 %v13664_v30  ;;  %8694 = vmatprep.subr.bf16.mxu0 %v13608_v39  ;;  %10099 = vtanh.f32 %v13668_v59  ;;  %v8701_v0 = vpack.c.bf16 %v6991_v17, %v6990_v60  ;;  %v8351_v30 = vcombine.low %v723_v37, %v727_v51  ;;  %v13677_v60 = vld [vmem:[#allocation51_spill] sm:$0xff]  ;;  %v13679_v37 = vld [vmem:[#allocation169_spill] sm:$0xff] }
 0x3f1   :  { %6004 = vmatprep.mubr.bf16.mxu1 %v13665_v20  ;;  %6120 = vmatpush1.bf16.msra.mxu1 %v8327_v25  ;;  %10101 = vtanh.f32 %v13669_v36  ;;  %v13670_v25 = vld [vmem:[#allocation45_spill] sm:$0xff]  ;;  %v13681_v59 = vld [vmem:[#allocation171_spill] sm:$0xff] }
 0x3f2   :  { %7183 = vmatmul.mubr.f32.gmra.mrb[152].mxu0 %v10084_v9  ;;  %6121 = vmatprep.subr.bf16.mxu1 %v8336_v50  ;;  %v10092_v34 = vpop.eup %10091  ;;  %v6993_v50 = vld [vmem:[%s13083_s4 + $0x1f8] sm:$0xff]  ;;  %v13672_v9 = vld [vmem:[#allocation162_spill] sm:$0xff]  ;;  %v13682_v36 = vld [vmem:[#allocation53_spill] sm:$0xff] }
 0x3f3   :  { %7187 = vmatprep.mubr.f32.mxu0 %v10086_v31  ;;  %8696 = vmatpush1.bf16.msra.mxu0 %v8695_v15  ;;  %v10094_v18 = vpop.eup %10093  ;;  %v13671_v15 = vld [vmem:[#allocation47_spill] sm:$0xff]  ;;  %10103 = vtanh.f32 %v13672_v9  ;;  %v8704_v33 = vpack.c.bf16 %v6993_v50, %v6992_v63  ;;  %v13685_v50 = vld [vmem:[#allocation172_spill] sm:$0xff]  ;;  %v13687_v9 = vld [vmem:[#allocation57_spill] sm:$0xff] }
 0x3f4   :  { %8697 = vmatprep.subr.bf16.mxu0 %v13608_v39  ;;  %10105 = vtanh.f32 %v13673_v16  ;;  %v10096_v31 = vpop.eup %10095  ;;  %v13688_v16 = vld [vmem:[#allocation59_spill] sm:$0xff] }
 0x3f5   :  { %6122 = vmatpush1.bf16.msra.mxu1 %v8335_v55  ;;  %v10098_v20 = vpop.eup %10097  ;;  %10107 = vtanh.f32 %v13674_v40  ;;  %v13675_v55 = vld [vmem:[#allocation167_spill] sm:$0xff] }
 0x3f6   :  { %7188 = vmatmul.mubr.f32.gmra.mrb[154].mxu0 %v10088_v61  ;;  %6123 = vmatprep.subr.bf16.mxu1 %v8344_v13  ;;  %10109 = vtanh.f32 %v13675_v55  ;;  %v13676_v13 = vld [vmem:[#allocation49_spill] sm:$0xff]  ;;  %v13678_v61 = vld [vmem:[#allocation166_spill] sm:$0xff] }
 0x3f7   :  { %7192 = vmatprep.mubr.f32.mxu0 %v10090_v54  ;;  %8699 = vmatpush1.bf16.msra.mxu0 %v8698_v47  ;;  %10111 = vtanh.f32 %v13678_v61  ;;  %v13680_v54 = vld [vmem:[#allocation168_spill] sm:$0xff]  ;;  %v13690_v61 = vld [vmem:[#allocation61_spill] sm:$0xff] }
 0x3f8   :  { %6005 = vmatmul.mubr.bf16.gmra.mrb[156].mxu1 %v13670_v25  ;;  %8700 = vmatprep.subr.bf16.mxu0 %v13608_v39  ;;  %10113 = vtanh.f32 %v13679_v37 }
 0x3f9   :  { %6014 = vmatprep.mubr.bf16.mxu1 %v13671_v15  ;;  %6124 = vmatpush1.bf16.msra.mxu1 %v8343_v44  ;;  %10115 = vtanh.f32 %v13680_v54 }
 0x3fa   :  { %7193 = vmatmul.mubr.f32.gmra.mrb[156].mxu0 %v10092_v34  ;;  %6125 = vmatprep.subr.bf16.mxu1 %v8352_v49  ;;  %v10100_v53 = vpop.eup %10099  ;;  %10117 = vtanh.f32 %v13681_v59  ;;  %v13684_v34 = vld [vmem:[#allocation170_spill] sm:$0xff] }
 0x3fb   :  { %7197 = vmatprep.mubr.f32.mxu0 %v10094_v18  ;;  %8702 = vmatpush1.bf16.msra.mxu0 %v8701_v0  ;;  %v10102_v47 = vpop.eup %10101  ;;  %v13683_v0 = vld [vmem:[#allocation55_spill] sm:$0xff]  ;;  %10119 = vtanh.f32 %v13684_v34  ;;  %v13686_v18 = vld [vmem:[#allocation174_spill] sm:$0xff]  ;;  %v13692_v34 = vld [vmem:[#allocation65_spill] sm:$0xff] }
 0x3fc   :  { %8703 = vmatprep.subr.bf16.mxu0 %v13608_v39  ;;  %10121 = vtanh.f32 %v11492_v41 }
 0x3fd   :  { %6126 = vmatpush1.bf16.msra.mxu1 %v8351_v30  ;;  %v10104_v51 = vpop.eup %10103  ;;  %10123 = vtanh.f32 %v13685_v50 }
 0x3fe   :  { %7198 = vmatmul.mubr.f32.gmra.mrb[158].mxu0 %v10096_v31  ;;  %6288 = vmatprep.subr.bf16.mxu1 %v8360_v2  ;;  %v10106_v17 = vpop.eup %10105  ;;  %10125 = vtanh.f32 %v13686_v18 }
 0x3ff   :  { %7202 = vmatprep.mubr.f32.mxu0 %v10098_v20  ;;  %8705 = vmatpush1.bf16.msra.mxu0 %v8704_v33  ;;  %v10108_v44 = vpop.eup %10107  ;;  %v13689_v33 = vld [vmem:[#allocation173_spill] sm:$0xff] }
 0x400   :  { %6015 = vmatmul.mubr.bf16.gmra.mrb[160].mxu1 %v13676_v13  ;;  %8706 = vmatprep.subr.bf16.mxu0 %v13608_v39  ;;  %v10110_v49 = vpop.eup %10109  ;;  %10127 = vtanh.f32 %v13689_v33 }
 0x401   :  { %6024 = vmatprep.mubr.bf16.mxu1 %v13677_v60  ;;  %v10112_v25 = vpop.eup %10111  ;;  %10129 = vtanh.f32 %v11508_v46 }
 0x402   :  { %7203 = vmatmul.mubr.f32.gmra.mrb[160].mxu0 %v10100_v53  ;;  %v10114_v63 = vpop.eup %10113  ;;  %10131 = vtanh.f32 %v11505_v48 }
 0x403   :  { %7207 = vmatprep.mubr.f32.mxu0 %v10102_v47  ;;  %v10116_v15 = vpop.eup %10115  ;;  %10133 = vtanh.f32 %v11513_v45 }
 0x404   :  { %v10118_v30 = vpop.eup %10117  ;;  %10135 = vtanh.f32 %v11510_v26 }
 0x405   :  { %v10120_v2 = vpop.eup %10119  ;;  %10137 = vtanh.f32 %v11530_v7 }
 0x406   :  { %7208 = vmatmul.mubr.f32.gmra.mrb[162].mxu0 %v10104_v51  ;;  %v10122_v40 = vpop.eup %10121  ;;  %v13691_v51 = vld [vmem:[#allocation63_spill] sm:$0xff]  ;;  %10139 = vtanh.f32 %v11523_v57 }
 0x407   :  { %7212 = vmatprep.mubr.f32.mxu0 %v10106_v17  ;;  %v10124_v60 = vpop.eup %10123  ;;  %10141 = vtanh.f32 %v11539_v52 }
 0x408   :  { %6025 = vmatmul.mubr.bf16.gmra.mrb[164].mxu1 %v13682_v36  ;;  %v10126_v37 = vpop.eup %10125  ;;  %10143 = vtanh.f32 %v11534_v4 }
 0x409   :  { %6034 = vmatprep.mubr.bf16.mxu1 %v13683_v0  ;;  %10145 = vtanh.f32 %v11550_v62  ;;  %v13694_v62 = vld [vmem:[#allocation142_spill] sm:$0xff] }
 0x40a   :  { %7213 = vmatmul.mubr.f32.gmra.mrb[164].mxu0 %v10108_v44  ;;  %v10128_v17 = vpop.eup %10127  ;;  %10147 = vtanh.f32 %v11547_v38  ;;  %v1000_v33 = vsub.s32 3, %v13694_v62  ;;  %v996_v38 = vsub.s32 2, %v13694_v62  ;;  %vm7994_vm1 = vcmp.eq.s32.totalorder %v13694_v62, 0 }
 0x40b   :  { %7217 = vmatprep.mubr.f32.mxu0 %v10110_v49  ;;  %v10130_v59 = vpop.eup %10129  ;;  %10149 = vtanh.f32 %v11555_v42 }
 0x40c   :  { %v10132_v0 = vpop.eup %10131  ;;  %10151 = vtanh.f32 %v11552_v58 }
 0x40d   :  { %10153 = vtanh.f32 %v11566_v12 }
 0x40e   :  { %7218 = vmatmul.mubr.f32.gmra.mrb[166].mxu0 %v10112_v25  ;;  %v10134_v25 = vpop.eup %10133  ;;  %10155 = vtanh.f32 %v11563_v5  ;;  %v13698_v5 = vld [vmem:[#allocation75_spill] sm:$0xff] }
 0x40f   :  { %7222 = vmatprep.mubr.f32.mxu0 %v10114_v63  ;;  %v13693_v63 = vld [vmem:[#allocation67_spill] sm:$0xff]  ;;  %v10136_v50 = vpop.eup %10135  ;;  %10157 = vtanh.f32 %v11571_v23 }
 0x410   :  { %6035 = vmatmul.mubr.bf16.gmra.mrb[168].mxu1 %v13687_v9  ;;  %10159 = vtanh.f32 %v11568_v27 }
 0x411   :  { %6044 = vmatprep.mubr.bf16.mxu1 %v13688_v16 }
 0x412   :  { %7223 = vmatmul.mubr.f32.gmra.mrb[168].mxu0 %v10116_v15  ;;  %v10138_v15 = vpop.eup %10137 }
 0x413   :  { %7227 = vmatprep.mubr.f32.mxu0 %v10118_v30  ;;  %v12055_v41 = vpop.f32.mrb[64].mxu1 }
 0x414   :  { %v12059_v20 = vpop.f32.mrb[65].mxu1 }
 0x415   :  { %v12057_v31 = vpop.f32.mrb[64].mxu0  ;;  %v12063_v53 = vpop.f32.mrb[66].mxu1 }
 0x416   :  { %v12061_v55 = vpop.f32.mrb[65].mxu0  ;;  %7228 = vmatmul.mubr.f32.gmra.mrb[170].mxu0 %v10120_v2  ;;  %v12068_v47 = vpop.f32.mrb[67].mxu1 }
 0x417   :  { %v12066_v13 = vpop.f32.mrb[66].mxu0  ;;  %7232 = vmatprep.mubr.f32.mxu0 %v10122_v40  ;;  %v10140_v40 = vpop.eup %10139 }
 0x418   :  { %v12071_v46 = vpop.f32.mrb[67].mxu0  ;;  %6045 = vmatmul.mubr.bf16.gmra.mrb[172].mxu1 %v13690_v61  ;;  %v10142_v61 = vpop.eup %10141 }
 0x419   :  { %6054 = vmatprep.mubr.bf16.mxu1 %v13691_v51  ;;  %v10553_v51 = vld [vmem:[#allocation9] sm:$0xff] }
 0x41a   :  { %7233 = vmatmul.mubr.f32.gmra.mrb[172].mxu0 %v10124_v60  ;;  %v13695_v60 = vld [vmem:[#allocation69_spill] sm:$0xff]  ;;  %v12123_v42 = vrot.slane %v10553_v51, %v1000_v33 }
 0x41b   :  { %7237 = vmatprep.mubr.f32.mxu0 %v10126_v37  ;;  %v12077_v48 = vpop.f32.mrb[68].mxu1  ;;  %v13696_v37 = vld [vmem:[#allocation71_spill] sm:$0xff] }
 0x41c   :  { %v12081_v45 = vpop.f32.mrb[69].mxu1  ;;  %v8931_v33 = vadd.f32 %v12059_v20, %v12123_v42  ;;  %v8933_v23 = vadd.f32 %v12068_v47, %v12123_v42 }
 0x41d   :  { %v12079_v54 = vpop.f32.mrb[68].mxu0  ;;  %v12085_v36 = vpop.f32.mrb[70].mxu1 }
 0x41e   :  { %v12083_v44 = vpop.f32.mrb[69].mxu0  ;;  %7238 = vmatmul.mubr.f32.gmra.mrb[174].mxu0 %v10128_v17  ;;  %v12090_v26 = vpop.f32.mrb[71].mxu1  ;;  %10161 = vtanh.f32 %v8931_v33 }
 0x41f   :  { %v12088_v49 = vpop.f32.mrb[70].mxu0  ;;  %7242 = vmatprep.mubr.f32.mxu0 %v10130_v59  ;;  %v10144_v59 = vpop.eup %10143 }
 0x420   :  { %v12093_v7 = vpop.f32.mrb[71].mxu0  ;;  %6055 = vmatmul.mubr.bf16.gmra.mrb[176].mxu1 %v13692_v34 }
 0x421   :  { %6064 = vmatprep.mubr.bf16.mxu1 %v13693_v63 }
 0x422   :  { %7243 = vmatmul.mubr.f32.gmra.mrb[176].mxu0 %v10132_v0 }
 0x423   :  { %7247 = vmatprep.mubr.f32.mxu0 %v10134_v25  ;;  %v12099_v57 = vpop.f32.mrb[72].mxu1  ;;  %v10146_v25 = vpop.eup %10145 }
 0x424   :  { %v12103_v52 = vpop.f32.mrb[73].mxu1 }
 0x425   :  { %v12101_v18 = vpop.f32.mrb[72].mxu0  ;;  %v12107_v30 = vpop.f32.mrb[74].mxu1  ;;  %v8939_v32 = vadd.f32 %v12103_v52, %v12123_v42  ;;  %v12217_v52 = vld [vmem:[#allocation8 + $0xc18] sm:$0xff] }
 0x426   :  { %v12105_v9 = vpop.f32.mrb[73].mxu0  ;;  %7248 = vmatmul.mubr.f32.gmra.mrb[178].mxu0 %v10136_v50  ;;  %v12112_v4 = vpop.f32.mrb[75].mxu1  ;;  %v12136_v50 = vrot.slane %v10553_v51, %v996_v38 }
 0x427   :  { %v12110_v16 = vpop.f32.mrb[74].mxu0  ;;  %7252 = vmatprep.mubr.f32.mxu0 %v10138_v15 }
 0x428   :  { %v12116_v2 = vpop.f32.mrb[75].mxu0  ;;  %6065 = vmatmul.mubr.bf16.gmra.mrb[180].mxu1 %v13695_v60  ;;  %v10148_v60 = vpop.eup %10147  ;;  %v8930_v38 = vadd.f32 %v12055_v41, %v12136_v50  ;;  %v8932_v41 = vadd.f32 %v12063_v53, %v12136_v50  ;;  %v8934_v53 = vadd.f32 %v12077_v48, %v12136_v50  ;;  %v6995_v48 = vld [vmem:[%s13083_s4 + $0x208] sm:$0xff] }
 0x429   :  { %6074 = vmatprep.mubr.bf16.mxu1 %v13696_v37  ;;  %v10150_v37 = vpop.eup %10149 }
 0x42a   :  { %7253 = vmatmul.mubr.f32.gmra.mrb[180].mxu0 %v10140_v40  ;;  %v10152_v51 = vpop.eup %10151  ;;  %10163 = vtanh.f32 %v8930_v38  ;;  %v13700_v38 = vld [vmem:[#allocation79_spill] sm:$0xff] }
 0x42b   :  { %7257 = vmatprep.mubr.f32.mxu0 %v10142_v61  ;;  %v12125_v17 = vpop.f32.mrb[76].mxu1  ;;  %v13697_v61 = vld [vmem:[#allocation73_spill] sm:$0xff]  ;;  %10165 = vtanh.f32 %v8933_v23  ;;  %v8937_v23 = vadd.f32 %v12090_v26, %v12123_v42 }
 0x42c   :  { %v12129_v34 = vpop.f32.mrb[77].mxu1  ;;  %10167 = vtanh.f32 %v8932_v41  ;;  %v6994_v41 = vld [vmem:[%s13083_s4 + $0x200] sm:$0xff] }
 0x42d   :  { %v12127_v0 = vpop.f32.mrb[76].mxu0  ;;  %v12133_v58 = vpop.f32.mrb[78].mxu1 }
 0x42e   :  { %v12131_v63 = vpop.f32.mrb[77].mxu0  ;;  %7258 = vmatmul.mubr.f32.gmra.mrb[182].mxu0 %v10144_v59  ;;  %v12140_v15 = vpop.f32.mrb[79].mxu1 }
 0x42f   :  { %v12138_v12 = vpop.f32.mrb[78].mxu0  ;;  %7262 = vmatprep.mubr.f32.mxu0 %v10146_v25 }
 0x430   :  { %v12145_v40 = vpop.f32.mrb[79].mxu0  ;;  %6075 = vmatmul.mubr.bf16.gmra.mrb[184].mxu1 %v13697_v61 }
 0x431   :  { %6084 = vmatprep.mubr.bf16.mxu1 %v13698_v5 }
 0x432   :  { %7263 = vmatmul.mubr.f32.gmra.mrb[184].mxu0 %v10148_v60  ;;  %v10154_v60 = vpop.eup %10153 }
 0x433   :  { %7267 = vmatprep.mubr.f32.mxu0 %v10150_v37  ;;  %v12154_v20 = vpop.f32.mrb[80].mxu1  ;;  %v8935_v37 = vadd.f32 %v12081_v45, %v12123_v42  ;;  %v10156_v10 = vpop.eup %10155  ;;  %v739_v45 = vld [vmem:[#allocation8 + $0x858] sm:$0xff] }
 0x434   :  { %v12158_v25 = vpop.f32.mrb[81].mxu1 }
 0x435   :  { %v12156_v59 = vpop.f32.mrb[80].mxu0  ;;  %v12162_v27 = vpop.f32.mrb[82].mxu1  ;;  %10169 = vtanh.f32 %v8935_v37 }
 0x436   :  { %v12160_v61 = vpop.f32.mrb[81].mxu0  ;;  %7268 = vmatmul.mubr.f32.gmra.mrb[186].mxu0 %v10152_v51  ;;  %v12168_v47 = vpop.f32.mrb[83].mxu1  ;;  %10171 = vtanh.f32 %v8934_v53  ;;  %v8707_v53 = vpack.c.bf16 %v6995_v48, %v6994_v41  ;;  %v13705_v41 = vcombine.low %v11894_v21, %v11896_v14  ;;  %v12235_v14 = vld [vmem:[#allocation8 + $0x8d8] sm:$0xff] }
 0x437   :  { %v12166_v33 = vpop.f32.mrb[82].mxu0  ;;  %7272 = vmatprep.mubr.f32.mxu0 %v10154_v60  ;;  %v10158_v51 = vpop.eup %10157  ;;  %10173 = vtanh.f32 %v8937_v23  ;;  %v6997_v23 = vld [vmem:[%s13083_s4 + $0x218] sm:$0xff] }
 0x438   :  { %v12172_v5 = vpop.f32.mrb[83].mxu0  ;;  %6085 = vmatmul.mubr.bf16.gmra.mrb[188].mxu1 %v13699_v1  ;;  %v10160_v3 = vpop.eup %10159 }
 0x439   :  { %6127 = vmatprep.mubr.bf16.mxu1 %v13700_v38  ;;  %v10162_v37 = vpop.eup %10161  ;;  %v8936_v38 = vadd.f32 %v12085_v36, %v12136_v50  ;;  %v6996_v36 = vld [vmem:[%s13083_s4 + $0x210] sm:$0xff] }
 0x43a   :  { %7273 = vmatmul.mubr.f32.gmra.mrb[188].mxu0 %v10156_v10  ;;  %v743_v10 = vld [vmem:[#allocation8 + $0x878] sm:$0xff]  ;;  %v10164_v29 = vpop.eup %10163 }
 0x43b   :  { %7277 = vmatprep.mubr.f32.mxu0 %v10158_v51  ;;  %v12180_v60 = vpop.f32.mrb[84].mxu1  ;;  %v8368_v19 = vcombine.high %v739_v45, %v743_v10  ;;  %v10166_v22 = vpop.eup %10165  ;;  %v8367_v48 = vcombine.low %v739_v45, %v743_v10  ;;  %10175 = vtanh.f32 %v8936_v38  ;;  %v8710_v45 = vpack.c.bf16 %v6997_v23, %v6996_v36 }
 0x43c   :  { %v12184_v1 = vpop.f32.mrb[85].mxu1  ;;  %10177 = vtanh.f32 %v8939_v32  ;;  %v10168_v10 = vpop.eup %10167  ;;  %v6998_v32 = vld [vmem:[%s13083_s4 + $0x220] sm:$0xff]  ;;  %v8940_v36 = vadd.f32 %v12107_v30, %v12136_v50 }
 0x43d   :  { %v12182_v11 = vpop.f32.mrb[84].mxu0  ;;  %v12194_v26 = vpop.f32.mrb[86].mxu1 }
 0x43e   :  { %13701 = vst [vmem:[#allocation18_spill] sm:$0xff] %v12182_v11  ;;  %v12192_v51 = vpop.f32.mrb[85].mxu0  ;;  %7278 = vmatmul.mubr.f32.gmra.mrb[190].mxu0 %v10160_v3  ;;  %v12200_v56 = vpop.f32.mrb[87].mxu1  ;;  %v12208_v3 = vld [vmem:[#allocation8 + $0x8b8] sm:$0xff] }
 0x43f   :  { %v12198_v35 = vpop.f32.mrb[86].mxu0  ;;  %7347 = vmatprep.mubr.f32.mxu0 %v10162_v37  ;;  %v13704_v37 = vld [vmem:[#allocation81_spill] sm:$0xff]  ;;  %v8375_v8 = vcombine.low %v12206_v43, %v12208_v3  ;;  %v783_v11 = vld [vmem:[#allocation8 + $0x9b8] sm:$0xff] }
 0x440   :  { %13702 = vst [vmem:[#allocation20_spill] sm:$0xff] %v12198_v35  ;;  %v12204_v28 = vpop.f32.mrb[87].mxu0  ;;  %6128 = vmatmul.mubr.bf16.vlgmr.msra.gmra.mrb[128].mxu1 %v13704_v37  ;;  %v8938_v37 = vadd.f32 %v12099_v57, %v12136_v50  ;;  %v13706_v35 = vld [vmem:[#allocation83_spill] sm:$0xff]  ;;  %v10170_v57 = vpop.eup %10169 }
 0x441   :  { %13703 = vst [vmem:[#allocation22_spill] sm:$0xff] %v12204_v28  ;;  %6289 = vmatpush1.bf16.msra.mxu1 %v13705_v41  ;;  %6137 = vmatprep.mubr.bf16.mxu1 %v13706_v35  ;;  %v8376_v28 = vcombine.high %v12206_v43, %v12208_v3  ;;  %v759_v35 = vld [vmem:[#allocation8 + $0x8f8] sm:$0xff]  ;;  %v7000_v43 = vld [vmem:[%s13083_s4 + $0x230] sm:$0xff] }
 0x442   :  { %7348 = vmatmul.mubr.f32.vlgmr.msra.gmra.mrb[128].mxu0 %v10164_v29  ;;  %v8941_v29 = vadd.f32 %v12112_v4, %v12123_v42  ;;  %6290 = vmatprep.subr.bf16.mxu1 %v8368_v19  ;;  %v6999_v19 = vld [vmem:[%s13083_s4 + $0x228] sm:$0xff]  ;;  %10179 = vtanh.f32 %v8938_v37  ;;  %v12265_v37 = vld [vmem:[#allocation8 + $0x918] sm:$0xff] }
 0x443   :  { %7352 = vmatprep.mubr.f32.mxu0 %v10166_v22  ;;  %v12233_v21 = vpop.f32.mrb[88].mxu1  ;;  %8708 = vmatpush1.bf16.msra.mxu0 %v8707_v53  ;;  %v8713_v30 = vpack.c.bf16 %v6999_v19, %v6998_v32  ;;  %v13712_v3 = vld [vmem:[#allocation87_spill] sm:$0xff]  ;;  %v8945_v32 = vadd.f32 %v12140_v15, %v12123_v42  ;;  %v7002_v15 = vld [vmem:[%s13083_s4 + $0x240] sm:$0xff] }
 0x444   :  { %v12239_v22 = vpop.f32.mrb[89].mxu1  ;;  %8709 = vmatprep.subr.bf16.mxu0 %v13608_v39  ;;  %10181 = vtanh.f32 %v8941_v29  ;;  %v8942_v29 = vadd.f32 %v12125_v17, %v12136_v50 }
 0x445   :  { %v12237_v38 = vpop.f32.mrb[88].mxu0  ;;  %v12250_v53 = vpop.f32.mrb[90].mxu1  ;;  %6291 = vmatpush1.bf16.msra.mxu1 %v8367_v48  ;;  %v8384_v48 = vcombine.high %v12235_v14, %v759_v35  ;;  %10183 = vtanh.f32 %v8940_v36 }
 0x446   :  { %13707 = vst [vmem:[#allocation24_spill] sm:$0xff] %v12237_v38  ;;  %v12248_v4 = vpop.f32.mrb[89].mxu0  ;;  %7353 = vmatmul.mubr.f32.gmra.mrb[130].mxu0 %v10168_v10  ;;  %v12256_v41 = vpop.f32.mrb[91].mxu1  ;;  %6292 = vmatprep.subr.bf16.mxu1 %v8376_v28  ;;  %v8943_v10 = vadd.f32 %v12129_v34, %v12123_v42  ;;  %v7001_v28 = vld [vmem:[%s13083_s4 + $0x238] sm:$0xff] }
 0x447   :  { %13708 = vst [vmem:[#allocation145_spill] sm:$0xff] %v12248_v4  ;;  %v12254_v23 = vpop.f32.mrb[90].mxu0  ;;  %7357 = vmatprep.mubr.f32.mxu0 %v10170_v57  ;;  %8711 = vmatpush1.bf16.msra.mxu0 %v8710_v45  ;;  %v13711_v57 = vld [vmem:[#allocation85_spill] sm:$0xff]  ;;  %v767_v4 = vld [vmem:[#allocation8 + $0x938] sm:$0xff]  ;;  %v8383_v45 = vcombine.low %v12235_v14, %v759_v35  ;;  %v8716_v36 = vpack.c.bf16 %v7001_v28, %v7000_v43 }
 0x448   :  { %13709 = vst [vmem:[#allocation144_spill] sm:$0xff] %v12254_v23  ;;  %v12262_v38 = vpop.f32.mrb[91].mxu0  ;;  %v10172_v23 = vpop.eup %10171  ;;  %6138 = vmatmul.mubr.bf16.gmra.mrb[132].mxu1 %v13711_v57  ;;  %8712 = vmatprep.subr.bf16.mxu0 %v13608_v39  ;;  %10185 = vtanh.f32 %v8943_v10  ;;  %v8392_v57 = vcombine.high %v12265_v37, %v767_v4  ;;  %v7003_v14 = vld [vmem:[%s13083_s4 + $0x248] sm:$0xff] }
 0x449   :  { %13710 = vst [vmem:[#allocation147_spill] sm:$0xff] %v12262_v38  ;;  %v10174_v34 = vpop.eup %10173  ;;  %6147 = vmatprep.mubr.bf16.mxu1 %v13712_v3  ;;  %6293 = vmatpush1.bf16.msra.mxu1 %v8375_v8  ;;  %v775_v8 = vld [vmem:[#allocation8 + $0x978] sm:$0xff]  ;;  %10187 = vtanh.f32 %v8942_v29 }
 0x44a   :  { %7358 = vmatmul.mubr.f32.gmra.mrb[132].mxu0 %v10172_v23  ;;  %6294 = vmatprep.subr.bf16.mxu1 %v8384_v48  ;;  %v12284_v23 = vld [vmem:[#allocation8 + $0x958] sm:$0xff]  ;;  %v10176_v3 = vpop.eup %10175  ;;  %10189 = vtanh.f32 %v8945_v32  ;;  %v8946_v32 = vadd.f32 %v12154_v20, %v12136_v50 }
 0x44b   :  { %7362 = vmatprep.mubr.f32.mxu0 %v10174_v34  ;;  %v12281_v19 = vpop.f32.mrb[92].mxu1  ;;  %8714 = vmatpush1.bf16.msra.mxu0 %v8713_v30  ;;  %v10178_v35 = vpop.eup %10177  ;;  %v8944_v30 = vadd.f32 %v12133_v58, %v12136_v50  ;;  %v8391_v34 = vcombine.low %v12265_v37, %v767_v4  ;;  %v8400_v29 = vcombine.high %v12284_v23, %v775_v8  ;;  %v7004_v4 = vld [vmem:[%s13083_s4 + $0x250] sm:$0xff] }
 0x44c   :  { %v12288_v17 = vpop.f32.mrb[93].mxu1  ;;  %8715 = vmatprep.subr.bf16.mxu0 %v13608_v39  ;;  %v8719_v58 = vpack.c.bf16 %v7003_v14, %v7002_v15 }
 0x44d   :  { %v12286_v38 = vpop.f32.mrb[92].mxu0  ;;  %v12299_v48 = vpop.f32.mrb[94].mxu1  ;;  %6295 = vmatpush1.bf16.msra.mxu1 %v8383_v45  ;;  %v13718_v45 = vld [vmem:[#allocation91_spill] sm:$0xff]  ;;  %10191 = vtanh.f32 %v8944_v30 }
 0x44e   :  { %13713 = vst [vmem:[#allocation29_spill] sm:$0xff] %v12286_v38  ;;  %v12297_v10 = vpop.f32.mrb[93].mxu0  ;;  %7363 = vmatmul.mubr.f32.gmra.mrb[134].mxu0 %v10176_v3  ;;  %v12305_v28 = vpop.f32.mrb[95].mxu1  ;;  %v8947_v38 = vadd.f32 %v12158_v25, %v12123_v42  ;;  %6296 = vmatprep.subr.bf16.mxu1 %v8392_v57  ;;  %v12313_v3 = vld [vmem:[#allocation8 + $0x998] sm:$0xff]  ;;  %v8399_v57 = vcombine.low %v12284_v23, %v775_v8 }
 0x44f   :  { %13714 = vst [vmem:[#allocation31_spill] sm:$0xff] %v12297_v10  ;;  %v12303_v43 = vpop.f32.mrb[94].mxu0  ;;  %7367 = vmatprep.mubr.f32.mxu0 %v10178_v35  ;;  %8717 = vmatpush1.bf16.msra.mxu0 %v8716_v36  ;;  %v13717_v35 = vld [vmem:[#allocation89_spill] sm:$0xff]  ;;  %v7005_v25 = vld [vmem:[%s13083_s4 + $0x258] sm:$0xff]  ;;  %v8949_v36 = vadd.f32 %v12168_v47, %v12123_v42  ;;  %v8408_v14 = vcombine.high %v12313_v3, %v783_v11 }
 0x450   :  { %13715 = vst [vmem:[#allocation146_spill] sm:$0xff] %v12303_v43  ;;  %v12310_v10 = vpop.f32.mrb[95].mxu0  ;;  %v10180_v43 = vpop.eup %10179  ;;  %6148 = vmatmul.mubr.bf16.gmra.mrb[136].mxu1 %v13717_v35  ;;  %8718 = vmatprep.subr.bf16.mxu0 %v13608_v39  ;;  %10193 = vtanh.f32 %v8947_v38  ;;  %v8722_v30 = vpack.c.bf16 %v7005_v25, %v7004_v4  ;;  %v7006_v47 = vld [vmem:[%s13083_s4 + $0x260] sm:$0xff]  ;;  %v7007_v38 = vld [vmem:[%s13083_s4 + $0x268] sm:$0xff] }
 0x451   :  { %13716 = vst [vmem:[#allocation149_spill] sm:$0xff] %v12310_v10  ;;  %v10182_v37 = vpop.eup %10181  ;;  %6157 = vmatprep.mubr.bf16.mxu1 %v13718_v45  ;;  %6297 = vmatpush1.bf16.msra.mxu1 %v8391_v34  ;;  %v791_v34 = vld [vmem:[#allocation8 + $0x9f8] sm:$0xff]  ;;  %10195 = vtanh.f32 %v8946_v32 }
 0x452   :  { %7368 = vmatmul.mubr.f32.gmra.mrb[136].mxu0 %v10180_v43  ;;  %6298 = vmatprep.subr.bf16.mxu1 %v8400_v29  ;;  %v12332_v43 = vld [vmem:[#allocation8 + $0x9d8] sm:$0xff]  ;;  %v10184_v35 = vpop.eup %10183  ;;  %10197 = vtanh.f32 %v8949_v36  ;;  %v8950_v36 = vadd.f32 %v12180_v60, %v12136_v50 }
 0x453   :  { %7372 = vmatprep.mubr.f32.mxu0 %v10182_v37  ;;  %v12329_v15 = vpop.f32.mrb[96].mxu1  ;;  %8720 = vmatpush1.bf16.msra.mxu0 %v8719_v58  ;;  %v10186_v23 = vpop.eup %10185  ;;  %v8948_v58 = vadd.f32 %v12162_v27, %v12136_v50  ;;  %v8407_v37 = vcombine.low %v12313_v3, %v783_v11  ;;  %v8416_v32 = vcombine.high %v12332_v43, %v791_v34  ;;  %v799_v10 = vld [vmem:[#allocation8 + $0xa38] sm:$0xff]  ;;  %v7008_v11 = vld [vmem:[%s13083_s4 + $0x270] sm:$0xff] }
 0x454   :  { %v12336_v20 = vpop.f32.mrb[97].mxu1  ;;  %8721 = vmatprep.subr.bf16.mxu0 %v13608_v39  ;;  %v8725_v27 = vpack.c.bf16 %v7007_v38, %v7006_v47 }
 0x455   :  { %v12334_v45 = vpop.f32.mrb[96].mxu0  ;;  %v12347_v29 = vpop.f32.mrb[98].mxu1  ;;  %6299 = vmatpush1.bf16.msra.mxu1 %v8399_v57  ;;  %v13724_v57 = vld [vmem:[#allocation95_spill] sm:$0xff]  ;;  %10199 = vtanh.f32 %v8948_v58 }
 0x456   :  { %13719 = vst [vmem:[#allocation148_spill] sm:$0xff] %v12334_v45  ;;  %v12345_v8 = vpop.f32.mrb[97].mxu0  ;;  %7373 = vmatmul.mubr.f32.gmra.mrb[138].mxu0 %v10184_v35  ;;  %v12353_v25 = vpop.f32.mrb[99].mxu1  ;;  %v8951_v45 = vadd.f32 %v12184_v1, %v12123_v42  ;;  %6300 = vmatprep.subr.bf16.mxu1 %v8408_v14  ;;  %v12361_v35 = vld [vmem:[#allocation8 + $0xa18] sm:$0xff]  ;;  %v8415_v14 = vcombine.low %v12332_v43, %v791_v34  ;;  %v7011_v43 = vld [vmem:[%s13083_s4 + $0x288] sm:$0xff] }
 0x457   :  { %13720 = vst [vmem:[#allocation151_spill] sm:$0xff] %v12345_v8  ;;  %v12351_v4 = vpop.f32.mrb[98].mxu0  ;;  %7377 = vmatprep.mubr.f32.mxu0 %v10186_v23  ;;  %8723 = vmatpush1.bf16.msra.mxu0 %v8722_v30  ;;  %v13723_v23 = vld [vmem:[#allocation93_spill] sm:$0xff]  ;;  %v7009_v1 = vld [vmem:[%s13083_s4 + $0x278] sm:$0xff]  ;;  %v8953_v30 = vadd.f32 %v12200_v56, %v12123_v42  ;;  %v8424_v38 = vcombine.high %v12361_v35, %v799_v10 }
 0x458   :  { %13721 = vst [vmem:[#allocation33_spill] sm:$0xff] %v12351_v4  ;;  %v12358_v8 = vpop.f32.mrb[99].mxu0  ;;  %v10188_v4 = vpop.eup %10187  ;;  %6158 = vmatmul.mubr.bf16.gmra.mrb[140].mxu1 %v13723_v23  ;;  %8724 = vmatprep.subr.bf16.mxu0 %v13608_v39  ;;  %10201 = vtanh.f32 %v8951_v45  ;;  %v8728_v58 = vpack.c.bf16 %v7009_v1, %v7008_v11  ;;  %v7010_v56 = vld [vmem:[%s13083_s4 + $0x280] sm:$0xff] }
 0x459   :  { %13722 = vst [vmem:[#allocation35_spill] sm:$0xff] %v12358_v8  ;;  %v10190_v3 = vpop.eup %10189  ;;  %6167 = vmatprep.mubr.bf16.mxu1 %v13724_v57  ;;  %6301 = vmatpush1.bf16.msra.mxu1 %v8407_v37  ;;  %v807_v37 = vld [vmem:[#allocation8 + $0xa78] sm:$0xff]  ;;  %10203 = vtanh.f32 %v8950_v36 }
 0x45a   :  { %7378 = vmatmul.mubr.f32.gmra.mrb[140].mxu0 %v10188_v4  ;;  %6302 = vmatprep.subr.bf16.mxu1 %v8416_v32  ;;  %v12380_v4 = vld [vmem:[#allocation8 + $0xa58] sm:$0xff]  ;;  %v10192_v23 = vpop.eup %10191  ;;  %10205 = vtanh.f32 %v8953_v30  ;;  %v8954_v30 = vadd.f32 %v12233_v21, %v12136_v50 }
 0x45b   :  { %7382 = vmatprep.mubr.f32.mxu0 %v10190_v3  ;;  %v12377_v47 = vpop.f32.mrb[100].mxu1  ;;  %8726 = vmatpush1.bf16.msra.mxu0 %v8725_v27  ;;  %v10194_v45 = vpop.eup %10193  ;;  %v8952_v27 = vadd.f32 %v12194_v26, %v12136_v50  ;;  %v8423_v3 = vcombine.low %v12361_v35, %v799_v10  ;;  %v8432_v36 = vcombine.high %v12380_v4, %v807_v37  ;;  %v815_v8 = vld [vmem:[#allocation8 + $0xab8] sm:$0xff]  ;;  %v7012_v10 = vld [vmem:[%s13083_s4 + $0x290] sm:$0xff] }
 0x45c   :  { %v12384_v60 = vpop.f32.mrb[101].mxu1  ;;  %8727 = vmatprep.subr.bf16.mxu0 %v13608_v39  ;;  %v8731_v26 = vpack.c.bf16 %v7011_v43, %v7010_v56 }
 0x45d   :  { %v12382_v57 = vpop.f32.mrb[100].mxu0  ;;  %v12395_v32 = vpop.f32.mrb[102].mxu1  ;;  %6303 = vmatpush1.bf16.msra.mxu1 %v8415_v14  ;;  %v13730_v14 = vld [vmem:[#allocation99_spill] sm:$0xff]  ;;  %10207 = vtanh.f32 %v8952_v27 }
 0x45e   :  { %13725 = vst [vmem:[#allocation150_spill] sm:$0xff] %v12382_v57  ;;  %v12393_v34 = vpop.f32.mrb[101].mxu0  ;;  %7383 = vmatmul.mubr.f32.gmra.mrb[142].mxu0 %v10192_v23  ;;  %v12401_v1 = vpop.f32.mrb[103].mxu1  ;;  %v8955_v57 = vadd.f32 %v12239_v22, %v12123_v42  ;;  %6304 = vmatprep.subr.bf16.mxu1 %v8424_v38  ;;  %v12409_v23 = vld [vmem:[#allocation8 + $0xa98] sm:$0xff]  ;;  %v8431_v38 = vcombine.low %v12380_v4, %v807_v37  ;;  %v7015_v4 = vld [vmem:[%s13083_s4 + $0x2a8] sm:$0xff] }
 0x45f   :  { %13726 = vst [vmem:[#allocation153_spill] sm:$0xff] %v12393_v34  ;;  %v12399_v11 = vpop.f32.mrb[102].mxu0  ;;  %7387 = vmatprep.mubr.f32.mxu0 %v10194_v45  ;;  %8729 = vmatpush1.bf16.msra.mxu0 %v8728_v58  ;;  %v13729_v45 = vld [vmem:[#allocation97_spill] sm:$0xff]  ;;  %v7013_v22 = vld [vmem:[%s13083_s4 + $0x298] sm:$0xff]  ;;  %v8957_v58 = vadd.f32 %v12256_v41, %v12123_v42  ;;  %v8440_v43 = vcombine.high %v12409_v23, %v815_v8 }
 0x460   :  { %13727 = vst [vmem:[#allocation152_spill] sm:$0xff] %v12399_v11  ;;  %v12406_v34 = vpop.f32.mrb[103].mxu0  ;;  %v10196_v11 = vpop.eup %10195  ;;  %6168 = vmatmul.mubr.bf16.gmra.mrb[144].mxu1 %v13729_v45  ;;  %8730 = vmatprep.subr.bf16.mxu0 %v13608_v39  ;;  %10209 = vtanh.f32 %v8955_v57  ;;  %v8734_v27 = vpack.c.bf16 %v7013_v22, %v7012_v10  ;;  %v7014_v41 = vld [vmem:[%s13083_s4 + $0x2a0] sm:$0xff] }
 0x461   :  { %13728 = vst [vmem:[#allocation155_spill] sm:$0xff] %v12406_v34  ;;  %v10198_v35 = vpop.eup %10197  ;;  %6177 = vmatprep.mubr.bf16.mxu1 %v13730_v14  ;;  %6305 = vmatpush1.bf16.msra.mxu1 %v8423_v3  ;;  %v823_v3 = vld [vmem:[#allocation8 + $0xaf8] sm:$0xff]  ;;  %10211 = vtanh.f32 %v8954_v30 }
 0x462   :  { %7388 = vmatmul.mubr.f32.gmra.mrb[144].mxu0 %v10196_v11  ;;  %6306 = vmatprep.subr.bf16.mxu1 %v8432_v36  ;;  %v12428_v11 = vld [vmem:[#allocation8 + $0xad8] sm:$0xff]  ;;  %v10200_v45 = vpop.eup %10199  ;;  %10213 = vtanh.f32 %v8957_v58  ;;  %v8958_v58 = vadd.f32 %v12281_v19, %v12136_v50 }
 0x463   :  { %7392 = vmatprep.mubr.f32.mxu0 %v10198_v35  ;;  %v12425_v56 = vpop.f32.mrb[104].mxu1  ;;  %8732 = vmatpush1.bf16.msra.mxu0 %v8731_v26  ;;  %v10202_v57 = vpop.eup %10201  ;;  %v8956_v26 = vadd.f32 %v12250_v53, %v12136_v50  ;;  %v8439_v35 = vcombine.low %v12409_v23, %v815_v8  ;;  %v8448_v30 = vcombine.high %v12428_v11, %v823_v3  ;;  %v831_v34 = vld [vmem:[#allocation8 + $0xb38] sm:$0xff]  ;;  %v7016_v8 = vld [vmem:[%s13083_s4 + $0x2b0] sm:$0xff] }
 0x464   :  { %v12432_v21 = vpop.f32.mrb[105].mxu1  ;;  %8733 = vmatprep.subr.bf16.mxu0 %v13608_v39  ;;  %v8737_v53 = vpack.c.bf16 %v7015_v4, %v7014_v41 }
 0x465   :  { %v12430_v14 = vpop.f32.mrb[104].mxu0  ;;  %v12443_v36 = vpop.f32.mrb[106].mxu1  ;;  %6307 = vmatpush1.bf16.msra.mxu1 %v8431_v38  ;;  %v13736_v38 = vld [vmem:[#allocation103_spill] sm:$0xff]  ;;  %10215 = vtanh.f32 %v8956_v26 }
 0x466   :  { %13731 = vst [vmem:[#allocation37_spill] sm:$0xff] %v12430_v14  ;;  %v12441_v37 = vpop.f32.mrb[105].mxu0  ;;  %7393 = vmatmul.mubr.f32.gmra.mrb[146].mxu0 %v10200_v45  ;;  %v12449_v22 = vpop.f32.mrb[107].mxu1  ;;  %v8959_v14 = vadd.f32 %v12288_v17, %v12123_v42  ;;  %6308 = vmatprep.subr.bf16.mxu1 %v8440_v43  ;;  %v12457_v45 = vld [vmem:[#allocation8 + $0xb18] sm:$0xff]  ;;  %v8447_v43 = vcombine.low %v12428_v11, %v823_v3  ;;  %v7019_v11 = vld [vmem:[%s13083_s4 + $0x2c8] sm:$0xff] }
 0x467   :  { %13732 = vst [vmem:[#allocation39_spill] sm:$0xff] %v12441_v37  ;;  %v12447_v10 = vpop.f32.mrb[106].mxu0  ;;  %7397 = vmatprep.mubr.f32.mxu0 %v10202_v57  ;;  %8735 = vmatpush1.bf16.msra.mxu0 %v8734_v27  ;;  %v13735_v57 = vld [vmem:[#allocation101_spill] sm:$0xff]  ;;  %v7017_v17 = vld [vmem:[%s13083_s4 + $0x2b8] sm:$0xff]  ;;  %v8961_v27 = vadd.f32 %v12305_v28, %v12123_v42  ;;  %v8456_v4 = vcombine.high %v12457_v45, %v831_v34 }
 0x468   :  { %13733 = vst [vmem:[#allocation154_spill] sm:$0xff] %v12447_v10  ;;  %v12454_v37 = vpop.f32.mrb[107].mxu0  ;;  %v10204_v10 = vpop.eup %10203  ;;  %6178 = vmatmul.mubr.bf16.gmra.mrb[148].mxu1 %v13735_v57  ;;  %8736 = vmatprep.subr.bf16.mxu0 %v13608_v39  ;;  %10217 = vtanh.f32 %v8959_v14  ;;  %v8740_v26 = vpack.c.bf16 %v7017_v17, %v7016_v8  ;;  %v7018_v28 = vld [vmem:[%s13083_s4 + $0x2c0] sm:$0xff] }
 0x469   :  { %13734 = vst [vmem:[#allocation157_spill] sm:$0xff] %v12454_v37  ;;  %v10206_v23 = vpop.eup %10205  ;;  %6187 = vmatprep.mubr.bf16.mxu1 %v13736_v38  ;;  %6309 = vmatpush1.bf16.msra.mxu1 %v8439_v35  ;;  %v839_v35 = vld [vmem:[#allocation8 + $0xb78] sm:$0xff]  ;;  %10219 = vtanh.f32 %v8958_v58 }
 0x46a   :  { %7398 = vmatmul.mubr.f32.gmra.mrb[148].mxu0 %v10204_v10  ;;  %6310 = vmatprep.subr.bf16.mxu1 %v8448_v30  ;;  %v12476_v10 = vld [vmem:[#allocation8 + $0xb58] sm:$0xff]  ;;  %v10208_v57 = vpop.eup %10207  ;;  %10221 = vtanh.f32 %v8961_v27  ;;  %v8962_v27 = vadd.f32 %v12329_v15, %v12136_v50 }
 0x46b   :  { %7402 = vmatprep.mubr.f32.mxu0 %v10206_v23  ;;  %v12473_v41 = vpop.f32.mrb[108].mxu1  ;;  %8738 = vmatpush1.bf16.msra.mxu0 %v8737_v53  ;;  %v10210_v14 = vpop.eup %10209  ;;  %v8960_v53 = vadd.f32 %v12299_v48, %v12136_v50  ;;  %v8455_v23 = vcombine.low %v12457_v45, %v831_v34  ;;  %v8464_v58 = vcombine.high %v12476_v10, %v839_v35  ;;  %v7020_v34 = vld [vmem:[%s13083_s4 + $0x2d0] sm:$0xff]  ;;  %v855_v15 = vld [vmem:[#allocation8 + $0xbf8] sm:$0xff] }
 0x46c   :  { %v12480_v19 = vpop.f32.mrb[109].mxu1  ;;  %8739 = vmatprep.subr.bf16.mxu0 %v13608_v39  ;;  %v8743_v48 = vpack.c.bf16 %v7019_v11, %v7018_v28  ;;  %v10212_v37 = vpop.eup %10211 }
 0x46d   :  { %v12478_v38 = vpop.f32.mrb[108].mxu0  ;;  %v12491_v30 = vpop.f32.mrb[110].mxu1  ;;  %6311 = vmatpush1.bf16.msra.mxu1 %v8447_v43  ;;  %v13742_v43 = vld [vmem:[#allocation107_spill] sm:$0xff]  ;;  %10223 = vtanh.f32 %v8960_v53 }
 0x46e   :  { %13737 = vst [vmem:[#allocation156_spill] sm:$0xff] %v12478_v38  ;;  %v12489_v3 = vpop.f32.mrb[109].mxu0  ;;  %7403 = vmatmul.mubr.f32.gmra.mrb[150].mxu0 %v10208_v57  ;;  %v12497_v17 = vpop.f32.mrb[111].mxu1  ;;  %v8963_v38 = vadd.f32 %v12336_v20, %v12123_v42  ;;  %6312 = vmatprep.subr.bf16.mxu1 %v8456_v4  ;;  %v843_v57 = vld [vmem:[#allocation8 + $0xb98] sm:$0xff]  ;;  %v8463_v4 = vcombine.low %v12476_v10, %v839_v35 }
 0x46f   :  { %13738 = vst [vmem:[#allocation159_spill] sm:$0xff] %v12489_v3  ;;  %v12495_v8 = vpop.f32.mrb[110].mxu0  ;;  %7407 = vmatprep.mubr.f32.mxu0 %v10210_v14  ;;  %8741 = vmatpush1.bf16.msra.mxu0 %v8740_v26  ;;  %v847_v14 = vld [vmem:[#allocation8 + $0xbb8] sm:$0xff]  ;;  %v10214_v45 = vpop.eup %10213  ;;  %v8965_v26 = vadd.f32 %v12353_v25, %v12123_v42  ;;  %v7023_v25 = vld [vmem:[%s13083_s4 + $0x2e8] sm:$0xff] }
 0x470   :  { %13739 = vst [vmem:[#allocation41_spill] sm:$0xff] %v12495_v8  ;;  %v12502_v3 = vpop.f32.mrb[111].mxu0  ;;  %v13741_v8 = vld [vmem:[#allocation105_spill] sm:$0xff]  ;;  %8742 = vmatprep.subr.bf16.mxu0 %v13608_v39  ;;  %v7021_v20 = vld [vmem:[%s13083_s4 + $0x2d8] sm:$0xff]  ;;  %10225 = vtanh.f32 %v8963_v38  ;;  %v8472_v11 = vcombine.high %v843_v57, %v847_v14 }
 0x471   :  { %13740 = vst [vmem:[#allocation43_spill] sm:$0xff] %v12502_v3  ;;  %6188 = vmatmul.mubr.bf16.gmra.mrb[152].mxu1 %v13741_v8  ;;  %v851_v8 = vld [vmem:[#allocation8 + $0xbd8] sm:$0xff]  ;;  %10227 = vtanh.f32 %v8962_v27 }
 0x472   :  { %7408 = vmatmul.mubr.f32.gmra.mrb[152].mxu0 %v10212_v37  ;;  %6197 = vmatprep.mubr.bf16.mxu1 %v13742_v43  ;;  %v8746_v37 = vpack.c.bf16 %v7021_v20, %v7020_v34  ;;  %v10216_v43 = vpop.eup %10215  ;;  %v7022_v10 = vld [vmem:[%s13083_s4 + $0x2e0] sm:$0xff]  ;;  %v8471_v20 = vcombine.low %v843_v57, %v847_v14  ;;  %10229 = vtanh.f32 %v8965_v26  ;;  %v7025_v57 = vld [vmem:[%s13083_s4 + $0x2f8] sm:$0xff]  ;;  %v13745_v14 = vld [vmem:[#allocation110_spill] sm:$0xff]  ;;  %v8969_v26 = vadd.f32 %v12401_v1, %v12123_v42 }
 0x473   :  { %7412 = vmatprep.mubr.f32.mxu0 %v10214_v45  ;;  %6313 = vmatpush1.bf16.msra.mxu1 %v8455_v23  ;;  %v12519_v28 = vpop.f32.mrb[112].mxu1  ;;  %v10218_v38 = vpop.eup %10217  ;;  %v8967_v45 = vadd.f32 %v12384_v60, %v12123_v42  ;;  %v8749_v27 = vpack.c.bf16 %v7023_v25, %v7022_v10  ;;  %v8488_v10 = vcombine.high %v12217_v52, %v12219_v6 }
 0x474   :  { %6314 = vmatprep.subr.bf16.mxu1 %v8464_v58  ;;  %8744 = vmatpush1.bf16.msra.mxu0 %v8743_v48  ;;  %v12523_v3 = vpop.f32.mrb[113].mxu1  ;;  %v8964_v58 = vadd.f32 %v12347_v29, %v12136_v50  ;;  %v7024_v29 = vld [vmem:[%s13083_s4 + $0x2f0] sm:$0xff] }
 0x475   :  { %v12521_v53 = vpop.f32.mrb[112].mxu0  ;;  %8745 = vmatprep.subr.bf16.mxu0 %v13608_v39  ;;  %v12534_v23 = vpop.f32.mrb[114].mxu1 }
 0x476   :  { %13743 = vst [vmem:[#allocation158_spill] sm:$0xff] %v12521_v53  ;;  %v12532_v35 = vpop.f32.mrb[113].mxu0  ;;  %7413 = vmatmul.mubr.f32.gmra.mrb[154].mxu0 %v10216_v43  ;;  %v12540_v34 = vpop.f32.mrb[115].mxu1  ;;  %v8480_v43 = vcombine.high %v851_v8, %v855_v15  ;;  %10231 = vtanh.f32 %v8964_v58 }
 0x477   :  { %13744 = vst [vmem:[#allocation161_spill] sm:$0xff] %v12532_v35  ;;  %v12538_v48 = vpop.f32.mrb[114].mxu0  ;;  %7417 = vmatprep.mubr.f32.mxu0 %v10218_v38  ;;  %6315 = vmatpush1.bf16.msra.mxu1 %v8463_v4  ;;  %v10220_v35 = vpop.eup %10219  ;;  %v8966_v4 = vadd.f32 %v12377_v47, %v12136_v50  ;;  %10233 = vtanh.f32 %v8967_v45  ;;  %v8971_v45 = vadd.f32 %v12432_v21, %v12123_v42 }
 0x478   :  { %v12544_v53 = vpop.f32.mrb[115].mxu0  ;;  %6316 = vmatprep.subr.bf16.mxu1 %v8472_v11  ;;  %8747 = vmatpush1.bf16.msra.mxu0 %v8746_v37  ;;  %v10222_v60 = vpop.eup %10221  ;;  %v8752_v37 = vpack.c.bf16 %v7025_v57, %v7024_v29  ;;  %v13746_v29 = vld [vmem:[#allocation112_spill] sm:$0xff]  ;;  %v13747_v57 = vld [vmem:[#allocation114_spill] sm:$0xff]  ;;  %v8973_v21 = vadd.f32 %v12449_v22, %v12123_v42 }
 0x479   :  { %6198 = vmatmul.mubr.bf16.gmra.mrb[156].mxu1 %v11107_v24  ;;  %8748 = vmatprep.subr.bf16.mxu0 %v13608_v39  ;;  %v8479_v24 = vcombine.low %v851_v8, %v855_v15  ;;  %v10224_v25 = vpop.eup %10223  ;;  %10235 = vtanh.f32 %v8966_v4  ;;  %v8968_v15 = vadd.f32 %v12395_v32, %v12136_v50 }
 0x47a   :  { %7418 = vmatmul.mubr.f32.gmra.mrb[156].mxu0 %v10220_v35  ;;  %6207 = vmatprep.mubr.bf16.mxu1 %v13745_v14  ;;  %v10226_v47 = vpop.eup %10225  ;;  %10237 = vtanh.f32 %v8969_v26 }
 0x47b   :  { %7422 = vmatprep.mubr.f32.mxu0 %v10222_v60  ;;  %6317 = vmatpush1.bf16.msra.mxu1 %v8471_v20  ;;  %v12559_v11 = vpop.f32.mrb[116].mxu1  ;;  %10239 = vtanh.f32 %v8968_v15  ;;  %v8970_v60 = vadd.f32 %v12425_v56, %v12136_v50  ;;  %v8972_v56 = vadd.f32 %v12443_v36, %v12136_v50  ;;  %v8975_v15 = vadd.f32 %v12480_v19, %v12123_v42 }
 0x47c   :  { %6318 = vmatprep.subr.bf16.mxu1 %v8480_v43  ;;  %8750 = vmatpush1.bf16.msra.mxu0 %v8749_v27  ;;  %v12565_v35 = vpop.f32.mrb[117].mxu1  ;;  %v10228_v27 = vpop.eup %10227  ;;  %10241 = vtanh.f32 %v8971_v45  ;;  %v8974_v36 = vadd.f32 %v12473_v41, %v12136_v50  ;;  %v8976_v41 = vadd.f32 %v12491_v30, %v12136_v50  ;;  %v8978_v30 = vadd.f32 %v12519_v28, %v12136_v50 }
 0x47d   :  { %v12563_v38 = vpop.f32.mrb[116].mxu0  ;;  %8751 = vmatprep.subr.bf16.mxu0 %v13608_v39  ;;  %v12570_v1 = vpop.f32.mrb[118].mxu1  ;;  %10243 = vtanh.f32 %v8970_v60  ;;  %v8977_v60 = vadd.f32 %v12497_v17, %v12123_v42 }
 0x47e   :  { %v12568_v8 = vpop.f32.mrb[117].mxu0  ;;  %7423 = vmatmul.mubr.f32.gmra.mrb[158].mxu0 %v10224_v25  ;;  %v12576_v20 = vpop.f32.mrb[119].mxu1  ;;  %10245 = vtanh.f32 %v8973_v21 }
 0x47f   :  { %v12574_v58 = vpop.f32.mrb[118].mxu0  ;;  %7427 = vmatprep.mubr.f32.mxu0 %v10226_v47  ;;  %6319 = vmatpush1.bf16.msra.mxu1 %v8479_v24  ;;  %v10230_v32 = vpop.eup %10229  ;;  %10247 = vtanh.f32 %v8972_v56 }
 0x480   :  { %v12580_v43 = vpop.f32.mrb[119].mxu0  ;;  %8753 = vmatpush1.bf16.msra.mxu0 %v8752_v37  ;;  %6481 = vmatprep.subr.bf16.mxu1 %v8488_v10  ;;  %v10232_v4 = vpop.eup %10231  ;;  %10249 = vtanh.f32 %v8975_v15 }
 0x481   :  { %6208 = vmatmul.mubr.bf16.gmra.mrb[160].mxu1 %v13746_v29  ;;  %8754 = vmatprep.subr.bf16.mxu0 %v13608_v39  ;;  %v10234_v37 = vpop.eup %10233  ;;  %v13748_v29 = vld [vmem:[#allocation116_spill] sm:$0xff]  ;;  %10251 = vtanh.f32 %v8974_v36  ;;  %v13753_v36 = vld [vmem:[#allocation122_spill] sm:$0xff] }
 0x482   :  { %7428 = vmatmul.mubr.f32.gmra.mrb[160].mxu0 %v10228_v27  ;;  %6217 = vmatprep.mubr.bf16.mxu1 %v13747_v57  ;;  %v13749_v57 = vld [vmem:[#allocation118_spill] sm:$0xff]  ;;  %10253 = vtanh.f32 %v8977_v60  ;;  %v8981_v60 = vadd.f32 %v12540_v34, %v12123_v42  ;;  %v8982_v34 = vadd.f32 %v12559_v11, %v12136_v50 }
 0x483   :  { %7432 = vmatprep.mubr.f32.mxu0 %v10230_v32  ;;  %v12589_v14 = vpop.f32.mrb[120].mxu1  ;;  %v10236_v27 = vpop.eup %10235  ;;  %10255 = vtanh.f32 %v8976_v41 }
 0x484   :  { %v12593_v26 = vpop.f32.mrb[121].mxu1  ;;  %v10238_v32 = vpop.eup %10237 }
 0x485   :  { %v12591_v24 = vpop.f32.mrb[120].mxu0  ;;  %v12597_v25 = vpop.f32.mrb[122].mxu1 }
 0x486   :  { %v12595_v10 = vpop.f32.mrb[121].mxu0  ;;  %7433 = vmatmul.mubr.f32.gmra.mrb[162].mxu0 %v10232_v4  ;;  %v12603_v22 = vpop.f32.mrb[123].mxu1 }
 0x487   :  { %v12601_v47 = vpop.f32.mrb[122].mxu0  ;;  %7437 = vmatprep.mubr.f32.mxu0 %v10234_v37  ;;  %v10240_v19 = vpop.eup %10239 }
 0x488   :  { %v12607_v45 = vpop.f32.mrb[123].mxu0 }
 0x489   :  { %6218 = vmatmul.mubr.bf16.gmra.mrb[164].mxu1 %v13748_v29  ;;  %v10242_v29 = vpop.eup %10241 }
 0x48a   :  { %7438 = vmatmul.mubr.f32.gmra.mrb[164].mxu0 %v10236_v27  ;;  %6227 = vmatprep.mubr.bf16.mxu1 %v13749_v57 }
 0x48b   :  { %7442 = vmatprep.mubr.f32.mxu0 %v10238_v32  ;;  %v12615_v21 = vpop.f32.mrb[124].mxu1  ;;  %v8979_v32 = vadd.f32 %v12523_v3, %v12123_v42 }
 0x48c   :  { %v12619_v37 = vpop.f32.mrb[125].mxu1 }
 0x48d   :  { %v12617_v4 = vpop.f32.mrb[124].mxu0  ;;  %v12623_v56 = vpop.f32.mrb[126].mxu1  ;;  %10257 = vtanh.f32 %v8979_v32  ;;  %v13755_v32 = vld [vmem:[#allocation126_spill] sm:$0xff] }
 0x48e   :  { %13750 = vst [vmem:[#allocation160_spill] sm:$0xff] %v12617_v4  ;;  %v12621_v27 = vpop.f32.mrb[125].mxu0  ;;  %7443 = vmatmul.mubr.f32.gmra.mrb[166].mxu0 %v10240_v19  ;;  %v12629_v17 = vpop.f32.mrb[127].mxu1  ;;  %10259 = vtanh.f32 %v8978_v30 }
 0x48f   :  { %13751 = vst [vmem:[#allocation163_spill] sm:$0xff] %v12621_v27  ;;  %v12627_v15 = vpop.f32.mrb[126].mxu0  ;;  %7447 = vmatprep.mubr.f32.mxu0 %v10242_v29  ;;  %v10244_v4 = vpop.eup %10243  ;;  %v13752_v27 = vld [vmem:[#allocation120_spill] sm:$0xff]  ;;  %10261 = vtanh.f32 %v8981_v60  ;;  %v8987_v60 = vadd.f32 %v12593_v26, %v12123_v42  ;;  %v8988_v26 = vadd.f32 %v12597_v25, %v12136_v50  ;;  %v8990_v25 = vadd.f32 %v12615_v21, %v12136_v50 }
 0x490   :  { %v12633_v57 = vpop.f32.mrb[127].mxu0  ;;  %v10246_v19 = vpop.eup %10245 }
 0x491   :  { %6228 = vmatmul.mubr.bf16.gmra.mrb[168].mxu1 %v13752_v27  ;;  %v10248_v29 = vpop.eup %10247  ;;  %v8980_v27 = vadd.f32 %v12534_v23, %v12136_v50  ;;  %v8985_v23 = vadd.f32 %v12576_v20, %v12123_v42  ;;  %v8986_v20 = vadd.f32 %v12589_v14, %v12136_v50 }
 0x492   :  { %7448 = vmatmul.mubr.f32.gmra.mrb[168].mxu0 %v10244_v4  ;;  %6237 = vmatprep.mubr.bf16.mxu1 %v13753_v36  ;;  %v10250_v3 = vpop.eup %10249  ;;  %v8983_v4 = vadd.f32 %v12565_v35, %v12123_v42  ;;  %v13754_v36 = vld [vmem:[#allocation124_spill] sm:$0xff]  ;;  %v8984_v35 = vadd.f32 %v12570_v1, %v12136_v50  ;;  %v8989_v1 = vadd.f32 %v12603_v22, %v12123_v42  ;;  %v13759_v22 = vld [vmem:[#allocation134_spill] sm:$0xff] }
 0x493   :  { %7452 = vmatprep.mubr.f32.mxu0 %v10246_v19  ;;  %v10252_v41 = vpop.eup %10251  ;;  %10263 = vtanh.f32 %v8980_v27  ;;  %v13757_v27 = vld [vmem:[#allocation130_spill] sm:$0xff] }
 0x494   :  { %v10254_v28 = vpop.eup %10253  ;;  %10265 = vtanh.f32 %v8983_v4 }
 0x495   :  { %v10256_v19 = vpop.eup %10255  ;;  %10267 = vtanh.f32 %v8982_v34 }
 0x496   :  { %7453 = vmatmul.mubr.f32.gmra.mrb[170].mxu0 %v10248_v29  ;;  %10269 = vtanh.f32 %v8985_v23  ;;  %v1004_v23 = vsub.s32 4, %v13694_v62 }
 0x497   :  { %7457 = vmatprep.mubr.f32.mxu0 %v10250_v3  ;;  %v10258_v30 = vpop.eup %10257  ;;  %v13756_v3 = vld [vmem:[#allocation128_spill] sm:$0xff]  ;;  %10271 = vtanh.f32 %v8984_v35 }
 0x498   :  { %v10260_v29 = vpop.eup %10259  ;;  %10273 = vtanh.f32 %v8987_v60 }
 0x499   :  { %6238 = vmatmul.mubr.bf16.gmra.mrb[172].mxu1 %v13754_v36  ;;  %v10262_v11 = vpop.eup %10261  ;;  %10275 = vtanh.f32 %v8986_v20  ;;  %v1008_v36 = vsub.s32 5, %v13694_v62 }
 0x49a   :  { %7458 = vmatmul.mubr.f32.gmra.mrb[172].mxu0 %v10252_v41  ;;  %6247 = vmatprep.mubr.bf16.mxu1 %v13755_v32  ;;  %10277 = vtanh.f32 %v8989_v1  ;;  %v13758_v32 = vld [vmem:[#allocation132_spill] sm:$0xff] }
 0x49b   :  { %7462 = vmatprep.mubr.f32.mxu0 %v10254_v28  ;;  %v8991_v28 = vadd.f32 %v12619_v37, %v12123_v42  ;;  %10279 = vtanh.f32 %v8988_v26  ;;  %v8993_v37 = vadd.f32 %v12629_v17, %v12123_v42  ;;  %v13761_v42 = vld [vmem:[#allocation138_spill] sm:$0xff] }
 0x49d   :  { %v10264_v4 = vpop.eup %10263  ;;  %10281 = vtanh.f32 %v8991_v28 }
 0x49e   :  { %7463 = vmatmul.mubr.f32.gmra.mrb[174].mxu0 %v10256_v19  ;;  %v10266_v41 = vpop.eup %10265  ;;  %v10554_v19 = vld [vmem:[#allocation9] sm:$0xff]  ;;  %10283 = vtanh.f32 %v8990_v25  ;;  %v879_v25 = vld [vmem:[#allocation8 + $0xcb8] sm:$0xff] }
 0x49f   :  { %7467 = vmatprep.mubr.f32.mxu0 %v10258_v30  ;;  %v10268_v14 = vpop.eup %10267  ;;  %v12671_v30 = vrot.slane %v10554_v19, %v1008_v36  ;;  %10285 = vtanh.f32 %v8993_v37  ;;  %v13763_v36 = vld [vmem:[#allocation19_spill] sm:$0xff]  ;;  %v13764_v37 = vld [vmem:[#allocation21_spill] sm:$0xff] }
 0x4a0   :  { %v10270_v34 = vpop.eup %10269 }
 0x4a1   :  { %6248 = vmatmul.mubr.bf16.gmra.mrb[176].mxu1 %v13756_v3  ;;  %v10272_v35 = vpop.eup %10271  ;;  %v8992_v3 = vadd.f32 %v12623_v56, %v12136_v50  ;;  %v8995_v21 = vadd.f32 %v12061_v55, %v12671_v30  ;;  %v8997_v50 = vadd.f32 %v12071_v46, %v12671_v30 }
 0x4a2   :  { %7468 = vmatmul.mubr.f32.gmra.mrb[176].mxu0 %v10260_v29  ;;  %6257 = vmatprep.mubr.bf16.mxu1 %v13757_v27  ;;  %v10274_v60 = vpop.eup %10273  ;;  %v12675_v29 = vrot.slane %v10554_v19, %v1004_v23  ;;  %v13760_v27 = vld [vmem:[#allocation136_spill] sm:$0xff] }
 0x4a3   :  { %7472 = vmatprep.mubr.f32.mxu0 %v10262_v11  ;;  %v10276_v11 = vpop.eup %10275  ;;  %10287 = vtanh.f32 %v8992_v3  ;;  %v875_v23 = vld [vmem:[#allocation8 + $0xc98] sm:$0xff] }
 0x4a4   :  { %v10278_v20 = vpop.eup %10277  ;;  %v8994_v17 = vadd.f32 %v12057_v31, %v12675_v29  ;;  %10289 = vtanh.f32 %v8995_v21  ;;  %v8996_v55 = vadd.f32 %v12066_v13, %v12675_v29  ;;  %v13762_v31 = vld [vmem:[#allocation140_spill] sm:$0xff]  ;;  %v8998_v46 = vadd.f32 %v12079_v54, %v12675_v29  ;;  %v13766_v3 = vld [vmem:[#allocation23_spill] sm:$0xff] }
 0x4a5   :  { %v10280_v56 = vpop.eup %10279  ;;  %v9001_v13 = vadd.f32 %v12093_v7, %v12671_v30  ;;  %v9005_v21 = vadd.f32 %v12116_v2, %v12671_v30 }
 0x4a6   :  { %7473 = vmatmul.mubr.f32.gmra.mrb[178].mxu0 %v10264_v4  ;;  %10291 = vtanh.f32 %v8994_v17  ;;  %v8999_v4 = vadd.f32 %v12083_v44, %v12671_v30 }
 0x4a7   :  { %7477 = vmatprep.mubr.f32.mxu0 %v10266_v41  ;;  %v10282_v1 = vpop.eup %10281  ;;  %10293 = vtanh.f32 %v8997_v50  ;;  %v13767_v50 = vld [vmem:[#allocation25_spill] sm:$0xff] }
 0x4a8   :  { %v10284_v41 = vpop.eup %10283  ;;  %10295 = vtanh.f32 %v8996_v55 }
 0x4a9   :  { %6258 = vmatmul.mubr.bf16.gmra.mrb[180].mxu1 %v13758_v32  ;;  %v10286_v26 = vpop.eup %10285  ;;  %10297 = vtanh.f32 %v8999_v4  ;;  %v871_v32 = vld [vmem:[#allocation8 + $0xc78] sm:$0xff]  ;;  %v13768_v4 = vld [vmem:[#allocation26_spill] sm:$0xff] }
 0x4aa   :  { %7478 = vmatmul.mubr.f32.gmra.mrb[180].mxu0 %v10268_v14  ;;  %6267 = vmatprep.mubr.bf16.mxu1 %v13759_v22  ;;  %v867_v14 = vld [vmem:[#allocation8 + $0xc58] sm:$0xff]  ;;  %10299 = vtanh.f32 %v8998_v46  ;;  %v9003_v22 = vadd.f32 %v12105_v9, %v12671_v30  ;;  %v8504_v9 = vcombine.high %v875_v23, %v879_v25 }
 0x4ab   :  { %7482 = vmatprep.mubr.f32.mxu0 %v10270_v34  ;;  %v9000_v34 = vadd.f32 %v12088_v49, %v12675_v29  ;;  %10301 = vtanh.f32 %v9001_v13  ;;  %v8496_v54 = vcombine.high %v867_v14, %v871_v32  ;;  %v9002_v49 = vadd.f32 %v12101_v18, %v12675_v29  ;;  %v903_v46 = vld [vmem:[#allocation8 + $0xd78] sm:$0xff] }
 0x4ac   :  { %v8503_v18 = vcombine.low %v875_v23, %v879_v25  ;;  %v13770_v23 = vld [vmem:[#allocation28_spill] sm:$0xff] }
 0x4ad   :  { %v10288_v28 = vpop.eup %10287  ;;  %10303 = vtanh.f32 %v9000_v34  ;;  %v907_v34 = vld [vmem:[#allocation8 + $0xd98] sm:$0xff] }
 0x4ae   :  { %7483 = vmatmul.mubr.f32.gmra.mrb[182].mxu0 %v10272_v35  ;;  %v10290_v44 = vpop.eup %10289  ;;  %v13765_v35 = vcombine.low %v12217_v52, %v12219_v6  ;;  %10305 = vtanh.f32 %v9003_v22  ;;  %v9004_v6 = vadd.f32 %v12110_v16, %v12675_v29  ;;  %v9007_v52 = vadd.f32 %v12131_v63, %v12671_v30  ;;  %v911_v22 = vld [vmem:[#allocation8 + $0xdb8] sm:$0xff] }
 0x4af   :  { %7487 = vmatprep.mubr.f32.mxu0 %v10274_v60  ;;  %v8495_v60 = vcombine.low %v867_v14, %v871_v32  ;;  %10307 = vtanh.f32 %v9002_v49  ;;  %v9006_v16 = vadd.f32 %v12127_v0, %v12675_v29  ;;  %v9009_v63 = vadd.f32 %v12145_v40, %v12671_v30 }
 0x4b0   :  { %v10292_v19 = vpop.eup %10291  ;;  %10309 = vtanh.f32 %v9005_v21  ;;  %v9011_v14 = vadd.f32 %v12160_v61, %v12671_v30  ;;  %v9013_v61 = vadd.f32 %v12172_v5, %v12671_v30  ;;  %v9012_v49 = vadd.f32 %v12166_v33, %v12675_v29  ;;  %v13771_v21 = vld [vmem:[#allocation30_spill] sm:$0xff] }
 0x4b1   :  { %6268 = vmatmul.mubr.bf16.gmra.mrb[184].mxu1 %v13760_v27  ;;  %v10294_v7 = vpop.eup %10293  ;;  %v883_v27 = vld [vmem:[#allocation8 + $0xcd8] sm:$0xff]  ;;  %10311 = vtanh.f32 %v9004_v6  ;;  %v13773_v33 = vld [vmem:[#allocation18_spill] sm:$0xff] }
 0x4b2   :  { %7488 = vmatmul.mubr.f32.gmra.mrb[184].mxu0 %v10276_v11  ;;  %6277 = vmatprep.mubr.bf16.mxu1 %v13761_v42  ;;  %v10296_v11 = vpop.eup %10295  ;;  %10313 = vtanh.f32 %v9007_v52  ;;  %v9014_v6 = vadd.f32 %v13773_v33, %v12675_v29 }
 0x4b3   :  { %7492 = vmatprep.mubr.f32.mxu0 %v10278_v20  ;;  %v887_v20 = vld [vmem:[#allocation8 + $0xcf8] sm:$0xff]  ;;  %v10298_v42 = vpop.eup %10297  ;;  %10315 = vtanh.f32 %v9006_v16 }
 0x4b4   :  { %v8512_v17 = vcombine.high %v883_v27, %v887_v20  ;;  %v10300_v2 = vpop.eup %10299  ;;  %10317 = vtanh.f32 %v9009_v63 }
 0x4b5   :  { %v10302_v55 = vpop.eup %10301 }
 0x4b6   :  { %7493 = vmatmul.mubr.f32.gmra.mrb[186].mxu0 %v10280_v56  ;;  %v891_v56 = vld [vmem:[#allocation8 + $0xd18] sm:$0xff] }
 0x4b7   :  { %7497 = vmatprep.mubr.f32.mxu0 %v10282_v1  ;;  %v895_v1 = vld [vmem:[#allocation8 + $0xd38] sm:$0xff] }
 0x4b8   :  { %v8519_v0 = vcombine.low %v891_v56, %v895_v1 }
 0x4b9   :  { %6278 = vmatmul.mubr.bf16.gmra.mrb[188].mxu1 %v13762_v31  ;;  %v8520_v31 = vcombine.high %v891_v56, %v895_v1  ;;  %v935_v56 = vld [vmem:[#allocation8 + $0xe78] sm:$0xff] }
 0x4ba   :  { %7498 = vmatmul.mubr.f32.gmra.mrb[188].mxu0 %v10284_v41  ;;  %6320 = vmatprep.mubr.bf16.mxu1 %v13763_v36  ;;  %v8511_v41 = vcombine.low %v883_v27, %v887_v20  ;;  %v899_v36 = vld [vmem:[#allocation8 + $0xd58] sm:$0xff] }
 0x4bb   :  { %7502 = vmatprep.mubr.f32.mxu0 %v10286_v26  ;;  %v10304_v26 = vpop.eup %10303  ;;  %v8528_v40 = vcombine.high %v899_v36, %v903_v46  ;;  %v8527_v25 = vcombine.low %v899_v36, %v903_v46  ;;  %v927_v27 = vld [vmem:[#allocation8 + $0xe38] sm:$0xff]  ;;  %v13777_v36 = vld [vmem:[#allocation34_spill] sm:$0xff] }
 0x4bc   :  { %v10306_v13 = vpop.eup %10305  ;;  %v939_v46 = vld [vmem:[#allocation8 + $0xe98] sm:$0xff] }
 0x4bd   :  { %v10308_v32 = vpop.eup %10307 }
 0x4be   :  { %7503 = vmatmul.mubr.f32.gmra.mrb[190].mxu0 %v10288_v28  ;;  %v9008_v28 = vadd.f32 %v12138_v12, %v12675_v29  ;;  %v9010_v12 = vadd.f32 %v12156_v59, %v12675_v29  ;;  %v8535_v59 = vcombine.low %v907_v34, %v911_v22 }
 0x4bf   :  { %7572 = vmatprep.mubr.f32.mxu0 %v10290_v44  ;;  %v13769_v44 = vld [vmem:[#allocation27_spill] sm:$0xff] }
 0x4c0   :  { %10319 = vtanh.f32 %v9008_v28 }
 0x4c1   :  { %6321 = vmatmul.mubr.bf16.vlgmr.msra.gmra.mrb[128].mxu1 %v13764_v37  ;;  %10321 = vtanh.f32 %v9011_v14  ;;  %v13779_v14 = vld [vmem:[#allocation24_spill] sm:$0xff] }
 0x4c2   :  { %7573 = vmatmul.mubr.f32.vlgmr.msra.gmra.mrb[128].mxu0 %v10292_v19  ;;  %6482 = vmatpush1.bf16.msra.mxu1 %v13765_v35  ;;  %v8536_v19 = vcombine.high %v907_v34, %v911_v22  ;;  %v919_v35 = vld [vmem:[#allocation8 + $0xdf8] sm:$0xff]  ;;  %10323 = vtanh.f32 %v9010_v12 }
 0x4c3   :  { %7577 = vmatprep.mubr.f32.mxu0 %v10294_v7  ;;  %6330 = vmatprep.mubr.bf16.mxu1 %v13766_v3  ;;  %v915_v7 = vld [vmem:[#allocation8 + $0xdd8] sm:$0xff]  ;;  %10325 = vtanh.f32 %v9013_v61  ;;  %v9015_v3 = vadd.f32 %v12192_v51, %v12671_v30  ;;  %v13774_v51 = vld [vmem:[#allocation22_spill] sm:$0xff] }
 0x4c4   :  { %6483 = vmatprep.subr.bf16.mxu1 %v8496_v54  ;;  %v10310_v54 = vpop.eup %10309  ;;  %v8544_v5 = vcombine.high %v915_v7, %v919_v35  ;;  %10327 = vtanh.f32 %v9012_v49  ;;  %v9017_v52 = vadd.f32 %v13774_v51, %v12671_v30  ;;  %v951_v12 = vld [vmem:[#allocation8 + $0xef8] sm:$0xff] }
 0x4c5   :  { %v10312_v37 = vpop.eup %10311  ;;  %10329 = vtanh.f32 %v9015_v3  ;;  %v13781_v61 = vld [vmem:[#allocation144_spill] sm:$0xff] }
 0x4c6   :  { %7578 = vmatmul.mubr.f32.gmra.mrb[130].mxu0 %v10296_v11  ;;  %6484 = vmatpush1.bf16.msra.mxu1 %v8495_v60  ;;  %v10314_v60 = vpop.eup %10313  ;;  %v923_v11 = vld [vmem:[#allocation8 + $0xe18] sm:$0xff]  ;;  %10331 = vtanh.f32 %v9014_v6 }
 0x4c7   :  { %7582 = vmatprep.mubr.f32.mxu0 %v10298_v42  ;;  %6485 = vmatprep.subr.bf16.mxu1 %v8504_v9  ;;  %v10316_v9 = vpop.eup %10315  ;;  %v13772_v42 = vld [vmem:[#allocation32_spill] sm:$0xff]  ;;  %v8551_v16 = vcombine.low %v923_v11, %v927_v27  ;;  %10333 = vtanh.f32 %v9017_v52 }
 0x4c8   :  { %v10318_v20 = vpop.eup %10317  ;;  %v955_v3 = vld [vmem:[#allocation8 + $0xf18] sm:$0xff] }
 0x4c9   :  { %6331 = vmatmul.mubr.bf16.gmra.mrb[132].mxu1 %v13767_v50  ;;  %v931_v50 = vld [vmem:[#allocation8 + $0xe58] sm:$0xff] }
 0x4ca   :  { %7583 = vmatmul.mubr.f32.gmra.mrb[132].mxu0 %v10300_v2  ;;  %6340 = vmatprep.mubr.bf16.mxu1 %v13768_v4  ;;  %v10320_v2 = vpop.eup %10319  ;;  %v963_v51 = vld [vmem:[#allocation8 + $0xf58] sm:$0xff] }
 0x4cb   :  { %7587 = vmatprep.mubr.f32.mxu0 %v10302_v55  ;;  %6486 = vmatpush1.bf16.msra.mxu1 %v8503_v18  ;;  %v8543_v18 = vcombine.low %v915_v7, %v919_v35  ;;  %v10322_v1 = vpop.eup %10321  ;;  %v13775_v55 = vld [vmem:[#allocation20_spill] sm:$0xff]  ;;  %v13782_v7 = vld [vmem:[#allocation31_spill] sm:$0xff] }
 0x4cc   :  { %6487 = vmatprep.subr.bf16.mxu1 %v8512_v17  ;;  %v8552_v17 = vcombine.high %v923_v11, %v927_v27  ;;  %v9016_v4 = vadd.f32 %v13775_v55, %v12675_v29  ;;  %v9023_v35 = vadd.f32 %v13782_v7, %v12671_v30  ;;  %v13785_v11 = vld [vmem:[#allocation29_spill] sm:$0xff]  ;;  %v967_v52 = vld [vmem:[#allocation8 + $0xf78] sm:$0xff]  ;;  %v13795_v7 = vld [vmem:[#allocation46_spill] sm:$0xff] }
 0x4cd   :  { %v9022_v27 = vadd.f32 %v13785_v11, %v12675_v29 }
 0x4ce   :  { %7588 = vmatmul.mubr.f32.gmra.mrb[134].mxu0 %v10304_v26  ;;  %v10324_v26 = vpop.eup %10323  ;;  %10335 = vtanh.f32 %v9016_v4  ;;  %v8592_v4 = vcombine.high %v963_v51, %v967_v52 }
 0x4cf   :  { %7592 = vmatprep.mubr.f32.mxu0 %v10306_v13  ;;  %6488 = vmatpush1.bf16.msra.mxu1 %v8511_v41  ;;  %v13776_v41 = vld [vmem:[#allocation145_spill] sm:$0xff]  ;;  %v943_v13 = vld [vmem:[#allocation8 + $0xeb8] sm:$0xff]  ;;  %v10326_v28 = vpop.eup %10325 }
 0x4d0   :  { %6489 = vmatprep.subr.bf16.mxu1 %v8520_v31  ;;  %v9019_v63 = vadd.f32 %v13776_v41, %v12671_v30  ;;  %v8560_v31 = vcombine.high %v931_v50, %v935_v56  ;;  %v8568_v22 = vcombine.high %v939_v46, %v943_v13  ;;  %v13789_v41 = vld [vmem:[#allocation42_spill] sm:$0xff] }
 0x4d1   :  { %6341 = vmatmul.mubr.bf16.gmra.mrb[136].mxu1 %v13769_v44  ;;  %v13780_v44 = vld [vmem:[#allocation147_spill] sm:$0xff] }
 0x4d2   :  { %7593 = vmatmul.mubr.f32.gmra.mrb[136].mxu0 %v10308_v32  ;;  %6350 = vmatprep.mubr.bf16.mxu1 %v13770_v23  ;;  %v8559_v32 = vcombine.low %v931_v50, %v935_v56  ;;  %10337 = vtanh.f32 %v9019_v63  ;;  %v9021_v34 = vadd.f32 %v13780_v44, %v12671_v30  ;;  %v947_v23 = vld [vmem:[#allocation8 + $0xed8] sm:$0xff] }
 0x4d3   :  { %7597 = vmatprep.mubr.f32.mxu0 %v10310_v54  ;;  %6490 = vmatpush1.bf16.msra.mxu1 %v8519_v0  ;;  %v13778_v0 = vld [vmem:[#allocation36_spill] sm:$0xff]  ;;  %v10328_v54 = vpop.eup %10327 }
 0x4d4   :  { %6491 = vmatprep.subr.bf16.mxu1 %v8528_v40  ;;  %v9018_v40 = vadd.f32 %v13779_v14, %v12675_v29  ;;  %v971_v63 = vld [vmem:[#allocation8 + $0xf98] sm:$0xff] }
 0x4d5   :  { %v979_v44 = vld [vmem:[#allocation8 + $0xfd8] sm:$0xff] }
 0x4d6   :  { %7598 = vmatmul.mubr.f32.gmra.mrb[138].mxu0 %v10312_v37  ;;  %10339 = vtanh.f32 %v9018_v40  ;;  %v8567_v37 = vcombine.low %v939_v46, %v943_v13  ;;  %v13791_v46 = vld [vmem:[#allocation148_spill] sm:$0xff] }
 0x4d7   :  { %7602 = vmatprep.mubr.f32.mxu0 %v10314_v60  ;;  %6492 = vmatpush1.bf16.msra.mxu1 %v8527_v25  ;;  %v10330_v25 = vpop.eup %10329  ;;  %10341 = vtanh.f32 %v9021_v34  ;;  %v8576_v60 = vcombine.high %v947_v23, %v951_v12  ;;  %v9026_v13 = vadd.f32 %v13791_v46, %v12675_v29  ;;  %v983_v34 = vld [vmem:[#allocation8 + $0xff8] sm:$0xff] }
 0x4d8   :  { %6493 = vmatprep.subr.bf16.mxu1 %v8536_v19  ;;  %v9020_v19 = vadd.f32 %v13781_v61, %v12675_v29  ;;  %v10332_v49 = vpop.eup %10331  ;;  %v13808_v46 = vld [vmem:[#allocation56_spill] sm:$0xff] }
 0x4d9   :  { %6351 = vmatmul.mubr.bf16.gmra.mrb[140].mxu1 %v13771_v21  ;;  %v13784_v21 = vld [vmem:[#allocation40_spill] sm:$0xff] }
 0x4da   :  { %7603 = vmatmul.mubr.f32.gmra.mrb[140].mxu0 %v10316_v9  ;;  %6360 = vmatprep.mubr.bf16.mxu1 %v13772_v42  ;;  %v10334_v9 = vpop.eup %10333  ;;  %10343 = vtanh.f32 %v9020_v19  ;;  %v13786_v42 = vld [vmem:[#allocation149_spill] sm:$0xff]  ;;  %v8608_v19 = vcombine.high %v979_v44, %v983_v34 }
 0x4db   :  { %7607 = vmatprep.mubr.f32.mxu0 %v10318_v20  ;;  %6494 = vmatpush1.bf16.msra.mxu1 %v8535_v59  ;;  %v13783_v59 = vld [vmem:[#allocation38_spill] sm:$0xff]  ;;  %v8575_v20 = vcombine.low %v947_v23, %v951_v12  ;;  %10345 = vtanh.f32 %v9023_v35  ;;  %v9025_v33 = vadd.f32 %v13786_v42, %v12671_v30  ;;  %v13800_v42 = vld [vmem:[#allocation39_spill] sm:$0xff] }
 0x4dc   :  { %6495 = vmatprep.subr.bf16.mxu1 %v8544_v5  ;;  %v959_v5 = vld [vmem:[#allocation8 + $0xf38] sm:$0xff]  ;;  %10347 = vtanh.f32 %v9022_v27 }
 0x4dd   :  { %v8584_v6 = vcombine.high %v955_v3, %v959_v5  ;;  %v8583_v56 = vcombine.low %v955_v3, %v959_v5  ;;  %10349 = vtanh.f32 %v9025_v33  ;;  %v8607_v3 = vcombine.low %v979_v44, %v983_v34  ;;  %v13798_v5 = vld [vmem:[#allocation155_spill] sm:$0xff]  ;;  %v13799_v27 = vld [vmem:[#allocation152_spill] sm:$0xff]  ;;  %v13811_v44 = vld [vmem:[#allocation41_spill] sm:$0xff] }
 0x4de   :  { %7608 = vmatmul.mubr.f32.gmra.mrb[142].mxu0 %v10320_v2  ;;  %v13787_v2 = vld [vmem:[#allocation146_spill] sm:$0xff]  ;;  %v9035_v33 = vadd.f32 %v13800_v42, %v12671_v30  ;;  %v9040_v34 = vadd.f32 %v13811_v44, %v12675_v29 }
 0x4df   :  { %7612 = vmatprep.mubr.f32.mxu0 %v10322_v1  ;;  %6496 = vmatpush1.bf16.msra.mxu1 %v8543_v18  ;;  %v10336_v18 = vpop.eup %10335  ;;  %v9024_v50 = vadd.f32 %v13787_v2, %v12675_v29  ;;  %v13788_v1 = vld [vmem:[#allocation151_spill] sm:$0xff]  ;;  %v13826_v44 = vld [vmem:[#allocation78_spill] sm:$0xff] }
 0x4e0   :  { %6497 = vmatprep.subr.bf16.mxu1 %v8552_v17  ;;  %v10338_v17 = vpop.eup %10337  ;;  %v9027_v55 = vadd.f32 %v13788_v1, %v12671_v30 }
 0x4e1   :  { %6361 = vmatmul.mubr.bf16.gmra.mrb[144].mxu1 %v13777_v36  ;;  %v13790_v36 = vld [vmem:[#allocation44_spill] sm:$0xff]  ;;  %10351 = vtanh.f32 %v9024_v50  ;;  %v13804_v50 = vld [vmem:[#allocation157_spill] sm:$0xff] }
 0x4e2   :  { %7613 = vmatmul.mubr.f32.gmra.mrb[144].mxu0 %v10324_v26  ;;  %6370 = vmatprep.mubr.bf16.mxu1 %v13778_v0  ;;  %10353 = vtanh.f32 %v9027_v55  ;;  %v13792_v0 = vld [vmem:[#allocation35_spill] sm:$0xff] }
 0x4e3   :  { %7617 = vmatprep.mubr.f32.mxu0 %v10326_v28  ;;  %6498 = vmatpush1.bf16.msra.mxu1 %v8551_v16  ;;  %v10340_v16 = vpop.eup %10339  ;;  %v8591_v28 = vcombine.low %v963_v51, %v967_v52  ;;  %v9029_v14 = vadd.f32 %v13792_v0, %v12671_v30  ;;  %10355 = vtanh.f32 %v9026_v13  ;;  %v13802_v52 = vld [vmem:[#allocation52_spill] sm:$0xff]  ;;  %v13810_v0 = vld [vmem:[#allocation43_spill] sm:$0xff] }
 0x4e4   :  { %6499 = vmatprep.subr.bf16.mxu1 %v8560_v31  ;;  %v975_v31 = vld [vmem:[#allocation8 + $0xfb8] sm:$0xff]  ;;  %v10342_v26 = vpop.eup %10341 }
 0x4e5   :  { %v8600_v40 = vcombine.high %v971_v63, %v975_v31  ;;  %v8599_v12 = vcombine.low %v971_v63, %v975_v31  ;;  %10357 = vtanh.f32 %v9029_v14  ;;  %v13809_v13 = vld [vmem:[#allocation156_spill] sm:$0xff]  ;;  %v9041_v14 = vadd.f32 %v13810_v0, %v12671_v30 }
 0x4e6   :  { %7618 = vmatmul.mubr.f32.gmra.mrb[146].mxu0 %v10328_v54  ;;  %v13793_v54 = vld [vmem:[#allocation33_spill] sm:$0xff] }
 0x4e7   :  { %7622 = vmatprep.mubr.f32.mxu0 %v10330_v25  ;;  %6500 = vmatpush1.bf16.msra.mxu1 %v8559_v32  ;;  %v10344_v32 = vpop.eup %10343  ;;  %v9028_v23 = vadd.f32 %v13793_v54, %v12675_v29  ;;  %v13794_v25 = vld [vmem:[#allocation153_spill] sm:$0xff] }
 0x4e8   :  { %6501 = vmatprep.subr.bf16.mxu1 %v8568_v22  ;;  %v10346_v22 = vpop.eup %10345  ;;  %v9031_v61 = vadd.f32 %v13794_v25, %v12671_v30  ;;  %v7030_v0 = vld [vmem:[%s13083_s4 + $0x320] sm:$0xff] }
 0x4e9   :  { %6371 = vmatmul.mubr.bf16.gmra.mrb[148].mxu1 %v13783_v59  ;;  %10359 = vtanh.f32 %v9028_v23 }
 0x4ea   :  { %7623 = vmatmul.mubr.f32.gmra.mrb[148].mxu0 %v10332_v49  ;;  %6380 = vmatprep.mubr.bf16.mxu1 %v13784_v21  ;;  %v13797_v49 = vld [vmem:[#allocation150_spill] sm:$0xff]  ;;  %10361 = vtanh.f32 %v9031_v61  ;;  %v13814_v61 = vld [vmem:[#allocation60_spill] sm:$0xff] }
 0x4eb   :  { %7627 = vmatprep.mubr.f32.mxu0 %v10334_v9  ;;  %6502 = vmatpush1.bf16.msra.mxu1 %v8567_v37  ;;  %v10348_v37 = vpop.eup %10347  ;;  %v9030_v59 = vadd.f32 %v13797_v49, %v12675_v29  ;;  %v9033_v9 = vadd.f32 %v13798_v5, %v12671_v30  ;;  %v9044_v49 = vadd.f32 %v12538_v48, %v12675_v29  ;;  %v13816_v5 = vld [vmem:[#allocation62_spill] sm:$0xff] }
 0x4ec   :  { %6503 = vmatprep.subr.bf16.mxu1 %v8576_v60  ;;  %v10350_v35 = vpop.eup %10349  ;;  %v13796_v60 = vld [vmem:[#allocation48_spill] sm:$0xff]  ;;  %v9049_v48 = vadd.f32 %v12580_v43, %v12671_v30  ;;  %v7027_v43 = vld [vmem:[%s13083_s4 + $0x308] sm:$0xff] }
 0x4ed   :  { %v10352_v21 = vpop.eup %10351  ;;  %10363 = vtanh.f32 %v9030_v59  ;;  %v9047_v59 = vadd.f32 %v12568_v8, %v12671_v30  ;;  %v9048_v8 = vadd.f32 %v12574_v58, %v12675_v29 }
 0x4ee   :  { %7628 = vmatmul.mubr.f32.gmra.mrb[150].mxu0 %v10336_v18  ;;  %v10354_v11 = vpop.eup %10353  ;;  %10365 = vtanh.f32 %v9033_v9  ;;  %v13801_v18 = vld [vmem:[#allocation50_spill] sm:$0xff] }
 0x4ef   :  { %7632 = vmatprep.mubr.f32.mxu0 %v10338_v17  ;;  %6504 = vmatpush1.bf16.msra.mxu1 %v8575_v20  ;;  %v9032_v20 = vadd.f32 %v13799_v27, %v12675_v29  ;;  %v13803_v17 = vld [vmem:[#allocation37_spill] sm:$0xff] }
 0x4f0   :  { %6505 = vmatprep.subr.bf16.mxu1 %v8584_v6  ;;  %v10356_v6 = vpop.eup %10355  ;;  %v9034_v2 = vadd.f32 %v13803_v17, %v12675_v29 }
 0x4f1   :  { %6381 = vmatmul.mubr.bf16.gmra.mrb[152].mxu1 %v13789_v41  ;;  %v10358_v51 = vpop.eup %10357  ;;  %10367 = vtanh.f32 %v9032_v20  ;;  %v13806_v41 = vld [vmem:[#allocation159_spill] sm:$0xff]  ;;  %v9051_v20 = vadd.f32 %v12595_v10, %v12671_v30  ;;  %v9050_v10 = vadd.f32 %v12591_v24, %v12675_v29 }
 0x4f2   :  { %7633 = vmatmul.mubr.f32.gmra.mrb[152].mxu0 %v10340_v16  ;;  %6390 = vmatprep.mubr.bf16.mxu1 %v13790_v36  ;;  %10369 = vtanh.f32 %v9035_v33  ;;  %v9039_v63 = vadd.f32 %v13806_v41, %v12671_v30  ;;  %v13818_v33 = vld [vmem:[#allocation66_spill] sm:$0xff]  ;;  %v13823_v41 = vld [vmem:[#allocation160_spill] sm:$0xff] }
 0x4f3   :  { %7637 = vmatprep.mubr.f32.mxu0 %v10342_v26  ;;  %6506 = vmatpush1.bf16.msra.mxu1 %v8583_v56  ;;  %v9037_v56 = vadd.f32 %v13804_v50, %v12671_v30  ;;  %v10360_v1 = vpop.eup %10359  ;;  %10371 = vtanh.f32 %v9034_v2  ;;  %v13807_v26 = vld [vmem:[#allocation54_spill] sm:$0xff]  ;;  %v9052_v2 = vadd.f32 %v12601_v47, %v12675_v29  ;;  %v13820_v50 = vld [vmem:[#allocation163_spill] sm:$0xff] }
 0x4f4   :  { %6507 = vmatprep.subr.bf16.mxu1 %v8592_v4  ;;  %v10362_v55 = vpop.eup %10361  ;;  %v13805_v4 = vld [vmem:[#allocation154_spill] sm:$0xff]  ;;  %v9055_v24 = vadd.f32 %v13820_v50, %v12671_v30 }
 0x4f5   :  { %v9036_v16 = vadd.f32 %v13805_v4, %v12675_v29  ;;  %10373 = vtanh.f32 %v9037_v56  ;;  %v13834_v50 = vld [vmem:[#allocation94_spill] sm:$0xff] }
 0x4f6   :  { %7638 = vmatmul.mubr.f32.gmra.mrb[154].mxu0 %v10344_v32 }
 0x4f7   :  { %7642 = vmatprep.mubr.f32.mxu0 %v10346_v22  ;;  %6508 = vmatpush1.bf16.msra.mxu1 %v8591_v28  ;;  %v10364_v31 = vpop.eup %10363  ;;  %10375 = vtanh.f32 %v9036_v16  ;;  %v9038_v28 = vadd.f32 %v13809_v13, %v12675_v29  ;;  %v13812_v22 = vld [vmem:[#allocation161_spill] sm:$0xff]  ;;  %v13822_v16 = vld [vmem:[#allocation72_spill] sm:$0xff] }
 0x4f8   :  { %6509 = vmatprep.subr.bf16.mxu1 %v8600_v40  ;;  %v10366_v36 = vpop.eup %10365  ;;  %10377 = vtanh.f32 %v9039_v63  ;;  %v9043_v54 = vadd.f32 %v13812_v22, %v12671_v30  ;;  %v9054_v63 = vadd.f32 %v13823_v41, %v12675_v29  ;;  %v7033_v22 = vld [vmem:[%s13083_s4 + $0x338] sm:$0xff] }
 0x4f9   :  { %6391 = vmatmul.mubr.bf16.gmra.mrb[156].mxu1 %v13795_v7  ;;  %10379 = vtanh.f32 %v9038_v28  ;;  %v9045_v7 = vadd.f32 %v12544_v53, %v12671_v30  ;;  %v9046_v53 = vadd.f32 %v12563_v38, %v12675_v29  ;;  %v7026_v38 = vld [vmem:[%s13083_s4 + $0x300] sm:$0xff]  ;;  %v13824_v28 = vld [vmem:[#allocation74_spill] sm:$0xff] }
 0x4fa   :  { %7643 = vmatmul.mubr.f32.gmra.mrb[156].mxu0 %v10348_v37  ;;  %6400 = vmatprep.mubr.bf16.mxu1 %v13796_v60  ;;  %10381 = vtanh.f32 %v9041_v14  ;;  %v8755_v58 = vpack.c.bf16 %v7027_v43, %v7026_v38  ;;  %v13825_v14 = vld [vmem:[#allocation76_spill] sm:$0xff] }
 0x4fb   :  { %7647 = vmatprep.mubr.f32.mxu0 %v10350_v35  ;;  %6510 = vmatpush1.bf16.msra.mxu1 %v8599_v12  ;;  %v10368_v40 = vpop.eup %10367  ;;  %v13813_v12 = vld [vmem:[#allocation58_spill] sm:$0xff]  ;;  %10383 = vtanh.f32 %v9040_v34  ;;  %v7045_v38 = vld [vmem:[%s13083_s4 + $0x398] sm:$0xff] }
 0x4fc   :  { %6511 = vmatprep.subr.bf16.mxu1 %v8608_v19  ;;  %v10370_v32 = vpop.eup %10369  ;;  %v13815_v19 = vld [vmem:[#allocation158_spill] sm:$0xff]  ;;  %10385 = vtanh.f32 %v9043_v54  ;;  %8756 = vmatpush1.bf16.msra.mxu0 %v8755_v58  ;;  %v7034_v54 = vld [vmem:[%s13083_s4 + $0x340] sm:$0xff] }
 0x4fd   :  { %v10372_v23 = vpop.eup %10371  ;;  %v9042_v37 = vadd.f32 %v13815_v19, %v12675_v29  ;;  %8757 = vmatprep.subr.bf16.mxu0 %v13608_v39  ;;  %v7032_v34 = vld [vmem:[%s13083_s4 + $0x330] sm:$0xff]  ;;  %v7047_v58 = vld [vmem:[%s13083_s4 + $0x3a8] sm:$0xff]  ;;  %v13837_v41 = vld [vmem:[#allocation100_spill] sm:$0xff] }
 0x4fe   :  { %7648 = vmatmul.mubr.f32.gmra.mrb[158].mxu0 %v10352_v21  ;;  %v13817_v21 = vld [vmem:[#allocation64_spill] sm:$0xff] }
 0x4ff   :  { %7652 = vmatprep.mubr.f32.mxu0 %v10354_v11  ;;  %6512 = vmatpush1.bf16.msra.mxu1 %v8607_v3  ;;  %v10374_v25 = vpop.eup %10373  ;;  %10387 = vtanh.f32 %v9042_v37 }
 0x500   :  { %10389 = vtanh.f32 %v9045_v7  ;;  %v7036_v7 = vld [vmem:[%s13083_s4 + $0x350] sm:$0xff] }
 0x501   :  { %6401 = vmatmul.mubr.bf16.gmra.mrb[160].mxu1 %v13801_v18  ;;  %v10376_v35 = vpop.eup %10375  ;;  %10391 = vtanh.f32 %v9044_v49  ;;  %v13819_v18 = vld [vmem:[#allocation68_spill] sm:$0xff]  ;;  %v13828_v49 = vld [vmem:[#allocation82_spill] sm:$0xff] }
 0x502   :  { %7653 = vmatmul.mubr.f32.gmra.mrb[160].mxu0 %v10356_v6  ;;  %6410 = vmatprep.mubr.bf16.mxu1 %v13802_v52  ;;  %v10378_v60 = vpop.eup %10377  ;;  %10393 = vtanh.f32 %v9047_v59  ;;  %v7038_v59 = vld [vmem:[%s13083_s4 + $0x360] sm:$0xff] }
 0x503   :  { %7657 = vmatprep.mubr.f32.mxu0 %v10358_v51  ;;  %v10380_v3 = vpop.eup %10379  ;;  %10395 = vtanh.f32 %v9046_v53  ;;  %v9053_v51 = vadd.f32 %v12607_v45, %v12671_v30  ;;  %v7028_v45 = vld [vmem:[%s13083_s4 + $0x310] sm:$0xff]  ;;  %v7041_v53 = vld [vmem:[%s13083_s4 + $0x378] sm:$0xff] }
 0x504   :  { %v10382_v9 = vpop.eup %10381  ;;  %10397 = vtanh.f32 %v9049_v48 }
 0x505   :  { %v10384_v11 = vpop.eup %10383  ;;  %10399 = vtanh.f32 %v9048_v8  ;;  %v7043_v8 = vld [vmem:[%s13083_s4 + $0x388] sm:$0xff] }
 0x506   :  { %7658 = vmatmul.mubr.f32.gmra.mrb[162].mxu0 %v10360_v1  ;;  %v10386_v27 = vpop.eup %10385  ;;  %10401 = vtanh.f32 %v9051_v20  ;;  %v13821_v1 = vld [vmem:[#allocation70_spill] sm:$0xff]  ;;  %v13831_v20 = vld [vmem:[#allocation88_spill] sm:$0xff] }
 0x507   :  { %7662 = vmatprep.mubr.f32.mxu0 %v10362_v55  ;;  %10403 = vtanh.f32 %v9050_v10  ;;  %v7029_v55 = vld [vmem:[%s13083_s4 + $0x318] sm:$0xff] }
 0x508   :  { %10405 = vtanh.f32 %v9053_v51  ;;  %v8758_v47 = vpack.c.bf16 %v7029_v55, %v7028_v45  ;;  %v13833_v10 = vld [vmem:[#allocation92_spill] sm:$0xff]  ;;  %v7052_v55 = vld [vmem:[%s13083_s4 + $0x3d0] sm:$0xff] }
 0x509   :  { %6411 = vmatmul.mubr.bf16.gmra.mrb[164].mxu1 %v13807_v26  ;;  %v10388_v42 = vpop.eup %10387  ;;  %10407 = vtanh.f32 %v9052_v2 }
 0x50a   :  { %7663 = vmatmul.mubr.f32.gmra.mrb[164].mxu0 %v10364_v31  ;;  %6420 = vmatprep.mubr.bf16.mxu1 %v13808_v46  ;;  %v10390_v6 = vpop.eup %10389  ;;  %10409 = vtanh.f32 %v9055_v24  ;;  %v9057_v31 = vadd.f32 %v12633_v57, %v12671_v30  ;;  %v9056_v46 = vadd.f32 %v12627_v15, %v12675_v29  ;;  %v7031_v57 = vld [vmem:[%s13083_s4 + $0x328] sm:$0xff]  ;;  %v7050_v24 = vld [vmem:[%s13083_s4 + $0x3c0] sm:$0xff] }
 0x50b   :  { %7667 = vmatprep.mubr.f32.mxu0 %v10366_v36  ;;  %v10392_v52 = vpop.eup %10391  ;;  %8759 = vmatpush1.bf16.msra.mxu0 %v8758_v47  ;;  %10411 = vtanh.f32 %v9054_v63  ;;  %v13836_v47 = vld [vmem:[#allocation98_spill] sm:$0xff] }
 0x50c   :  { %v10394_v17 = vpop.eup %10393  ;;  %8760 = vmatprep.subr.bf16.mxu0 %v13608_v39  ;;  %10413 = vtanh.f32 %v9057_v31  ;;  %v13838_v63 = vld [vmem:[#allocation102_spill] sm:$0xff]  ;;  %v13839_v31 = vld [vmem:[#allocation104_spill] sm:$0xff] }
 0x50d   :  { %v10396_v56 = vpop.eup %10395  ;;  %10415 = vtanh.f32 %v9056_v46  ;;  %v13842_v46 = vld [vmem:[#allocation109_spill] sm:$0xff] }
 0x50e   :  { %7668 = vmatmul.mubr.f32.gmra.mrb[166].mxu0 %v10368_v40  ;;  %v10398_v4 = vpop.eup %10397  ;;  %v8761_v40 = vpack.c.bf16 %v7031_v57, %v7030_v0  ;;  %v13845_v0 = vld [vmem:[#allocation115_spill] sm:$0xff]  ;;  %v13846_v57 = vld [vmem:[#allocation117_spill] sm:$0xff] }
 0x50f   :  { %7672 = vmatprep.mubr.f32.mxu0 %v10370_v32  ;;  %v10400_v26 = vpop.eup %10399 }
 0x510   :  { %v10402_v36 = vpop.eup %10401  ;;  %8762 = vmatpush1.bf16.msra.mxu0 %v8761_v40  ;;  %v13849_v40 = vld [vmem:[#allocation123_spill] sm:$0xff] }
 0x511   :  { %6421 = vmatmul.mubr.bf16.gmra.mrb[168].mxu1 %v13813_v12  ;;  %v10404_v13 = vpop.eup %10403  ;;  %8763 = vmatprep.subr.bf16.mxu0 %v13608_v39  ;;  %v13827_v12 = vld [vmem:[#allocation80_spill] sm:$0xff] }
 0x512   :  { %7673 = vmatmul.mubr.f32.gmra.mrb[168].mxu0 %v10372_v23  ;;  %6430 = vmatprep.mubr.bf16.mxu1 %v13814_v61  ;;  %v10406_v30 = vpop.eup %10405  ;;  %v7035_v61 = vld [vmem:[%s13083_s4 + $0x348] sm:$0xff] }
 0x513   :  { %7677 = vmatprep.mubr.f32.mxu0 %v10374_v25  ;;  %v10408_v15 = vpop.eup %10407  ;;  %v8764_v25 = vpack.c.bf16 %v7033_v22, %v7032_v34  ;;  %v8767_v19 = vpack.c.bf16 %v7035_v61, %v7034_v54  ;;  %v13851_v34 = vld [vmem:[#allocation127_spill] sm:$0xff]  ;;  %v13854_v61 = vld [vmem:[#allocation133_spill] sm:$0xff] }
 0x514   :  { %v10410_v29 = vpop.eup %10409  ;;  %v7056_v22 = vld [vmem:[%s13083_s4 + $0x3f0] sm:$0xff]  ;;  %v7057_v54 = vld [vmem:[%s13083_s4 + $0x3f8] sm:$0xff] }
 0x515   :  { %v10412_v32 = vpop.eup %10411  ;;  %8765 = vmatpush1.bf16.msra.mxu0 %v8764_v25  ;;  %v13853_v25 = vld [vmem:[#allocation131_spill] sm:$0xff] }
 0x516   :  { %7678 = vmatmul.mubr.f32.gmra.mrb[170].mxu0 %v10376_v35  ;;  %v10414_v23 = vpop.eup %10413  ;;  %8766 = vmatprep.subr.bf16.mxu0 %v13608_v39  ;;  %v7037_v35 = vld [vmem:[%s13083_s4 + $0x358] sm:$0xff] }
 0x517   :  { %7682 = vmatprep.mubr.f32.mxu0 %v10378_v60  ;;  %v10416_v37 = vpop.eup %10415  ;;  %v8770_v60 = vpack.c.bf16 %v7037_v35, %v7036_v7  ;;  %v13858_v7 = vld [vmem:[#allocation141_spill] sm:$0xff]  ;;  %v1012_v35 = vsub.s32 6, %v13694_v62 }
 0x519   :  { %6431 = vmatmul.mubr.bf16.gmra.mrb[172].mxu1 %v13816_v5  ;;  %8768 = vmatpush1.bf16.msra.mxu0 %v8767_v19  ;;  %v13829_v5 = vld [vmem:[#allocation84_spill] sm:$0xff]  ;;  %v13855_v19 = vld [vmem:[#allocation135_spill] sm:$0xff] }
 0x51a   :  { %7683 = vmatmul.mubr.f32.gmra.mrb[172].mxu0 %v10380_v3  ;;  %6440 = vmatprep.mubr.bf16.mxu1 %v13817_v21  ;;  %v7039_v3 = vld [vmem:[%s13083_s4 + $0x368] sm:$0xff]  ;;  %v7040_v21 = vld [vmem:[%s13083_s4 + $0x370] sm:$0xff] }
 0x51b   :  { %7687 = vmatprep.mubr.f32.mxu0 %v10382_v9  ;;  %8769 = vmatprep.subr.bf16.mxu0 %v13608_v39  ;;  %v8773_v9 = vpack.c.bf16 %v7039_v3, %v7038_v59  ;;  %v8776_v48 = vpack.c.bf16 %v7041_v53, %v7040_v21 }
 0x51d   :  { %8771 = vmatpush1.bf16.msra.mxu0 %v8770_v60  ;;  %v1016_v60 = vsub.s32 7, %v13694_v62 }
 0x51e   :  { %7688 = vmatmul.mubr.f32.gmra.mrb[174].mxu0 %v10384_v11  ;;  %8772 = vmatprep.subr.bf16.mxu0 %v13608_v39  ;;  %v13830_v11 = vld [vmem:[#allocation86_spill] sm:$0xff] }
 0x51f   :  { %7692 = vmatprep.mubr.f32.mxu0 %v10386_v27  ;;  %v7042_v27 = vld [vmem:[%s13083_s4 + $0x380] sm:$0xff] }
 0x521   :  { %6441 = vmatmul.mubr.bf16.gmra.mrb[176].mxu1 %v13818_v33  ;;  %8774 = vmatpush1.bf16.msra.mxu0 %v8773_v9  ;;  %v7044_v33 = vld [vmem:[%s13083_s4 + $0x390] sm:$0xff] }
 0x522   :  { %7693 = vmatmul.mubr.f32.gmra.mrb[176].mxu0 %v10388_v42  ;;  %6450 = vmatprep.mubr.bf16.mxu1 %v13819_v18  ;;  %v8779_v42 = vpack.c.bf16 %v7043_v8, %v7042_v27  ;;  %v8782_v43 = vpack.c.bf16 %v7045_v38, %v7044_v33  ;;  %v7046_v18 = vld [vmem:[%s13083_s4 + $0x3a0] sm:$0xff] }
 0x523   :  { %7697 = vmatprep.mubr.f32.mxu0 %v10390_v6  ;;  %8775 = vmatprep.subr.bf16.mxu0 %v13608_v39  ;;  %v13832_v6 = vld [vmem:[#allocation90_spill] sm:$0xff]  ;;  %v8785_v51 = vpack.c.bf16 %v7047_v58, %v7046_v18 }
 0x525   :  { %8777 = vmatpush1.bf16.msra.mxu0 %v8776_v48 }
 0x526   :  { %7698 = vmatmul.mubr.f32.gmra.mrb[178].mxu0 %v10392_v52  ;;  %8778 = vmatprep.subr.bf16.mxu0 %v13608_v39  ;;  %v7048_v52 = vld [vmem:[%s13083_s4 + $0x3b0] sm:$0xff] }
 0x527   :  { %7702 = vmatprep.mubr.f32.mxu0 %v10394_v17  ;;  %v7049_v17 = vld [vmem:[%s13083_s4 + $0x3b8] sm:$0xff] }
 0x528   :  { %v8788_v2 = vpack.c.bf16 %v7049_v17, %v7048_v52 }
 0x529   :  { %6451 = vmatmul.mubr.bf16.gmra.mrb[180].mxu1 %v13821_v1  ;;  %8780 = vmatpush1.bf16.msra.mxu0 %v8779_v42  ;;  %v13835_v1 = vld [vmem:[#allocation96_spill] sm:$0xff] }
 0x52a   :  { %7703 = vmatmul.mubr.f32.gmra.mrb[180].mxu0 %v10396_v56  ;;  %6460 = vmatprep.mubr.bf16.mxu1 %v13822_v16  ;;  %v7051_v56 = vld [vmem:[%s13083_s4 + $0x3c8] sm:$0xff] }
 0x52b   :  { %7707 = vmatprep.mubr.f32.mxu0 %v10398_v4  ;;  %8781 = vmatprep.subr.bf16.mxu0 %v13608_v39  ;;  %v8791_v45 = vpack.c.bf16 %v7051_v56, %v7050_v24  ;;  %v7053_v4 = vld [vmem:[%s13083_s4 + $0x3d8] sm:$0xff] }
 0x52c   :  { %v8794_v16 = vpack.c.bf16 %v7053_v4, %v7052_v55 }
 0x52d   :  { %8783 = vmatpush1.bf16.msra.mxu0 %v8782_v43 }
 0x52e   :  { %7708 = vmatmul.mubr.f32.gmra.mrb[182].mxu0 %v10400_v26  ;;  %8784 = vmatprep.subr.bf16.mxu0 %v13608_v39  ;;  %v13840_v26 = vld [vmem:[#allocation106_spill] sm:$0xff] }
 0x52f   :  { %7712 = vmatprep.mubr.f32.mxu0 %v10402_v36  ;;  %v13841_v36 = vld [vmem:[#allocation108_spill] sm:$0xff] }
 0x531   :  { %6461 = vmatmul.mubr.bf16.gmra.mrb[184].mxu1 %v13824_v28  ;;  %8786 = vmatpush1.bf16.msra.mxu0 %v8785_v51  ;;  %v13844_v28 = vld [vmem:[#allocation113_spill] sm:$0xff] }
 0x532   :  { %7713 = vmatmul.mubr.f32.gmra.mrb[184].mxu0 %v10404_v13  ;;  %6470 = vmatprep.mubr.bf16.mxu1 %v13825_v14  ;;  %v13843_v13 = vld [vmem:[#allocation111_spill] sm:$0xff]  ;;  %v13848_v14 = vld [vmem:[#allocation121_spill] sm:$0xff] }
 0x533   :  { %7717 = vmatprep.mubr.f32.mxu0 %v10406_v30  ;;  %8787 = vmatprep.subr.bf16.mxu0 %v13608_v39  ;;  %v13847_v30 = vld [vmem:[#allocation119_spill] sm:$0xff] }
 0x535   :  { %8789 = vmatpush1.bf16.msra.mxu0 %v8788_v2 }
 0x536   :  { %7718 = vmatmul.mubr.f32.gmra.mrb[186].mxu0 %v10408_v15  ;;  %8790 = vmatprep.subr.bf16.mxu0 %v13608_v39  ;;  %v7054_v15 = vld [vmem:[%s13083_s4 + $0x3e0] sm:$0xff] }
 0x537   :  { %7722 = vmatprep.mubr.f32.mxu0 %v10410_v29  ;;  %v7055_v29 = vld [vmem:[%s13083_s4 + $0x3e8] sm:$0xff]  ;;  %s7958_s4 = sld [smem:[#allocation11]] }
 0x539   :  { %6471 = vmatmul.mubr.bf16.gmra.mrb[188].mxu1 %v13826_v44  ;;  %8792 = vmatpush1.bf16.msra.mxu0 %v8791_v45  ;;  %v8797_v44 = vpack.c.bf16 %v7055_v29, %v7054_v15 }
 0x53a   :  { %7723 = vmatmul.mubr.f32.gmra.mrb[188].mxu0 %v10412_v32  ;;  %6513 = vmatprep.mubr.bf16.mxu1 %v13827_v12  ;;  %v13850_v32 = vld [vmem:[#allocation125_spill] sm:$0xff]  ;;  %v8800_v12 = vpack.c.bf16 %v7057_v54, %v7056_v22 }
 0x53b   :  { %7727 = vmatprep.mubr.f32.mxu0 %v10414_v23  ;;  %8793 = vmatprep.subr.bf16.mxu0 %v13608_v39  ;;  %v13852_v23 = vld [vmem:[#allocation129_spill] sm:$0xff] }
 0x53d   :  { %8795 = vmatpush1.bf16.msra.mxu0 %v8794_v16 }
 0x53e   :  { %7728 = vmatmul.mubr.f32.gmra.mrb[190].mxu0 %v10416_v37  ;;  %8796 = vmatprep.subr.bf16.mxu0 %v13608_v39  ;;  %v13856_v37 = vld [vmem:[#allocation137_spill] sm:$0xff] }
 0x541   :  { %6514 = vmatmul.mubr.bf16.vlgmr.msra.gmra.mrb[128].mxu1 %v13828_v49  ;;  %8798 = vmatpush1.bf16.msra.mxu0 %v8797_v44  ;;  %v10555_v49 = vld [vmem:[#allocation9] sm:$0xff] }
 0x542   :  { %6523 = vmatprep.mubr.bf16.mxu1 %v13829_v5  ;;  %8799 = vmatprep.subr.bf16.mxu0 %v13608_v39  ;;  %v13857_v39 = vld [vmem:[#allocation139_spill] sm:$0xff]  ;;  %v12990_v59 = vrot.slane %v10555_v49, %v1012_v35  ;;  %v12992_v3 = vrot.slane %v10555_v49, %v1016_v60 }
 0x545   :  { %8801 = vmatpush1.bf16.msra.mxu0 %v8800_v12 }
 0x549   :  { %6524 = vmatmul.mubr.bf16.gmra.mrb[132].mxu1 %v13830_v11 }
 0x54a   :  { %6533 = vmatprep.mubr.bf16.mxu1 %v13831_v20 }
 0x551   :  { %6534 = vmatmul.mubr.bf16.gmra.mrb[136].mxu1 %v13832_v6 }
 0x552   :  { %6543 = vmatprep.mubr.bf16.mxu1 %v13833_v10 }
 0x559   :  { %6544 = vmatmul.mubr.bf16.gmra.mrb[140].mxu1 %v13834_v50 }
 0x55a   :  { %6553 = vmatprep.mubr.bf16.mxu1 %v13835_v1 }
 0x561   :  { %6554 = vmatmul.mubr.bf16.gmra.mrb[144].mxu1 %v13836_v47 }
 0x562   :  { %6563 = vmatprep.mubr.bf16.mxu1 %v13837_v41 }
 0x569   :  { %6564 = vmatmul.mubr.bf16.gmra.mrb[148].mxu1 %v13838_v63 }
 0x56a   :  { %6573 = vmatprep.mubr.bf16.mxu1 %v13839_v31 }
 0x571   :  { %6574 = vmatmul.mubr.bf16.gmra.mrb[152].mxu1 %v13840_v26 }
 0x572   :  { %6583 = vmatprep.mubr.bf16.mxu1 %v13841_v36 }
 0x579   :  { %6584 = vmatmul.mubr.bf16.gmra.mrb[156].mxu1 %v13842_v46 }
 0x57a   :  { %6593 = vmatprep.mubr.bf16.mxu1 %v13843_v13 }
 0x581   :  { %6594 = vmatmul.mubr.bf16.gmra.mrb[160].mxu1 %v13844_v28 }
 0x582   :  { %6603 = vmatprep.mubr.bf16.mxu1 %v13845_v0 }
 0x589   :  { %6604 = vmatmul.mubr.bf16.gmra.mrb[164].mxu1 %v13846_v57 }
 0x58a   :  { %6613 = vmatprep.mubr.bf16.mxu1 %v13847_v30 }
 0x591   :  { %6614 = vmatmul.mubr.bf16.gmra.mrb[168].mxu1 %v13848_v14 }
 0x592   :  { %6623 = vmatprep.mubr.bf16.mxu1 %v13849_v40 }
 0x599   :  { %6624 = vmatmul.mubr.bf16.gmra.mrb[172].mxu1 %v13850_v32 }
 0x59a   :  { %6633 = vmatprep.mubr.bf16.mxu1 %v13851_v34 }
 0x5a1   :  { %6634 = vmatmul.mubr.bf16.gmra.mrb[176].mxu1 %v13852_v23 }
 0x5a2   :  { %6643 = vmatprep.mubr.bf16.mxu1 %v13853_v25 }
 0x5a9   :  { %6644 = vmatmul.mubr.bf16.gmra.mrb[180].mxu1 %v13854_v61 }
 0x5aa   :  { %6653 = vmatprep.mubr.bf16.mxu1 %v13855_v19 }
 0x5b1   :  { %6654 = vmatmul.mubr.bf16.gmra.mrb[184].mxu1 %v13856_v37 }
 0x5b2   :  { %6663 = vmatprep.mubr.bf16.mxu1 %v13857_v39 }
 0x5b9   :  { %6664 = vmatmul.mubr.bf16.gmra.mrb[188].mxu1 %v13858_v7 }
 0x614   :  { %v6515_v5 = vpop.f32.mrb[128].mxu1 }
 0x615   :  { %v9058_v9 = vadd.f32 %v6515_v5, %v12990_v59  ;;  %v6517_v21 = vpop.f32.mrb[129].mxu1 }
 0x616   :  { %v9059_v53 = vadd.f32 %v6517_v21, %v12992_v3  ;;  %v6519_v48 = vpop.f32.mrb[130].mxu1 }
 0x617   :  { %v6521_v11 = vpop.f32.mrb[131].mxu1  ;;  %v9060_v8 = vadd.f32 %v6519_v48, %v12990_v59 }
 0x618   :  { %10417 = vtanh.f32 %v9059_v53  ;;  %v9061_v27 = vadd.f32 %v6521_v11, %v12992_v3 }
 0x619   :  { %10419 = vtanh.f32 %v9058_v9 }
 0x61a   :  { %10421 = vtanh.f32 %v9061_v27 }
 0x61b   :  { %10423 = vtanh.f32 %v9060_v8 }
 0x61c   :  { %v6525_v20 = vpop.f32.mrb[132].mxu1 }
 0x61d   :  { %v9062_v42 = vadd.f32 %v6525_v20, %v12990_v59  ;;  %v6527_v33 = vpop.f32.mrb[133].mxu1 }
 0x61e   :  { %v9063_v38 = vadd.f32 %v6527_v33, %v12992_v3  ;;  %v6529_v43 = vpop.f32.mrb[134].mxu1 }
 0x61f   :  { %v6531_v6 = vpop.f32.mrb[135].mxu1  ;;  %v9064_v58 = vadd.f32 %v6529_v43, %v12990_v59 }
 0x620   :  { %10425 = vtanh.f32 %v9063_v38  ;;  %v9065_v18 = vadd.f32 %v6531_v6, %v12992_v3 }
 0x621   :  { %10427 = vtanh.f32 %v9062_v42 }
 0x622   :  { %v10418_v10 = vpop.eup %10417  ;;  %10429 = vtanh.f32 %v9065_v18 }
 0x623   :  { %v10420_v51 = vpop.eup %10419  ;;  %7797 = vmatprep.mubr.f32.mxu0 %v10418_v10  ;;  %10431 = vtanh.f32 %v9064_v58 }
 0x624   :  { %v10422_v52 = vpop.eup %10421  ;;  %v6535_v17 = vpop.f32.mrb[136].mxu1  ;;  %7798 = vmatmul.mubr.f32.vlgmr.msra.gmra.mrb[128].mxu0 %v10420_v51 }
 0x625   :  { %v9066_v2 = vadd.f32 %v6535_v17, %v12990_v59  ;;  %v6537_v50 = vpop.f32.mrb[137].mxu1  ;;  %7802 = vmatprep.mubr.f32.mxu0 %v10422_v52  ;;  %v10424_v1 = vpop.eup %10423 }
 0x626   :  { %v9067_v24 = vadd.f32 %v6537_v50, %v12992_v3  ;;  %v6539_v56 = vpop.f32.mrb[138].mxu1 }
 0x627   :  { %v6541_v45 = vpop.f32.mrb[139].mxu1  ;;  %v9068_v4 = vadd.f32 %v6539_v56, %v12990_v59 }
 0x628   :  { %10433 = vtanh.f32 %v9067_v24  ;;  %v9069_v55 = vadd.f32 %v6541_v45, %v12992_v3  ;;  %7803 = vmatmul.mubr.f32.gmra.mrb[130].mxu0 %v10424_v1 }
 0x629   :  { %10435 = vtanh.f32 %v9066_v2 }
 0x62a   :  { %v10426_v16 = vpop.eup %10425  ;;  %10437 = vtanh.f32 %v9069_v55 }
 0x62b   :  { %v10428_v47 = vpop.eup %10427  ;;  %7807 = vmatprep.mubr.f32.mxu0 %v10426_v16  ;;  %10439 = vtanh.f32 %v9068_v4 }
 0x62c   :  { %v10430_v41 = vpop.eup %10429  ;;  %v6545_v63 = vpop.f32.mrb[140].mxu1  ;;  %7808 = vmatmul.mubr.f32.gmra.mrb[132].mxu0 %v10428_v47 }
 0x62d   :  { %v9070_v31 = vadd.f32 %v6545_v63, %v12990_v59  ;;  %v6547_v26 = vpop.f32.mrb[141].mxu1  ;;  %7812 = vmatprep.mubr.f32.mxu0 %v10430_v41  ;;  %v10432_v13 = vpop.eup %10431 }
 0x62e   :  { %v9071_v36 = vadd.f32 %v6547_v26, %v12992_v3  ;;  %v6549_v46 = vpop.f32.mrb[142].mxu1 }
 0x62f   :  { %v6551_v28 = vpop.f32.mrb[143].mxu1  ;;  %v9072_v57 = vadd.f32 %v6549_v46, %v12990_v59 }
 0x630   :  { %10441 = vtanh.f32 %v9071_v36  ;;  %v9073_v0 = vadd.f32 %v6551_v28, %v12992_v3  ;;  %7813 = vmatmul.mubr.f32.gmra.mrb[134].mxu0 %v10432_v13 }
 0x631   :  { %10443 = vtanh.f32 %v9070_v31 }
 0x632   :  { %v10434_v30 = vpop.eup %10433  ;;  %10445 = vtanh.f32 %v9073_v0 }
 0x633   :  { %v10436_v14 = vpop.eup %10435  ;;  %7817 = vmatprep.mubr.f32.mxu0 %v10434_v30  ;;  %10447 = vtanh.f32 %v9072_v57 }
 0x634   :  { %v10438_v40 = vpop.eup %10437  ;;  %v6555_v15 = vpop.f32.mrb[144].mxu1  ;;  %7818 = vmatmul.mubr.f32.gmra.mrb[136].mxu0 %v10436_v14 }
 0x635   :  { %v9074_v29 = vadd.f32 %v6555_v15, %v12990_v59  ;;  %v6557_v32 = vpop.f32.mrb[145].mxu1  ;;  %7822 = vmatprep.mubr.f32.mxu0 %v10438_v40  ;;  %v10440_v22 = vpop.eup %10439 }
 0x636   :  { %v9075_v44 = vadd.f32 %v6557_v32, %v12992_v3  ;;  %v6559_v34 = vpop.f32.mrb[146].mxu1 }
 0x637   :  { %v6561_v54 = vpop.f32.mrb[147].mxu1  ;;  %v9076_v12 = vadd.f32 %v6559_v34, %v12990_v59 }
 0x638   :  { %10449 = vtanh.f32 %v9075_v44  ;;  %v9077_v23 = vadd.f32 %v6561_v54, %v12992_v3  ;;  %7823 = vmatmul.mubr.f32.gmra.mrb[138].mxu0 %v10440_v22 }
 0x639   :  { %10451 = vtanh.f32 %v9074_v29 }
 0x63a   :  { %v10442_v25 = vpop.eup %10441  ;;  %10453 = vtanh.f32 %v9077_v23 }
 0x63b   :  { %v10444_v61 = vpop.eup %10443  ;;  %7827 = vmatprep.mubr.f32.mxu0 %v10442_v25  ;;  %10455 = vtanh.f32 %v9076_v12 }
 0x63c   :  { %v10446_v19 = vpop.eup %10445  ;;  %v6565_v37 = vpop.f32.mrb[148].mxu1  ;;  %7828 = vmatmul.mubr.f32.gmra.mrb[140].mxu0 %v10444_v61 }
 0x63d   :  { %v9078_v39 = vadd.f32 %v6565_v37, %v12990_v59  ;;  %v6567_v7 = vpop.f32.mrb[149].mxu1  ;;  %7832 = vmatprep.mubr.f32.mxu0 %v10446_v19  ;;  %v10448_v49 = vpop.eup %10447 }
 0x63e   :  { %v9079_v35 = vadd.f32 %v6567_v7, %v12992_v3  ;;  %v6569_v60 = vpop.f32.mrb[150].mxu1 }
 0x63f   :  { %v6571_v5 = vpop.f32.mrb[151].mxu1  ;;  %v9080_v21 = vadd.f32 %v6569_v60, %v12990_v59 }
 0x640   :  { %10457 = vtanh.f32 %v9079_v35  ;;  %v9081_v9 = vadd.f32 %v6571_v5, %v12992_v3  ;;  %7833 = vmatmul.mubr.f32.gmra.mrb[142].mxu0 %v10448_v49 }
 0x641   :  { %10459 = vtanh.f32 %v9078_v39 }
 0x642   :  { %v10450_v53 = vpop.eup %10449  ;;  %10461 = vtanh.f32 %v9081_v9 }
 0x643   :  { %v10452_v48 = vpop.eup %10451  ;;  %7837 = vmatprep.mubr.f32.mxu0 %v10450_v53  ;;  %10463 = vtanh.f32 %v9080_v21 }
 0x644   :  { %v10454_v11 = vpop.eup %10453  ;;  %v6575_v27 = vpop.f32.mrb[152].mxu1  ;;  %7838 = vmatmul.mubr.f32.gmra.mrb[144].mxu0 %v10452_v48 }
 0x645   :  { %v9082_v8 = vadd.f32 %v6575_v27, %v12990_v59  ;;  %v6577_v20 = vpop.f32.mrb[153].mxu1  ;;  %7842 = vmatprep.mubr.f32.mxu0 %v10454_v11  ;;  %v10456_v38 = vpop.eup %10455 }
 0x646   :  { %v9083_v42 = vadd.f32 %v6577_v20, %v12992_v3  ;;  %v6579_v33 = vpop.f32.mrb[154].mxu1 }
 0x647   :  { %v6581_v43 = vpop.f32.mrb[155].mxu1  ;;  %v9084_v18 = vadd.f32 %v6579_v33, %v12990_v59 }
 0x648   :  { %10465 = vtanh.f32 %v9083_v42  ;;  %v9085_v6 = vadd.f32 %v6581_v43, %v12992_v3  ;;  %7843 = vmatmul.mubr.f32.gmra.mrb[146].mxu0 %v10456_v38 }
 0x649   :  { %10467 = vtanh.f32 %v9082_v8 }
 0x64a   :  { %v10458_v58 = vpop.eup %10457  ;;  %10469 = vtanh.f32 %v9085_v6 }
 0x64b   :  { %v10460_v10 = vpop.eup %10459  ;;  %7847 = vmatprep.mubr.f32.mxu0 %v10458_v58  ;;  %10471 = vtanh.f32 %v9084_v18 }
 0x64c   :  { %v10462_v51 = vpop.eup %10461  ;;  %v6585_v52 = vpop.f32.mrb[156].mxu1  ;;  %7848 = vmatmul.mubr.f32.gmra.mrb[148].mxu0 %v10460_v10 }
 0x64d   :  { %v9086_v17 = vadd.f32 %v6585_v52, %v12990_v59  ;;  %v6587_v2 = vpop.f32.mrb[157].mxu1  ;;  %7852 = vmatprep.mubr.f32.mxu0 %v10462_v51  ;;  %v10464_v56 = vpop.eup %10463 }
 0x64e   :  { %v9087_v50 = vadd.f32 %v6587_v2, %v12992_v3  ;;  %v6589_v24 = vpop.f32.mrb[158].mxu1 }
 0x64f   :  { %v6591_v1 = vpop.f32.mrb[159].mxu1  ;;  %v9088_v55 = vadd.f32 %v6589_v24, %v12990_v59 }
 0x650   :  { %10473 = vtanh.f32 %v9087_v50  ;;  %v9089_v45 = vadd.f32 %v6591_v1, %v12992_v3  ;;  %7853 = vmatmul.mubr.f32.gmra.mrb[150].mxu0 %v10464_v56 }
 0x651   :  { %10475 = vtanh.f32 %v9086_v17 }
 0x652   :  { %v10466_v4 = vpop.eup %10465  ;;  %10477 = vtanh.f32 %v9089_v45 }
 0x653   :  { %v10468_v16 = vpop.eup %10467  ;;  %7857 = vmatprep.mubr.f32.mxu0 %v10466_v4  ;;  %10479 = vtanh.f32 %v9088_v55 }
 0x654   :  { %v10470_v47 = vpop.eup %10469  ;;  %v6595_v41 = vpop.f32.mrb[160].mxu1  ;;  %7858 = vmatmul.mubr.f32.gmra.mrb[152].mxu0 %v10468_v16 }
 0x655   :  { %v9090_v63 = vadd.f32 %v6595_v41, %v12990_v59  ;;  %v6597_v31 = vpop.f32.mrb[161].mxu1  ;;  %7862 = vmatprep.mubr.f32.mxu0 %v10470_v47  ;;  %v10472_v46 = vpop.eup %10471 }
 0x656   :  { %v9091_v26 = vadd.f32 %v6597_v31, %v12992_v3  ;;  %v6599_v36 = vpop.f32.mrb[162].mxu1 }
 0x657   :  { %v6601_v13 = vpop.f32.mrb[163].mxu1  ;;  %v9092_v0 = vadd.f32 %v6599_v36, %v12990_v59 }
 0x658   :  { %10481 = vtanh.f32 %v9091_v26  ;;  %v9093_v28 = vadd.f32 %v6601_v13, %v12992_v3  ;;  %7863 = vmatmul.mubr.f32.gmra.mrb[154].mxu0 %v10472_v46 }
 0x659   :  { %10483 = vtanh.f32 %v9090_v63 }
 0x65a   :  { %v10474_v57 = vpop.eup %10473  ;;  %10485 = vtanh.f32 %v9093_v28 }
 0x65b   :  { %v10476_v30 = vpop.eup %10475  ;;  %7867 = vmatprep.mubr.f32.mxu0 %v10474_v57  ;;  %10487 = vtanh.f32 %v9092_v0 }
 0x65c   :  { %v10478_v14 = vpop.eup %10477  ;;  %v6605_v40 = vpop.f32.mrb[164].mxu1  ;;  %7868 = vmatmul.mubr.f32.gmra.mrb[156].mxu0 %v10476_v30 }
 0x65d   :  { %v9094_v15 = vadd.f32 %v6605_v40, %v12990_v59  ;;  %v6607_v29 = vpop.f32.mrb[165].mxu1  ;;  %7872 = vmatprep.mubr.f32.mxu0 %v10478_v14  ;;  %v10480_v34 = vpop.eup %10479 }
 0x65e   :  { %v9095_v32 = vadd.f32 %v6607_v29, %v12992_v3  ;;  %v6609_v44 = vpop.f32.mrb[166].mxu1 }
 0x65f   :  { %v6611_v22 = vpop.f32.mrb[167].mxu1  ;;  %v9096_v23 = vadd.f32 %v6609_v44, %v12990_v59 }
 0x660   :  { %10489 = vtanh.f32 %v9095_v32  ;;  %v9097_v54 = vadd.f32 %v6611_v22, %v12992_v3  ;;  %7873 = vmatmul.mubr.f32.gmra.mrb[158].mxu0 %v10480_v34 }
 0x661   :  { %10491 = vtanh.f32 %v9094_v15 }
 0x662   :  { %v10482_v12 = vpop.eup %10481  ;;  %10493 = vtanh.f32 %v9097_v54 }
 0x663   :  { %v10484_v25 = vpop.eup %10483  ;;  %7877 = vmatprep.mubr.f32.mxu0 %v10482_v12  ;;  %10495 = vtanh.f32 %v9096_v23 }
 0x664   :  { %v10486_v61 = vpop.eup %10485  ;;  %v6615_v19 = vpop.f32.mrb[168].mxu1  ;;  %7878 = vmatmul.mubr.f32.gmra.mrb[160].mxu0 %v10484_v25 }
 0x665   :  { %v9098_v37 = vadd.f32 %v6615_v19, %v12990_v59  ;;  %v6617_v39 = vpop.f32.mrb[169].mxu1  ;;  %7882 = vmatprep.mubr.f32.mxu0 %v10486_v61  ;;  %v10488_v60 = vpop.eup %10487 }
 0x666   :  { %v9099_v7 = vadd.f32 %v6617_v39, %v12992_v3  ;;  %v6619_v35 = vpop.f32.mrb[170].mxu1 }
 0x667   :  { %v6621_v49 = vpop.f32.mrb[171].mxu1  ;;  %v9100_v9 = vadd.f32 %v6619_v35, %v12990_v59 }
 0x668   :  { %10497 = vtanh.f32 %v9099_v7  ;;  %v9101_v5 = vadd.f32 %v6621_v49, %v12992_v3  ;;  %7883 = vmatmul.mubr.f32.gmra.mrb[162].mxu0 %v10488_v60 }
 0x669   :  { %10499 = vtanh.f32 %v9098_v37 }
 0x66a   :  { %v10490_v21 = vpop.eup %10489  ;;  %10501 = vtanh.f32 %v9101_v5 }
 0x66b   :  { %v10492_v53 = vpop.eup %10491  ;;  %7887 = vmatprep.mubr.f32.mxu0 %v10490_v21  ;;  %10503 = vtanh.f32 %v9100_v9 }
 0x66c   :  { %v10494_v48 = vpop.eup %10493  ;;  %v6625_v11 = vpop.f32.mrb[172].mxu1  ;;  %7888 = vmatmul.mubr.f32.gmra.mrb[164].mxu0 %v10492_v53 }
 0x66d   :  { %v9102_v27 = vadd.f32 %v6625_v11, %v12990_v59  ;;  %v6627_v8 = vpop.f32.mrb[173].mxu1  ;;  %7892 = vmatprep.mubr.f32.mxu0 %v10494_v48  ;;  %v10496_v33 = vpop.eup %10495 }
 0x66e   :  { %v9103_v20 = vadd.f32 %v6627_v8, %v12992_v3  ;;  %v6629_v42 = vpop.f32.mrb[174].mxu1 }
 0x66f   :  { %v6631_v38 = vpop.f32.mrb[175].mxu1  ;;  %v9104_v6 = vadd.f32 %v6629_v42, %v12990_v59 }
 0x670   :  { %10505 = vtanh.f32 %v9103_v20  ;;  %v9105_v43 = vadd.f32 %v6631_v38, %v12992_v3  ;;  %7893 = vmatmul.mubr.f32.gmra.mrb[166].mxu0 %v10496_v33 }
 0x671   :  { %10507 = vtanh.f32 %v9102_v27 }
 0x672   :  { %v10498_v18 = vpop.eup %10497  ;;  %10509 = vtanh.f32 %v9105_v43 }
 0x673   :  { %v10500_v58 = vpop.eup %10499  ;;  %7897 = vmatprep.mubr.f32.mxu0 %v10498_v18  ;;  %10511 = vtanh.f32 %v9104_v6 }
 0x674   :  { %v10502_v10 = vpop.eup %10501  ;;  %v6635_v51 = vpop.f32.mrb[176].mxu1  ;;  %7898 = vmatmul.mubr.f32.gmra.mrb[168].mxu0 %v10500_v58 }
 0x675   :  { %v9106_v52 = vadd.f32 %v6635_v51, %v12990_v59  ;;  %v6637_v17 = vpop.f32.mrb[177].mxu1  ;;  %7902 = vmatprep.mubr.f32.mxu0 %v10502_v10  ;;  %v10504_v24 = vpop.eup %10503 }
 0x676   :  { %v9107_v2 = vadd.f32 %v6637_v17, %v12992_v3  ;;  %v6639_v50 = vpop.f32.mrb[178].mxu1 }
 0x677   :  { %v6641_v56 = vpop.f32.mrb[179].mxu1  ;;  %v9108_v45 = vadd.f32 %v6639_v50, %v12990_v59 }
 0x678   :  { %10513 = vtanh.f32 %v9107_v2  ;;  %v9109_v1 = vadd.f32 %v6641_v56, %v12992_v3  ;;  %7903 = vmatmul.mubr.f32.gmra.mrb[170].mxu0 %v10504_v24 }
 0x679   :  { %10515 = vtanh.f32 %v9106_v52 }
 0x67a   :  { %v10506_v55 = vpop.eup %10505  ;;  %10517 = vtanh.f32 %v9109_v1 }
 0x67b   :  { %v10508_v4 = vpop.eup %10507  ;;  %7907 = vmatprep.mubr.f32.mxu0 %v10506_v55  ;;  %10519 = vtanh.f32 %v9108_v45 }
 0x67c   :  { %v10510_v16 = vpop.eup %10509  ;;  %v6645_v47 = vpop.f32.mrb[180].mxu1  ;;  %7908 = vmatmul.mubr.f32.gmra.mrb[172].mxu0 %v10508_v4 }
 0x67d   :  { %v9110_v41 = vadd.f32 %v6645_v47, %v12990_v59  ;;  %v6647_v63 = vpop.f32.mrb[181].mxu1  ;;  %7912 = vmatprep.mubr.f32.mxu0 %v10510_v16  ;;  %v10512_v36 = vpop.eup %10511 }
 0x67e   :  { %v9111_v31 = vadd.f32 %v6647_v63, %v12992_v3  ;;  %v6649_v26 = vpop.f32.mrb[182].mxu1 }
 0x67f   :  { %v6651_v46 = vpop.f32.mrb[183].mxu1  ;;  %v9112_v28 = vadd.f32 %v6649_v26, %v12990_v59 }
 0x680   :  { %10521 = vtanh.f32 %v9111_v31  ;;  %v9113_v13 = vadd.f32 %v6651_v46, %v12992_v3  ;;  %7913 = vmatmul.mubr.f32.gmra.mrb[174].mxu0 %v10512_v36 }
 0x681   :  { %10523 = vtanh.f32 %v9110_v41 }
 0x682   :  { %v10514_v0 = vpop.eup %10513  ;;  %10525 = vtanh.f32 %v9113_v13 }
 0x683   :  { %v10516_v57 = vpop.eup %10515  ;;  %7917 = vmatprep.mubr.f32.mxu0 %v10514_v0  ;;  %10527 = vtanh.f32 %v9112_v28 }
 0x684   :  { %v10518_v30 = vpop.eup %10517  ;;  %v6655_v14 = vpop.f32.mrb[184].mxu1  ;;  %7918 = vmatmul.mubr.f32.gmra.mrb[176].mxu0 %v10516_v57 }
 0x685   :  { %v9114_v40 = vadd.f32 %v6655_v14, %v12990_v59  ;;  %v6657_v15 = vpop.f32.mrb[185].mxu1  ;;  %7922 = vmatprep.mubr.f32.mxu0 %v10518_v30  ;;  %v10520_v44 = vpop.eup %10519 }
 0x686   :  { %v9115_v29 = vadd.f32 %v6657_v15, %v12992_v3  ;;  %v6659_v32 = vpop.f32.mrb[186].mxu1 }
 0x687   :  { %v6661_v34 = vpop.f32.mrb[187].mxu1  ;;  %v9116_v54 = vadd.f32 %v6659_v32, %v12990_v59 }
 0x688   :  { %10529 = vtanh.f32 %v9115_v29  ;;  %v9117_v22 = vadd.f32 %v6661_v34, %v12992_v3  ;;  %7923 = vmatmul.mubr.f32.gmra.mrb[178].mxu0 %v10520_v44 }
 0x689   :  { %10531 = vtanh.f32 %v9114_v40 }
 0x68a   :  { %v10522_v23 = vpop.eup %10521  ;;  %10533 = vtanh.f32 %v9117_v22 }
 0x68b   :  { %v10524_v12 = vpop.eup %10523  ;;  %7927 = vmatprep.mubr.f32.mxu0 %v10522_v23  ;;  %10535 = vtanh.f32 %v9116_v54 }
 0x68c   :  { %v10526_v25 = vpop.eup %10525  ;;  %v6665_v61 = vpop.f32.mrb[188].mxu1  ;;  %7928 = vmatmul.mubr.f32.gmra.mrb[180].mxu0 %v10524_v12 }
 0x68d   :  { %v9118_v19 = vadd.f32 %v6665_v61, %v12990_v59  ;;  %v6667_v37 = vpop.f32.mrb[189].mxu1  ;;  %7932 = vmatprep.mubr.f32.mxu0 %v10526_v25  ;;  %v10528_v35 = vpop.eup %10527 }
 0x68e   :  { %v9119_v39 = vadd.f32 %v6667_v37, %v12992_v3  ;;  %v6669_v7 = vpop.f32.mrb[190].mxu1 }
 0x68f   :  { %v6671_v60 = vpop.f32.mrb[191].mxu1  ;;  %v9120_v5 = vadd.f32 %v6669_v7, %v12990_v59 }
 0x690   :  { %10537 = vtanh.f32 %v9119_v39  ;;  %v9121_v49 = vadd.f32 %v6671_v60, %v12992_v3  ;;  %7933 = vmatmul.mubr.f32.gmra.mrb[182].mxu0 %v10528_v35 }
 0x691   :  { %10539 = vtanh.f32 %v9118_v19 }
 0x692   :  { %v10530_v9 = vpop.eup %10529  ;;  %10541 = vtanh.f32 %v9121_v49 }
 0x693   :  { %v10532_v21 = vpop.eup %10531  ;;  %7937 = vmatprep.mubr.f32.mxu0 %v10530_v9  ;;  %10543 = vtanh.f32 %v9120_v5 }
 0x694   :  { %v10534_v53 = vpop.eup %10533  ;;  %7938 = vmatmul.mubr.f32.gmra.mrb[184].mxu0 %v10532_v21 }
 0x695   :  { %7942 = vmatprep.mubr.f32.mxu0 %v10534_v53  ;;  %v10536_v48 = vpop.eup %10535 }
 0x698   :  { %7943 = vmatmul.mubr.f32.gmra.mrb[186].mxu0 %v10536_v48 }
 0x69a   :  { %v10538_v11 = vpop.eup %10537 }
 0x69b   :  { %v10540_v27 = vpop.eup %10539  ;;  %7947 = vmatprep.mubr.f32.mxu0 %v10538_v11  ;;  %v7999_v11 = vld [vmem:[#allocation6] sm:$0x1] }
 0x69c   :  { %v10542_v8 = vpop.eup %10541  ;;  %7948 = vmatmul.mubr.f32.gmra.mrb[188].mxu0 %v10540_v27  ;;  %vm8000_vm0 = vcmp.eq.f32.partialorder %v7999_v11, 0.0 }
 0x69d   :  { %7952 = vmatprep.mubr.f32.mxu0 %v10542_v8  ;;  %v10544_v3 = vpop.eup %10543 }
 0x6a0   :  { %7953 = vmatmul.mubr.f32.gmra.mrb[190].mxu0 %v10544_v3 }
 0x6f7   :  { %v7799_v20 = vpop.f32.mrb[128].mxu0 }
 0x6f8   :  { %7960 = vxpose.xlu0.b32.start [1/16] (narrow) %v7799_v20, 8  ;;  %v7801_v59 = vpop.f32.mrb[129].mxu0  ;;  %v10698_v20 = vmov 0  }
 0x6f9   :  { %v8001_v59 = vsel %vm8000_vm0, 1, %v10698_v20 }
 0x6fb   :  { %v7804_v42 = vpop.f32.mrb[130].mxu0 }
 0x6fc   :  { %7961 = vxpose.xlu0.b32.cont [2/16] (narrow) %v7804_v42, 8  ;;  %v7806_v33 = vpop.f32.mrb[131].mxu0 }
 0x6fd   :  { %v7995_v33 = vstv %s7958_s4 }
 0x6ff   :  { %v7809_v38 = vpop.f32.mrb[132].mxu0 }
 0x700   :  { %7962 = vxpose.xlu0.b32.cont [3/16] (narrow) %v7809_v38, 8  ;;  %v7811_v43 = vpop.f32.mrb[133].mxu0  ;;  %v7996_v38 = vstv %s8609_s11 }
 0x703   :  { %v7814_v6 = vpop.f32.mrb[134].mxu0 }
 0x704   :  { %7963 = vxpose.xlu0.b32.cont [4/16] (narrow) %v7814_v6, 8  ;;  %v7816_v18 = vpop.f32.mrb[135].mxu0  ;;  %v13859_v6 = vld [vmem:[#allocation143_spill] sm:$0xff] }
 0x705   :  { %v8005_v18 = vrot.slane %v8001_v59, %v13859_v6 }
 0x707   :  { %v7819_v58 = vpop.f32.mrb[136].mxu0  ;;  %vm8006_vm2 = vcmp.eq.s32.totalorder %v8005_v18, 1 }
 0x708   :  { %7964 = vxpose.xlu0.b32.cont [5/16] (narrow) %v7819_v58, 8  ;;  %v7821_v10 = vpop.f32.mrb[137].mxu0  ;;  %v7997_v58 = vsel %vm7994_vm1, %v7995_v33, %v7996_v38 }
 0x70b   :  { %v7824_v51 = vpop.f32.mrb[138].mxu0 }
 0x70c   :  { %7965 = vxpose.xlu0.b32.cont [6/16] (narrow) %v7824_v51, 8  ;;  %v7826_v52 = vpop.f32.mrb[139].mxu0 }
 0x70f   :  { %v7829_v17 = vpop.f32.mrb[140].mxu0 }
 0x710   :  { %7966 = vxpose.xlu0.b32.cont [7/16] (narrow) %v7829_v17, 8  ;;  %v7831_v2 = vpop.f32.mrb[141].mxu0 }
 0x711   :  { %v8055_v2 = vld [vmem:[#allocation6 + $0x1] sm:$0x1] }
 0x712   :  { %vm8056_vm4 = vcmp.eq.f32.partialorder %v8055_v2, 0.0 }
 0x713   :  { %v7834_v50 = vpop.f32.mrb[142].mxu0 }
 0x714   :  { %7967 = vxpose.xlu0.b32.cont [8/16] (narrow) %v7834_v50, 8  ;;  %v7836_v24 = vpop.f32.mrb[143].mxu0  ;;  %v8057_v50 = vsel %vm8056_vm4, 1, %v10698_v20 }
 0x715   :  { %v8061_v62 = vrot.slane %v8057_v50, %v13859_v6 }
 0x717   :  { %v7839_v56 = vpop.f32.mrb[144].mxu0  ;;  %vm8062_vm5 = vcmp.eq.s32.totalorder %v8061_v62, 1 }
 0x718   :  { %7968 = vxpose.xlu0.b32.cont [9/16] (narrow) %v7839_v56, 8  ;;  %v7841_v1 = vpop.f32.mrb[145].mxu0 }
 0x71b   :  { %v7844_v45 = vpop.f32.mrb[146].mxu0 }
 0x71c   :  { %7969 = vxpose.xlu0.b32.cont [10/16] (narrow) %v7844_v45, 8  ;;  %v7846_v55 = vpop.f32.mrb[147].mxu0 }
 0x71f   :  { %v7849_v4 = vpop.f32.mrb[148].mxu0 }
 0x720   :  { %7970 = vxpose.xlu0.b32.cont [11/16] (narrow) %v7849_v4, 8  ;;  %v7851_v16 = vpop.f32.mrb[149].mxu0 }
 0x723   :  { %v7854_v47 = vpop.f32.mrb[150].mxu0 }
 0x724   :  { %7971 = vxpose.xlu0.b32.cont [12/16] (narrow) %v7854_v47, 8  ;;  %v7856_v41 = vpop.f32.mrb[151].mxu0 }
 0x727   :  { %v7859_v63 = vpop.f32.mrb[152].mxu0 }
 0x728   :  { %7972 = vxpose.xlu0.b32.cont [13/16] (narrow) %v7859_v63, 8  ;;  %v7861_v31 = vpop.f32.mrb[153].mxu0 }
 0x72b   :  { %v7864_v26 = vpop.f32.mrb[154].mxu0 }
 0x72c   :  { %7973 = vxpose.xlu0.b32.cont [14/16] (narrow) %v7864_v26, 8  ;;  %v7866_v36 = vpop.f32.mrb[155].mxu0 }
 0x72f   :  { %v7869_v46 = vpop.f32.mrb[156].mxu0 }
 0x730   :  { %7974 = vxpose.xlu0.b32.cont [15/16] (narrow) %v7869_v46, 8  ;;  %v7871_v13 = vpop.f32.mrb[157].mxu0 }
 0x733   :  { %v7874_v28 = vpop.f32.mrb[158].mxu0 }
 0x734   :  { %7975 = vxpose.xlu0.b32.end [16/16] (narrow) %v7874_v28, 8  ;;  %v7876_v0 = vpop.f32.mrb[159].mxu0 }
 0x737   :  { %v7879_v57 = vpop.f32.mrb[160].mxu0 }
 0x738   :  { %8021 = vxpose.xlu1.b32.start [1/16] (narrow) %v7879_v57, 8  ;;  %v7881_v30 = vpop.f32.mrb[161].mxu0 }
 0x73b   :  { %v7884_v14 = vpop.f32.mrb[162].mxu0 }
 0x73c   :  { %8022 = vxpose.xlu1.b32.cont [2/16] (narrow) %v7884_v14, 8  ;;  %v7886_v40 = vpop.f32.mrb[163].mxu0 }
 0x73f   :  { %v7889_v15 = vpop.f32.mrb[164].mxu0 }
 0x740   :  { %8023 = vxpose.xlu1.b32.cont [3/16] (narrow) %v7889_v15, 8  ;;  %v7891_v29 = vpop.f32.mrb[165].mxu0 }
 0x743   :  { %v7894_v32 = vpop.f32.mrb[166].mxu0 }
 0x744   :  { %8024 = vxpose.xlu1.b32.cont [4/16] (narrow) %v7894_v32, 8  ;;  %v7896_v44 = vpop.f32.mrb[167].mxu0 }
 0x747   :  { %v7899_v34 = vpop.f32.mrb[168].mxu0 }
 0x748   :  { %8025 = vxpose.xlu1.b32.cont [5/16] (narrow) %v7899_v34, 8  ;;  %v7901_v22 = vpop.f32.mrb[169].mxu0 }
 0x74b   :  { %v7904_v54 = vpop.f32.mrb[170].mxu0 }
 0x74c   :  { %8026 = vxpose.xlu1.b32.cont [6/16] (narrow) %v7904_v54, 8  ;;  %v7906_v23 = vpop.f32.mrb[171].mxu0 }
 0x74f   :  { %v7909_v12 = vpop.f32.mrb[172].mxu0 }
 0x750   :  { %8027 = vxpose.xlu1.b32.cont [7/16] (narrow) %v7909_v12, 8  ;;  %v7911_v25 = vpop.f32.mrb[173].mxu0 }
 0x753   :  { %v7914_v61 = vpop.f32.mrb[174].mxu0 }
 0x754   :  { %8028 = vxpose.xlu1.b32.cont [8/16] (narrow) %v7914_v61, 8  ;;  %v7916_v19 = vpop.f32.mrb[175].mxu0 }
 0x757   :  { %v7919_v37 = vpop.f32.mrb[176].mxu0 }
 0x758   :  { %8029 = vxpose.xlu1.b32.cont [9/16] (narrow) %v7919_v37, 8  ;;  %v7921_v39 = vpop.f32.mrb[177].mxu0 }
 0x75b   :  { %v7924_v7 = vpop.f32.mrb[178].mxu0 }
 0x75c   :  { %8030 = vxpose.xlu1.b32.cont [10/16] (narrow) %v7924_v7, 8  ;;  %v7926_v35 = vpop.f32.mrb[179].mxu0 }
 0x75f   :  { %v7929_v60 = vpop.f32.mrb[180].mxu0 }
 0x760   :  { %8031 = vxpose.xlu1.b32.cont [11/16] (narrow) %v7929_v60, 8  ;;  %v7931_v49 = vpop.f32.mrb[181].mxu0 }
 0x763   :  { %v7934_v5 = vpop.f32.mrb[182].mxu0 }
 0x764   :  { %8032 = vxpose.xlu1.b32.cont [12/16] (narrow) %v7934_v5, 8  ;;  %v7936_v9 = vpop.f32.mrb[183].mxu0 }
 0x767   :  { %v7939_v21 = vpop.f32.mrb[184].mxu0 }
 0x768   :  { %8033 = vxpose.xlu1.b32.cont [13/16] (narrow) %v7939_v21, 8  ;;  %v7941_v53 = vpop.f32.mrb[185].mxu0 }
 0x76b   :  { %v7944_v48 = vpop.f32.mrb[186].mxu0 }
 0x76c   :  { %8034 = vxpose.xlu1.b32.cont [14/16] (narrow) %v7944_v48, 8  ;;  %v7946_v27 = vpop.f32.mrb[187].mxu0 }
 0x76f   :  { %v7949_v8 = vpop.f32.mrb[188].mxu0 }
 0x770   :  { %8035 = vxpose.xlu1.b32.cont [15/16] (narrow) %v7949_v8, 8  ;;  %v7951_v3 = vpop.f32.mrb[189].mxu0 }
 0x773   :  { %v7954_v42 = vpop.f32.mrb[190].mxu0 }
 0x774   :  { %8036 = vxpose.xlu1.b32.end [16/16] (narrow) %v7954_v42, 8  ;;  %v7956_v43 = vpop.f32.mrb[191].mxu0 }
 0x778   :  { %v7976_v10 = vpop.trf.xlu0 }
 0x779   :  { %v7998_v51 = vadd.f32 %v7997_v58, %v7976_v10 }
 0x77b   :  { %v8007_v52 = vsel %vm8006_vm2, -1e+30, %v7998_v51 }
 0x77c   :  { %v8009_v17 = vsel %vm8008_vm3, %v8007_v52, -inf }
 0x77d   :  { %8010 = vmax.xlane.f32.xlu0 %v8009_v17 }
 0x7b8   :  { %v8037_v24 = vpop.trf.xlu1 }
 0x7b9   :  { %v8053_v56 = vadd.f32 %v8037_v24, %v7997_v58 }
 0x7bb   :  { %v8063_v1 = vsel %vm8062_vm5, -1e+30, %v8053_v56 }
 0x7bc   :  { %v8064_v45 = vsel %vm8008_vm3, %v8063_v1, -inf }
 0x7bd   :  { %8065 = vmax.xlane.f32.xlu1 %v8064_v45 }
 0x80a   :  { %v8011_v55 = vpop.xlane.xlu0 %8010 }
 0x80b   :  { %v8012_v4 = vsub.f32 %v8007_v52, %v8011_v55 }
 0x80d   :  { %v8013_v16 = vmul.f32 1.442695, %v8012_v4 }
 0x80f   :  { %10545 = vpow2.f32 %v8013_v16 }
 0x819   :  { %v10546_v47 = vpop.eup %10545 }
 0x81a   :  { %v8015_v41 = vsel %vm8008_vm3, %v10546_v47, 0.0 }
 0x81b   :  { %8016 = vadd.xlane.f32.xlu1 %v8015_v41 }
 0x84a   :  { %v8066_v63 = vpop.xlane.xlu1 %8065 }
 0x84b   :  { %v8067_v31 = vsub.f32 %v8063_v1, %v8066_v63 }
 0x84d   :  { %v8068_v26 = vmul.f32 1.442695, %v8067_v31 }
 0x84f   :  { %10547 = vpow2.f32 %v8068_v26 }
 0x859   :  { %v10548_v36 = vpop.eup %10547 }
 0x85a   :  { %v8070_v46 = vsel %vm8008_vm3, %v10548_v36, 0.0 }
 0x85b   :  { %8071 = vadd.xlane.f32.xlu1 %v8070_v46 }
 0x8a8   :  { %v8017_v13 = vpop.xlane.xlu1 %8016 }
 0x8a9   :  { %10549 = vrcp.f32 %v8017_v13 }
 0x8b3   :  { %v10550_v28 = vpop.eup %10549 }
 0x8b4   :  { %v8019_v0 = vmul.f32 %v10550_v28, %v10546_v47 }
 0x8b6   :  { %8020 = vst [vmem:[#allocation12] sm:$0x3] %v8019_v0 }
 0x8e8   :  { %v8072_v57 = vpop.xlane.xlu1 %8071 }
 0x8e9   :  { %10551 = vrcp.f32 %v8072_v57 }
 0x8f3   :  { %v10552_v30 = vpop.eup %10551 }
 0x8f4   :  { %v8074_v14 = vmul.f32 %v10552_v30, %v10548_v36 }
 0x8f6   :  { %8076 = vst [vmem:[#allocation12 + $0x2] sm:$0x3] %v8074_v14 }
 0x8f7   :  { %10665 = shalt.err (!%p10662_p11)
}
 0x8f8   :  { %s10666_s17 = scalar_lea.hbm %s13085_s6, 64 }
 0x8f9   :  { %p10667_p12 = scmp.ne.s32.totalorder %s13085_s6, %s10666_s17  ;;  %p10670_p13 = scmp.lt.u32.totalorder %s10666_s17, %s13085_s6 }
 0x8fb   :  { %p10672_p0 = pnand %p10670_p13, %p10667_p12 }
 0x8fd   :  { %10675 = shalt.err (!%p10672_p0)
}
 0x8fe   :  { %s10700_s21 = smov 2  }
 0x8ff   :  { %8088 = dma.vmem_to_hbm [thread:$0]  %s8083_s13, 64, %s13085_s6, [#allocation4], %s10694_s10, %s10694_s10, %s10700_s21  }
 0x900   :  { %10684 = dma.done.wait [#allocation4], 64  }
 0x901   :  { %10685 = vsyncadd [#allocation4], 4294967232 }
 0x902   :  { %8092 = vsyncpa [#allocation3], 1 }
 0x903   :  { %8093 = vsyncpa [#allocation7], 1 }
 0x904   :  { %8094 = vsyncpa [#allocation10], 1 }
 0x905   :  { %8095 = vsyncpa [#allocation4], 1 }
 0x906   :  { %8096 = vsyncpa [#allocation5], 1 }

</bundles_post_ra>
